<compile_context>
chip_gen: v5e
topology: v5e:2x2
jax: 0.10.0
libtpu: 0.0.40
codegen_flags: <defaults>
</compile_context>

<pallas_src>
import functools
import math

import jax
import jax.numpy as jnp
from jax.experimental import pallas as pl
from jax.experimental.pallas import tpu as pltpu


def _attn_kernel(xq_ref, xkv_ref, wq_ref, bq_ref, wk_ref, bk_ref,
                 wv_ref, bv_ref, wp_ref, bp_ref, out_ref,
                 k_scr, v_scr, *, head):
    """One (batch, q-block) grid step; all heads handled inside."""
    i = pl.program_id(1)

    # K/V projections: computed once per batch element (first q-block) and
    # cached in VMEM scratch; reused for every subsequent q block.
    @pl.when(i == 0)
    def _():
        xkv = xkv_ref[...]                                            # (M, C) bf16
        k = jnp.dot(xkv, wk_ref[...],
                    preferred_element_type=jnp.float32) + bk_ref[...]
        v = jnp.dot(xkv, wv_ref[...],
                    preferred_element_type=jnp.float32) + bv_ref[...]
        k_scr[...] = k.astype(k_scr.dtype)
        v_scr[...] = v.astype(v_scr.dtype)

    # Full-width q projection (C-wide output fills the 256-wide MXU).
    xq = xq_ref[...]                                                  # (TQ, C) bf16
    q = jnp.dot(xq, wq_ref[...],
                preferred_element_type=jnp.float32) + bq_ref[...]
    q = q.astype(jnp.bfloat16)              # softmax scale already folded in wq/bq

    C = q.shape[-1]
    D = C // head
    outs = []
    for h in range(head):                   # static unrolled loop (head is small)
        sl = slice(h * D, (h + 1) * D)
        qh = q[:, sl]                                                 # (TQ, D) bf16
        kh = k_scr[:, sl]                                             # (M,  D) bf16
        s = jax.lax.dot_general(qh, kh, (((1,), (1,)), ((), ())),
                                preferred_element_type=jnp.float32)   # (TQ, M) f32
        m = jnp.max(s, axis=-1, keepdims=True)
        p = jnp.exp(s - m)                                            # EUP, f32
        l = jnp.sum(p, axis=-1, keepdims=True)
        o = jnp.dot(p.astype(jnp.bfloat16), v_scr[:, sl],
                    preferred_element_type=jnp.float32)               # (TQ, D) f32
        o = o * pl.reciprocal(l, approx=True)
        outs.append(o.astype(jnp.bfloat16))

    o_all = jnp.concatenate(outs, axis=-1)                            # (TQ, C) bf16
    out = jnp.dot(o_all, wp_ref[...],
                  preferred_element_type=jnp.float32) + bp_ref[...]
    out_ref[...] = out.astype(out_ref.dtype)


def m_efficient_self_atten(x, params, head, *, x_kv=None, tq=256):
    """Pallas forward for M_EfficientSelfAtten (reduction_ratio=None path).

    params use torch layouts:
      q_w (C, C), q_b (C,), kv_w (2C, C), kv_b (2C,), proj_w (C, C), proj_b (C,)
    """
    if x_kv is None:
        x_kv = x                       # reduction_ratio is None -> kv comes from x
    B, N, C = x.shape
    M = x_kv.shape[1]
    assert C % head == 0
    D = C // head
    scale = float(D) ** -0.5

    f32, bf16 = jnp.float32, jnp.bfloat16

    # --- wrapper-side weight prep (free layout plumbing) ---
    # bf16 matmul operands; biases kept in f32 (added to f32 accumulators).
    wq = (params["q_w"].T * scale).astype(bf16)          # (C, C), scale folded in
    bq = (params["q_b"] * scale).reshape(1, C).astype(f32)
    wk = params["kv_w"][:C].T.astype(bf16)               # (C, C)
    bk = params["kv_b"][:C].reshape(1, C).astype(f32)
    wv = params["kv_w"][C:].T.astype(bf16)               # (C, C)
    bv = params["kv_b"][C:].reshape(1, C).astype(f32)
    wp = params["proj_w"].T.astype(bf16)                 # (C, C)
    bp = params["proj_b"].reshape(1, C).astype(f32)

    xq = x.astype(bf16)
    xkv = x_kv.astype(bf16)

    # q-row tiling: pad N up to a multiple of tq (padded query rows are
    # independent and sliced off afterwards).
    tq = min(tq, N)
    n_pad = (-N) % tq
    if n_pad:
        xq = jnp.pad(xq, ((0, 0), (0, n_pad), (0, 0)))
    Np = N + n_pad
    nq = Np // tq
    grid = (B, nq)

    # Cost estimate without the (removed) per-q-block K/V recompute.
    flops = 2 * B * (2 * N * C * C + 2 * M * C * C + 2 * N * M * C)
    bytes_accessed = int(
        2 * (xq.size + xkv.size + wq.size + wk.size + wv.size + wp.size)
        + 4 * (bq.size + bk.size + bv.size + bp.size)
        + B * N * C * x.dtype.itemsize)

    kernel = functools.partial(_attn_kernel, head=head)
    out = pl.pallas_call(
        kernel,
        out_shape=jax.ShapeDtypeStruct((B, Np, C), x.dtype),
        grid_spec=pltpu.PrefetchScalarGridSpec(
            num_scalar_prefetch=0,
            grid=grid,
            in_specs=[
                pl.BlockSpec((None, tq, C), lambda b, i: (b, i, 0)),  # x (queries)
                pl.BlockSpec((None, M, C),  lambda b, i: (b, 0, 0)),  # x_kv
                pl.BlockSpec((C, C), lambda b, i: (0, 0)),            # wq (once)
                pl.BlockSpec((1, C), lambda b, i: (0, 0)),            # bq
                pl.BlockSpec((C, C), lambda b, i: (0, 0)),            # wk
                pl.BlockSpec((1, C), lambda b, i: (0, 0)),            # bk
                pl.BlockSpec((C, C), lambda b, i: (0, 0)),            # wv
                pl.BlockSpec((1, C), lambda b, i: (0, 0)),            # bv
                pl.BlockSpec((C, C), lambda b, i: (0, 0)),            # wp
                pl.BlockSpec((1, C), lambda b, i: (0, 0)),            # bp
            ],
            out_specs=pl.BlockSpec((None, tq, C), lambda b, i: (b, i, 0)),
            scratch_shapes=[pltpu.VMEM((M, C), bf16),     # cached K (all heads)
                            pltpu.VMEM((M, C), bf16)],    # cached V (all heads)
        ),
        compiler_params=pltpu.CompilerParams(
            dimension_semantics=("parallel", "arbitrary")),
        cost_estimate=pl.CostEstimate(flops=flops,
                                      transcendentals=B * head * N * M,
                                      bytes_accessed=bytes_accessed),
    )(xq, xkv, wq, bq, wk, bk, wv, bv, wp, bp)

    return out[:, :N, :] if n_pad else out


def m_efficient_self_atten_ref(x, params, head):
    """Pure-JAX reference mirroring the PyTorch forward (reduction_ratio=None)."""
    B, N, C = x.shape
    D = C // head
    scale = float(D) ** -0.5
    q = x @ params["q_w"].T + params["q_b"]
    q = q.reshape(B, N, head, D).transpose(0, 2, 1, 3)                 # (B, H, N, D)
    kv = x @ params["kv_w"].T + params["kv_b"]
    kv = kv.reshape(B, -1, 2, head, D).transpose(2, 0, 3, 1, 4)        # (2, B, H, M, D)
    k, v = kv[0], kv[1]
    attn = (q @ jnp.swapaxes(k, -2, -1)) * scale
    attn = jax.nn.softmax(attn, axis=-1)
    xa = (attn @ v).transpose(0, 2, 1, 3).reshape(B, N, C)
    return xa @ params["proj_w"].T + params["proj_b"]


if __name__ == "__main__":
    # dim=256, head=2 -> head_dim = 128 (lane-aligned); N=256 tokens, batch=2.
    B, N, C, head = 2, 256, 256, 2

    key = jax.random.PRNGKey(0)
    kx, k1, k2, k3, k4, k5, k6 = jax.random.split(key, 7)

    s = 1.0 / math.sqrt(C)
    params = {
        "q_w":    jax.random.normal(k1, (C, C), jnp.float32) * s,
        "q_b":    jax.random.normal(k2, (C,), jnp.float32) * 0.1,
        "kv_w":   jax.random.normal(k3, (2 * C, C), jnp.float32) * s,
        "kv_b":   jax.random.normal(k4, (2 * C,), jnp.float32) * 0.1,
        "proj_w": jax.random.normal(k5, (C, C), jnp.float32) * s,
        "proj_b": jax.random.normal(k6, (C,), jnp.float32) * 0.1,
    }
    x = jax.random.normal(kx, (B, N, C), jnp.float32)

    out = jax.block_until_ready(m_efficient_self_atten(x, params, head))
    ref = m_efficient_self_atten_ref(x, params, head)

    assert out.shape == (B, N, C)
    err = jnp.max(jnp.abs(out - ref))
    # bf16 matmul operands (f32 accumulation) -> bf16-level tolerance vs f32 ref.
    assert jnp.allclose(out, ref, atol=6e-2, rtol=6e-2), f"max abs err = {err}"
    print("KERNEL_OK")
</pallas_src>

<mosaic_0001>
module attributes {stable_mosaic.version = 11 : i64} {
  func.func @_attn_kernel(%arg0: i32, %arg1: i32, %arg2: memref<1x256x256xbf16, #tpu.memory_space<vmem>>, %arg3: memref<1x256x256xbf16, #tpu.memory_space<vmem>>, %arg4: memref<256x256xbf16, #tpu.memory_space<vmem>>, %arg5: memref<1x256xf32, #tpu.memory_space<vmem>>, %arg6: memref<256x256xbf16, #tpu.memory_space<vmem>>, %arg7: memref<1x256xf32, #tpu.memory_space<vmem>>, %arg8: memref<256x256xbf16, #tpu.memory_space<vmem>>, %arg9: memref<1x256xf32, #tpu.memory_space<vmem>>, %arg10: memref<256x256xbf16, #tpu.memory_space<vmem>>, %arg11: memref<1x256xf32, #tpu.memory_space<vmem>>, %arg12: memref<1x256x256xf32, #tpu.memory_space<vmem>>, %arg13: memref<256x256xbf16, #tpu.memory_space<vmem>>, %arg14: memref<256x256xbf16, #tpu.memory_space<vmem>>) attributes {dimension_semantics = [#tpu.dimension_semantics<parallel>, #tpu.dimension_semantics<arbitrary>], iteration_bounds = array<i64: 2, 1>, scalar_prefetch = 0 : i64, scratch_operands = 2 : i64, tpu.core_type = #tpu.core_type<tc>, window_params = [{transform_indices = @transform_0, window_bounds = array<i64: 1, 256, 256>}, {transform_indices = @transform_1, window_bounds = array<i64: 1, 256, 256>}, {pipeline_mode = #tpu.pipeline_mode<synchronous>, transform_indices = @transform_2, window_bounds = array<i64: 256, 256>}, {pipeline_mode = #tpu.pipeline_mode<synchronous>, transform_indices = @transform_3, window_bounds = array<i64: 1, 256>}, {pipeline_mode = #tpu.pipeline_mode<synchronous>, transform_indices = @transform_4, window_bounds = array<i64: 256, 256>}, {pipeline_mode = #tpu.pipeline_mode<synchronous>, transform_indices = @transform_5, window_bounds = array<i64: 1, 256>}, {pipeline_mode = #tpu.pipeline_mode<synchronous>, transform_indices = @transform_6, window_bounds = array<i64: 256, 256>}, {pipeline_mode = #tpu.pipeline_mode<synchronous>, transform_indices = @transform_7, window_bounds = array<i64: 1, 256>}, {pipeline_mode = #tpu.pipeline_mode<synchronous>, transform_indices = @transform_8, window_bounds = array<i64: 256, 256>}, {pipeline_mode = #tpu.pipeline_mode<synchronous>, transform_indices = @transform_9, window_bounds = array<i64: 1, 256>}, {transform_indices = @transform_10, window_bounds = array<i64: 1, 256, 256>}]} {
    %c0_i32 = arith.constant 0 : i32
    %0 = arith.cmpi eq, %arg1, %c0_i32 : i32
    %1 = arith.extui %0 : i1 to i32
    %c0_i32_0 = arith.constant 0 : i32
    %2 = arith.cmpi ne, %1, %c0_i32_0 : i32
    scf.if %2 {
      %c0_30 = arith.constant 0 : index
      %c0_31 = arith.constant 0 : index
      %c0_32 = arith.constant 0 : index
      %54 = vector.load %arg3[%c0_30, %c0_31, %c0_32] : memref<1x256x256xbf16, #tpu.memory_space<vmem>>, vector<1x256x256xbf16>
      %55 = vector.shape_cast %54 : vector<1x256x256xbf16> to vector<256x256xbf16>
      %c0_33 = arith.constant 0 : index
      %c0_34 = arith.constant 0 : index
      %56 = vector.load %arg6[%c0_33, %c0_34] : memref<256x256xbf16, #tpu.memory_space<vmem>>, vector<256x256xbf16>
      %cst_35 = arith.constant dense<0.000000e+00> : vector<256x256xf32>
      %57 = tpu.matmul %55, %56, %cst_35 {dimension_numbers = #tpu.dot_dimension_numbers<[1], [0], [0], [1], [0, 0, 1, 1], [], []>} : vector<256x256xbf16>, vector<256x256xbf16>, vector<256x256xf32> -> vector<256x256xf32>
      %c0_36 = arith.constant 0 : index
      %c0_37 = arith.constant 0 : index
      %58 = vector.load %arg7[%c0_36, %c0_37] : memref<1x256xf32, #tpu.memory_space<vmem>>, vector<1x256xf32>
      %59 = vector.broadcast %58 : vector<1x256xf32> to vector<256x256xf32>
      %60 = arith.addf %57, %59 : vector<256x256xf32>
      %c0_38 = arith.constant 0 : index
      %c0_39 = arith.constant 0 : index
      %61 = vector.load %arg8[%c0_38, %c0_39] : memref<256x256xbf16, #tpu.memory_space<vmem>>, vector<256x256xbf16>
      %cst_40 = arith.constant dense<0.000000e+00> : vector<256x256xf32>
      %62 = tpu.matmul %55, %61, %cst_40 {dimension_numbers = #tpu.dot_dimension_numbers<[1], [0], [0], [1], [0, 0, 1, 1], [], []>} : vector<256x256xbf16>, vector<256x256xbf16>, vector<256x256xf32> -> vector<256x256xf32>
      %c0_41 = arith.constant 0 : index
      %c0_42 = arith.constant 0 : index
      %63 = vector.load %arg9[%c0_41, %c0_42] : memref<1x256xf32, #tpu.memory_space<vmem>>, vector<1x256xf32>
      %64 = vector.broadcast %63 : vector<1x256xf32> to vector<256x256xf32>
      %65 = arith.addf %62, %64 : vector<256x256xf32>
      %66 = arith.truncf %60 : vector<256x256xf32> to vector<256x256xbf16>
      %c0_43 = arith.constant 0 : index
      %c0_44 = arith.constant 0 : index
      %67 = vector.load %arg13[%c0_43, %c0_44] : memref<256x256xbf16, #tpu.memory_space<vmem>>, vector<256x256xbf16>
      tpu.vector_store %arg13[%c0_43, %c0_44], %66 {strides = array<i32>} : memref<256x256xbf16, #tpu.memory_space<vmem>>, vector<256x256xbf16>,
      %68 = arith.truncf %65 : vector<256x256xf32> to vector<256x256xbf16>
      %c0_45 = arith.constant 0 : index
      %c0_46 = arith.constant 0 : index
      %69 = vector.load %arg14[%c0_45, %c0_46] : memref<256x256xbf16, #tpu.memory_space<vmem>>, vector<256x256xbf16>
      tpu.vector_store %arg14[%c0_45, %c0_46], %68 {strides = array<i32>} : memref<256x256xbf16, #tpu.memory_space<vmem>>, vector<256x256xbf16>,
    } else {
    }
    %c0 = arith.constant 0 : index
    %c0_1 = arith.constant 0 : index
    %c0_2 = arith.constant 0 : index
    %3 = vector.load %arg2[%c0, %c0_1, %c0_2] : memref<1x256x256xbf16, #tpu.memory_space<vmem>>, vector<1x256x256xbf16>
    %4 = vector.shape_cast %3 : vector<1x256x256xbf16> to vector<256x256xbf16>
    %c0_3 = arith.constant 0 : index
    %c0_4 = arith.constant 0 : index
    %5 = vector.load %arg4[%c0_3, %c0_4] : memref<256x256xbf16, #tpu.memory_space<vmem>>, vector<256x256xbf16>
    %cst = arith.constant dense<0.000000e+00> : vector<256x256xf32>
    %6 = tpu.matmul %4, %5, %cst {dimension_numbers = #tpu.dot_dimension_numbers<[1], [0], [0], [1], [0, 0, 1, 1], [], []>} : vector<256x256xbf16>, vector<256x256xbf16>, vector<256x256xf32> -> vector<256x256xf32>
    %c0_5 = arith.constant 0 : index
    %c0_6 = arith.constant 0 : index
    %7 = vector.load %arg5[%c0_5, %c0_6] : memref<1x256xf32, #tpu.memory_space<vmem>>, vector<1x256xf32>
    %8 = vector.broadcast %7 : vector<1x256xf32> to vector<256x256xf32>
    %9 = arith.addf %6, %8 : vector<256x256xf32>
    %10 = arith.truncf %9 : vector<256x256xf32> to vector<256x256xbf16>
    %11 = vector.extract_strided_slice %10 {offsets = [0, 0], sizes = [256, 128], strides = [1, 1]} : vector<256x256xbf16> to vector<256x128xbf16>
    %c0_7 = arith.constant 0 : index
    %c0_8 = arith.constant 0 : index
    %12 = vector.load %arg13[%c0_7, %c0_8] : memref<256x256xbf16, #tpu.memory_space<vmem>>, vector<256x128xbf16>
    %cst_9 = arith.constant dense<0.000000e+00> : vector<256x256xf32>
    %13 = tpu.matmul %11, %12, %cst_9 {dimension_numbers = #tpu.dot_dimension_numbers<[1], [1], [0], [0], [0, 0, 1, 0], [], []>} : vector<256x128xbf16>, vector<256x128xbf16>, vector<256x256xf32> -> vector<256x256xf32>
    %cst_10 = arith.constant dense<0xFF800000> : vector<256xf32>
    %14 = vector.multi_reduction <maximumf>, %13, %cst_10 [1] : vector<256x256xf32> to vector<256xf32>
    %15 = vector.shape_cast %14 : vector<256xf32> to vector<256x1xf32>
    %16 = vector.broadcast %15 : vector<256x1xf32> to vector<256x256xf32>
    %17 = arith.subf %13, %16 : vector<256x256xf32>
    %18 = math.exp %17 : vector<256x256xf32>
    %cst_11 = arith.constant dense<0.000000e+00> : vector<256xf32>
    %19 = vector.multi_reduction <add>, %18, %cst_11 [1] : vector<256x256xf32> to vector<256xf32>
    %20 = vector.shape_cast %19 : vector<256xf32> to vector<256x1xf32>
    %21 = arith.truncf %18 : vector<256x256xf32> to vector<256x256xbf16>
    %c0_12 = arith.constant 0 : index
    %c0_13 = arith.constant 0 : index
    %22 = vector.load %arg14[%c0_12, %c0_13] : memref<256x256xbf16, #tpu.memory_space<vmem>>, vector<256x128xbf16>
    %cst_14 = arith.constant dense<0.000000e+00> : vector<256x128xf32>
    %23 = tpu.matmul %21, %22, %cst_14 {dimension_numbers = #tpu.dot_dimension_numbers<[1], [0], [0], [1], [0, 0, 1, 1], [], []>} : vector<256x256xbf16>, vector<256x128xbf16>, vector<256x128xf32> -> vector<256x128xf32>
    %24 = tpu.reciprocal %20 {approx = true} : vector<256x1xf32> -> vector<256x1xf32>
    %25 = vector.broadcast %24 : vector<256x1xf32> to vector<256x128xf32>
    %26 = arith.mulf %23, %25 : vector<256x128xf32>
    %27 = arith.truncf %26 : vector<256x128xf32> to vector<256x128xbf16>
    %28 = vector.extract_strided_slice %10 {offsets = [0, 128], sizes = [256, 128], strides = [1, 1]} : vector<256x256xbf16> to vector<256x128xbf16>
    %c0_15 = arith.constant 0 : index
    %c128 = arith.constant 128 : index
    %29 = vector.load %arg13[%c0_15, %c128] : memref<256x256xbf16, #tpu.memory_space<vmem>>, vector<256x128xbf16>
    %cst_16 = arith.constant dense<0.000000e+00> : vector<256x256xf32>
    %30 = tpu.matmul %28, %29, %cst_16 {dimension_numbers = #tpu.dot_dimension_numbers<[1], [1], [0], [0], [0, 0, 1, 0], [], []>} : vector<256x128xbf16>, vector<256x128xbf16>, vector<256x256xf32> -> vector<256x256xf32>
    %cst_17 = arith.constant dense<0xFF800000> : vector<256xf32>
    %31 = vector.multi_reduction <maximumf>, %30, %cst_17 [1] : vector<256x256xf32> to vector<256xf32>
    %32 = vector.shape_cast %31 : vector<256xf32> to vector<256x1xf32>
    %33 = vector.broadcast %32 : vector<256x1xf32> to vector<256x256xf32>
    %34 = arith.subf %30, %33 : vector<256x256xf32>
    %35 = math.exp %34 : vector<256x256xf32>
    %cst_18 = arith.constant dense<0.000000e+00> : vector<256xf32>
    %36 = vector.multi_reduction <add>, %35, %cst_18 [1] : vector<256x256xf32> to vector<256xf32>
    %37 = vector.shape_cast %36 : vector<256xf32> to vector<256x1xf32>
    %38 = arith.truncf %35 : vector<256x256xf32> to vector<256x256xbf16>
    %c0_19 = arith.constant 0 : index
    %c128_20 = arith.constant 128 : index
    %39 = vector.load %arg14[%c0_19, %c128_20] : memref<256x256xbf16, #tpu.memory_space<vmem>>, vector<256x128xbf16>
    %cst_21 = arith.constant dense<0.000000e+00> : vector<256x128xf32>
    %40 = tpu.matmul %38, %39, %cst_21 {dimension_numbers = #tpu.dot_dimension_numbers<[1], [0], [0], [1], [0, 0, 1, 1], [], []>} : vector<256x256xbf16>, vector<256x128xbf16>, vector<256x128xf32> -> vector<256x128xf32>
    %41 = tpu.reciprocal %37 {approx = true} : vector<256x1xf32> -> vector<256x1xf32>
    %42 = vector.broadcast %41 : vector<256x1xf32> to vector<256x128xf32>
    %43 = arith.mulf %40, %42 : vector<256x128xf32>
    %44 = arith.truncf %43 : vector<256x128xf32> to vector<256x128xbf16>
    %45 = tpu.concatenate %27, %44 in 1 : vector<256x128xbf16>, vector<256x128xbf16> -> vector<256x256xbf16>
    %c0_22 = arith.constant 0 : index
    %c0_23 = arith.constant 0 : index
    %46 = vector.load %arg10[%c0_22, %c0_23] : memref<256x256xbf16, #tpu.memory_space<vmem>>, vector<256x256xbf16>
    %cst_24 = arith.constant dense<0.000000e+00> : vector<256x256xf32>
    %47 = tpu.matmul %45, %46, %cst_24 {dimension_numbers = #tpu.dot_dimension_numbers<[1], [0], [0], [1], [0, 0, 1, 1], [], []>} : vector<256x256xbf16>, vector<256x256xbf16>, vector<256x256xf32> -> vector<256x256xf32>
    %c0_25 = arith.constant 0 : index
    %c0_26 = arith.constant 0 : index
    %48 = vector.load %arg11[%c0_25, %c0_26] : memref<1x256xf32, #tpu.memory_space<vmem>>, vector<1x256xf32>
    %49 = vector.broadcast %48 : vector<1x256xf32> to vector<256x256xf32>
    %50 = arith.addf %47, %49 : vector<256x256xf32>
    %c0_27 = arith.constant 0 : index
    %c0_28 = arith.constant 0 : index
    %c0_29 = arith.constant 0 : index
    %51 = vector.load %arg12[%c0_27, %c0_28, %c0_29] : memref<1x256x256xf32, #tpu.memory_space<vmem>>, vector<1x256x256xf32>
    %52 = vector.shape_cast %51 : vector<1x256x256xf32> to vector<256x256xf32>
    %53 = vector.shape_cast %50 : vector<256x256xf32> to vector<1x256x256xf32>
    tpu.vector_store %arg12[%c0_27, %c0_28, %c0_29], %53 {strides = array<i32>} : memref<1x256x256xf32, #tpu.memory_space<vmem>>, vector<1x256x256xf32>,
    return
  }
  func.func @transform_0(%arg0: i32, %arg1: i32) -> (i32, i32, i32) {
    %c0_i32 = arith.constant 0 : i32
    %c0_i32_0 = arith.constant 0 : i32
    return %arg0, %arg1, %c0_i32 : i32, i32, i32
  }
  func.func @transform_1(%arg0: i32, %arg1: i32) -> (i32, i32, i32) {
    %c0_i32 = arith.constant 0 : i32
    %c0_i32_0 = arith.constant 0 : i32
    %c0_i32_1 = arith.constant 0 : i32
    return %arg0, %c0_i32, %c0_i32_0 : i32, i32, i32
  }
  func.func @transform_2(%arg0: i32, %arg1: i32) -> (i32, i32) {
    %c0_i32 = arith.constant 0 : i32
    %c0_i32_0 = arith.constant 0 : i32
    %c0_i32_1 = arith.constant 0 : i32
    return %c0_i32, %c0_i32_0 : i32, i32
  }
  func.func @transform_3(%arg0: i32, %arg1: i32) -> (i32, i32) {
    %c0_i32 = arith.constant 0 : i32
    %c0_i32_0 = arith.constant 0 : i32
    %c0_i32_1 = arith.constant 0 : i32
    return %c0_i32, %c0_i32_0 : i32, i32
  }
  func.func @transform_4(%arg0: i32, %arg1: i32) -> (i32, i32) {
    %c0_i32 = arith.constant 0 : i32
    %c0_i32_0 = arith.constant 0 : i32
    %c0_i32_1 = arith.constant 0 : i32
    return %c0_i32, %c0_i32_0 : i32, i32
  }
  func.func @transform_5(%arg0: i32, %arg1: i32) -> (i32, i32) {
    %c0_i32 = arith.constant 0 : i32
    %c0_i32_0 = arith.constant 0 : i32
    %c0_i32_1 = arith.constant 0 : i32
    return %c0_i32, %c0_i32_0 : i32, i32
  }
  func.func @transform_6(%arg0: i32, %arg1: i32) -> (i32, i32) {
    %c0_i32 = arith.constant 0 : i32
    %c0_i32_0 = arith.constant 0 : i32
    %c0_i32_1 = arith.constant 0 : i32
    return %c0_i32, %c0_i32_0 : i32, i32
  }
  func.func @transform_7(%arg0: i32, %arg1: i32) -> (i32, i32) {
    %c0_i32 = arith.constant 0 : i32
    %c0_i32_0 = arith.constant 0 : i32
    %c0_i32_1 = arith.constant 0 : i32
    return %c0_i32, %c0_i32_0 : i32, i32
  }
  func.func @transform_8(%arg0: i32, %arg1: i32) -> (i32, i32) {
    %c0_i32 = arith.constant 0 : i32
    %c0_i32_0 = arith.constant 0 : i32
    %c0_i32_1 = arith.constant 0 : i32
    return %c0_i32, %c0_i32_0 : i32, i32
  }
  func.func @transform_9(%arg0: i32, %arg1: i32) -> (i32, i32) {
    %c0_i32 = arith.constant 0 : i32
    %c0_i32_0 = arith.constant 0 : i32
    %c0_i32_1 = arith.constant 0 : i32
    return %c0_i32, %c0_i32_0 : i32, i32
  }
  func.func @transform_10(%arg0: i32, %arg1: i32) -> (i32, i32, i32) {
    %c0_i32 = arith.constant 0 : i32
    %c0_i32_0 = arith.constant 0 : i32
    return %arg0, %arg1, %c0_i32 : i32, i32, i32
  }
}

</mosaic_0001>

<bundles_post_ra>
// kernel: tpu_custom_call.1
= control target key start
LH: loop header
LB: loop body
LE: loop exit
PB: predicated region body
PF: predicated region fallthrough
CT: control target
= control target key end

     0   :  { %s10311_s0 = inlined_call_operand.hbm [shape: bf16[2,256,256], index: 0, kind: input, shape index: {}]   ;;  %s10312_s1 = inlined_call_operand.hbm [shape: bf16[2,256,256], index: 1, kind: input, shape index: {}]   ;;  %s10313_s2 = inlined_call_operand.hbm [shape: bf16[256,256], index: 2, kind: input, shape index: {}]   ;;  %s10314_s3 = inlined_call_operand.vmem [shape: f32[1,256], index: 3, kind: input, shape index: {}]   ;;  %s10315_s4 = inlined_call_operand.hbm [shape: bf16[256,256], index: 4, kind: input, shape index: {}]   ;;  %s10316_s5 = inlined_call_operand.vmem [shape: f32[1,256], index: 5, kind: input, shape index: {}]   ;;  %s10317_s6 = inlined_call_operand.hbm [shape: bf16[256,256], index: 6, kind: input, shape index: {}]   ;;  %s10318_s7 = inlined_call_operand.vmem [shape: f32[1,256], index: 7, kind: input, shape index: {}]   ;;  %s10319_s8 = inlined_call_operand.hbm [shape: bf16[256,256], index: 8, kind: input, shape index: {}]   ;;  %s10320_s9 = inlined_call_operand.vmem [shape: f32[1,256], index: 9, kind: input, shape index: {}]   ;;  %s10321_s10 = inlined_call_operand.hbm [shape: f32[2,256,256], index: 10, kind: output, shape index: {}]  }
   0x1   :  { %10340 = sst [smem:[#allocation89_spill]] %s10313_s2 }
   0x2   :  { %10341 = sst [smem:[#allocation90_spill]] %s10315_s4 }
   0x3   :  { %10342 = sst [smem:[#allocation91_spill]] %s10317_s6 }
   0x4   :  { %10343 = sst [smem:[#allocation92_spill]] %s10319_s8 }
   0x5   :  { %15 = vsyncpa [#allocation5], 0 }
   0x6   :  { %17 = vsyncpa [#allocation5 + $0x1], 0 }
   0x7   :  { %18 = vsyncpa [#allocation8], 0 }
   0x8   :  { %20 = vsyncpa [#allocation8 + $0x1], 0 }
   0x9   :  { %21 = vsyncpa [#allocation11], 0 }
   0xa   :  { %22 = vsyncpa [#allocation14], 0 }
   0xb   :  { %23 = vsyncpa [#allocation6], 0 }
   0xc   :  { %25 = vsyncpa [#allocation6 + $0x1], 0  ;;  %s8253_s13 = smov 0   ;;  %s8255_s14 = smov 0  }
   0xd   :  { %s8257_s15 = smov 0   ;;  %s8259_s16 = smov 0  }
   0xe   :  { %s8261_s17 = smov 0   ;;  %s8263_s18 = smov 0  }
   0xf LB: > { %10344 = sst [smem:[#allocation22_spill]] %s8168_s13  ;;  %s8284_s19 = sadd.s32 4294967295, %s8188_s18   ;;  %s8188_s18 = sphi %s8263_s18, %s31_s18   ;;  %s8184_s17 = sphi %s8261_s17, %s10489_s17   ;;  %s8180_s16 = sphi %s8259_s16, %s10488_s16   ;;  %s8176_s15 = sphi %s8257_s15, %s10487_s15   ;;  %s8172_s14 = sphi %s8255_s14, %s10491_s14   ;;  %s8168_s13 = sphi %s8253_s13, %s10490_s13  }
  0x10   : > { %10345 = sst [smem:[#allocation23_spill]] %s8176_s15  ;;  %s6105_s20 = sadd.s32 4294967294, %s8188_s18  }
  0x11   : > { %10346 = sst [smem:[#allocation24_spill]] %s8184_s17  ;;  %p65_p0 = scmp.ne.s32.totalorder %s8172_s14, %s8168_s13 }
  0x12   : > { %p66_p1 = scmp.eq.s32.totalorder %s8284_s19, 0  ;;  %p285_p2 = scmp.eq.s32.totalorder %s8284_s19, 1 }
  0x13   : > { %p291_p3 = scmp.eq.s32.totalorder %s6105_s20, 1  ;;  %p6106_p5 = scmp.ge.s32.totalorder %s8188_s18, 1 }
  0x14   : > { %p8293_p4 = por %p66_p1, %p65_p0  ;;  %p298_p7 = scmp.lt.s32.totalorder %s8188_s18, 3 }
  0x15   : > { %p8298_p6 = por %p291_p3, %p65_p0  ;;  %s10350_s2 = sld [smem:[#allocation89_spill]] }
  0x16   : > { %p8306_p8 = pnand %p6106_p5, %p298_p7  ;;  %s8190_s27 = smov [#allocation9]  }
  0x17   : > { %s10348_s22 = scalar_select %p8298_p6, 1, 0 }
  0x18   : > { %p7436_p9 = pneg %p8306_p8  ;;  %s311_s28 = sshll.u32 %s8190_s27, 4  ;;  %s312_s28 = int_to_ptr.vmem [resolvable:$true] %s311_s28 }
  0x19   : > { %10349 = sst [smem:[#allocation25_spill]] %s10348_s22  ;;  %p6111_p11 = scmp.ge.s32.totalorder %s8188_s18, 2 }
  0x1a   : > { %p8314_p10 = pnand %p7436_p9, %p66_p1  ;;  %s10353_s4 = sld [smem:[#allocation90_spill]] }
  0x1b   : > { %s309_s25 = sshll.u32 %s10350_s2, 4  ;;  %s10324_s20 = smov 128   ;;  %s310_s25 = int_to_ptr.hbm [resolvable:$true] %s309_s25 }
  0x1c   : > { %s10326_s23 = smov 8   ;;  %s8193_s24 = smov [#allocation10]  }
  0x1d   : > { %7439 = dma.hbm_to_vmem [thread:$0]  (!%p8314_p10), %s310_s25, 4096, %s312_s28, [#allocation8], %s10324_s20, %s10324_s20, %s10326_s23  }
  0x1e   : > { %s328_s27 = sshll.u32 %s8193_s24, 4  ;;  %s10354_s6 = sld [smem:[#allocation91_spill]]  ;;  %s329_s27 = int_to_ptr.vmem [resolvable:$true] %s328_s27 }
  0x1f   : > { %s10355_s8 = sld [smem:[#allocation92_spill]]  ;;  %s8194_s11 = smov [#allocation12]  }
  0x20   : > { %s326_s12 = sshll.u32 %s10353_s4, 4  ;;  %s345_s24 = sshll.u32 %s8194_s11, 4  ;;  %s327_s12 = int_to_ptr.hbm [resolvable:$true] %s326_s12  ;;  %s346_s24 = int_to_ptr.vmem [resolvable:$true] %s345_s24 }
  0x21   : > { %7442 = dma.hbm_to_vmem [thread:$0]  (!%p8314_p10), %s327_s12, 4096, %s329_s27, [#allocation11], %s10324_s20, %s10324_s20, %s10326_s23  }
  0x22   : > { %s8195_s2 = smov [#allocation13]   ;;  %s43_s12 = sadd.s32 1, %s8184_s17 }
  0x23   : > { %s362_s22 = sshll.u32 %s8195_s2, 4  ;;  %s52_s27 = sadd.s32 1, %s8176_s15  ;;  %s363_s22 = int_to_ptr.vmem [resolvable:$true] %s362_s22 }
  0x24   : > { %s343_s13 = sshll.u32 %s10354_s6, 4  ;;  %p45_p12 = scmp.ge.s32.totalorder %s43_s12, 2  ;;  %s344_s13 = int_to_ptr.hbm [resolvable:$true] %s343_s13 }
  0x25   : > { %s360_s30 = sshll.u32 %s10355_s8, 4  ;;  %p59_p13 = scmp.ne.s32.totalorder %s8176_s15, %s8172_s14  ;;  %s361_s30 = int_to_ptr.hbm [resolvable:$true] %s360_s30 }
  0x26   : > { %7445 = dma.hbm_to_vmem [thread:$0]  (!%p8314_p10), %s344_s13, 4096, %s346_s24, [#allocation11], %s10324_s20, %s10324_s20, %s10326_s23  }
  0x27   : > { %7448 = dma.hbm_to_vmem [thread:$0]  (!%p8314_p10), %s361_s30, 4096, %s363_s22, [#allocation14], %s10324_s20, %s10324_s20, %s10326_s23  }
  0x28   : > { %p60_p0 = scmp.eq.s32.totalorder %s8188_s18, 0  ;;  %p7464_p3 = scmp.lt.s32.totalorder %s8188_s18, 2 }
  0x29   : > { %s10493_s12 = smov (%p45_p12, %s43_s12), 0  ;;  %p8362_p7 = por %p285_p2, %p59_p13 }
  0x2a   : > { %10356 = sst [smem:[#allocation26_spill]] %s10493_s12  ;;  %p8356_p5 = por %p60_p0, %p59_p13 }
  0x2b   : > { %s10358_s29 = scalar_select %p8362_p7, 1, 0 }
  0x2c   : > { %s47_s25 = ssub.s32 %s8184_s17, %s10493_s12  ;;  %s379_s28 = sand.u32 1, %s8176_s15  }
  0x2d   : > { %10359 = sst [smem:[#allocation27_spill]] %s10358_s29  ;;  %p50_p9 = scmp.eq.s32.totalorder %s47_s25, 0 }
  0x2e   : > { %s6112_s30 = sshll.u32 %s379_s28, 8  ;;  %s7155_s11 = sshll.u32 %s8184_s17, 8 }
  0x2f   : > { %s8371_s24 = scalar_select %p50_p9, %s8176_s15, %s52_s27  }
  0x30   : > { %s391_s20 = scalar_lea.hbm %s10311_s0, %s7155_s11  ;;  %s383_s4 = scalar_lea.vmem [#allocation4], %s6112_s30 }
  0x31   : > { %10360 = sst [smem:[#allocation28_spill]] %s8371_s24  ;;  %s392_s23 = sshll.u32 %s391_s20, 4  ;;  %s393_s23 = int_to_ptr.hbm [resolvable:$true] %s392_s23 }
  0x32   : > { %s394_s6 = sshll.u32 %s383_s4, 4  ;;  %p7450_p2 = pnand %p7464_p3, %p8356_p5  ;;  %s395_s6 = int_to_ptr.vmem [resolvable:$true] %s394_s6 }
  0x33   : > { %s413_s25 = scalar_lea.hbm %s10312_s1, %s7155_s11  ;;  %s408_s17 = scalar_lea.vmem [#allocation7], %s6112_s30 }
  0x34   : > { %s416_s27 = sshll.u32 %s408_s17, 4  ;;  %s414_s24 = sshll.u32 %s413_s25, 4  ;;  %s415_s24 = int_to_ptr.hbm [resolvable:$true] %s414_s24  ;;  %s417_s27 = int_to_ptr.vmem [resolvable:$true] %s416_s27 }
  0x35   : > { %s380_s15 = scalar_lea.sflag [#allocation5], %s379_s28  ;;  %s10361_s29 = smov 8  }
  0x36   : > { %s10362_s2 = smov 128   ;;  %s404_s4 = sand.u32 1, %s8188_s18  }
  0x37   : > { %7452 = dma.hbm_to_vmem [thread:$0]  (!%p7450_p2), %s393_s23, 4096, %s395_s6, %s380_s15, %s10362_s2, %s10362_s2, %s10361_s29  }
  0x38   : > { %s405_s20 = scalar_lea.sflag [#allocation8], %s404_s4  ;;  %428 = sbr.rel (%p8306_p8) target bundleno = 2043 (0x7fb), region = 60 }
  0x39   : > { %7455 = dma.hbm_to_vmem [thread:$0]  (!%p7450_p2), %s415_s24, 4096, %s417_s27, %s405_s20, %s10362_s2, %s10362_s2, %s10361_s29  }
  0x3d   : > { %s8393_s8 = sand.u32 1, %s8172_s14  }
  0x3e   : > { %s6119_s17 = sshll.u32 %s8393_s8, 8  ;;  %s431_s12 = scalar_lea.sflag [#allocation5], %s8393_s8 }
  0x3f   : > { %s8397_s6 = scalar_lea.vmem [#allocation4], %s6119_s17 }
  0x40   : > { %8143 = dma.done.wait (%p8293_p4), %s431_s12, 4096  }
  0x41   : > { %8145 = vsyncadd (%p8293_p4), %s431_s12, 4294963200  ;;  %s440_s15 = sand.u32 1, %s8284_s19   ;;  %s8404_s23 = scalar_lea.vmem [#allocation7], %s6119_s17 }
  0x42   : > { %s441_s26 = scalar_lea.sflag [#allocation8], %s440_s15 }
  0x43   : > { %8147 = dma.done.wait (%p8293_p4), %s441_s26, 4096  }
  0x44   : > { %8149 = vsyncadd (%p8293_p4), %s441_s26, 4294963200 }
  0x45   : > { %8151 = dma.done.wait (%p66_p1), [#allocation8], 4096  }
  0x46   : > { %8153 = vsyncadd (%p66_p1), [#allocation8], 4294963200 }
  0x47   : > { %8155 = dma.done.wait (%p66_p1), [#allocation11], 8192  }
  0x48   : > { %8157 = vsyncadd (%p66_p1), [#allocation11], 4294959104 }
  0x49   : > { %8159 = dma.done.wait (%p66_p1), [#allocation14], 4096  }
  0x4a   : > { %8161 = vsyncadd (%p66_p1), [#allocation14], 4294963200  ;;  %v6312_v0 = vld [vmem:[#allocation10 + $0x70] sm:$0xf]  ;;  %v7204_v1 = vld [vmem:[#allocation10 + $0x74] sm:$0xf0] }
  0x4b   : > { %v6376_v2 = vld [vmem:[#allocation10 + $0xf0] sm:$0xf]  ;;  %v6313_v3 = vor.u32 %v7204_v1, %v6312_v0  ;;  %v7220_v4 = vld [vmem:[#allocation10 + $0xf4] sm:$0xf0]  ;;  %v7203_v5 = vld [vmem:[#allocation10 + $0x74] sm:$0xf] }
  0x4c   : > { %v6314_v6 = vld [vmem:[#allocation10 + $0x78] sm:$0xf0]  ;;  %v6377_v7 = vor.u32 %v7220_v4, %v6376_v2  ;;  %v7219_v9 = vld [vmem:[#allocation10 + $0xf4] sm:$0xf]  ;;  %v6304_v11 = vld [vmem:[#allocation10 + $0x60] sm:$0xf] }
  0x4d   : > { %v6317_v8 = vor.u32 %v7203_v5, %v6314_v6  ;;  %v6378_v10 = vld [vmem:[#allocation10 + $0xf8] sm:$0xf0]  ;;  %903 = vmatpush.bf16.msra.mxu0 %v6313_v3  ;;  %v7202_v13 = vld [vmem:[#allocation10 + $0x64] sm:$0xf0]  ;;  %v6368_v14 = vld [vmem:[#allocation10 + $0xe0] sm:$0xf] }
  0x4e   : > { %v6381_v12 = vor.u32 %v7219_v9, %v6378_v10  ;;  %v7218_v15 = vld [vmem:[#allocation10 + $0xe4] sm:$0xf0]  ;;  %992 = vmatpush.bf16.msra.mxu1 %v6377_v7  ;;  %v6305_v16 = vor.u32 %v7202_v13, %v6304_v11  ;;  %v7201_v18 = vld [vmem:[#allocation10 + $0x64] sm:$0xf]  ;;  %v6306_v19 = vld [vmem:[#allocation10 + $0x68] sm:$0xf0] }
  0x4f   : > { %1081 = vmatpush.bf16.msra.mxu2 %v6317_v8  ;;  %v6369_v17 = vor.u32 %v7218_v15, %v6368_v14  ;;  %v7217_v20 = vld [vmem:[#allocation10 + $0xe4] sm:$0xf]  ;;  %v6309_v21 = vor.u32 %v7201_v18, %v6306_v19  ;;  %v6370_v22 = vld [vmem:[#allocation10 + $0xe8] sm:$0xf0]  ;;  %v6296_v23 = vld [vmem:[#allocation10 + $0x50] sm:$0xf] }
  0x50   : > { %1170 = vmatpush.bf16.msra.mxu3 %v6381_v12  ;;  %v7200_v24 = vld [vmem:[#allocation10 + $0x54] sm:$0xf0]  ;;  %v6373_v25 = vor.u32 %v7217_v20, %v6370_v22  ;;  %v6360_v26 = vld [vmem:[#allocation10 + $0xd0] sm:$0xf]  ;;  %v7199_v28 = vld [vmem:[#allocation10 + $0x54] sm:$0xf] }
  0x51   : > { %v7216_v27 = vld [vmem:[#allocation10 + $0xd4] sm:$0xf0]  ;;  %904 = vmatpush.bf16.msra.mxu0 %v6305_v16  ;;  %v6297_v29 = vor.u32 %v7200_v24, %v6296_v23  ;;  %v6298_v30 = vld [vmem:[#allocation10 + $0x58] sm:$0xf0]  ;;  %v7215_v31 = vld [vmem:[#allocation10 + $0xd4] sm:$0xf] }
  0x52   : > { %v6362_v32 = vld [vmem:[#allocation10 + $0xd8] sm:$0xf0]  ;;  %993 = vmatpush.bf16.msra.mxu1 %v6369_v17  ;;  %v6361_v33 = vor.u32 %v7216_v27, %v6360_v26  ;;  %v6301_v34 = vor.u32 %v7199_v28, %v6298_v30  ;;  %v6288_v35 = vld [vmem:[#allocation10 + $0x40] sm:$0xf]  ;;  %v7198_v36 = vld [vmem:[#allocation10 + $0x44] sm:$0xf0] }
  0x53   : > { %1082 = vmatpush.bf16.msra.mxu2 %v6309_v21  ;;  %v6352_v37 = vld [vmem:[#allocation10 + $0xc0] sm:$0xf]  ;;  %v6365_v38 = vor.u32 %v7215_v31, %v6362_v32  ;;  %v7214_v39 = vld [vmem:[#allocation10 + $0xc4] sm:$0xf0]  ;;  %v7197_v40 = vld [vmem:[#allocation10 + $0x44] sm:$0xf]  ;;  %v6289_v44 = vor.u32 %v7198_v36, %v6288_v35 }
  0x54   : > { %1171 = vmatpush.bf16.msra.mxu3 %v6373_v25  ;;  %v6290_v41 = vld [vmem:[#allocation10 + $0x48] sm:$0xf0]  ;;  %v7213_v42 = vld [vmem:[#allocation10 + $0xc4] sm:$0xf]  ;;  %v6353_v45 = vor.u32 %v7214_v39, %v6352_v37  ;;  %v6280_v47 = vld [vmem:[#allocation10 + $0x30] sm:$0xf] }
  0x55   : > { %v6354_v43 = vld [vmem:[#allocation10 + $0xc8] sm:$0xf0]  ;;  %905 = vmatpush.bf16.msra.mxu0 %v6297_v29  ;;  %v6293_v46 = vor.u32 %v7197_v40, %v6290_v41  ;;  %v7196_v48 = vld [vmem:[#allocation10 + $0x34] sm:$0xf0]  ;;  %v6344_v49 = vld [vmem:[#allocation10 + $0xb0] sm:$0xf] }
  0x56   : > { %994 = vmatpush.bf16.msra.mxu1 %v6361_v33  ;;  %v6357_v50 = vor.u32 %v7213_v42, %v6354_v43  ;;  %v7212_v51 = vld [vmem:[#allocation10 + $0xb4] sm:$0xf0]  ;;  %v7195_v52 = vld [vmem:[#allocation10 + $0x34] sm:$0xf]  ;;  %v6282_v53 = vld [vmem:[#allocation10 + $0x38] sm:$0xf0]  ;;  %v6281_v56 = vor.u32 %v7196_v48, %v6280_v47 }
  0x57   : > { %1083 = vmatpush.bf16.msra.mxu2 %v6301_v34  ;;  %v7211_v54 = vld [vmem:[#allocation10 + $0xb4] sm:$0xf]  ;;  %v6346_v55 = vld [vmem:[#allocation10 + $0xb8] sm:$0xf0]  ;;  %v6345_v57 = vor.u32 %v7212_v51, %v6344_v49  ;;  %v6285_v58 = vor.u32 %v7195_v52, %v6282_v53  ;;  %v6272_v59 = vld [vmem:[#allocation10 + $0x20] sm:$0xf] }
  0x58   : > { %1172 = vmatpush.bf16.msra.mxu3 %v6365_v38  ;;  %v7194_v60 = vld [vmem:[#allocation10 + $0x24] sm:$0xf0]  ;;  %v6336_v61 = vld [vmem:[#allocation10 + $0xa0] sm:$0xf]  ;;  %v6349_v62 = vor.u32 %v7211_v54, %v6346_v55  ;;  %v7193_v0 = vld [vmem:[#allocation10 + $0x24] sm:$0xf] }
  0x59   : > { %906 = vmatpush.bf16.msra.mxu0 %v6289_v44  ;;  %v7210_v63 = vld [vmem:[#allocation10 + $0xa4] sm:$0xf0]  ;;  %v6274_v1 = vld [vmem:[#allocation10 + $0x28] sm:$0xf0]  ;;  %v7209_v2 = vld [vmem:[#allocation10 + $0xa4] sm:$0xf]  ;;  %v6273_v4 = vor.u32 %v7194_v60, %v6272_v59 }
  0x5a   : > { %995 = vmatpush.bf16.msra.mxu1 %v6353_v45  ;;  %v6338_v3 = vld [vmem:[#allocation10 + $0xa8] sm:$0xf0]  ;;  %v6337_v5 = vor.u32 %v7210_v63, %v6336_v61  ;;  %v6277_v6 = vor.u32 %v7193_v0, %v6274_v1  ;;  %v6264_v7 = vld [vmem:[#allocation10 + $0x10] sm:$0xf]  ;;  %v7192_v8 = vld [vmem:[#allocation10 + $0x14] sm:$0xf0] }
  0x5b   : > { %1084 = vmatpush.bf16.msra.mxu2 %v6293_v46  ;;  %v6328_v9 = vld [vmem:[#allocation10 + $0x90] sm:$0xf]  ;;  %v6341_v10 = vor.u32 %v7209_v2, %v6338_v3  ;;  %v7208_v11 = vld [vmem:[#allocation10 + $0x94] sm:$0xf0]  ;;  %v7191_v12 = vld [vmem:[#allocation10 + $0x14] sm:$0xf]  ;;  %v6265_v16 = vor.u32 %v7192_v8, %v6264_v7 }
  0x5c   : > { %1173 = vmatpush.bf16.msra.mxu3 %v6357_v50  ;;  %v6266_v13 = vld [vmem:[#allocation10 + $0x18] sm:$0xf0]  ;;  %v7207_v14 = vld [vmem:[#allocation10 + $0x94] sm:$0xf]  ;;  %v6256_v17 = vld [vmem:[#allocation10] sm:$0xf]  ;;  %v6329_v19 = vor.u32 %v7208_v11, %v6328_v9 }
  0x5d   : > { %907 = vmatpush.bf16.msra.mxu0 %v6281_v56  ;;  %v6330_v15 = vld [vmem:[#allocation10 + $0x98] sm:$0xf0]  ;;  %v7190_v18 = vld [vmem:[#allocation10 + $0x4] sm:$0xf0]  ;;  %v6269_v20 = vor.u32 %v7191_v12, %v6266_v13  ;;  %v6320_v21 = vld [vmem:[#allocation10 + $0x80] sm:$0xf] }
  0x5e   : > { %996 = vmatpush.bf16.msra.mxu1 %v6345_v57  ;;  %v7206_v22 = vld [vmem:[#allocation10 + $0x84] sm:$0xf0]  ;;  %v7189_v23 = vld [vmem:[#allocation10 + $0x4] sm:$0xf]  ;;  %v6333_v24 = vor.u32 %v7207_v14, %v6330_v15  ;;  %v6258_v25 = vld [vmem:[#allocation10 + $0x8] sm:$0xf0]  ;;  %v6257_v31 = vor.u32 %v7190_v18, %v6256_v17 }
  0x5f   : > { %1085 = vmatpush.bf16.msra.mxu2 %v6285_v58  ;;  %v7205_v26 = vld [vmem:[#allocation10 + $0x84] sm:$0xf]  ;;  %v6322_v27 = vld [vmem:[#allocation10 + $0x88] sm:$0xf0]  ;;  %v6128_v28 = vld [vmem:[%s8404_s23] sm:$0xf]  ;;  %v6321_v35 = vor.u32 %v7206_v22, %v6320_v21  ;;  %v6261_v36 = vor.u32 %v7189_v23, %v6258_v25 }
  0x60   : > { %1174 = vmatpush.bf16.msra.mxu3 %v6349_v62  ;;  %v6440_v29 = vld [vmem:[#allocation12 + $0x70] sm:$0xf]  ;;  %v7236_v30 = vld [vmem:[#allocation12 + $0x74] sm:$0xf0]  ;;  %v7158_v32 = vld [vmem:[%s8404_s23 + $0x4] sm:$0xf0]  ;;  %v6325_v39 = vor.u32 %v7205_v26, %v6322_v27 }
  0x61   : > { %908 = vmatpush.bf16.msra.mxu0 %v6273_v4  ;;  %v6504_v33 = vld [vmem:[#allocation12 + $0xf0] sm:$0xf]  ;;  %v7252_v34 = vld [vmem:[#allocation12 + $0xf4] sm:$0xf0]  ;;  %v7157_v37 = vld [vmem:[%s8404_s23 + $0x4] sm:$0xf]  ;;  %v6441_v40 = vor.u32 %v7236_v30, %v6440_v29  ;;  %v8426_v41 = vor.u32 %v7158_v32, %v6128_v28 }
  0x62   : > { %997 = vmatpush.bf16.msra.mxu1 %v6337_v5  ;;  %v6130_v38 = vld [vmem:[%s8404_s23 + $0x8] sm:$0xf0]  ;;  %v6505_v42 = vor.u32 %v7252_v34, %v6504_v33  ;;  %v6432_v44 = vld [vmem:[#allocation12 + $0x60] sm:$0xf]  ;;  %v7234_v45 = vld [vmem:[#allocation12 + $0x64] sm:$0xf0] }
  0x63   : > { %1086 = vmatpush.bf16.msra.mxu2 %v6277_v6  ;;  %v8428_v43 = vor.u32 %v7157_v37, %v6130_v38  ;;  %v6496_v46 = vld [vmem:[#allocation12 + $0xe0] sm:$0xf]  ;;  %v6433_v47 = vor.u32 %v7234_v45, %v6432_v44  ;;  %v7250_v48 = vld [vmem:[#allocation12 + $0xe4] sm:$0xf0]  ;;  %v6136_v50 = vld [vmem:[%s8404_s23 + $0x10] sm:$0xf] }
  0x64   : > { %1175 = vmatpush.bf16.msra.mxu3 %v6341_v10  ;;  %v6497_v49 = vor.u32 %v7250_v48, %v6496_v46  ;;  %v7160_v51 = vld [vmem:[%s8404_s23 + $0x14] sm:$0xf0]  ;;  %v7159_v52 = vld [vmem:[%s8404_s23 + $0x14] sm:$0xf]  ;;  %v6138_v53 = vld [vmem:[%s8404_s23 + $0x18] sm:$0xf0] }
  0x65   : > { %909 = vmatpush.bf16.msra.mxu0 %v6265_v16  ;;  %v8438_v54 = vor.u32 %v7160_v51, %v6136_v50  ;;  %v8440_v55 = vor.u32 %v7159_v52, %v6138_v53  ;;  %v6144_v56 = vld [vmem:[%s8404_s23 + $0x20] sm:$0xf]  ;;  %v7162_v57 = vld [vmem:[%s8404_s23 + $0x24] sm:$0xf0]  ;;  %v7161_v58 = vld [vmem:[%s8404_s23 + $0x24] sm:$0xf] }
  0x66   : > { %998 = vmatpush.bf16.msra.mxu1 %v6329_v19  ;;  %v6146_v59 = vld [vmem:[%s8404_s23 + $0x28] sm:$0xf0]  ;;  %v8450_v60 = vor.u32 %v7162_v57, %v6144_v56  ;;  %v6424_v62 = vld [vmem:[#allocation12 + $0x50] sm:$0xf]  ;;  %v7232_v63 = vld [vmem:[#allocation12 + $0x54] sm:$0xf0] }
  0x67   : > { %1087 = vmatpush.bf16.msra.mxu2 %v6269_v20  ;;  %v8452_v61 = vor.u32 %v7161_v58, %v6146_v59  ;;  %v6488_v0 = vld [vmem:[#allocation12 + $0xd0] sm:$0xf]  ;;  %v6425_v1 = vor.u32 %v7232_v63, %v6424_v62  ;;  %v7248_v2 = vld [vmem:[#allocation12 + $0xd4] sm:$0xf0]  ;;  %v7163_v6 = vld [vmem:[%s8404_s23 + $0x34] sm:$0xf] }
  0x68   : > { %1176 = vmatpush.bf16.msra.mxu3 %v6333_v24  ;;  %v6489_v3 = vor.u32 %v7248_v2, %v6488_v0  ;;  %v6152_v4 = vld [vmem:[%s8404_s23 + $0x30] sm:$0xf]  ;;  %v7164_v5 = vld [vmem:[%s8404_s23 + $0x34] sm:$0xf0]  ;;  %v6154_v7 = vld [vmem:[%s8404_s23 + $0x38] sm:$0xf0] }
  0x69   : > { %910 = vmatpush.bf16.msra.mxu0 %v6257_v31  ;;  %v8462_v8 = vor.u32 %v7164_v5, %v6152_v4  ;;  %v8464_v9 = vor.u32 %v7163_v6, %v6154_v7  ;;  %v6160_v10 = vld [vmem:[%s8404_s23 + $0x40] sm:$0xf]  ;;  %v7166_v11 = vld [vmem:[%s8404_s23 + $0x44] sm:$0xf0]  ;;  %v7165_v12 = vld [vmem:[%s8404_s23 + $0x44] sm:$0xf] }
  0x6a   : > { %999 = vmatpush.bf16.msra.mxu1 %v6321_v35  ;;  %v6162_v13 = vld [vmem:[%s8404_s23 + $0x48] sm:$0xf0]  ;;  %v8474_v14 = vor.u32 %v7166_v11, %v6160_v10  ;;  %v6416_v16 = vld [vmem:[#allocation12 + $0x40] sm:$0xf]  ;;  %v7230_v17 = vld [vmem:[#allocation12 + $0x44] sm:$0xf0] }
  0x6b   : > { %1088 = vmatpush.bf16.msra.mxu2 %v6261_v36  ;;  %v8476_v15 = vor.u32 %v7165_v12, %v6162_v13  ;;  %v6480_v18 = vld [vmem:[#allocation12 + $0xc0] sm:$0xf]  ;;  %v6417_v19 = vor.u32 %v7230_v17, %v6416_v16  ;;  %v7246_v20 = vld [vmem:[#allocation12 + $0xc4] sm:$0xf0]  ;;  %v7235_v21 = vld [vmem:[#allocation12 + $0x74] sm:$0xf] }
  0x6c   : > { %1177 = vmatpush.bf16.msra.mxu3 %v6325_v39  ;;  %911 = vmatmul.bf16.vlgmr.msra.gmra.mxu0 %v8426_v41  ;;  %v6442_v22 = vld [vmem:[#allocation12 + $0x78] sm:$0xf0]  ;;  %v6481_v23 = vor.u32 %v7246_v20, %v6480_v18  ;;  %v7251_v25 = vld [vmem:[#allocation12 + $0xf4] sm:$0xf]  ;;  %v6168_v28 = vld [vmem:[%s8404_s23 + $0x50] sm:$0xf] }
  0x6d   : > { %1457 = vmatpush.bf16.msrb.mxu0 %v6441_v40  ;;  %1000 = vmatmul.bf16.vlgmr.msra.gmra.mxu1 %v8428_v43  ;;  %v6445_v24 = vor.u32 %v7235_v21, %v6442_v22  ;;  %v6506_v26 = vld [vmem:[#allocation12 + $0xf8] sm:$0xf0]  ;;  %v7168_v29 = vld [vmem:[%s8404_s23 + $0x54] sm:$0xf0]  ;;  %v7167_v30 = vld [vmem:[%s8404_s23 + $0x54] sm:$0xf] }
  0x6e   : > { %1546 = vmatpush.bf16.msrb.mxu1 %v6505_v42  ;;  %1089 = vmatmul.bf16.vlgmr.msra.gmra.mxu2 %v8426_v41  ;;  %v6509_v27 = vor.u32 %v7251_v25, %v6506_v26  ;;  %v6170_v31 = vld [vmem:[%s8404_s23 + $0x58] sm:$0xf0]  ;;  %v8486_v32 = vor.u32 %v7168_v29, %v6168_v28  ;;  %v6176_v34 = vld [vmem:[%s8404_s23 + $0x60] sm:$0xf]  ;;  %v7170_v35 = vld [vmem:[%s8404_s23 + $0x64] sm:$0xf0] }
  0x6f   : > { %1178 = vmatmul.bf16.vlgmr.msra.gmra.mxu3 %v8428_v43  ;;  %1635 = vmatpush.bf16.msrb.mxu2 %v6445_v24  ;;  %v8488_v33 = vor.u32 %v7167_v30, %v6170_v31  ;;  %v7169_v36 = vld [vmem:[%s8404_s23 + $0x64] sm:$0xf]  ;;  %v6178_v37 = vld [vmem:[%s8404_s23 + $0x68] sm:$0xf0]  ;;  %v8498_v38 = vor.u32 %v7170_v35, %v6176_v34  ;;  %v6408_v40 = vld [vmem:[#allocation12 + $0x30] sm:$0xf] }
  0x70   : > { %1724 = vmatpush.bf16.msrb.mxu3 %v6509_v27  ;;  %v8500_v39 = vor.u32 %v7169_v36, %v6178_v37  ;;  %v7228_v42 = vld [vmem:[#allocation12 + $0x34] sm:$0xf0]  ;;  %v6472_v44 = vld [vmem:[#allocation12 + $0xb0] sm:$0xf]  ;;  %v7171_v50 = vld [vmem:[%s8404_s23 + $0x74] sm:$0xf] }
  0x71   : > { %1458 = vmatpush.bf16.msrb.mxu0 %v6433_v47  ;;  %v6409_v45 = vor.u32 %v7228_v42, %v6408_v40  ;;  %v7244_v46 = vld [vmem:[#allocation12 + $0xb4] sm:$0xf0]  ;;  %v6184_v48 = vld [vmem:[%s8404_s23 + $0x70] sm:$0xf]  ;;  %v6186_v51 = vld [vmem:[%s8404_s23 + $0x78] sm:$0xf0] }
  0x72   : > { %1547 = vmatpush.bf16.msrb.mxu1 %v6497_v49  ;;  %v6473_v47 = vor.u32 %v7244_v46, %v6472_v44  ;;  %v7172_v49 = vld [vmem:[%s8404_s23 + $0x74] sm:$0xf0]  ;;  %v7233_v52 = vld [vmem:[#allocation12 + $0x64] sm:$0xf]  ;;  %v6434_v53 = vld [vmem:[#allocation12 + $0x68] sm:$0xf0]  ;;  %v8512_v58 = vor.u32 %v7171_v50, %v6186_v51 }
  0x73   : > { %v8510_v56 = vor.u32 %v7172_v49, %v6184_v48  ;;  %v6437_v57 = vor.u32 %v7233_v52, %v6434_v53  ;;  %v7249_v59 = vld [vmem:[#allocation12 + $0xe4] sm:$0xf]  ;;  %v6498_v62 = vld [vmem:[#allocation12 + $0xe8] sm:$0xf0]  ;;  %v6192_v0 = vld [vmem:[%s8404_s23 + $0x80] sm:$0xf] }
  0x74   : > { %v6501_v63 = vor.u32 %v7249_v59, %v6498_v62  ;;  %v7173_v2 = vld [vmem:[%s8404_s23 + $0x84] sm:$0xf]  ;;  %v577_v4 = vld [vmem:[%s10316_s5] sm:$0x3]  ;;  %v7226_v17 = vld [vmem:[#allocation12 + $0x24] sm:$0xf0] }
  0x75   : > { %1459 = vmatpush.bf16.msrb.mxu0 %v6425_v1  ;;  %1636 = vmatpush.bf16.msrb.mxu2 %v6437_v57  ;;  %v7174_v1 = vld [vmem:[%s8404_s23 + $0x84] sm:$0xf0]  ;;  %v8529_v11 = vperm.slane %v577_v4, 0  ;;  %v8534_v12 = vperm.slane %v577_v4, 1  ;;  %v6400_v16 = vld [vmem:[#allocation12 + $0x20] sm:$0xf] }
  0x76   : > { %1548 = vmatpush.bf16.msrb.mxu1 %v6489_v3  ;;  %1725 = vmatpush.bf16.msrb.mxu3 %v6501_v63  ;;  %v6194_v3 = vld [vmem:[%s8404_s23 + $0x88] sm:$0xf0]  ;;  %v8525_v5 = vor.u32 %v7174_v1, %v6192_v0  ;;  %v6464_v18 = vld [vmem:[#allocation12 + $0xa0] sm:$0xf]  ;;  %v6401_v20 = vor.u32 %v7226_v17, %v6400_v16  ;;  %v7242_v21 = vld [vmem:[#allocation12 + $0xa4] sm:$0xf0] }
  0x77   : > { %v8527_v7 = vor.u32 %v7173_v2, %v6194_v3  ;;  %v6465_v25 = vor.u32 %v7242_v21, %v6464_v18  ;;  %v6200_v30 = vld [vmem:[%s8404_s23 + $0x90] sm:$0xf]  ;;  %v7176_v31 = vld [vmem:[%s8404_s23 + $0x94] sm:$0xf0]  ;;  %v7175_v34 = vld [vmem:[%s8404_s23 + $0x94] sm:$0xf] }
  0x78   : > { %v6202_v35 = vld [vmem:[%s8404_s23 + $0x98] sm:$0xf0]  ;;  %v7231_v37 = vld [vmem:[#allocation12 + $0x54] sm:$0xf]  ;;  %v8544_v44 = vor.u32 %v7176_v31, %v6200_v30  ;;  %v6208_v16 = vld [vmem:[%s8404_s23 + $0xa0] sm:$0xf] }
  0x79   : > { %1460 = vmatpush.bf16.msrb.mxu0 %v6417_v19  ;;  %v6426_v40 = vld [vmem:[#allocation12 + $0x58] sm:$0xf0]  ;;  %v8547_v49 = vor.u32 %v7175_v34, %v6202_v35  ;;  %v7247_v50 = vld [vmem:[#allocation12 + $0xd4] sm:$0xf]  ;;  %v7178_v17 = vld [vmem:[%s8404_s23 + $0xa4] sm:$0xf0] }
  0x7a   : > { %1549 = vmatpush.bf16.msrb.mxu1 %v6481_v23  ;;  %v6490_v51 = vld [vmem:[#allocation12 + $0xd8] sm:$0xf0]  ;;  %v7177_v18 = vld [vmem:[%s8404_s23 + $0xa4] sm:$0xf]  ;;  %v6392_v34 = vld [vmem:[#allocation12 + $0x10] sm:$0xf] }
  0x7b   : > { %v6493_v53 = vor.u32 %v7247_v50, %v6490_v51  ;;  %v7224_v35 = vld [vmem:[#allocation12 + $0x14] sm:$0xf0]  ;;  %s6125_s22 = sshll.u32 %s8393_s8, 9  ;;  %s7413_s27 = sshll.u32 %s8180_s16, 9 }
  0x7c   : > { %916 = vmatmul.bf16.gmra.mxu0 %v8438_v54  ;;  %s10090_s25 = scalar_lea.vmem [#allocation15], %s6125_s22  ;;  %s5952_s20 = scalar_lea.hbm %s10321_s10, %s7413_s27 }
  0x7d   : > { %1005 = vmatmul.bf16.gmra.mxu1 %v8440_v55  ;;  %1461 = vmatpush.bf16.msrb.mxu0 %v6409_v45  ;;  %v6429_v45 = vor.u32 %v7231_v37, %v6426_v40  ;;  %v6393_v37 = vor.u32 %v7224_v35, %v6392_v34  ;;  %v6456_v40 = vld [vmem:[#allocation12 + $0x90] sm:$0xf]  ;;  %s5953_s12 = sshll.u32 %s10090_s25, 4  ;;  %s5938_s15 = scalar_lea.sflag [#allocation6], %s8393_s8  ;;  %s5954_s12 = int_to_ptr.vmem [resolvable:$true] %s5953_s12 }
  0x7e   : > { %1094 = vmatmul.bf16.gmra.mxu2 %v8438_v54  ;;  %1550 = vmatpush.bf16.msrb.mxu1 %v6473_v47  ;;  %s8110_s21 = scalar_lea.hbm %s10321_s10, 1024 }
  0x7f   : > { %1183 = vmatmul.bf16.gmra.mxu3 %v8440_v55  ;;  %1637 = vmatpush.bf16.msrb.mxu2 %v6429_v45 }
  0x80   : > { %1726 = vmatpush.bf16.msrb.mxu3 %v6493_v53 }
  0x81   : > { %1462 = vmatpush.bf16.msrb.mxu0 %v6401_v20 }
  0x82   : > { %1551 = vmatpush.bf16.msrb.mxu1 %v6465_v25 }
  0x85   : > { %1463 = vmatpush.bf16.msrb.mxu0 %v6393_v37 }
  0x8c   : > { %921 = vmatmul.bf16.gmra.mxu0 %v8450_v60 }
  0x8d   : > { %1010 = vmatmul.bf16.gmra.mxu1 %v8452_v61 }
  0x8e   : > { %1099 = vmatmul.bf16.gmra.mxu2 %v8450_v60 }
  0x8f   : > { %1188 = vmatmul.bf16.gmra.mxu3 %v8452_v61 }
  0x9c   : > { %926 = vmatmul.bf16.gmra.mxu0 %v8462_v8 }
  0x9d   : > { %1015 = vmatmul.bf16.gmra.mxu1 %v8464_v9 }
  0x9e   : > { %1104 = vmatmul.bf16.gmra.mxu2 %v8462_v8 }
  0x9f   : > { %1193 = vmatmul.bf16.gmra.mxu3 %v8464_v9 }
  0xac   : > { %931 = vmatmul.bf16.gmra.mxu0 %v8474_v14 }
  0xad   : > { %1020 = vmatmul.bf16.gmra.mxu1 %v8476_v15 }
  0xae   : > { %1109 = vmatmul.bf16.gmra.mxu2 %v8474_v14 }
  0xaf   : > { %1198 = vmatmul.bf16.gmra.mxu3 %v8476_v15 }
  0xbc   : > { %936 = vmatmul.bf16.gmra.mxu0 %v8486_v32 }
  0xbd   : > { %1025 = vmatmul.bf16.gmra.mxu1 %v8488_v33 }
  0xbe   : > { %1114 = vmatmul.bf16.gmra.mxu2 %v8486_v32 }
  0xbf   : > { %1203 = vmatmul.bf16.gmra.mxu3 %v8488_v33 }
  0xcc   : > { %941 = vmatmul.bf16.gmra.mxu0 %v8498_v38 }
  0xcd   : > { %1030 = vmatmul.bf16.gmra.mxu1 %v8500_v39 }
  0xce   : > { %1119 = vmatmul.bf16.gmra.mxu2 %v8498_v38 }
  0xcf   : > { %1208 = vmatmul.bf16.gmra.mxu3 %v8500_v39 }
  0xdc   : > { %946 = vmatmul.bf16.gmra.mxu0 %v8510_v56 }
  0xdd   : > { %1035 = vmatmul.bf16.gmra.mxu1 %v8512_v58 }
  0xde   : > { %1124 = vmatmul.bf16.gmra.mxu2 %v8510_v56 }
  0xdf   : > { %1213 = vmatmul.bf16.gmra.mxu3 %v8512_v58 }
  0xe9   : > { %v912_v6 = vpop.f32.mrf.mxu0 }
  0xea   : > { %v1001_v10 = vpop.f32.mrf.mxu1  ;;  %v913_v13 = vadd.f32 %v912_v6, %v8529_v11 }
  0xec   : > { %951 = vmatmul.bf16.gmra.mxu0 %v8525_v5  ;;  %v1002_v27 = vadd.f32 %v1001_v10, %v913_v13 }
  0xed   : > { %1040 = vmatmul.bf16.gmra.mxu1 %v8527_v7 }
  0xee   : > { %1129 = vmatmul.bf16.gmra.mxu2 %v8525_v5 }
  0xef   : > { %1218 = vmatmul.bf16.gmra.mxu3 %v8527_v7 }
  0xf1   : > { %v1090_v19 = vpop.f32.mrf.mxu2  ;;  %v914_v23 = vpop.f32.mrf.mxu0 }
  0xf2   : > { %v1091_v22 = vadd.f32 %v1090_v19, %v8534_v12  ;;  %v1179_v24 = vpop.f32.mrf.mxu3  ;;  %v1003_v26 = vpop.f32.mrf.mxu1  ;;  %v915_v36 = vadd.f32 %v914_v23, %v8529_v11  ;;  %v6210_v19 = vld [vmem:[%s8404_s23 + $0xa8] sm:$0xf0] }
  0xf4   : > { %v1180_v28 = vadd.f32 %v1179_v24, %v1091_v22  ;;  %v1004_v57 = vadd.f32 %v1003_v26, %v915_v36  ;;  %v8560_v22 = vor.u32 %v7178_v17, %v6208_v16  ;;  %v8563_v26 = vor.u32 %v7177_v18, %v6210_v19  ;;  %v7245_v18 = vld [vmem:[#allocation12 + $0xc4] sm:$0xf]  ;;  %v6482_v19 = vld [vmem:[#allocation12 + $0xc8] sm:$0xf0] }
  0xf6   : > { %v1813_v29 = vpack.c.bf16 %v1180_v28, %v1002_v27 }
  0xf8   : > { %1845 = vst [vmem:[#allocation2] sm:$0xff] %v1813_v29 }
  0xf9   : > { %v1092_v42 = vpop.f32.mrf.mxu2  ;;  %v917_v47 = vpop.f32.mrf.mxu0 }
  0xfa   : > { %v1093_v46 = vadd.f32 %v1092_v42, %v8534_v12  ;;  %v1181_v48 = vpop.f32.mrf.mxu3  ;;  %v1006_v52 = vpop.f32.mrf.mxu1  ;;  %v918_v63 = vadd.f32 %v917_v47, %v8529_v11  ;;  %v7240_v42 = vld [vmem:[#allocation12 + $0x94] sm:$0xf0] }
  0xfc   : > { %v1182_v59 = vadd.f32 %v1181_v48, %v1093_v46  ;;  %956 = vmatmul.bf16.gmra.mxu0 %v8544_v44  ;;  %v1007_v6 = vadd.f32 %v1006_v52, %v918_v63  ;;  %v6457_v48 = vor.u32 %v7240_v42, %v6456_v40  ;;  %v6218_v63 = vld [vmem:[%s8404_s23 + $0xb8] sm:$0xf0]  ;;  %v6224_v40 = vld [vmem:[%s8404_s23 + $0xc0] sm:$0xf]  ;;  %v7182_v42 = vld [vmem:[%s8404_s23 + $0xc4] sm:$0xf0] }
  0xfd   : > { %1045 = vmatmul.bf16.gmra.mxu1 %v8547_v49 }
  0xfe   : > { %v1814_v62 = vpack.c.bf16 %v1182_v59, %v1004_v57  ;;  %1134 = vmatmul.bf16.gmra.mxu2 %v8544_v44  ;;  %1552 = vmatpush.bf16.msrb.mxu1 %v6457_v48  ;;  %v6216_v57 = vld [vmem:[%s8404_s23 + $0xb0] sm:$0xf]  ;;  %v7180_v59 = vld [vmem:[%s8404_s23 + $0xb4] sm:$0xf0] }
  0xff   : > { %1223 = vmatmul.bf16.gmra.mxu3 %v8547_v49 }
 0x100   : > { %1846 = vst [vmem:[#allocation2 + $0x8] sm:$0xff] %v1814_v62  ;;  %v7179_v62 = vld [vmem:[%s8404_s23 + $0xb4] sm:$0xf] }
 0x101   : > { %v1095_v0 = vpop.f32.mrf.mxu2  ;;  %v919_v2 = vpop.f32.mrf.mxu0  ;;  %v8579_v17 = vor.u32 %v7179_v62, %v6218_v63 }
 0x102   : > { %v1096_v1 = vadd.f32 %v1095_v0, %v8534_v12  ;;  %v1184_v3 = vpop.f32.mrf.mxu3  ;;  %v1008_v4 = vpop.f32.mrf.mxu1  ;;  %v920_v20 = vadd.f32 %v919_v2, %v8529_v11  ;;  %v6418_v2 = vld [vmem:[#allocation12 + $0x48] sm:$0xf0] }
 0x104   : > { %v1185_v10 = vadd.f32 %v1184_v3, %v1096_v1  ;;  %v1009_v28 = vadd.f32 %v1008_v4, %v920_v20  ;;  %v7229_v1 = vld [vmem:[#allocation12 + $0x44] sm:$0xf]  ;;  %v8576_v4 = vor.u32 %v7180_v59, %v6216_v57 }
 0x106   : > { %v1815_v13 = vpack.c.bf16 %v1185_v10, %v1007_v6  ;;  %v6421_v6 = vor.u32 %v7229_v1, %v6418_v2  ;;  %v6384_v2 = vld [vmem:[#allocation12] sm:$0xf] }
 0x108   : > { %1847 = vst [vmem:[#allocation2 + $0x10] sm:$0xff] %v1815_v13  ;;  %1638 = vmatpush.bf16.msrb.mxu2 %v6421_v6 }
 0x109   : > { %v1097_v21 = vpop.f32.mrf.mxu2  ;;  %v922_v24 = vpop.f32.mrf.mxu0 }
 0x10a   : > { %v1098_v23 = vadd.f32 %v1097_v21, %v8534_v12  ;;  %v1186_v25 = vpop.f32.mrf.mxu3  ;;  %v1011_v27 = vpop.f32.mrf.mxu1  ;;  %v923_v31 = vadd.f32 %v922_v24, %v8529_v11  ;;  %v6485_v21 = vor.u32 %v7245_v18, %v6482_v19 }
 0x10c   : > { %v1187_v29 = vadd.f32 %v1186_v25, %v1098_v23  ;;  %961 = vmatmul.bf16.gmra.mxu0 %v8560_v22  ;;  %v1012_v51 = vadd.f32 %v1011_v27, %v923_v31  ;;  %1727 = vmatpush.bf16.msrb.mxu3 %v6485_v21 }
 0x10d   : > { %1050 = vmatmul.bf16.gmra.mxu1 %v8563_v26 }
 0x10e   : > { %v1816_v30 = vpack.c.bf16 %v1187_v29, %v1009_v28  ;;  %1139 = vmatmul.bf16.gmra.mxu2 %v8560_v22 }
 0x10f   : > { %1228 = vmatmul.bf16.gmra.mxu3 %v8563_v26 }
 0x110   : > { %1848 = vst [vmem:[#allocation2 + $0x18] sm:$0xff] %v1816_v30 }
 0x111   : > { %v1100_v36 = vpop.f32.mrf.mxu2  ;;  %v924_v46 = vpop.f32.mrf.mxu0 }
 0x112   : > { %v1101_v45 = vadd.f32 %v1100_v36, %v8534_v12  ;;  %v1189_v47 = vpop.f32.mrf.mxu3  ;;  %v1013_v50 = vpop.f32.mrf.mxu1  ;;  %v925_v0 = vadd.f32 %v924_v46, %v8529_v11  ;;  %v6226_v46 = vld [vmem:[%s8404_s23 + $0xc8] sm:$0xf0] }
 0x114   : > { %v1190_v52 = vadd.f32 %v1189_v47, %v1101_v45  ;;  %v1014_v23 = vadd.f32 %v1013_v50, %v925_v0  ;;  %v7181_v45 = vld [vmem:[%s8404_s23 + $0xc4] sm:$0xf]  ;;  %v8592_v50 = vor.u32 %v7182_v42, %v6224_v40 }
 0x115   : > { %v8595_v57 = vor.u32 %v7181_v45, %v6226_v46 }
 0x116   : > { %v1817_v53 = vpack.c.bf16 %v1190_v52, %v1012_v51 }
 0x118   : > { %1849 = vst [vmem:[#allocation2 + $0x20] sm:$0xff] %v1817_v53 }
 0x119   : > { %v1102_v3 = vpop.f32.mrf.mxu2  ;;  %v927_v13 = vpop.f32.mrf.mxu0 }
 0x11a   : > { %v1103_v10 = vadd.f32 %v1102_v3, %v8534_v12  ;;  %v1191_v16 = vpop.f32.mrf.mxu3  ;;  %v1016_v20 = vpop.f32.mrf.mxu1  ;;  %v928_v27 = vadd.f32 %v927_v13, %v8529_v11  ;;  %v7222_v3 = vld [vmem:[#allocation12 + $0x4] sm:$0xf0]  ;;  %v6448_v13 = vld [vmem:[#allocation12 + $0x80] sm:$0xf] }
 0x11c   : > { %v1192_v24 = vadd.f32 %v1191_v16, %v1103_v10  ;;  %966 = vmatmul.bf16.gmra.mxu0 %v8576_v4  ;;  %v1017_v35 = vadd.f32 %v1016_v20, %v928_v27  ;;  %v6385_v10 = vor.u32 %v7222_v3, %v6384_v2  ;;  %v7238_v16 = vld [vmem:[#allocation12 + $0x84] sm:$0xf0] }
 0x11d   : > { %1055 = vmatmul.bf16.gmra.mxu1 %v8579_v17  ;;  %v6449_v21 = vor.u32 %v7238_v16, %v6448_v13 }
 0x11e   : > { %v1818_v25 = vpack.c.bf16 %v1192_v24, %v1014_v23  ;;  %1144 = vmatmul.bf16.gmra.mxu2 %v8576_v4  ;;  %1464 = vmatpush.bf16.msrb.mxu0 %v6385_v10  ;;  %v7298_v10 = vld [vmem:[#allocation9 + $0x64] sm:$0xf0] }
 0x11f   : > { %1233 = vmatmul.bf16.gmra.mxu3 %v8579_v17  ;;  %1553 = vmatpush.bf16.msrb.mxu1 %v6449_v21 }
 0x120   : > { %1850 = vst [vmem:[#allocation2 + $0x28] sm:$0xff] %v1818_v25 }
 0x121   : > { %v1105_v28 = vpop.f32.mrf.mxu2  ;;  %v929_v30 = vpop.f32.mrf.mxu0 }
 0x122   : > { %v1106_v29 = vadd.f32 %v1105_v28, %v8534_v12  ;;  %v1194_v31 = vpop.f32.mrf.mxu3  ;;  %v1018_v34 = vpop.f32.mrf.mxu1  ;;  %v930_v47 = vadd.f32 %v929_v30, %v8529_v11  ;;  %v6232_v28 = vld [vmem:[%s8404_s23 + $0xd0] sm:$0xf]  ;;  %v7183_v30 = vld [vmem:[%s8404_s23 + $0xd4] sm:$0xf] }
 0x124   : > { %v1195_v36 = vadd.f32 %v1194_v31, %v1106_v29  ;;  %v1019_v62 = vadd.f32 %v1018_v34, %v930_v47  ;;  %v7184_v29 = vld [vmem:[%s8404_s23 + $0xd4] sm:$0xf0]  ;;  %v6234_v31 = vld [vmem:[%s8404_s23 + $0xd8] sm:$0xf0] }
 0x125   : > { %v8608_v40 = vor.u32 %v7184_v29, %v6232_v28  ;;  %v6466_v28 = vld [vmem:[#allocation12 + $0xa8] sm:$0xf0]  ;;  %v6680_v29 = vld [vmem:[#allocation9 + $0x50] sm:$0xf] }
 0x126   : > { %v1819_v37 = vpack.c.bf16 %v1195_v36, %v1017_v35  ;;  %v7227_v35 = vld [vmem:[#allocation12 + $0x34] sm:$0xf]  ;;  %v6410_v36 = vld [vmem:[#allocation12 + $0x38] sm:$0xf0] }
 0x127   : > { %v6413_v42 = vor.u32 %v7227_v35, %v6410_v36 }
 0x128   : > { %1851 = vst [vmem:[#allocation2 + $0x30] sm:$0xff] %v1819_v37 }
 0x129   : > { %v1107_v48 = vpop.f32.mrf.mxu2  ;;  %v932_v52 = vpop.f32.mrf.mxu0  ;;  %1639 = vmatpush.bf16.msrb.mxu2 %v6413_v42  ;;  %v7223_v42 = vld [vmem:[#allocation12 + $0x14] sm:$0xf] }
 0x12a   : > { %v1108_v51 = vadd.f32 %v1107_v48, %v8534_v12  ;;  %v1196_v53 = vpop.f32.mrf.mxu3  ;;  %v1021_v59 = vpop.f32.mrf.mxu1  ;;  %v933_v1 = vadd.f32 %v932_v52, %v8529_v11  ;;  %v8611_v48 = vor.u32 %v7183_v30, %v6234_v31  ;;  %v6474_v52 = vld [vmem:[#allocation12 + $0xb8] sm:$0xf0] }
 0x12c   : > { %v1197_v63 = vadd.f32 %v1196_v53, %v1108_v51  ;;  %971 = vmatmul.bf16.gmra.mxu0 %v8592_v50  ;;  %v1022_v24 = vadd.f32 %v1021_v59, %v933_v1  ;;  %v7243_v51 = vld [vmem:[#allocation12 + $0xb4] sm:$0xf]  ;;  %v6696_v53 = vld [vmem:[#allocation9 + $0x70] sm:$0xf] }
 0x12d   : > { %1060 = vmatmul.bf16.gmra.mxu1 %v8595_v57 }
 0x12e   : > { %v1820_v0 = vpack.c.bf16 %v1197_v63, %v1019_v62  ;;  %1149 = vmatmul.bf16.gmra.mxu2 %v8592_v50  ;;  %v6477_v62 = vor.u32 %v7243_v51, %v6474_v52  ;;  %v7300_v63 = vld [vmem:[#allocation9 + $0x74] sm:$0xf0] }
 0x12f   : > { %1238 = vmatmul.bf16.gmra.mxu3 %v8595_v57  ;;  %v6697_v2 = vor.u32 %v7300_v63, %v6696_v53  ;;  %v7239_v53 = vld [vmem:[#allocation12 + $0x94] sm:$0xf]  ;;  %v6672_v63 = vld [vmem:[#allocation9 + $0x40] sm:$0xf] }
 0x130   : > { %1852 = vst [vmem:[#allocation2 + $0x38] sm:$0xff] %v1820_v0  ;;  %1728 = vmatpush.bf16.msrb.mxu3 %v6477_v62  ;;  %v6458_v62 = vld [vmem:[#allocation12 + $0x98] sm:$0xf0] }
 0x131   : > { %v1110_v6 = vpop.f32.mrf.mxu2  ;;  %v934_v19 = vpop.f32.mrf.mxu0  ;;  %2331 = vmatpush.bf16.msra.mxu0 %v6697_v2  ;;  %v6461_v2 = vor.u32 %v7239_v53, %v6458_v62 }
 0x132   : > { %v1111_v18 = vadd.f32 %v1110_v6, %v8534_v12  ;;  %v1199_v20 = vpop.f32.mrf.mxu3  ;;  %v1023_v23 = vpop.f32.mrf.mxu1  ;;  %v935_v34 = vadd.f32 %v934_v19, %v8529_v11  ;;  %v6688_v6 = vld [vmem:[#allocation9 + $0x60] sm:$0xf]  ;;  %v6402_v19 = vld [vmem:[#allocation12 + $0x28] sm:$0xf0] }
 0x133   : > { %v6689_v13 = vor.u32 %v7298_v10, %v6688_v6  ;;  %v7221_v10 = vld [vmem:[#allocation12 + $0x4] sm:$0xf] }
 0x134   : > { %v1200_v25 = vadd.f32 %v1199_v20, %v1111_v18  ;;  %v1024_v0 = vadd.f32 %v1023_v23, %v935_v34  ;;  %v7225_v18 = vld [vmem:[#allocation12 + $0x24] sm:$0xf]  ;;  %v7296_v34 = vld [vmem:[#allocation9 + $0x54] sm:$0xf0] }
 0x135   : > { %v6405_v21 = vor.u32 %v7225_v18, %v6402_v19  ;;  %2332 = vmatpush.bf16.msra.mxu0 %v6689_v13  ;;  %v6386_v13 = vld [vmem:[#allocation12 + $0x8] sm:$0xf0] }
 0x136   : > { %v1821_v27 = vpack.c.bf16 %v1200_v25, %v1022_v24  ;;  %v6389_v19 = vor.u32 %v7221_v10, %v6386_v13 }
 0x137   : > { %1640 = vmatpush.bf16.msrb.mxu2 %v6405_v21 }
 0x138   : > { %1853 = vst [vmem:[#allocation2 + $0x40] sm:$0xff] %v1821_v27  ;;  %v7241_v27 = vld [vmem:[#allocation12 + $0xa4] sm:$0xf] }
 0x139   : > { %v1112_v37 = vpop.f32.mrf.mxu2  ;;  %v937_v46 = vpop.f32.mrf.mxu0  ;;  %v6469_v31 = vor.u32 %v7241_v27, %v6466_v28  ;;  %v7237_v27 = vld [vmem:[#allocation12 + $0x84] sm:$0xf]  ;;  %v6450_v28 = vld [vmem:[#allocation12 + $0x88] sm:$0xf0] }
 0x13a   : > { %v1113_v45 = vadd.f32 %v1112_v37, %v8534_v12  ;;  %v1201_v47 = vpop.f32.mrf.mxu3  ;;  %v1026_v59 = vpop.f32.mrf.mxu1  ;;  %v938_v16 = vadd.f32 %v937_v46, %v8529_v11  ;;  %v6681_v37 = vor.u32 %v7296_v34, %v6680_v29  ;;  %v6240_v46 = vld [vmem:[%s8404_s23 + $0xe0] sm:$0xf]  ;;  %v6664_v29 = vld [vmem:[#allocation9 + $0x30] sm:$0xf]  ;;  %v7292_v34 = vld [vmem:[#allocation9 + $0x34] sm:$0xf0] }
 0x13b   : > { %1729 = vmatpush.bf16.msrb.mxu3 %v6469_v31 }
 0x13c   : > { %v1202_v1 = vadd.f32 %v1201_v47, %v1113_v45  ;;  %976 = vmatmul.bf16.gmra.mxu0 %v8608_v40  ;;  %v1027_v35 = vadd.f32 %v1026_v59, %v938_v16  ;;  %v6394_v45 = vld [vmem:[#allocation12 + $0x18] sm:$0xf0]  ;;  %v7186_v47 = vld [vmem:[%s8404_s23 + $0xe4] sm:$0xf0] }
 0x13d   : > { %1065 = vmatmul.bf16.gmra.mxu1 %v8611_v48  ;;  %v6397_v51 = vor.u32 %v7223_v42, %v6394_v45  ;;  %2333 = vmatpush.bf16.msra.mxu0 %v6681_v37  ;;  %v8624_v18 = vor.u32 %v7186_v47, %v6240_v46  ;;  %v6665_v37 = vor.u32 %v7292_v34, %v6664_v29  ;;  %v6656_v45 = vld [vmem:[#allocation9 + $0x20] sm:$0xf]  ;;  %v7290_v46 = vld [vmem:[#allocation9 + $0x24] sm:$0xf0] }
 0x13e   : > { %v1822_v3 = vpack.c.bf16 %v1202_v1, %v1024_v0  ;;  %1154 = vmatmul.bf16.gmra.mxu2 %v8608_v40  ;;  %v7185_v0 = vld [vmem:[%s8404_s23 + $0xe4] sm:$0xf]  ;;  %v6242_v1 = vld [vmem:[%s8404_s23 + $0xe8] sm:$0xf0]  ;;  %v6657_v47 = vor.u32 %v7290_v46, %v6656_v45 }
 0x13f   : > { %1243 = vmatmul.bf16.gmra.mxu3 %v8611_v48  ;;  %1641 = vmatpush.bf16.msrb.mxu2 %v6397_v51 }
 0x140   : > { %1854 = vst [vmem:[#allocation2 + $0x48] sm:$0xff] %v1822_v3  ;;  %v7294_v3 = vld [vmem:[#allocation9 + $0x44] sm:$0xf0]  ;;  %1730 = vmatpush.bf16.msrb.mxu3 %v6461_v2  ;;  %v6648_v2 = vld [vmem:[#allocation9 + $0x10] sm:$0xf] }
 0x141   : > { %v1115_v20 = vpop.f32.mrf.mxu2  ;;  %v939_v24 = vpop.f32.mrf.mxu0  ;;  %v6673_v6 = vor.u32 %v7294_v3, %v6672_v63  ;;  %v7288_v3 = vld [vmem:[#allocation9 + $0x14] sm:$0xf0] }
 0x142   : > { %v1116_v23 = vadd.f32 %v1115_v20, %v8534_v12  ;;  %v1204_v25 = vpop.f32.mrf.mxu3  ;;  %v1028_v30 = vpop.f32.mrf.mxu1  ;;  %v940_v59 = vadd.f32 %v939_v24, %v8529_v11  ;;  %v6453_v24 = vor.u32 %v7237_v27, %v6450_v28  ;;  %v7187_v27 = vld [vmem:[%s8404_s23 + $0xf4] sm:$0xf]  ;;  %v6250_v28 = vld [vmem:[%s8404_s23 + $0xf8] sm:$0xf0] }
 0x143   : > { %2334 = vmatpush.bf16.msra.mxu0 %v6673_v6  ;;  %1642 = vmatpush.bf16.msrb.mxu2 %v6389_v19  ;;  %v6649_v6 = vor.u32 %v7288_v3, %v6648_v2 }
 0x144   : > { %v1205_v36 = vadd.f32 %v1204_v25, %v1116_v23  ;;  %v8627_v25 = vor.u32 %v7185_v0, %v6242_v1  ;;  %1731 = vmatpush.bf16.msrb.mxu3 %v6453_v24 }
 0x146   : > { %v1823_v52 = vpack.c.bf16 %v1205_v36, %v1027_v35  ;;  %v1029_v35 = vadd.f32 %v1028_v30, %v940_v59  ;;  %v6760_v30 = vld [vmem:[#allocation9 + $0xf0] sm:$0xf] }
 0x147   : > { %2335 = vmatpush.bf16.msra.mxu0 %v6665_v37 }
 0x148   : > { %1855 = vst [vmem:[#allocation2 + $0x50] sm:$0xff] %v1823_v52  ;;  %v7316_v52 = vld [vmem:[#allocation9 + $0xf4] sm:$0xf0] }
 0x149   : > { %v1117_v16 = vpop.f32.mrf.mxu2  ;;  %v942_v21 = vpop.f32.mrf.mxu0  ;;  %v6761_v62 = vor.u32 %v7316_v52, %v6760_v30 }
 0x14a   : > { %v1118_v20 = vadd.f32 %v1117_v16, %v8534_v12  ;;  %v1206_v23 = vpop.f32.mrf.mxu3  ;;  %v1031_v31 = vpop.f32.mrf.mxu1  ;;  %v943_v51 = vadd.f32 %v942_v21, %v8529_v11  ;;  %v6248_v16 = vld [vmem:[%s8404_s23 + $0xf0] sm:$0xf]  ;;  %v6640_v21 = vld [vmem:[#allocation9] sm:$0xf] }
 0x14b   : > { %2420 = vmatpush.bf16.msra.mxu1 %v6761_v62  ;;  %2336 = vmatpush.bf16.msra.mxu0 %v6657_v47 }
 0x14c   : > { %v1207_v36 = vadd.f32 %v1206_v23, %v1118_v20  ;;  %981 = vmatmul.bf16.gmra.mxu0 %v8624_v18  ;;  %v1032_v10 = vadd.f32 %v1031_v31, %v943_v51  ;;  %v7188_v20 = vld [vmem:[%s8404_s23 + $0xf4] sm:$0xf0]  ;;  %v7286_v23 = vld [vmem:[#allocation9 + $0x4] sm:$0xf0] }
 0x14d   : > { %1070 = vmatmul.bf16.gmra.mxu1 %v8627_v25  ;;  %v6641_v29 = vor.u32 %v7286_v23, %v6640_v21 }
 0x14e   : > { %v1824_v42 = vpack.c.bf16 %v1207_v36, %v1029_v35  ;;  %1159 = vmatmul.bf16.gmra.mxu2 %v8624_v18  ;;  %v8640_v35 = vor.u32 %v7188_v20, %v6248_v16 }
 0x14f   : > { %1248 = vmatmul.bf16.gmra.mxu3 %v8627_v25  ;;  %2337 = vmatpush.bf16.msra.mxu0 %v6649_v6 }
 0x150   : > { %1856 = vst [vmem:[#allocation2 + $0x58] sm:$0xff] %v1824_v42  ;;  %v8643_v42 = vor.u32 %v7187_v27, %v6250_v28  ;;  %v6752_v28 = vld [vmem:[#allocation9 + $0xe0] sm:$0xf] }
 0x151   : > { %v1120_v53 = vpop.f32.mrf.mxu2  ;;  %v944_v0 = vpop.f32.mrf.mxu0 }
 0x152   : > { %v1121_v63 = vadd.f32 %v1120_v53, %v8534_v12  ;;  %v1209_v1 = vpop.f32.mrf.mxu3  ;;  %v1033_v59 = vpop.f32.mrf.mxu1  ;;  %v945_v24 = vadd.f32 %v944_v0, %v8529_v11 }
 0x153   : > { %2338 = vmatpush.bf16.msra.mxu0 %v6641_v29  ;;  %v7314_v29 = vld [vmem:[#allocation9 + $0xe4] sm:$0xf0] }
 0x154   : > { %v1210_v13 = vadd.f32 %v1209_v1, %v1121_v63  ;;  %v1034_v46 = vadd.f32 %v1033_v59, %v945_v24 }
 0x156   : > { %v1825_v19 = vpack.c.bf16 %v1210_v13, %v1032_v10 }
 0x158   : > { %1857 = vst [vmem:[#allocation2 + $0x60] sm:$0xff] %v1825_v19 }
 0x159   : > { %v1122_v34 = vpop.f32.mrf.mxu2  ;;  %v947_v37 = vpop.f32.mrf.mxu0 }
 0x15a   : > { %v1123_v36 = vadd.f32 %v1122_v34, %v8534_v12  ;;  %v1211_v31 = vpop.f32.mrf.mxu3  ;;  %v1036_v45 = vpop.f32.mrf.mxu1  ;;  %v948_v30 = vadd.f32 %v947_v37, %v8529_v11  ;;  %v6753_v34 = vor.u32 %v7314_v29, %v6752_v28 }
 0x15c   : > { %v1212_v47 = vadd.f32 %v1211_v31, %v1123_v36  ;;  %986 = vmatmul.bf16.gmra.mxu0 %v8640_v35  ;;  %v1037_v1 = vadd.f32 %v1036_v45, %v948_v30  ;;  %2421 = vmatpush.bf16.msra.mxu1 %v6753_v34 }
 0x15d   : > { %1075 = vmatmul.bf16.gmra.mxu1 %v8643_v42 }
 0x15e   : > { %v1826_v51 = vpack.c.bf16 %v1212_v47, %v1034_v46  ;;  %1164 = vmatmul.bf16.gmra.mxu2 %v8640_v35 }
 0x15f   : > { %1253 = vmatmul.bf16.gmra.mxu3 %v8643_v42 }
 0x160   : > { %1858 = vst [vmem:[#allocation2 + $0x68] sm:$0xff] %v1826_v51 }
 0x161   : > { %v1125_v52 = vpop.f32.mrf.mxu2  ;;  %v949_v62 = vpop.f32.mrf.mxu0 }
 0x162   : > { %v1126_v53 = vadd.f32 %v1125_v52, %v8534_v12  ;;  %v1214_v63 = vpop.f32.mrf.mxu3  ;;  %v1038_v0 = vpop.f32.mrf.mxu1  ;;  %v950_v59 = vadd.f32 %v949_v62, %v8529_v11 }
 0x164   : > { %v1215_v2 = vadd.f32 %v1214_v63, %v1126_v53  ;;  %v1039_v20 = vadd.f32 %v1038_v0, %v950_v59 }
 0x166   : > { %v1827_v3 = vpack.c.bf16 %v1215_v2, %v1037_v1 }
 0x167   : > { %v7323_v59 = vld [vmem:[#allocation2 + $0x64] sm:$0xf0] }
 0x168   : > { %1859 = vst [vmem:[#allocation2 + $0x70] sm:$0xff] %v1827_v3 }
 0x169   : > { %v1127_v6 = vpop.f32.mrf.mxu2  ;;  %v952_v13 = vpop.f32.mrf.mxu0 }
 0x16a   : > { %v1128_v10 = vadd.f32 %v1127_v6, %v8534_v12  ;;  %v1216_v16 = vpop.f32.mrf.mxu3  ;;  %v1041_v19 = vpop.f32.mrf.mxu1  ;;  %v953_v27 = vadd.f32 %v952_v13, %v8529_v11 }
 0x16c   : > { %v1217_v21 = vadd.f32 %v1216_v16, %v1128_v10  ;;  %1465 = vmatmul.bf16.vlgmr.msrb.gmra.mxu0 %v8426_v41  ;;  %v1042_v46 = vadd.f32 %v1041_v19, %v953_v27  ;;  %v6792_v10 = vld [vmem:[#allocation2 + $0x60] sm:$0xf] }
 0x16d   : > { %1554 = vmatmul.bf16.vlgmr.msrb.gmra.mxu1 %v8428_v43  ;;  %v6793_v16 = vor.u32 %v7323_v59, %v6792_v10 }
 0x16e   : > { %v1828_v23 = vpack.c.bf16 %v1217_v21, %v1039_v20  ;;  %1643 = vmatmul.bf16.vlgmr.msrb.gmra.mxu2 %v8426_v41 }
 0x16f   : > { %1732 = vmatmul.bf16.vlgmr.msrb.gmra.mxu3 %v8428_v43  ;;  %v6796_v30 = vld [vmem:[#allocation2 + $0x70] sm:$0xf] }
 0x170   : > { %1860 = vst [vmem:[#allocation2 + $0x78] sm:$0xff] %v1828_v23 }
 0x171   : > { %v1130_v24 = vpop.f32.mrf.mxu2  ;;  %v954_v37 = vpop.f32.mrf.mxu0 }
 0x172   : > { %v1131_v36 = vadd.f32 %v1130_v24, %v8534_v12  ;;  %v1219_v31 = vpop.f32.mrf.mxu3  ;;  %v1043_v45 = vpop.f32.mrf.mxu1  ;;  %v955_v43 = vadd.f32 %v954_v37, %v8529_v11  ;;  %v7322_v24 = vld [vmem:[#allocation2 + $0x54] sm:$0xf0] }
 0x174   : > { %v1220_v47 = vadd.f32 %v1219_v31, %v1131_v36  ;;  %v1044_v2 = vadd.f32 %v1043_v45, %v955_v43  ;;  %v6788_v36 = vld [vmem:[#allocation2 + $0x50] sm:$0xf] }
 0x176   : > { %v1829_v51 = vpack.c.bf16 %v1220_v47, %v1042_v46 }
 0x177   : > { %v7324_v41 = vld [vmem:[#allocation2 + $0x74] sm:$0xf0] }
 0x178   : > { %1861 = vst [vmem:[#allocation2 + $0x80] sm:$0xff] %v1829_v51  ;;  %v6797_v52 = vor.u32 %v7324_v41, %v6796_v30  ;;  %v7321_v41 = vld [vmem:[#allocation2 + $0x44] sm:$0xf0] }
 0x179   : > { %v1132_v53 = vpop.f32.mrf.mxu2  ;;  %v957_v63 = vpop.f32.mrf.mxu0 }
 0x17a   : > { %v1133_v62 = vadd.f32 %v1132_v53, %v8534_v12  ;;  %2943 = vmatpush.bf16.xpose.msrb.mxu0 %v6797_v52  ;;  %v1221_v0 = vpop.f32.mrf.mxu3  ;;  %v1046_v1 = vpop.f32.mrf.mxu1  ;;  %v958_v13 = vadd.f32 %v957_v63, %v8529_v11  ;;  %v6784_v52 = vld [vmem:[#allocation2 + $0x40] sm:$0xf]  ;;  %v6744_v63 = vld [vmem:[#allocation9 + $0xd0] sm:$0xf] }
 0x17c   : > { %v1222_v3 = vadd.f32 %v1221_v0, %v1133_v62  ;;  %1470 = vmatmul.bf16.gmra.mxu0 %v8438_v54  ;;  %v1047_v28 = vadd.f32 %v1046_v1, %v958_v13  ;;  %v6785_v62 = vor.u32 %v7321_v41, %v6784_v52  ;;  %v7312_v0 = vld [vmem:[#allocation9 + $0xd4] sm:$0xf0] }
 0x17d   : > { %1559 = vmatmul.bf16.gmra.mxu1 %v8440_v55 }
 0x17e   : > { %v1830_v6 = vpack.c.bf16 %v1222_v3, %v1044_v2  ;;  %1648 = vmatmul.bf16.gmra.mxu2 %v8438_v54  ;;  %v6745_v2 = vor.u32 %v7312_v0, %v6744_v63  ;;  %v6772_v63 = vld [vmem:[#allocation2 + $0x10] sm:$0xf] }
 0x17f   : > { %1737 = vmatmul.bf16.gmra.mxu3 %v8440_v55  ;;  %v6789_v55 = vor.u32 %v7322_v24, %v6788_v36 }
 0x180   : > { %1862 = vst [vmem:[#allocation2 + $0x88] sm:$0xff] %v1830_v6  ;;  %2422 = vmatpush.bf16.msra.mxu1 %v6745_v2 }
 0x181   : > { %v1135_v19 = vpop.f32.mrf.mxu2  ;;  %v959_v21 = vpop.f32.mrf.mxu0 }
 0x182   : > { %v1136_v20 = vadd.f32 %v1135_v19, %v8534_v12  ;;  %2944 = vmatpush.bf16.xpose.msrb.mxu0 %v6793_v16  ;;  %v1224_v23 = vpop.f32.mrf.mxu3  ;;  %v1048_v27 = vpop.f32.mrf.mxu1  ;;  %v960_v54 = vadd.f32 %v959_v21, %v8529_v11  ;;  %v7320_v16 = vld [vmem:[#allocation2 + $0x34] sm:$0xf0]  ;;  %v6780_v19 = vld [vmem:[#allocation2 + $0x30] sm:$0xf] }
 0x183   : > { %v6781_v21 = vor.u32 %v7320_v16, %v6780_v19  ;;  %v6768_v16 = vld [vmem:[#allocation2] sm:$0xf] }
 0x184   : > { %v1225_v29 = vadd.f32 %v1224_v23, %v1136_v20  ;;  %v1049_v51 = vadd.f32 %v1048_v27, %v960_v54  ;;  %v7319_v54 = vld [vmem:[#allocation2 + $0x24] sm:$0xf0] }
 0x186   : > { %v1831_v34 = vpack.c.bf16 %v1225_v29, %v1047_v28 }
 0x188   : > { %1863 = vst [vmem:[#allocation2 + $0x90] sm:$0xff] %v1831_v34 }
 0x189   : > { %v1137_v37 = vpop.f32.mrf.mxu2  ;;  %v962_v45 = vpop.f32.mrf.mxu0 }
 0x18a   : > { %v1138_v31 = vadd.f32 %v1137_v37, %v8534_v12  ;;  %2945 = vmatpush.bf16.xpose.msrb.mxu0 %v6789_v55  ;;  %v1226_v46 = vpop.f32.mrf.mxu3  ;;  %v1051_v47 = vpop.f32.mrf.mxu1  ;;  %v963_v53 = vadd.f32 %v962_v45, %v8529_v11  ;;  %v6776_v37 = vld [vmem:[#allocation2 + $0x20] sm:$0xf] }
 0x18b   : > { %v6777_v45 = vor.u32 %v7319_v54, %v6776_v37  ;;  %v6698_v37 = vld [vmem:[#allocation9 + $0x78] sm:$0xf0] }
 0x18c   : > { %v1227_v30 = vadd.f32 %v1226_v46, %v1138_v31  ;;  %1475 = vmatmul.bf16.gmra.mxu0 %v8450_v60  ;;  %v1052_v13 = vadd.f32 %v1051_v47, %v963_v53  ;;  %v7318_v53 = vld [vmem:[#allocation2 + $0x14] sm:$0xf0] }
 0x18d   : > { %1564 = vmatmul.bf16.gmra.mxu1 %v8452_v61 }
 0x18e   : > { %v1832_v43 = vpack.c.bf16 %v1227_v30, %v1049_v51  ;;  %1653 = vmatmul.bf16.gmra.mxu2 %v8450_v60 }
 0x18f   : > { %1742 = vmatmul.bf16.gmra.mxu3 %v8452_v61 }
 0x190   : > { %1864 = vst [vmem:[#allocation2 + $0x98] sm:$0xff] %v1832_v43 }
 0x191   : > { %v1140_v1 = vpop.f32.mrf.mxu2  ;;  %v964_v59 = vpop.f32.mrf.mxu0 }
 0x192   : > { %v1141_v3 = vadd.f32 %v1140_v1, %v8534_v12  ;;  %2946 = vmatpush.bf16.xpose.msrb.mxu0 %v6785_v62  ;;  %v1229_v6 = vpop.f32.mrf.mxu3  ;;  %v1053_v10 = vpop.f32.mrf.mxu1  ;;  %v965_v20 = vadd.f32 %v964_v59, %v8529_v11 }
 0x194   : > { %v1230_v60 = vadd.f32 %v1229_v6, %v1141_v3  ;;  %v1054_v34 = vadd.f32 %v1053_v10, %v965_v20  ;;  %v6736_v20 = vld [vmem:[#allocation9 + $0xc0] sm:$0xf] }
 0x196   : > { %v1833_v61 = vpack.c.bf16 %v1230_v60, %v1052_v13  ;;  %v7317_v13 = vld [vmem:[#allocation2 + $0x4] sm:$0xf0] }
 0x197   : > { %v6769_v19 = vor.u32 %v7317_v13, %v6768_v16 }
 0x198   : > { %1865 = vst [vmem:[#allocation2 + $0xa0] sm:$0xff] %v1833_v61 }
 0x199   : > { %v1142_v23 = vpop.f32.mrf.mxu2  ;;  %v967_v28 = vpop.f32.mrf.mxu0 }
 0x19a   : > { %v1143_v27 = vadd.f32 %v1142_v23, %v8534_v12  ;;  %2947 = vmatpush.bf16.xpose.msrb.mxu0 %v6781_v21  ;;  %v1231_v29 = vpop.f32.mrf.mxu3  ;;  %v1056_v24 = vpop.f32.mrf.mxu1  ;;  %v968_v31 = vadd.f32 %v967_v28, %v8529_v11  ;;  %v7310_v21 = vld [vmem:[#allocation9 + $0xc4] sm:$0xf0] }
 0x19c   : > { %v1232_v36 = vadd.f32 %v1231_v29, %v1143_v27  ;;  %1480 = vmatmul.bf16.gmra.mxu0 %v8462_v8  ;;  %v1057_v43 = vadd.f32 %v1056_v24, %v968_v31  ;;  %v6737_v27 = vor.u32 %v7310_v21, %v6736_v20 }
 0x19d   : > { %1569 = vmatmul.bf16.gmra.mxu1 %v8464_v9 }
 0x19e   : > { %v1834_v55 = vpack.c.bf16 %v1232_v36, %v1054_v34  ;;  %1658 = vmatmul.bf16.gmra.mxu2 %v8462_v8  ;;  %2423 = vmatpush.bf16.msra.mxu1 %v6737_v27 }
 0x19f   : > { %1747 = vmatmul.bf16.gmra.mxu3 %v8464_v9  ;;  %v6773_v9 = vor.u32 %v7318_v53, %v6772_v63 }
 0x1a0   : > { %1866 = vst [vmem:[#allocation2 + $0xa8] sm:$0xff] %v1834_v55  ;;  %v7299_v55 = vld [vmem:[#allocation9 + $0x74] sm:$0xf] }
 0x1a1   : > { %v1145_v46 = vpop.f32.mrf.mxu2  ;;  %v969_v51 = vpop.f32.mrf.mxu0 }
 0x1a2   : > { %v1146_v47 = vadd.f32 %v1145_v46, %v8534_v12  ;;  %2948 = vmatpush.bf16.xpose.msrb.mxu0 %v6777_v45  ;;  %v1234_v30 = vpop.f32.mrf.mxu3  ;;  %v1058_v41 = vpop.f32.mrf.mxu1  ;;  %v970_v8 = vadd.f32 %v969_v51, %v8529_v11  ;;  %v6701_v45 = vor.u32 %v7299_v55, %v6698_v37  ;;  %v6712_v37 = vld [vmem:[#allocation9 + $0x90] sm:$0xf] }
 0x1a4   : > { %v1235_v52 = vadd.f32 %v1234_v30, %v1146_v47  ;;  %v1059_v6 = vadd.f32 %v1058_v41, %v970_v8  ;;  %v7315_v30 = vld [vmem:[#allocation9 + $0xf4] sm:$0xf]  ;;  %v6762_v41 = vld [vmem:[#allocation9 + $0xf8] sm:$0xf0]  ;;  %2509 = vmatpush.bf16.msra.mxu2 %v6701_v45 }
 0x1a6   : > { %v1835_v62 = vpack.c.bf16 %v1235_v52, %v1057_v43  ;;  %v6765_v52 = vor.u32 %v7315_v30, %v6762_v41  ;;  %v6704_v30 = vld [vmem:[#allocation9 + $0x80] sm:$0xf] }
 0x1a8   : > { %1867 = vst [vmem:[#allocation2 + $0xb0] sm:$0xff] %v1835_v62  ;;  %2598 = vmatpush.bf16.msra.mxu3 %v6765_v52  ;;  %v7297_v52 = vld [vmem:[#allocation9 + $0x64] sm:$0xf] }
 0x1a9   : > { %v1147_v0 = vpop.f32.mrf.mxu2  ;;  %v972_v2 = vpop.f32.mrf.mxu0 }
 0x1aa   : > { %v1148_v1 = vadd.f32 %v1147_v0, %v8534_v12  ;;  %2949 = vmatpush.bf16.xpose.msrb.mxu0 %v6773_v9  ;;  %v1236_v3 = vpop.f32.mrf.mxu3  ;;  %v1061_v59 = vpop.f32.mrf.mxu1  ;;  %v973_v61 = vadd.f32 %v972_v2, %v8529_v11 }
 0x1ac   : > { %v1237_v10 = vadd.f32 %v1236_v3, %v1148_v1  ;;  %1485 = vmatmul.bf16.gmra.mxu0 %v8474_v14  ;;  %v1062_v36 = vadd.f32 %v1061_v59, %v973_v61  ;;  %v6728_v61 = vld [vmem:[#allocation9 + $0xb0] sm:$0xf] }
 0x1ad   : > { %1574 = vmatmul.bf16.gmra.mxu1 %v8476_v15 }
 0x1ae   : > { %v1836_v60 = vpack.c.bf16 %v1237_v10, %v1059_v6  ;;  %1663 = vmatmul.bf16.gmra.mxu2 %v8474_v14 }
 0x1af   : > { %1752 = vmatmul.bf16.gmra.mxu3 %v8476_v15 }
 0x1b0   : > { %1868 = vst [vmem:[#allocation2 + $0xb8] sm:$0xff] %v1836_v60 }
 0x1b1   : > { %v1150_v23 = vpop.f32.mrf.mxu2  ;;  %v974_v29 = vpop.f32.mrf.mxu0 }
 0x1b2   : > { %v1151_v28 = vadd.f32 %v1150_v23, %v8534_v12  ;;  %2950 = vmatpush.bf16.xpose.msrb.mxu0 %v6769_v19  ;;  %v1239_v24 = vpop.f32.mrf.mxu3  ;;  %v1063_v34 = vpop.f32.mrf.mxu1  ;;  %v975_v15 = vadd.f32 %v974_v29, %v8529_v11  ;;  %v7308_v19 = vld [vmem:[#allocation9 + $0xb4] sm:$0xf0]  ;;  %v6720_v29 = vld [vmem:[#allocation9 + $0xa0] sm:$0xf] }
 0x1b3   : > { %v6729_v21 = vor.u32 %v7308_v19, %v6728_v61 }
 0x1b4   : > { %v1240_v14 = vadd.f32 %v1239_v24, %v1151_v28  ;;  %v1064_v53 = vadd.f32 %v1063_v34, %v975_v15  ;;  %v7306_v24 = vld [vmem:[#allocation9 + $0xa4] sm:$0xf0] }
 0x1b5   : > { %2424 = vmatpush.bf16.msra.mxu1 %v6729_v21  ;;  %v6721_v34 = vor.u32 %v7306_v24, %v6720_v29 }
 0x1b6   : > { %v1837_v54 = vpack.c.bf16 %v1240_v14, %v1062_v36 }
 0x1b8   : > { %1869 = vst [vmem:[#allocation2 + $0xc0] sm:$0xff] %v1837_v54 }
 0x1b9   : > { %v1152_v31 = vpop.f32.mrf.mxu2  ;;  %v977_v47 = vpop.f32.mrf.mxu0  ;;  %2425 = vmatpush.bf16.msra.mxu1 %v6721_v34 }
 0x1ba   : > { %v1153_v46 = vadd.f32 %v1152_v31, %v8534_v12  ;;  %v1241_v51 = vpop.f32.mrf.mxu3  ;;  %v1066_v43 = vpop.f32.mrf.mxu1  ;;  %v978_v8 = vadd.f32 %v977_v47, %v8529_v11  ;;  %v7304_v31 = vld [vmem:[#allocation9 + $0x94] sm:$0xf0] }
 0x1bc   : > { %v1242_v62 = vadd.f32 %v1241_v51, %v1153_v46  ;;  %1490 = vmatmul.bf16.gmra.mxu0 %v8486_v32  ;;  %v1067_v59 = vadd.f32 %v1066_v43, %v978_v8  ;;  %v6713_v46 = vor.u32 %v7304_v31, %v6712_v37 }
 0x1bd   : > { %1579 = vmatmul.bf16.gmra.mxu1 %v8488_v33 }
 0x1be   : > { %v1838_v63 = vpack.c.bf16 %v1242_v62, %v1064_v53  ;;  %1668 = vmatmul.bf16.gmra.mxu2 %v8486_v32  ;;  %2426 = vmatpush.bf16.msra.mxu1 %v6713_v46  ;;  %v6690_v53 = vld [vmem:[#allocation9 + $0x68] sm:$0xf0] }
 0x1bf   : > { %1757 = vmatmul.bf16.gmra.mxu3 %v8488_v33 }
 0x1c0   : > { %1870 = vst [vmem:[#allocation2 + $0xc8] sm:$0xff] %v1838_v63  ;;  %v6693_v63 = vor.u32 %v7297_v52, %v6690_v53 }
 0x1c1   : > { %v1155_v9 = vpop.f32.mrf.mxu2  ;;  %v979_v1 = vpop.f32.mrf.mxu0 }
 0x1c2   : > { %v1156_v0 = vadd.f32 %v1155_v9, %v8534_v12  ;;  %v1244_v2 = vpop.f32.mrf.mxu3  ;;  %v1068_v3 = vpop.f32.mrf.mxu1  ;;  %v980_v13 = vadd.f32 %v979_v1, %v8529_v11  ;;  %v7313_v1 = vld [vmem:[#allocation9 + $0xe4] sm:$0xf]  ;;  %2510 = vmatpush.bf16.msra.mxu2 %v6693_v63 }
 0x1c4   : > { %v1245_v6 = vadd.f32 %v1244_v2, %v1156_v0  ;;  %v1069_v23 = vadd.f32 %v1068_v3, %v980_v13  ;;  %v6754_v2 = vld [vmem:[#allocation9 + $0xe8] sm:$0xf0] }
 0x1c6   : > { %v1839_v10 = vpack.c.bf16 %v1245_v6, %v1067_v59  ;;  %v6757_v59 = vor.u32 %v7313_v1, %v6754_v2 }
 0x1c8   : > { %1871 = vst [vmem:[#allocation2 + $0xd0] sm:$0xff] %v1839_v10  ;;  %2599 = vmatpush.bf16.msra.mxu3 %v6757_v59 }
 0x1c9   : > { %v1157_v60 = vpop.f32.mrf.mxu2  ;;  %v982_v16 = vpop.f32.mrf.mxu0 }
 0x1ca   : > { %v1158_v32 = vadd.f32 %v1157_v60, %v8534_v12  ;;  %v1246_v33 = vpop.f32.mrf.mxu3  ;;  %v1071_v20 = vpop.f32.mrf.mxu1  ;;  %v983_v36 = vadd.f32 %v982_v16, %v8529_v11 }
 0x1cc   : > { %v1247_v27 = vadd.f32 %v1246_v33, %v1158_v32  ;;  %1495 = vmatmul.bf16.gmra.mxu0 %v8498_v38  ;;  %v1072_v47 = vadd.f32 %v1071_v20, %v983_v36 }
 0x1cd   : > { %1584 = vmatmul.bf16.gmra.mxu1 %v8500_v39 }
 0x1ce   : > { %v1840_v28 = vpack.c.bf16 %v1247_v27, %v1069_v23  ;;  %1673 = vmatmul.bf16.gmra.mxu2 %v8498_v38 }
 0x1cf   : > { %1762 = vmatmul.bf16.gmra.mxu3 %v8500_v39  ;;  %v7302_v39 = vld [vmem:[#allocation9 + $0x84] sm:$0xf0] }
 0x1d0   : > { %1872 = vst [vmem:[#allocation2 + $0xd8] sm:$0xff] %v1840_v28  ;;  %v6705_v41 = vor.u32 %v7302_v39, %v6704_v30 }
 0x1d1   : > { %v1160_v14 = vpop.f32.mrf.mxu2  ;;  %v984_v15 = vpop.f32.mrf.mxu0 }
 0x1d2   : > { %v1161_v54 = vadd.f32 %v1160_v14, %v8534_v12  ;;  %v1249_v55 = vpop.f32.mrf.mxu3  ;;  %v1073_v45 = vpop.f32.mrf.mxu1  ;;  %v985_v43 = vadd.f32 %v984_v15, %v8529_v11  ;;  %2427 = vmatpush.bf16.msra.mxu1 %v6705_v41 }
 0x1d4   : > { %v1250_v38 = vadd.f32 %v1249_v55, %v1161_v54  ;;  %v1074_v6 = vadd.f32 %v1073_v45, %v985_v43  ;;  %v7295_v43 = vld [vmem:[#allocation9 + $0x54] sm:$0xf] }
 0x1d6   : > { %v1841_v51 = vpack.c.bf16 %v1250_v38, %v1072_v47 }
 0x1d8   : > { %1873 = vst [vmem:[#allocation2 + $0xe0] sm:$0xff] %v1841_v51 }
 0x1d9   : > { %v1162_v62 = vpop.f32.mrf.mxu2  ;;  %v987_v9 = vpop.f32.mrf.mxu0 }
 0x1da   : > { %v1163_v8 = vadd.f32 %v1162_v62, %v8534_v12  ;;  %v1251_v0 = vpop.f32.mrf.mxu3  ;;  %v1076_v3 = vpop.f32.mrf.mxu1  ;;  %v988_v60 = vadd.f32 %v987_v9, %v8529_v11  ;;  %v7311_v9 = vld [vmem:[#allocation9 + $0xd4] sm:$0xf] }
 0x1dc   : > { %v1252_v10 = vadd.f32 %v1251_v0, %v1163_v8  ;;  %1500 = vmatmul.bf16.gmra.mxu0 %v8510_v56  ;;  %v1077_v20 = vadd.f32 %v1076_v3, %v988_v60  ;;  %v6746_v0 = vld [vmem:[#allocation9 + $0xd8] sm:$0xf0] }
 0x1dd   : > { %1589 = vmatmul.bf16.gmra.mxu1 %v8512_v58  ;;  %v6749_v2 = vor.u32 %v7311_v9, %v6746_v0 }
 0x1de   : > { %v1842_v13 = vpack.c.bf16 %v1252_v10, %v1074_v6  ;;  %1678 = vmatmul.bf16.gmra.mxu2 %v8510_v56  ;;  %v1291_v56 = vld [vmem:[%s10318_s7] sm:$0x3] }
 0x1df   : > { %1767 = vmatmul.bf16.gmra.mxu3 %v8512_v58  ;;  %v8720_v54 = vperm.slane %v1291_v56, 0 }
 0x1e0   : > { %1874 = vst [vmem:[#allocation2 + $0xe8] sm:$0xff] %v1842_v13  ;;  %2600 = vmatpush.bf16.msra.mxu3 %v6749_v2  ;;  %v6824_v13 = vld [vmem:[#allocation2 + $0xe0] sm:$0xf]  ;;  %v6738_v2 = vld [vmem:[#allocation9 + $0xc8] sm:$0xf0] }
 0x1e1   : > { %v1165_v32 = vpop.f32.mrf.mxu2  ;;  %v989_v33 = vpop.f32.mrf.mxu0 }
 0x1e2   : > { %v1166_v16 = vadd.f32 %v1165_v32, %v8534_v12  ;;  %v1254_v61 = vpop.f32.mrf.mxu3  ;;  %v1078_v19 = vpop.f32.mrf.mxu1  ;;  %v990_v27 = vadd.f32 %v989_v33, %v8529_v11  ;;  %v8725_v11 = vperm.slane %v1291_v56, 1  ;;  %v6820_v56 = vld [vmem:[#allocation2 + $0xd0] sm:$0xf] }
 0x1e4   : > { %v1255_v21 = vadd.f32 %v1254_v61, %v1166_v16  ;;  %v1079_v36 = vadd.f32 %v1078_v19, %v990_v27  ;;  %v7330_v27 = vld [vmem:[#allocation2 + $0xd4] sm:$0xf0] }
 0x1e6   : > { %v1843_v23 = vpack.c.bf16 %v1255_v21, %v1077_v20 }
 0x1e7   : > { %v7331_v6 = vld [vmem:[#allocation2 + $0xe4] sm:$0xf0] }
 0x1e8   : > { %1875 = vst [vmem:[#allocation2 + $0xf0] sm:$0xff] %v1843_v23  ;;  %v6825_v32 = vor.u32 %v7331_v6, %v6824_v13  ;;  %v7327_v13 = vld [vmem:[#allocation2 + $0xa4] sm:$0xf0] }
 0x1e9   : > { %v1167_v28 = vpop.f32.mrf.mxu2  ;;  %v1466_v24 = vpop.f32.mrf.mxu0 }
 0x1ea   : > { %v1168_v58 = vadd.f32 %v1167_v28, %v8534_v12  ;;  %v1256_v29 = vpop.f32.mrf.mxu3  ;;  %v1555_v34 = vpop.f32.mrf.mxu1  ;;  %v1467_v12 = vadd.f32 %v1466_v24, %v8720_v54 }
 0x1ec   : > { %v1257_v14 = vadd.f32 %v1256_v29, %v1168_v58  ;;  %1505 = vmatmul.bf16.gmra.mxu0 %v8525_v5  ;;  %v1556_v47 = vadd.f32 %v1555_v34, %v1467_v12  ;;  %v7329_v12 = vld [vmem:[#allocation2 + $0xc4] sm:$0xf0] }
 0x1ed   : > { %1594 = vmatmul.bf16.gmra.mxu1 %v8527_v7 }
 0x1ee   : > { %v1844_v15 = vpack.c.bf16 %v1257_v14, %v1079_v36  ;;  %1683 = vmatmul.bf16.gmra.mxu2 %v8525_v5 }
 0x1ef   : > { %1772 = vmatmul.bf16.gmra.mxu3 %v8527_v7  ;;  %v6828_v30 = vld [vmem:[#allocation2 + $0xf0] sm:$0xf]  ;;  %v6682_v7 = vld [vmem:[#allocation9 + $0x58] sm:$0xf0] }
 0x1f0   : > { %1876 = vst [vmem:[#allocation2 + $0xf8] sm:$0xff] %v1844_v15  ;;  %v6685_v53 = vor.u32 %v7295_v43, %v6682_v7  ;;  %v6812_v7 = vld [vmem:[#allocation2 + $0xb0] sm:$0xf] }
 0x1f1   : > { %v1644_v55 = vpop.f32.mrf.mxu2  ;;  %v1468_v31 = vpop.f32.mrf.mxu0 }
 0x1f2   : > { %v1645_v37 = vadd.f32 %v1644_v55, %v8725_v11  ;;  %v1733_v45 = vpop.f32.mrf.mxu3  ;;  %v1557_v46 = vpop.f32.mrf.mxu1  ;;  %v1469_v5 = vadd.f32 %v1468_v31, %v8720_v54  ;;  %2511 = vmatpush.bf16.msra.mxu2 %v6685_v53  ;;  %v6674_v53 = vld [vmem:[#allocation9 + $0x48] sm:$0xf0] }
 0x1f4   : > { %v1734_v38 = vadd.f32 %v1733_v45, %v1645_v37  ;;  %v1558_v3 = vadd.f32 %v1557_v46, %v1469_v5  ;;  %v6816_v37 = vld [vmem:[#allocation2 + $0xc0] sm:$0xf] }
 0x1f5   : > { %v6817_v45 = vor.u32 %v7329_v12, %v6816_v37  ;;  %v7325_v12 = vld [vmem:[#allocation2 + $0x84] sm:$0xf0]  ;;  %v6800_v37 = vld [vmem:[#allocation2 + $0x80] sm:$0xf] }
 0x1f6   : > { %v1877_v51 = vpack.c.bf16 %v1734_v38, %v1556_v47 }
 0x1f7   : > { %v7332_v39 = vld [vmem:[#allocation2 + $0xf4] sm:$0xf0] }
 0x1f8   : > { %1909 = vst [vmem:[#allocation3] sm:$0xff] %v1877_v51  ;;  %v6829_v41 = vor.u32 %v7332_v39, %v6828_v30 }
 0x1f9   : > { %v1646_v52 = vpop.f32.mrf.mxu2  ;;  %v1471_v63 = vpop.f32.mrf.mxu0 }
 0x1fa   : > { %v1647_v62 = vadd.f32 %v1646_v52, %v8725_v11  ;;  %3032 = vmatpush.bf16.xpose.msrb.mxu1 %v6829_v41  ;;  %v1735_v8 = vpop.f32.mrf.mxu3  ;;  %v1560_v1 = vpop.f32.mrf.mxu1  ;;  %v1472_v60 = vadd.f32 %v1471_v63, %v8720_v54  ;;  %v7328_v41 = vld [vmem:[#allocation2 + $0xb4] sm:$0xf0]  ;;  %v7293_v52 = vld [vmem:[#allocation9 + $0x44] sm:$0xf] }
 0x1fb   : > { %v6677_v63 = vor.u32 %v7293_v52, %v6674_v53 }
 0x1fc   : > { %v1736_v59 = vadd.f32 %v1735_v8, %v1647_v62  ;;  %1510 = vmatmul.bf16.gmra.mxu0 %v8544_v44  ;;  %v1561_v21 = vadd.f32 %v1560_v1, %v1472_v60  ;;  %v7309_v1 = vld [vmem:[#allocation9 + $0xc4] sm:$0xf] }
 0x1fd   : > { %1599 = vmatmul.bf16.gmra.mxu1 %v8547_v49  ;;  %2512 = vmatpush.bf16.msra.mxu2 %v6677_v63  ;;  %v6730_v63 = vld [vmem:[#allocation9 + $0xb8] sm:$0xf0] }
 0x1fe   : > { %v1878_v10 = vpack.c.bf16 %v1736_v59, %v1558_v3  ;;  %1688 = vmatmul.bf16.gmra.mxu2 %v8544_v44  ;;  %v6741_v59 = vor.u32 %v7309_v1, %v6738_v2 }
 0x1ff   : > { %1777 = vmatmul.bf16.gmra.mxu3 %v8547_v49  ;;  %v6821_v49 = vor.u32 %v7330_v27, %v6820_v56  ;;  %v7326_v56 = vld [vmem:[#allocation2 + $0x94] sm:$0xf0] }
 0x200   : > { %1910 = vst [vmem:[#allocation3 + $0x8] sm:$0xff] %v1878_v10  ;;  %2601 = vmatpush.bf16.msra.mxu3 %v6741_v59  ;;  %v7289_v59 = vld [vmem:[#allocation9 + $0x24] sm:$0xf] }
 0x201   : > { %v1649_v16 = vpop.f32.mrf.mxu2  ;;  %v1473_v61 = vpop.f32.mrf.mxu0 }
 0x202   : > { %v1650_v33 = vadd.f32 %v1649_v16, %v8725_v11  ;;  %3033 = vmatpush.bf16.xpose.msrb.mxu1 %v6825_v32  ;;  %v1738_v19 = vpop.f32.mrf.mxu3  ;;  %v1562_v20 = vpop.f32.mrf.mxu1  ;;  %v1474_v44 = vadd.f32 %v1473_v61, %v8720_v54  ;;  %v6808_v32 = vld [vmem:[#allocation2 + $0xa0] sm:$0xf] }
 0x204   : > { %v1739_v23 = vadd.f32 %v1738_v19, %v1650_v33  ;;  %v1563_v14 = vadd.f32 %v1562_v20, %v1474_v44  ;;  %v6809_v33 = vor.u32 %v7327_v13, %v6808_v32 }
 0x206   : > { %v1879_v28 = vpack.c.bf16 %v1739_v23, %v1561_v21 }
 0x208   : > { %1911 = vst [vmem:[#allocation3 + $0x10] sm:$0xff] %v1879_v28 }
 0x209   : > { %v1651_v58 = vpop.f32.mrf.mxu2  ;;  %v1476_v24 = vpop.f32.mrf.mxu0 }
 0x20a   : > { %v1652_v29 = vadd.f32 %v1651_v58, %v8725_v11  ;;  %3034 = vmatpush.bf16.xpose.msrb.mxu1 %v6821_v49  ;;  %v1740_v34 = vpop.f32.mrf.mxu3  ;;  %v1565_v36 = vpop.f32.mrf.mxu1  ;;  %v1477_v31 = vadd.f32 %v1476_v24, %v8720_v54  ;;  %v6804_v49 = vld [vmem:[#allocation2 + $0x90] sm:$0xf] }
 0x20c   : > { %v1741_v15 = vadd.f32 %v1740_v34, %v1652_v29  ;;  %1515 = vmatmul.bf16.gmra.mxu0 %v8560_v22  ;;  %v1566_v39 = vadd.f32 %v1565_v36, %v1477_v31 }
 0x20d   : > { %1604 = vmatmul.bf16.gmra.mxu1 %v8563_v26 }
 0x20e   : > { %v1880_v55 = vpack.c.bf16 %v1741_v15, %v1563_v14  ;;  %1693 = vmatmul.bf16.gmra.mxu2 %v8560_v22 }
 0x20f   : > { %1782 = vmatmul.bf16.gmra.mxu3 %v8563_v26  ;;  %v6813_v26 = vor.u32 %v7328_v41, %v6812_v7 }
 0x210   : > { %1912 = vst [vmem:[#allocation3 + $0x18] sm:$0xff] %v1880_v55 }
 0x211   : > { %v1654_v46 = vpop.f32.mrf.mxu2  ;;  %v1478_v38 = vpop.f32.mrf.mxu0 }
 0x212   : > { %v1655_v47 = vadd.f32 %v1654_v46, %v8725_v11  ;;  %3035 = vmatpush.bf16.xpose.msrb.mxu1 %v6817_v45  ;;  %v1743_v51 = vpop.f32.mrf.mxu3  ;;  %v1567_v30 = vpop.f32.mrf.mxu1  ;;  %v1479_v22 = vadd.f32 %v1478_v38, %v8720_v54  ;;  %v6801_v45 = vor.u32 %v7325_v12, %v6800_v37  ;;  %v6706_v12 = vld [vmem:[#allocation9 + $0x88] sm:$0xf0] }
 0x214   : > { %v1744_v5 = vadd.f32 %v1743_v51, %v1655_v47  ;;  %v1568_v6 = vadd.f32 %v1567_v30, %v1479_v22 }
 0x216   : > { %v1881_v43 = vpack.c.bf16 %v1744_v5, %v1566_v39 }
 0x218   : > { %1913 = vst [vmem:[#allocation3 + $0x20] sm:$0xff] %v1881_v43 }
 0x219   : > { %v1656_v62 = vpop.f32.mrf.mxu2  ;;  %v1481_v9 = vpop.f32.mrf.mxu0 }
 0x21a   : > { %v1657_v8 = vadd.f32 %v1656_v62, %v8725_v11  ;;  %3036 = vmatpush.bf16.xpose.msrb.mxu1 %v6813_v26  ;;  %v1745_v0 = vpop.f32.mrf.mxu3  ;;  %v1570_v3 = vpop.f32.mrf.mxu1  ;;  %v1482_v16 = vadd.f32 %v1481_v9, %v8720_v54  ;;  %v7307_v62 = vld [vmem:[#allocation9 + $0xb4] sm:$0xf] }
 0x21b   : > { %v6733_v9 = vor.u32 %v7307_v62, %v6730_v63 }
 0x21c   : > { %v1746_v10 = vadd.f32 %v1745_v0, %v1657_v8  ;;  %1520 = vmatmul.bf16.gmra.mxu0 %v8576_v4  ;;  %v1571_v27 = vadd.f32 %v1570_v3, %v1482_v16 }
 0x21d   : > { %1609 = vmatmul.bf16.gmra.mxu1 %v8579_v17  ;;  %2602 = vmatpush.bf16.msra.mxu3 %v6733_v9 }
 0x21e   : > { %v1882_v60 = vpack.c.bf16 %v1746_v10, %v1568_v6  ;;  %1698 = vmatmul.bf16.gmra.mxu2 %v8576_v4  ;;  %v6658_v6 = vld [vmem:[#allocation9 + $0x28] sm:$0xf0] }
 0x21f   : > { %1787 = vmatmul.bf16.gmra.mxu3 %v8579_v17  ;;  %v6805_v17 = vor.u32 %v7326_v56, %v6804_v49  ;;  %v6661_v13 = vor.u32 %v7289_v59, %v6658_v6  ;;  %v7303_v56 = vld [vmem:[#allocation9 + $0x94] sm:$0xf] }
 0x220   : > { %1914 = vst [vmem:[#allocation3 + $0x28] sm:$0xff] %v1882_v60 }
 0x221   : > { %v1659_v61 = vpop.f32.mrf.mxu2  ;;  %v1483_v20 = vpop.f32.mrf.mxu0 }
 0x222   : > { %v1660_v19 = vadd.f32 %v1659_v61, %v8725_v11  ;;  %3037 = vmatpush.bf16.xpose.msrb.mxu1 %v6809_v33  ;;  %v1748_v21 = vpop.f32.mrf.mxu3  ;;  %v1572_v23 = vpop.f32.mrf.mxu1  ;;  %v1484_v4 = vadd.f32 %v1483_v20, %v8720_v54  ;;  %v7305_v33 = vld [vmem:[#allocation9 + $0xa4] sm:$0xf]  ;;  %v6722_v61 = vld [vmem:[#allocation9 + $0xa8] sm:$0xf0] }
 0x223   : > { %v6725_v20 = vor.u32 %v7305_v33, %v6722_v61 }
 0x224   : > { %v1749_v28 = vadd.f32 %v1748_v21, %v1660_v19  ;;  %v1573_v14 = vadd.f32 %v1572_v23, %v1484_v4  ;;  %v7287_v23 = vld [vmem:[#allocation9 + $0x14] sm:$0xf] }
 0x225   : > { %2603 = vmatpush.bf16.msra.mxu3 %v6725_v20 }
 0x226   : > { %v1883_v44 = vpack.c.bf16 %v1749_v28, %v1571_v27 }
 0x228   : > { %1915 = vst [vmem:[#allocation3 + $0x30] sm:$0xff] %v1883_v44  ;;  %v6714_v44 = vld [vmem:[#allocation9 + $0x98] sm:$0xf0] }
 0x229   : > { %v1661_v58 = vpop.f32.mrf.mxu2  ;;  %v1486_v24 = vpop.f32.mrf.mxu0  ;;  %v6717_v49 = vor.u32 %v7303_v56, %v6714_v44  ;;  %v6956_v56 = vld [vmem:[#allocation2 + $0xf4] sm:$0xf] }
 0x22a   : > { %v1662_v29 = vadd.f32 %v1661_v58, %v8725_v11  ;;  %3038 = vmatpush.bf16.xpose.msrb.mxu1 %v6805_v17  ;;  %v1750_v34 = vpop.f32.mrf.mxu3  ;;  %v1575_v36 = vpop.f32.mrf.mxu1  ;;  %v1487_v31 = vadd.f32 %v1486_v24, %v8720_v54  ;;  %v7285_v17 = vld [vmem:[#allocation9 + $0x4] sm:$0xf]  ;;  %v6642_v58 = vld [vmem:[#allocation9 + $0x8] sm:$0xf0] }
 0x22b   : > { %2604 = vmatpush.bf16.msra.mxu3 %v6717_v49  ;;  %v6645_v24 = vor.u32 %v7285_v17, %v6642_v58 }
 0x22c   : > { %v1751_v15 = vadd.f32 %v1750_v34, %v1662_v29  ;;  %1525 = vmatmul.bf16.gmra.mxu0 %v8592_v50  ;;  %v1576_v39 = vadd.f32 %v1575_v36, %v1487_v31 }
 0x22d   : > { %1614 = vmatmul.bf16.gmra.mxu1 %v8595_v57 }
 0x22e   : > { %v1884_v55 = vpack.c.bf16 %v1751_v15, %v1573_v14  ;;  %1703 = vmatmul.bf16.gmra.mxu2 %v8592_v50  ;;  %v7291_v50 = vld [vmem:[#allocation9 + $0x34] sm:$0xf]  ;;  %v7301_v15 = vld [vmem:[#allocation9 + $0x84] sm:$0xf] }
 0x22f   : > { %1792 = vmatmul.bf16.gmra.mxu3 %v8595_v57  ;;  %v6666_v57 = vld [vmem:[#allocation9 + $0x38] sm:$0xf0]  ;;  %v6709_v37 = vor.u32 %v7301_v15, %v6706_v12 }
 0x230   : > { %1916 = vst [vmem:[#allocation3 + $0x38] sm:$0xff] %v1884_v55  ;;  %v6669_v22 = vor.u32 %v7291_v50, %v6666_v57 }
 0x231   : > { %v1664_v46 = vpop.f32.mrf.mxu2  ;;  %v1488_v38 = vpop.f32.mrf.mxu0  ;;  %2605 = vmatpush.bf16.msra.mxu3 %v6709_v37  ;;  %v6920_v37 = vld [vmem:[#allocation2 + $0x64] sm:$0xf] }
 0x232   : > { %v1665_v47 = vadd.f32 %v1664_v46, %v8725_v11  ;;  %3039 = vmatpush.bf16.xpose.msrb.mxu1 %v6801_v45  ;;  %v1753_v51 = vpop.f32.mrf.mxu3  ;;  %v1577_v30 = vpop.f32.mrf.mxu1  ;;  %v1489_v43 = vadd.f32 %v1488_v38, %v8720_v54  ;;  %2513 = vmatpush.bf16.msra.mxu2 %v6669_v22 }
 0x234   : > { %v1754_v5 = vadd.f32 %v1753_v51, %v1665_v47  ;;  %v1578_v0 = vadd.f32 %v1577_v30, %v1489_v43 }
 0x236   : > { %v1885_v41 = vpack.c.bf16 %v1754_v5, %v1576_v39  ;;  %2514 = vmatpush.bf16.msra.mxu2 %v6661_v13  ;;  %v7254_v13 = vld [vmem:[%s8397_s6 + $0x4] sm:$0xf0] }
 0x238   : > { %1917 = vst [vmem:[#allocation3 + $0x40] sm:$0xff] %v1885_v41 }
 0x239   : > { %v1666_v7 = vpop.f32.mrf.mxu2  ;;  %v1491_v52 = vpop.f32.mrf.mxu0 }
 0x23a   : > { %v1667_v26 = vadd.f32 %v1666_v7, %v8725_v11  ;;  %v1755_v53 = vpop.f32.mrf.mxu3  ;;  %v1580_v8 = vpop.f32.mrf.mxu1  ;;  %v1492_v3 = vadd.f32 %v1491_v52, %v8720_v54 }
 0x23c   : > { %v1756_v1 = vadd.f32 %v1755_v53, %v1667_v26  ;;  %1530 = vmatmul.bf16.gmra.mxu0 %v8608_v40  ;;  %v1581_v21 = vadd.f32 %v1580_v8, %v1492_v3 }
 0x23d   : > { %1619 = vmatmul.bf16.gmra.mxu1 %v8611_v48 }
 0x23e   : > { %v1886_v2 = vpack.c.bf16 %v1756_v1, %v1578_v0  ;;  %1708 = vmatmul.bf16.gmra.mxu2 %v8608_v40 }
 0x23f   : > { %1797 = vmatmul.bf16.gmra.mxu3 %v8611_v48  ;;  %v6650_v48 = vld [vmem:[#allocation9 + $0x18] sm:$0xf0] }
 0x240   : > { %1918 = vst [vmem:[#allocation3 + $0x48] sm:$0xff] %v1886_v2  ;;  %v6653_v27 = vor.u32 %v7287_v23, %v6650_v48 }
 0x241   : > { %v1669_v10 = vpop.f32.mrf.mxu2  ;;  %v1493_v32 = vpop.f32.mrf.mxu0 }
 0x242   : > { %v1670_v60 = vadd.f32 %v1669_v10, %v8725_v11  ;;  %v1758_v16 = vpop.f32.mrf.mxu3  ;;  %v1582_v19 = vpop.f32.mrf.mxu1  ;;  %2515 = vmatpush.bf16.msra.mxu2 %v6653_v27  ;;  %v1494_v4 = vadd.f32 %v1493_v32, %v8720_v54  ;;  %v6512_v10 = vld [vmem:[%s8397_s6] sm:$0xf]  ;;  %v6514_v32 = vld [vmem:[%s8397_s6 + $0x8] sm:$0xf0] }
 0x244   : > { %v1759_v40 = vadd.f32 %v1758_v16, %v1670_v60  ;;  %v1583_v31 = vadd.f32 %v1582_v19, %v1494_v4  ;;  %v7253_v60 = vld [vmem:[%s8397_s6 + $0x4] sm:$0xf]  ;;  %v6513_v16 = vor.u32 %v7254_v13, %v6512_v10 }
 0x245   : > { %v6517_v20 = vor.u32 %v7253_v60, %v6514_v32 }
 0x246   : > { %v1887_v28 = vpack.c.bf16 %v1759_v40, %v1581_v21  ;;  %2516 = vmatpush.bf16.msra.mxu2 %v6645_v24  ;;  %v7356_v21 = vld [vmem:[#allocation2 + $0x78] sm:$0xf0] }
 0x247   : > { %v7364_v40 = vld [vmem:[#allocation2 + $0xf8] sm:$0xf0] }
 0x248   : > { %1919 = vst [vmem:[#allocation3 + $0x50] sm:$0xff] %v1887_v28  ;;  %v6924_v28 = vld [vmem:[#allocation2 + $0x74] sm:$0xf]  ;;  %v6957_v49 = vor.u32 %v7364_v40, %v6956_v56  ;;  %v7361_v40 = vld [vmem:[#allocation2 + $0xc8] sm:$0xf0] }
 0x249   : > { %v1671_v29 = vpop.f32.mrf.mxu2  ;;  %v1496_v36 = vpop.f32.mrf.mxu0  ;;  %v6925_v44 = vor.u32 %v7356_v21, %v6924_v28  ;;  %v6912_v28 = vld [vmem:[#allocation2 + $0x44] sm:$0xf] }
 0x24a   : > { %v1672_v34 = vadd.f32 %v1671_v29, %v8725_v11  ;;  %v1760_v14 = vpop.f32.mrf.mxu3  ;;  %v1585_v55 = vpop.f32.mrf.mxu1  ;;  %v1497_v47 = vadd.f32 %v1496_v36, %v8720_v54  ;;  %v7355_v36 = vld [vmem:[#allocation2 + $0x68] sm:$0xf0] }
 0x24c   : > { %v1761_v45 = vadd.f32 %v1760_v14, %v1672_v34  ;;  %1535 = vmatmul.bf16.gmra.mxu0 %v8624_v18  ;;  %v1586_v41 = vadd.f32 %v1585_v55, %v1497_v47  ;;  %v7363_v14 = vld [vmem:[#allocation2 + $0xe8] sm:$0xf0] }
 0x24d   : > { %1624 = vmatmul.bf16.gmra.mxu1 %v8627_v25 }
 0x24e   : > { %v1888_v46 = vpack.c.bf16 %v1761_v45, %v1583_v31  ;;  %1713 = vmatmul.bf16.gmra.mxu2 %v8624_v18  ;;  %v6952_v31 = vld [vmem:[#allocation2 + $0xe4] sm:$0xf]  ;;  %v6921_v45 = vor.u32 %v7355_v36, %v6920_v37  ;;  %v6530_v36 = vld [vmem:[%s8397_s6 + $0x28] sm:$0xf0] }
 0x24f   : > { %1802 = vmatmul.bf16.gmra.mxu3 %v8627_v25  ;;  %v6852_v32 = vld [vmem:[#allocation3 + $0x50] sm:$0xf] }
 0x250   : > { %1920 = vst [vmem:[#allocation3 + $0x58] sm:$0xff] %v1888_v46  ;;  %v6953_v46 = vor.u32 %v7363_v14, %v6952_v31 }
 0x251   : > { %v1674_v38 = vpop.f32.mrf.mxu2  ;;  %v1498_v30 = vpop.f32.mrf.mxu0 }
 0x252   : > { %v1675_v51 = vadd.f32 %v1674_v38, %v8725_v11  ;;  %v1763_v39 = vpop.f32.mrf.mxu3  ;;  %v1587_v5 = vpop.f32.mrf.mxu1  ;;  %v1499_v57 = vadd.f32 %v1498_v30, %v8720_v54  ;;  %v6520_v38 = vld [vmem:[%s8397_s6 + $0x10] sm:$0xf]  ;;  %v7255_v30 = vld [vmem:[%s8397_s6 + $0x14] sm:$0xf] }
 0x254   : > { %v1764_v43 = vadd.f32 %v1763_v39, %v1675_v51  ;;  %v1588_v52 = vadd.f32 %v1587_v5, %v1499_v57  ;;  %v7256_v51 = vld [vmem:[%s8397_s6 + $0x14] sm:$0xf0] }
 0x256   : > { %v1889_v50 = vpack.c.bf16 %v1764_v43, %v1586_v41  ;;  %v6522_v41 = vld [vmem:[%s8397_s6 + $0x18] sm:$0xf0] }
 0x257   : > { %v7338_v13 = vld [vmem:[#allocation3 + $0x54] sm:$0xf0] }
 0x258   : > { %1921 = vst [vmem:[#allocation3 + $0x60] sm:$0xff] %v1889_v50 }
 0x259   : > { %v1676_v7 = vpop.f32.mrf.mxu2  ;;  %v1501_v22 = vpop.f32.mrf.mxu0 }
 0x25a   : > { %v1677_v18 = vadd.f32 %v1676_v7, %v8725_v11  ;;  %v1765_v25 = vpop.f32.mrf.mxu3  ;;  %v1590_v26 = vpop.f32.mrf.mxu1  ;;  %v1502_v63 = vadd.f32 %v1501_v22, %v8720_v54  ;;  %v6521_v7 = vor.u32 %v7256_v51, %v6520_v38  ;;  %v7335_v38 = vld [vmem:[#allocation3 + $0x24] sm:$0xf0]  ;;  %v7352_v51 = vld [vmem:[#allocation2 + $0x38] sm:$0xf0] }
 0x25c   : > { %v1766_v53 = vadd.f32 %v1765_v25, %v1677_v18  ;;  %1540 = vmatmul.bf16.gmra.mxu0 %v8640_v35  ;;  %v1591_v3 = vadd.f32 %v1590_v26, %v1502_v63  ;;  %v6525_v26 = vor.u32 %v7255_v30, %v6522_v41  ;;  %v7362_v63 = vld [vmem:[#allocation2 + $0xd8] sm:$0xf0] }
 0x25d   : > { %1629 = vmatmul.bf16.gmra.mxu1 %v8643_v42 }
 0x25e   : > { %v1890_v62 = vpack.c.bf16 %v1766_v53, %v1588_v52  ;;  %1718 = vmatmul.bf16.gmra.mxu2 %v8640_v35  ;;  %v7354_v53 = vld [vmem:[#allocation2 + $0x58] sm:$0xf0] }
 0x25f   : > { %1807 = vmatmul.bf16.gmra.mxu3 %v8643_v42 }
 0x260   : > { %1922 = vst [vmem:[#allocation3 + $0x68] sm:$0xff] %v1890_v62 }
 0x261   : > { %v1679_v8 = vpop.f32.mrf.mxu2  ;;  %v1503_v0 = vpop.f32.mrf.mxu0 }
 0x262   : > { %v1680_v9 = vadd.f32 %v1679_v8, %v8725_v11  ;;  %v1768_v1 = vpop.f32.mrf.mxu3  ;;  %v1592_v2 = vpop.f32.mrf.mxu1  ;;  %v1504_v35 = vadd.f32 %v1503_v0, %v8720_v54  ;;  %v6856_v0 = vld [vmem:[#allocation3 + $0x60] sm:$0xf] }
 0x264   : > { %v1769_v59 = vadd.f32 %v1768_v1, %v1680_v9  ;;  %v1593_v48 = vadd.f32 %v1592_v2, %v1504_v35  ;;  %v6916_v1 = vld [vmem:[#allocation2 + $0x54] sm:$0xf] }
 0x266   : > { %v1891_v6 = vpack.c.bf16 %v1769_v59, %v1591_v3  ;;  %v6917_v3 = vor.u32 %v7354_v53, %v6916_v1  ;;  %v6948_v59 = vld [vmem:[#allocation2 + $0xd4] sm:$0xf]  ;;  %v6836_v53 = vld [vmem:[#allocation3 + $0x10] sm:$0xf]  ;;  %v7333_v1 = vld [vmem:[#allocation3 + $0x4] sm:$0xf0] }
 0x267   : > { %v7339_v52 = vld [vmem:[#allocation3 + $0x64] sm:$0xf0]  ;;  %v6949_v10 = vor.u32 %v7362_v63, %v6948_v59  ;;  %v7359_v59 = vld [vmem:[#allocation2 + $0xa8] sm:$0xf0] }
 0x268   : > { %1923 = vst [vmem:[#allocation3 + $0x70] sm:$0xff] %v1891_v6  ;;  %v6857_v2 = vor.u32 %v7339_v52, %v6856_v0 }
 0x269   : > { %v1681_v42 = vpop.f32.mrf.mxu2  ;;  %v1506_v61 = vpop.f32.mrf.mxu0 }
 0x26a   : > { %v1682_v33 = vadd.f32 %v1681_v42, %v8725_v11  ;;  %v1770_v19 = vpop.f32.mrf.mxu3  ;;  %v1595_v23 = vpop.f32.mrf.mxu1  ;;  %v1507_v17 = vadd.f32 %v1506_v61, %v8720_v54  ;;  %v6853_v42 = vor.u32 %v7338_v13, %v6852_v32  ;;  %v6904_v32 = vld [vmem:[#allocation2 + $0x24] sm:$0xf] }
 0x26c   : > { %v1771_v27 = vadd.f32 %v1770_v19, %v1682_v33  ;;  %2339 = vmatmul.bf16.vlgmr.msra.gmra.mxu0 %v6513_v16  ;;  %v1596_v12 = vadd.f32 %v1595_v23, %v1507_v17  ;;  %v7337_v19 = vld [vmem:[#allocation3 + $0x44] sm:$0xf0] }
 0x26d   : > { %2428 = vmatmul.bf16.vlgmr.msra.gmra.mxu1 %v6517_v20  ;;  %4131 = vmatpush.bf16.xpose.msra.mxu0 %v6925_v44 }
 0x26e   : > { %v1892_v4 = vpack.c.bf16 %v1771_v27, %v1593_v48  ;;  %2517 = vmatmul.bf16.vlgmr.msra.gmra.mxu2 %v6513_v16  ;;  %4220 = vmatpush.bf16.xpose.msra.mxu1 %v6957_v49  ;;  %v6848_v27 = vld [vmem:[#allocation3 + $0x40] sm:$0xf]  ;;  %v6944_v49 = vld [vmem:[#allocation2 + $0xc4] sm:$0xf] }
 0x26f   : > { %2606 = vmatmul.bf16.vlgmr.msra.gmra.mxu3 %v6517_v20  ;;  %v6860_v39 = vld [vmem:[#allocation3 + $0x70] sm:$0xf]  ;;  %v7353_v20 = vld [vmem:[#allocation2 + $0x48] sm:$0xf0]  ;;  %v6849_v56 = vor.u32 %v7337_v19, %v6848_v27  ;;  %v6945_v17 = vor.u32 %v7361_v40, %v6944_v49  ;;  %v7260_v40 = vld [vmem:[%s8397_s6 + $0x34] sm:$0xf0] }
 0x270   : > { %1924 = vst [vmem:[#allocation3 + $0x78] sm:$0xff] %v1892_v4  ;;  %v6913_v44 = vor.u32 %v7353_v20, %v6912_v28  ;;  %v6538_v27 = vld [vmem:[%s8397_s6 + $0x38] sm:$0xf0] }
 0x271   : > { %v1684_v58 = vpop.f32.mrf.mxu2  ;;  %v1508_v24 = vpop.f32.mrf.mxu0 }
 0x272   : > { %v1685_v29 = vadd.f32 %v1684_v58, %v8725_v11  ;;  %v1773_v34 = vpop.f32.mrf.mxu3  ;;  %v1597_v15 = vpop.f32.mrf.mxu1  ;;  %v1509_v43 = vadd.f32 %v1508_v24, %v8720_v54  ;;  %v7336_v58 = vld [vmem:[#allocation3 + $0x34] sm:$0xf0]  ;;  %v7258_v24 = vld [vmem:[%s8397_s6 + $0x24] sm:$0xf0] }
 0x274   : > { %v1774_v55 = vadd.f32 %v1773_v34, %v1685_v29  ;;  %v1598_v8 = vadd.f32 %v1597_v15, %v1509_v43  ;;  %v6528_v29 = vld [vmem:[%s8397_s6 + $0x20] sm:$0xf]  ;;  %v7257_v34 = vld [vmem:[%s8397_s6 + $0x24] sm:$0xf]  ;;  %v6844_v15 = vld [vmem:[#allocation3 + $0x30] sm:$0xf] }
 0x275   : > { %4132 = vmatpush.bf16.xpose.msra.mxu0 %v6921_v45  ;;  %v6529_v37 = vor.u32 %v7258_v24, %v6528_v29  ;;  %v6840_v43 = vld [vmem:[#allocation3 + $0x20] sm:$0xf] }
 0x276   : > { %v1893_v47 = vpack.c.bf16 %v1774_v55, %v1596_v12  ;;  %4221 = vmatpush.bf16.xpose.msra.mxu1 %v6953_v46  ;;  %v6845_v55 = vor.u32 %v7336_v58, %v6844_v15  ;;  %v7370_v15 = vld [vmem:[#allocation3 + $0x58] sm:$0xf0] }
 0x277   : > { %v7340_v5 = vld [vmem:[#allocation3 + $0x74] sm:$0xf0] }
 0x278   : > { %1925 = vst [vmem:[#allocation3 + $0x80] sm:$0xff] %v1893_v47  ;;  %v6861_v50 = vor.u32 %v7340_v5, %v6860_v39  ;;  %v6533_v47 = vor.u32 %v7257_v34, %v6530_v36  ;;  %v7360_v39 = vld [vmem:[#allocation2 + $0xb8] sm:$0xf0] }
 0x279   : > { %v1686_v57 = vpop.f32.mrf.mxu2  ;;  %v1511_v22 = vpop.f32.mrf.mxu0  ;;  %v7350_v34 = vld [vmem:[#allocation2 + $0x18] sm:$0xf0] }
 0x27a   : > { %v1687_v18 = vadd.f32 %v1686_v57, %v8725_v11  ;;  %3665 = vmatpush.bf16.msrb.mxu2 %v6861_v50  ;;  %v1775_v25 = vpop.f32.mrf.mxu3  ;;  %v1600_v62 = vpop.f32.mrf.mxu1  ;;  %v1512_v60 = vadd.f32 %v1511_v22, %v8720_v54  ;;  %v6908_v50 = vld [vmem:[#allocation2 + $0x34] sm:$0xf]  ;;  %v6841_v57 = vor.u32 %v7335_v38, %v6840_v43 }
 0x27c   : > { %v1776_v9 = vadd.f32 %v1775_v25, %v1687_v18  ;;  %2344 = vmatmul.bf16.gmra.mxu0 %v6521_v7  ;;  %v1601_v23 = vadd.f32 %v1600_v62, %v1512_v60  ;;  %v6940_v18 = vld [vmem:[#allocation2 + $0xb4] sm:$0xf]  ;;  %v6832_v60 = vld [vmem:[#allocation3] sm:$0xf] }
 0x27d   : > { %2433 = vmatmul.bf16.gmra.mxu1 %v6525_v26  ;;  %4133 = vmatpush.bf16.xpose.msra.mxu0 %v6917_v3  ;;  %v6941_v25 = vor.u32 %v7360_v39, %v6940_v18  ;;  %v7349_v18 = vld [vmem:[#allocation2 + $0x8] sm:$0xf0] }
 0x27e   : > { %v1894_v6 = vpack.c.bf16 %v1776_v9, %v1598_v8  ;;  %2522 = vmatmul.bf16.gmra.mxu2 %v6521_v7  ;;  %4222 = vmatpush.bf16.xpose.msra.mxu1 %v6949_v10  ;;  %v6909_v7 = vor.u32 %v7352_v51, %v6908_v50 }
 0x27f   : > { %3666 = vmatpush.bf16.msrb.mxu2 %v6857_v2  ;;  %2611 = vmatmul.bf16.gmra.mxu3 %v6525_v26  ;;  %v7334_v26 = vld [vmem:[#allocation3 + $0x14] sm:$0xf0]  ;;  %v7351_v2 = vld [vmem:[#allocation2 + $0x28] sm:$0xf0] }
 0x280   : > { %1926 = vst [vmem:[#allocation3 + $0x88] sm:$0xff] %v1894_v6  ;;  %v6837_v63 = vor.u32 %v7334_v26, %v6836_v53  ;;  %v7372_v6 = vld [vmem:[#allocation3 + $0x78] sm:$0xf0] }
 0x281   : > { %v1689_v35 = vpop.f32.mrf.mxu2  ;;  %v1513_v33 = vpop.f32.mrf.mxu0  ;;  %v7368_v26 = vld [vmem:[#allocation3 + $0x38] sm:$0xf0] }
 0x282   : > { %v1690_v16 = vadd.f32 %v1689_v35, %v8725_v11  ;;  %v1778_v61 = vpop.f32.mrf.mxu3  ;;  %v1602_v21 = vpop.f32.mrf.mxu1  ;;  %v1514_v14 = vadd.f32 %v1513_v33, %v8720_v54  ;;  %v6833_v35 = vor.u32 %v7333_v1, %v6832_v60  ;;  %v6988_v33 = vld [vmem:[#allocation3 + $0x74] sm:$0xf] }
 0x283   : > { %3667 = vmatpush.bf16.msrb.mxu2 %v6853_v42  ;;  %v6905_v42 = vor.u32 %v7351_v2, %v6904_v32  ;;  %v6989_v20 = vor.u32 %v7372_v6, %v6988_v33  ;;  %v7367_v6 = vld [vmem:[#allocation3 + $0x28] sm:$0xf0] }
 0x284   : > { %v1779_v48 = vadd.f32 %v1778_v61, %v1690_v16  ;;  %v1603_v5 = vadd.f32 %v1602_v21, %v1514_v14  ;;  %v6936_v16 = vld [vmem:[#allocation2 + $0xa4] sm:$0xf]  ;;  %v6536_v21 = vld [vmem:[%s8397_s6 + $0x30] sm:$0xf]  ;;  %v7358_v14 = vld [vmem:[#allocation2 + $0x98] sm:$0xf0] }
 0x285   : > { %4134 = vmatpush.bf16.xpose.msra.mxu0 %v6913_v44  ;;  %v6937_v19 = vor.u32 %v7359_v59, %v6936_v16  ;;  %v6984_v44 = vld [vmem:[#allocation3 + $0x64] sm:$0xf]  ;;  %v6537_v49 = vor.u32 %v7260_v40, %v6536_v21  ;;  %v7262_v59 = vld [vmem:[%s8397_s6 + $0x44] sm:$0xf0]  ;;  %v7366_v40 = vld [vmem:[#allocation3 + $0x18] sm:$0xf0] }
 0x286   : > { %v1895_v4 = vpack.c.bf16 %v1779_v48, %v1601_v23  ;;  %4223 = vmatpush.bf16.xpose.msra.mxu1 %v6945_v17  ;;  %v7371_v23 = vld [vmem:[#allocation3 + $0x68] sm:$0xf0]  ;;  %v7259_v48 = vld [vmem:[%s8397_s6 + $0x34] sm:$0xf] }
 0x287   : > { %3668 = vmatpush.bf16.msrb.mxu2 %v6849_v56  ;;  %v6985_v29 = vor.u32 %v7371_v23, %v6984_v44  ;;  %v6541_v24 = vor.u32 %v7259_v48, %v6538_v27  ;;  %v6964_v27 = vld [vmem:[#allocation3 + $0x14] sm:$0xf]  ;;  %v7365_v44 = vld [vmem:[#allocation3 + $0x8] sm:$0xf0] }
 0x288   : > { %1927 = vst [vmem:[#allocation3 + $0x90] sm:$0xff] %v1895_v4 }
 0x289   : > { %v1691_v12 = vpop.f32.mrf.mxu2  ;;  %v1516_v45 = vpop.f32.mrf.mxu0 }
 0x28a   : > { %v1692_v31 = vadd.f32 %v1691_v12, %v8725_v11  ;;  %v1780_v46 = vpop.f32.mrf.mxu3  ;;  %v1605_v30 = vpop.f32.mrf.mxu1  ;;  %v1517_v52 = vadd.f32 %v1516_v45, %v8720_v54  ;;  %v6932_v45 = vld [vmem:[#allocation2 + $0x94] sm:$0xf] }
 0x28b   : > { %3669 = vmatpush.bf16.msrb.mxu2 %v6845_v55  ;;  %v6933_v38 = vor.u32 %v7358_v14, %v6932_v45  ;;  %v6554_v45 = vld [vmem:[%s8397_s6 + $0x58] sm:$0xf0] }
 0x28c   : > { %v1781_v41 = vadd.f32 %v1780_v46, %v1692_v31  ;;  %2349 = vmatmul.bf16.gmra.mxu0 %v6529_v37  ;;  %v1606_v10 = vadd.f32 %v1605_v30, %v1517_v52  ;;  %v6980_v46 = vld [vmem:[#allocation3 + $0x54] sm:$0xf]  ;;  %v7369_v30 = vld [vmem:[#allocation3 + $0x48] sm:$0xf0] }
 0x28d   : > { %2438 = vmatmul.bf16.gmra.mxu1 %v6533_v47  ;;  %4135 = vmatpush.bf16.xpose.msra.mxu0 %v6909_v7  ;;  %v6981_v51 = vor.u32 %v7370_v15, %v6980_v46 }
 0x28e   : > { %v1896_v22 = vpack.c.bf16 %v1781_v41, %v1603_v5  ;;  %2527 = vmatmul.bf16.gmra.mxu2 %v6529_v37  ;;  %4224 = vmatpush.bf16.xpose.msra.mxu1 %v6941_v25  ;;  %v6900_v37 = vld [vmem:[#allocation2 + $0x14] sm:$0xf]  ;;  %v6976_v41 = vld [vmem:[#allocation3 + $0x44] sm:$0xf]  ;;  %v7357_v25 = vld [vmem:[#allocation2 + $0x88] sm:$0xf0] }
 0x28f   : > { %3670 = vmatpush.bf16.msrb.mxu2 %v6841_v57  ;;  %2616 = vmatmul.bf16.gmra.mxu3 %v6533_v47  ;;  %v6901_v31 = vor.u32 %v7350_v34, %v6900_v37  ;;  %v6977_v7 = vor.u32 %v7369_v30, %v6976_v41  ;;  %v7264_v37 = vld [vmem:[%s8397_s6 + $0x54] sm:$0xf0] }
 0x290   : > { %1928 = vst [vmem:[#allocation3 + $0x98] sm:$0xff] %v1896_v22 }
 0x291   : > { %v1694_v62 = vpop.f32.mrf.mxu2  ;;  %v1518_v9 = vpop.f32.mrf.mxu0 }
 0x292   : > { %v1695_v8 = vadd.f32 %v1694_v62, %v8725_v11  ;;  %v1783_v0 = vpop.f32.mrf.mxu3  ;;  %v1607_v3 = vpop.f32.mrf.mxu1  ;;  %v1519_v28 = vadd.f32 %v1518_v9, %v8720_v54  ;;  %v6896_v62 = vld [vmem:[#allocation2 + $0x4] sm:$0xf]  ;;  %v6972_v9 = vld [vmem:[#allocation3 + $0x34] sm:$0xf] }
 0x293   : > { %3671 = vmatpush.bf16.msrb.mxu2 %v6837_v63  ;;  %v6897_v63 = vor.u32 %v7349_v18, %v6896_v62  ;;  %v6973_v2 = vor.u32 %v7368_v26, %v6972_v9  ;;  %v7266_v9 = vld [vmem:[%s8397_s6 + $0x64] sm:$0xf0] }
 0x294   : > { %v1784_v13 = vadd.f32 %v1783_v0, %v1695_v8  ;;  %v1608_v12 = vadd.f32 %v1607_v3, %v1519_v28  ;;  %v6928_v8 = vld [vmem:[#allocation2 + $0x84] sm:$0xf]  ;;  %v6544_v3 = vld [vmem:[%s8397_s6 + $0x40] sm:$0xf] }
 0x295   : > { %4136 = vmatpush.bf16.xpose.msra.mxu0 %v6905_v42  ;;  %v6929_v1 = vor.u32 %v7357_v25, %v6928_v8  ;;  %v6545_v42 = vor.u32 %v7262_v59, %v6544_v3  ;;  %v6560_v8 = vld [vmem:[%s8397_s6 + $0x60] sm:$0xf] }
 0x296   : > { %v1897_v61 = vpack.c.bf16 %v1784_v13, %v1606_v10  ;;  %4225 = vmatpush.bf16.xpose.msra.mxu1 %v6937_v19  ;;  %v7261_v10 = vld [vmem:[%s8397_s6 + $0x44] sm:$0xf]  ;;  %v6546_v13 = vld [vmem:[%s8397_s6 + $0x48] sm:$0xf0]  ;;  %v6561_v59 = vor.u32 %v7266_v9, %v6560_v8 }
 0x297   : > { %3672 = vmatpush.bf16.msrb.mxu2 %v6833_v35  ;;  %v6968_v35 = vld [vmem:[#allocation3 + $0x24] sm:$0xf] }
 0x298   : > { %1929 = vst [vmem:[#allocation3 + $0xa0] sm:$0xff] %v1897_v61  ;;  %v6969_v19 = vor.u32 %v7367_v6, %v6968_v35 }
 0x299   : > { %v1696_v56 = vpop.f32.mrf.mxu2  ;;  %v1521_v17 = vpop.f32.mrf.mxu0 }
 0x29a   : > { %v1697_v4 = vadd.f32 %v1696_v56, %v8725_v11  ;;  %v1785_v58 = vpop.f32.mrf.mxu3  ;;  %v1610_v36 = vpop.f32.mrf.mxu1  ;;  %v1522_v39 = vadd.f32 %v1521_v17, %v8720_v54  ;;  %v6965_v56 = vor.u32 %v7366_v40, %v6964_v27  ;;  %v6960_v17 = vld [vmem:[#allocation3 + $0x4] sm:$0xf] }
 0x29b   : > { %4853 = vmatpush.bf16.msra.mxu2 %v6989_v20  ;;  %v6549_v20 = vor.u32 %v7261_v10, %v6546_v13  ;;  %v6961_v34 = vor.u32 %v7365_v44, %v6960_v17  ;;  %v7267_v44 = vld [vmem:[%s8397_s6 + $0x74] sm:$0xf] }
 0x29c   : > { %v1786_v55 = vadd.f32 %v1785_v58, %v1697_v4  ;;  %2354 = vmatmul.bf16.gmra.mxu0 %v6537_v49  ;;  %v1611_v52 = vadd.f32 %v1610_v36, %v1522_v39 }
 0x29d   : > { %2443 = vmatmul.bf16.gmra.mxu1 %v6541_v24  ;;  %4137 = vmatpush.bf16.xpose.msra.mxu0 %v6901_v31  ;;  %v7263_v31 = vld [vmem:[%s8397_s6 + $0x54] sm:$0xf] }
 0x29e   : > { %v1898_v47 = vpack.c.bf16 %v1786_v55, %v1608_v12  ;;  %2532 = vmatmul.bf16.gmra.mxu2 %v6537_v49  ;;  %4226 = vmatpush.bf16.xpose.msra.mxu1 %v6933_v38  ;;  %v6552_v55 = vld [vmem:[%s8397_s6 + $0x50] sm:$0xf] }
 0x29f   : > { %4854 = vmatpush.bf16.msra.mxu2 %v6985_v29  ;;  %2621 = vmatmul.bf16.gmra.mxu3 %v6541_v24  ;;  %v6553_v38 = vor.u32 %v7264_v37, %v6552_v55 }
 0x2a0   : > { %1930 = vst [vmem:[#allocation3 + $0xa8] sm:$0xff] %v1898_v47 }
 0x2a1   : > { %v1699_v5 = vpop.f32.mrf.mxu2  ;;  %v1523_v50 = vpop.f32.mrf.mxu0 }
 0x2a2   : > { %v1700_v43 = vadd.f32 %v1699_v5, %v8725_v11  ;;  %v1788_v57 = vpop.f32.mrf.mxu3  ;;  %v1612_v22 = vpop.f32.mrf.mxu1  ;;  %v1524_v60 = vadd.f32 %v1523_v50, %v8720_v54  ;;  %v6557_v5 = vor.u32 %v7263_v31, %v6554_v45 }
 0x2a3   : > { %4855 = vmatpush.bf16.msra.mxu2 %v6981_v51 }
 0x2a4   : > { %v1789_v53 = vadd.f32 %v1788_v57, %v1700_v43  ;;  %v1613_v23 = vadd.f32 %v1612_v22, %v1524_v60 }
 0x2a5   : > { %4138 = vmatpush.bf16.xpose.msra.mxu0 %v6897_v63 }
 0x2a6   : > { %v1899_v0 = vpack.c.bf16 %v1789_v53, %v1611_v52  ;;  %4227 = vmatpush.bf16.xpose.msra.mxu1 %v6929_v1  ;;  %v6562_v1 = vld [vmem:[%s8397_s6 + $0x68] sm:$0xf0] }
 0x2a7   : > { %4856 = vmatpush.bf16.msra.mxu2 %v6977_v7 }
 0x2a8   : > { %1931 = vst [vmem:[#allocation3 + $0xb0] sm:$0xff] %v1899_v0  ;;  %v7265_v0 = vld [vmem:[%s8397_s6 + $0x64] sm:$0xf] }
 0x2a9   : > { %v1701_v32 = vpop.f32.mrf.mxu2  ;;  %v1526_v33 = vpop.f32.mrf.mxu0  ;;  %v6565_v60 = vor.u32 %v7265_v0, %v6562_v1 }
 0x2aa   : > { %v1702_v16 = vadd.f32 %v1701_v32, %v8725_v11  ;;  %v1790_v61 = vpop.f32.mrf.mxu3  ;;  %v1615_v21 = vpop.f32.mrf.mxu1  ;;  %v1527_v49 = vadd.f32 %v1526_v33, %v8720_v54 }
 0x2ab   : > { %4857 = vmatpush.bf16.msra.mxu2 %v6973_v2 }
 0x2ac   : > { %v1791_v48 = vadd.f32 %v1790_v61, %v1702_v16  ;;  %2359 = vmatmul.bf16.gmra.mxu0 %v6545_v42  ;;  %v1616_v14 = vadd.f32 %v1615_v21, %v1527_v49  ;;  %v6570_v49 = vld [vmem:[%s8397_s6 + $0x78] sm:$0xf0] }
 0x2ad   : > { %2448 = vmatmul.bf16.gmra.mxu1 %v6549_v20 }
 0x2ae   : > { %v1900_v28 = vpack.c.bf16 %v1791_v48, %v1613_v23  ;;  %2537 = vmatmul.bf16.gmra.mxu2 %v6545_v42 }
 0x2af   : > { %4858 = vmatpush.bf16.msra.mxu2 %v6969_v19  ;;  %2626 = vmatmul.bf16.gmra.mxu3 %v6549_v20 }
 0x2b0   : > { %1932 = vst [vmem:[#allocation3 + $0xb8] sm:$0xff] %v1900_v28  ;;  %v6568_v28 = vld [vmem:[%s8397_s6 + $0x70] sm:$0xf] }
 0x2b1   : > { %v1704_v4 = vpop.f32.mrf.mxu2  ;;  %v1528_v29 = vpop.f32.mrf.mxu0 }
 0x2b2   : > { %v1705_v58 = vadd.f32 %v1704_v4, %v8725_v11  ;;  %v1793_v24 = vpop.f32.mrf.mxu3  ;;  %v1617_v36 = vpop.f32.mrf.mxu1  ;;  %v1529_v46 = vadd.f32 %v1528_v29, %v8720_v54 }
 0x2b3   : > { %4859 = vmatpush.bf16.msra.mxu2 %v6965_v56  ;;  %v7268_v56 = vld [vmem:[%s8397_s6 + $0x74] sm:$0xf0] }
 0x2b4   : > { %v1794_v15 = vadd.f32 %v1793_v24, %v1705_v58  ;;  %v1618_v43 = vadd.f32 %v1617_v36, %v1529_v46  ;;  %v6569_v58 = vor.u32 %v7268_v56, %v6568_v28  ;;  %v6573_v36 = vor.u32 %v7267_v44, %v6570_v49 }
 0x2b6   : > { %v1901_v12 = vpack.c.bf16 %v1794_v15, %v1616_v14 }
 0x2b7   : > { %4860 = vmatpush.bf16.msra.mxu2 %v6961_v34 }
 0x2b8   : > { %1933 = vst [vmem:[#allocation3 + $0xc0] sm:$0xff] %v1901_v12 }
 0x2b9   : > { %v1706_v47 = vpop.f32.mrf.mxu2  ;;  %v1531_v30 = vpop.f32.mrf.mxu0 }
 0x2ba   : > { %v1707_v51 = vadd.f32 %v1706_v47, %v8725_v11  ;;  %v1795_v39 = vpop.f32.mrf.mxu3  ;;  %v1620_v41 = vpop.f32.mrf.mxu1  ;;  %v1532_v7 = vadd.f32 %v1531_v30, %v8720_v54 }
 0x2bc   : > { %v1796_v50 = vadd.f32 %v1795_v39, %v1707_v51  ;;  %2364 = vmatmul.bf16.gmra.mxu0 %v6553_v38  ;;  %v1621_v53 = vadd.f32 %v1620_v41, %v1532_v7  ;;  %v2005_v39 = vld [vmem:[%s10314_s3] sm:$0x3]  ;;  %v6578_v7 = vld [vmem:[%s8397_s6 + $0x88] sm:$0xf0] }
 0x2bd   : > { %2453 = vmatmul.bf16.gmra.mxu1 %v6557_v5  ;;  %v6576_v41 = vld [vmem:[%s8397_s6 + $0x80] sm:$0xf] }
 0x2be   : > { %v1902_v57 = vpack.c.bf16 %v1796_v50, %v1618_v43  ;;  %2542 = vmatmul.bf16.gmra.mxu2 %v6553_v38  ;;  %v7270_v43 = vld [vmem:[%s8397_s6 + $0x84] sm:$0xf0]  ;;  %v8855_v50 = vperm.slane %v2005_v39, 0 }
 0x2bf   : > { %2631 = vmatmul.bf16.gmra.mxu3 %v6557_v5 }
 0x2c0   : > { %1934 = vst [vmem:[#allocation3 + $0xc8] sm:$0xff] %v1902_v57  ;;  %v7269_v57 = vld [vmem:[%s8397_s6 + $0x84] sm:$0xf] }
 0x2c1   : > { %v1709_v18 = vpop.f32.mrf.mxu2  ;;  %v1533_v25 = vpop.f32.mrf.mxu0 }
 0x2c2   : > { %v1710_v22 = vadd.f32 %v1709_v18, %v8725_v11  ;;  %v1798_v26 = vpop.f32.mrf.mxu3  ;;  %v1622_v52 = vpop.f32.mrf.mxu1  ;;  %v1534_v2 = vadd.f32 %v1533_v25, %v8720_v54  ;;  %v6577_v25 = vor.u32 %v7270_v43, %v6576_v41  ;;  %v6880_v43 = vld [vmem:[#allocation3 + $0xc0] sm:$0xf] }
 0x2c4   : > { %v1799_v62 = vadd.f32 %v1798_v26, %v1710_v22  ;;  %v1623_v35 = vadd.f32 %v1622_v52, %v1534_v2 }
 0x2c6   : > { %v1903_v63 = vpack.c.bf16 %v1799_v62, %v1621_v53  ;;  %v6581_v62 = vor.u32 %v7269_v57, %v6578_v7 }
 0x2c8   : > { %1935 = vst [vmem:[#allocation3 + $0xd0] sm:$0xff] %v1903_v63 }
 0x2c9   : > { %v1711_v3 = vpop.f32.mrf.mxu2  ;;  %v1536_v10 = vpop.f32.mrf.mxu0 }
 0x2ca   : > { %v1712_v6 = vadd.f32 %v1711_v3, %v8725_v11  ;;  %v1800_v13 = vpop.f32.mrf.mxu3  ;;  %v1625_v32 = vpop.f32.mrf.mxu1  ;;  %v1537_v33 = vadd.f32 %v1536_v10, %v8720_v54 }
 0x2cc   : > { %v1801_v42 = vadd.f32 %v1800_v13, %v1712_v6  ;;  %2369 = vmatmul.bf16.gmra.mxu0 %v6561_v59  ;;  %v1626_v23 = vadd.f32 %v1625_v32, %v1537_v33  ;;  %v6584_v32 = vld [vmem:[%s8397_s6 + $0x90] sm:$0xf] }
 0x2cd   : > { %2458 = vmatmul.bf16.gmra.mxu1 %v6565_v60 }
 0x2ce   : > { %v1904_v16 = vpack.c.bf16 %v1801_v42, %v1623_v35  ;;  %2547 = vmatmul.bf16.gmra.mxu2 %v6561_v59  ;;  %v7272_v35 = vld [vmem:[%s8397_s6 + $0x94] sm:$0xf0]  ;;  %v7271_v42 = vld [vmem:[%s8397_s6 + $0x94] sm:$0xf] }
 0x2cf   : > { %2636 = vmatmul.bf16.gmra.mxu3 %v6565_v60 }
 0x2d0   : > { %1936 = vst [vmem:[#allocation3 + $0xd8] sm:$0xff] %v1904_v16 }
 0x2d1   : > { %v1714_v61 = vpop.f32.mrf.mxu2  ;;  %v1538_v20 = vpop.f32.mrf.mxu0 }
 0x2d2   : > { %v1715_v19 = vadd.f32 %v1714_v61, %v8725_v11  ;;  %v1803_v21 = vpop.f32.mrf.mxu3  ;;  %v1627_v40 = vpop.f32.mrf.mxu1  ;;  %v1539_v4 = vadd.f32 %v1538_v20, %v8720_v54  ;;  %v6586_v61 = vld [vmem:[%s8397_s6 + $0x98] sm:$0xf0] }
 0x2d4   : > { %v1804_v48 = vadd.f32 %v1803_v21, %v1715_v19  ;;  %v1628_v15 = vadd.f32 %v1627_v40, %v1539_v4  ;;  %v6585_v40 = vor.u32 %v7272_v35, %v6584_v32 }
 0x2d6   : > { %v1905_v27 = vpack.c.bf16 %v1804_v48, %v1626_v23 }
 0x2d8   : > { %1937 = vst [vmem:[#allocation3 + $0xe0] sm:$0xff] %v1905_v27  ;;  %v6589_v27 = vor.u32 %v7271_v42, %v6586_v61 }
 0x2d9   : > { %v1716_v17 = vpop.f32.mrf.mxu2  ;;  %v1541_v24 = vpop.f32.mrf.mxu0 }
 0x2da   : > { %v1717_v29 = vadd.f32 %v1716_v17, %v8725_v11  ;;  %v1805_v34 = vpop.f32.mrf.mxu3  ;;  %v1630_v14 = vpop.f32.mrf.mxu1  ;;  %v1542_v37 = vadd.f32 %v1541_v24, %v8720_v54 }
 0x2dc   : > { %v1806_v12 = vadd.f32 %v1805_v34, %v1717_v29  ;;  %2374 = vmatmul.bf16.gmra.mxu0 %v6569_v58  ;;  %v1631_v51 = vadd.f32 %v1630_v14, %v1542_v37  ;;  %v6884_v37 = vld [vmem:[#allocation3 + $0xd0] sm:$0xf] }
 0x2dd   : > { %2463 = vmatmul.bf16.gmra.mxu1 %v6573_v36 }
 0x2de   : > { %v1906_v55 = vpack.c.bf16 %v1806_v12, %v1628_v15  ;;  %2552 = vmatmul.bf16.gmra.mxu2 %v6569_v58 }
 0x2df   : > { %2641 = vmatmul.bf16.gmra.mxu3 %v6573_v36  ;;  %v6888_v58 = vld [vmem:[#allocation3 + $0xe0] sm:$0xf]  ;;  %v7346_v36 = vld [vmem:[#allocation3 + $0xd4] sm:$0xf0] }
 0x2e0   : > { %1938 = vst [vmem:[#allocation3 + $0xe8] sm:$0xff] %v1906_v55 }
 0x2e1   : > { %v1719_v31 = vpop.f32.mrf.mxu2  ;;  %v1543_v46 = vpop.f32.mrf.mxu0 }
 0x2e2   : > { %v1720_v45 = vadd.f32 %v1719_v31, %v8725_v11  ;;  %v1808_v47 = vpop.f32.mrf.mxu3  ;;  %v1632_v38 = vpop.f32.mrf.mxu1  ;;  %v1544_v18 = vadd.f32 %v1543_v46, %v8720_v54  ;;  %v8862_v54 = vperm.slane %v2005_v39, 1 }
 0x2e4   : > { %v1809_v30 = vadd.f32 %v1808_v47, %v1720_v45  ;;  %v1633_v9 = vadd.f32 %v1632_v38, %v1544_v18  ;;  %v6885_v45 = vor.u32 %v7346_v36, %v6884_v37  ;;  %v7344_v18 = vld [vmem:[#allocation3 + $0xb4] sm:$0xf0]  ;;  %v7275_v37 = vld [vmem:[%s8397_s6 + $0xb4] sm:$0xf] }
 0x2e6   : > { %v1907_v5 = vpack.c.bf16 %v1809_v30, %v1631_v51  ;;  %v7345_v51 = vld [vmem:[#allocation3 + $0xc4] sm:$0xf0] }
 0x2e7   : > { %v7347_v28 = vld [vmem:[#allocation3 + $0xe4] sm:$0xf0]  ;;  %v6881_v7 = vor.u32 %v7345_v51, %v6880_v43  ;;  %v7016_v51 = vld [vmem:[#allocation3 + $0xe4] sm:$0xf] }
 0x2e8   : > { %1939 = vst [vmem:[#allocation3 + $0xf0] sm:$0xff] %v1907_v5  ;;  %v6889_v24 = vor.u32 %v7347_v28, %v6888_v58 }
 0x2e9   : > { %v1721_v22 = vpop.f32.mrf.mxu2  ;;  %v2340_v53 = vpop.f32.mrf.mxu0 }
 0x2ea   : > { %v1722_v26 = vadd.f32 %v1721_v22, %v8725_v11  ;;  %v1810_v52 = vpop.f32.mrf.mxu3  ;;  %v2341_v63 = vadd.f32 %v2340_v53, %v8855_v50  ;;  %v2429_v8 = vpop.f32.mrf.mxu1  ;;  %v6592_v22 = vld [vmem:[%s8397_s6 + $0xa0] sm:$0xf] }
 0x2ec   : > { %v1811_v0 = vadd.f32 %v1810_v52, %v1722_v26  ;;  %v2430_v1 = vadd.f32 %v2429_v8, %v2341_v63  ;;  %2379 = vmatmul.bf16.gmra.mxu0 %v6577_v25  ;;  %v7273_v26 = vld [vmem:[%s8397_s6 + $0xa4] sm:$0xf]  ;;  %v6594_v52 = vld [vmem:[%s8397_s6 + $0xa8] sm:$0xf0] }
 0x2ed   : > { %2468 = vmatmul.bf16.gmra.mxu1 %v6581_v62 }
 0x2ee   : > { %v1908_v2 = vpack.c.bf16 %v1811_v0, %v1633_v9  ;;  %2557 = vmatmul.bf16.gmra.mxu2 %v6577_v25  ;;  %v7274_v25 = vld [vmem:[%s8397_s6 + $0xa4] sm:$0xf0] }
 0x2ef   : > { %2646 = vmatmul.bf16.gmra.mxu3 %v6581_v62  ;;  %v6892_v16 = vld [vmem:[#allocation3 + $0xf0] sm:$0xf]  ;;  %v6593_v9 = vor.u32 %v7274_v25, %v6592_v22  ;;  %v7020_v36 = vld [vmem:[#allocation3 + $0xf4] sm:$0xf]  ;;  %v7378_v22 = vld [vmem:[#allocation3 + $0xd8] sm:$0xf0] }
 0x2f0   : > { %1940 = vst [vmem:[#allocation3 + $0xf8] sm:$0xff] %v1908_v2  ;;  %v6876_v62 = vld [vmem:[#allocation3 + $0xb0] sm:$0xf]  ;;  %v6597_v2 = vor.u32 %v7273_v26, %v6594_v52 }
 0x2f1   : > { %v2518_v11 = vpop.f32.mrf.mxu2  ;;  %v2342_v3 = vpop.f32.mrf.mxu0  ;;  %v6877_v8 = vor.u32 %v7344_v18, %v6876_v62 }
 0x2f2   : > { %v2343_v59 = vadd.f32 %v2342_v3, %v8855_v50  ;;  %v2431_v6 = vpop.f32.mrf.mxu1  ;;  %v2607_v10 = vpop.f32.mrf.mxu3  ;;  %v2519_v13 = vadd.f32 %v2518_v11, %v8862_v54  ;;  %v7343_v11 = vld [vmem:[#allocation3 + $0xa4] sm:$0xf0] }
 0x2f4   : > { %v2432_v60 = vadd.f32 %v2431_v6, %v2343_v59  ;;  %v2608_v19 = vadd.f32 %v2607_v10, %v2519_v13 }
 0x2f6   : > { %v2687_v4 = vpack.c.bf16 %v2608_v19, %v2430_v1 }
 0x2f7   : > { %v7348_v33 = vld [vmem:[#allocation3 + $0xf4] sm:$0xf0] }
 0x2f8   : > { %v6893_v20 = vor.u32 %v7348_v33, %v6892_v16  ;;  %v2783_v14 = vunpack.c.l.b16 %v2687_v4  ;;  %v3971_v15 = vunpack.c.h.b16 %v2687_v4  ;;  %v7342_v16 = vld [vmem:[#allocation3 + $0x94] sm:$0xf0] }
 0x2f9   : > { %v2520_v21 = vpop.f32.mrf.mxu2  ;;  %v2345_v48 = vpop.f32.mrf.mxu0 }
 0x2fa   : > { %v2521_v23 = vadd.f32 %v2520_v21, %v8862_v54  ;;  %3754 = vmatpush.bf16.msrb.mxu3 %v6893_v20  ;;  %v2346_v56 = vadd.f32 %v2345_v48, %v8855_v50  ;;  %v2434_v44 = vpop.f32.mrf.mxu1  ;;  %v2609_v49 = vpop.f32.mrf.mxu3  ;;  %v6868_v21 = vld [vmem:[#allocation3 + $0x90] sm:$0xf] }
 0x2fc   : > { %v2610_v17 = vadd.f32 %v2609_v49, %v2521_v23  ;;  %v2435_v29 = vadd.f32 %v2434_v44, %v2346_v56  ;;  %2384 = vmatmul.bf16.gmra.mxu0 %v6585_v40  ;;  %v6869_v23 = vor.u32 %v7342_v16, %v6868_v21  ;;  %v7278_v21 = vld [vmem:[%s8397_s6 + $0xc4] sm:$0xf0] }
 0x2fd   : > { %2473 = vmatmul.bf16.gmra.mxu1 %v6589_v27 }
 0x2fe   : > { %v2688_v34 = vpack.c.bf16 %v2610_v17, %v2432_v60  ;;  %2562 = vmatmul.bf16.gmra.mxu2 %v6585_v40  ;;  %3755 = vmatpush.bf16.msrb.mxu3 %v6889_v24  ;;  %v6872_v60 = vld [vmem:[#allocation3 + $0xa0] sm:$0xf]  ;;  %v7380_v17 = vld [vmem:[#allocation3 + $0xf8] sm:$0xf0] }
 0x2ff   : > { %2651 = vmatmul.bf16.gmra.mxu3 %v6589_v27  ;;  %v6873_v35 = vor.u32 %v7343_v11, %v6872_v60  ;;  %v7341_v27 = vld [vmem:[#allocation3 + $0x84] sm:$0xf0] }
 0x300   : > { %v2784_v12 = vunpack.c.l.b16 %v2688_v34  ;;  %v3972_v55 = vunpack.c.h.b16 %v2688_v34 }
 0x301   : > { %v2523_v31 = vpop.f32.mrf.mxu2  ;;  %v2347_v38 = vpop.f32.mrf.mxu0 }
 0x302   : > { %v8872_v46 = vpack.c.b16 %v2784_v12, %v2783_v14  ;;  %v8874_v47 = vpack.c.b16 %v3972_v55, %v3971_v15  ;;  %3756 = vmatpush.bf16.msrb.mxu3 %v6885_v45  ;;  %v2348_v30 = vadd.f32 %v2347_v38, %v8855_v50  ;;  %v2436_v39 = vpop.f32.mrf.mxu1  ;;  %v2612_v5 = vpop.f32.mrf.mxu3  ;;  %v2524_v41 = vadd.f32 %v2523_v31, %v8862_v54  ;;  %v6600_v15 = vld [vmem:[%s8397_s6 + $0xb0] sm:$0xf]  ;;  %v7276_v12 = vld [vmem:[%s8397_s6 + $0xb4] sm:$0xf0]  ;;  %v7379_v55 = vld [vmem:[#allocation3 + $0xe8] sm:$0xf0] }
 0x303   : > { %v7021_v14 = vor.u32 %v7380_v17, %v7020_v36  ;;  %v6602_v31 = vld [vmem:[%s8397_s6 + $0xb8] sm:$0xf0] }
 0x304   : > { %v2437_v57 = vadd.f32 %v2436_v39, %v2348_v30  ;;  %v2613_v53 = vadd.f32 %v2612_v5, %v2524_v41  ;;  %v6601_v30 = vor.u32 %v7276_v12, %v6600_v15  ;;  %v7017_v41 = vor.u32 %v7379_v55, %v7016_v51  ;;  %v7373_v51 = vld [vmem:[#allocation3 + $0x88] sm:$0xf0] }
 0x305   : > { %v6605_v43 = vor.u32 %v7275_v37, %v6602_v31  ;;  %v6996_v31 = vld [vmem:[#allocation3 + $0x94] sm:$0xf] }
 0x306   : > { %3757 = vmatpush.bf16.msrb.mxu3 %v6881_v7  ;;  %v2689_v10 = vpack.c.bf16 %v2613_v53, %v2435_v29  ;;  %v6864_v29 = vld [vmem:[#allocation3 + $0x80] sm:$0xf]  ;;  %v7012_v53 = vld [vmem:[#allocation3 + $0xd4] sm:$0xf] }
 0x307   : > { %v6865_v34 = vor.u32 %v7341_v27, %v6864_v29 }
 0x308   : > { %v2785_v33 = vunpack.c.l.b16 %v2689_v10  ;;  %v3973_v61 = vunpack.c.h.b16 %v2689_v10 }
 0x309   : > { %v2525_v63 = vpop.f32.mrf.mxu2  ;;  %v2350_v1 = vpop.f32.mrf.mxu0 }
 0x30a   : > { %v2526_v0 = vadd.f32 %v2525_v63, %v8862_v54  ;;  %3758 = vmatpush.bf16.msrb.mxu3 %v6877_v8  ;;  %v2351_v3 = vadd.f32 %v2350_v1, %v8855_v50  ;;  %v2439_v59 = vpop.f32.mrf.mxu1  ;;  %v2614_v6 = vpop.f32.mrf.mxu3  ;;  %v7013_v63 = vor.u32 %v7378_v22, %v7012_v53  ;;  %v7377_v8 = vld [vmem:[#allocation3 + $0xc8] sm:$0xf0] }
 0x30c   : > { %v2615_v13 = vadd.f32 %v2614_v6, %v2526_v0  ;;  %v2440_v32 = vadd.f32 %v2439_v59, %v2351_v3  ;;  %2389 = vmatmul.bf16.gmra.mxu0 %v6593_v9  ;;  %v7008_v3 = vld [vmem:[#allocation3 + $0xc4] sm:$0xf] }
 0x30d   : > { %2478 = vmatmul.bf16.gmra.mxu1 %v6597_v2  ;;  %v7009_v6 = vor.u32 %v7377_v8, %v7008_v3  ;;  %v6616_v8 = vld [vmem:[%s8397_s6 + $0xd0] sm:$0xf] }
 0x30e   : > { %v2690_v42 = vpack.c.bf16 %v2615_v13, %v2437_v57  ;;  %2567 = vmatmul.bf16.gmra.mxu2 %v6593_v9  ;;  %3759 = vmatpush.bf16.msrb.mxu3 %v6873_v35  ;;  %v7376_v35 = vld [vmem:[#allocation3 + $0xb8] sm:$0xf0] }
 0x30f   : > { %2656 = vmatmul.bf16.gmra.mxu3 %v6597_v2 }
 0x310   : > { %v2786_v19 = vunpack.c.l.b16 %v2690_v42  ;;  %v3974_v20 = vunpack.c.h.b16 %v2690_v42 }
 0x311   : > { %v2528_v40 = vpop.f32.mrf.mxu2  ;;  %v2352_v48 = vpop.f32.mrf.mxu0 }
 0x312   : > { %v8884_v28 = vpack.c.b16 %v2786_v19, %v2785_v33  ;;  %v8886_v56 = vpack.c.b16 %v3974_v20, %v3973_v61  ;;  %3760 = vmatpush.bf16.msrb.mxu3 %v6869_v23  ;;  %v2353_v44 = vadd.f32 %v2352_v48, %v8855_v50  ;;  %v2441_v49 = vpop.f32.mrf.mxu1  ;;  %v2617_v4 = vpop.f32.mrf.mxu3  ;;  %v2529_v58 = vadd.f32 %v2528_v40, %v8862_v54  ;;  %v7004_v61 = vld [vmem:[#allocation3 + $0xb4] sm:$0xf]  ;;  %v6608_v20 = vld [vmem:[%s8397_s6 + $0xc0] sm:$0xf]  ;;  %v7375_v40 = vld [vmem:[#allocation3 + $0xa8] sm:$0xf0] }
 0x313   : > { %v7005_v19 = vor.u32 %v7376_v35, %v7004_v61  ;;  %v7277_v23 = vld [vmem:[%s8397_s6 + $0xc4] sm:$0xf]  ;;  %v6610_v48 = vld [vmem:[%s8397_s6 + $0xc8] sm:$0xf0] }
 0x314   : > { %v2442_v24 = vadd.f32 %v2441_v49, %v2353_v44  ;;  %v2618_v45 = vadd.f32 %v2617_v4, %v2529_v58  ;;  %v7000_v49 = vld [vmem:[#allocation3 + $0xa4] sm:$0xf]  ;;  %v6609_v4 = vor.u32 %v7278_v21, %v6608_v20 }
 0x315   : > { %v7001_v29 = vor.u32 %v7375_v40, %v7000_v49 }
 0x316   : > { %3761 = vmatpush.bf16.msrb.mxu3 %v6865_v34  ;;  %v2691_v25 = vpack.c.bf16 %v2618_v45, %v2440_v32 }
 0x318   : > { %v2787_v9 = vunpack.c.l.b16 %v2691_v25  ;;  %v3975_v0 = vunpack.c.h.b16 %v2691_v25 }
 0x319   : > { %v2530_v38 = vpop.f32.mrf.mxu2  ;;  %v2355_v5 = vpop.f32.mrf.mxu0 }
 0x31a   : > { %4942 = vmatpush.bf16.msra.mxu3 %v7021_v14  ;;  %v2531_v39 = vadd.f32 %v2530_v38, %v8862_v54  ;;  %v2356_v57 = vadd.f32 %v2355_v5, %v8855_v50  ;;  %v2444_v7 = vpop.f32.mrf.mxu1  ;;  %v2619_v18 = vpop.f32.mrf.mxu3  ;;  %v7374_v14 = vld [vmem:[#allocation3 + $0x98] sm:$0xf0] }
 0x31b   : > { %v6997_v45 = vor.u32 %v7374_v14, %v6996_v31  ;;  %v7281_v14 = vld [vmem:[%s8397_s6 + $0xe4] sm:$0xf] }
 0x31c   : > { %v2620_v26 = vadd.f32 %v2619_v18, %v2531_v39  ;;  %v2445_v52 = vadd.f32 %v2444_v7, %v2356_v57  ;;  %2394 = vmatmul.bf16.gmra.mxu0 %v6601_v30  ;;  %v6992_v57 = vld [vmem:[#allocation3 + $0x84] sm:$0xf] }
 0x31d   : > { %2483 = vmatmul.bf16.gmra.mxu1 %v6605_v43  ;;  %v6993_v18 = vor.u32 %v7373_v51, %v6992_v57 }
 0x31e   : > { %4943 = vmatpush.bf16.msra.mxu3 %v7017_v41  ;;  %v2692_v62 = vpack.c.bf16 %v2620_v26, %v2442_v24  ;;  %2572 = vmatmul.bf16.gmra.mxu2 %v6601_v30  ;;  %v6613_v24 = vor.u32 %v7277_v23, %v6610_v48 }
 0x31f   : > { %2661 = vmatmul.bf16.gmra.mxu3 %v6605_v43 }
 0x320   : > { %v2788_v1 = vunpack.c.l.b16 %v2692_v62  ;;  %v3976_v2 = vunpack.c.h.b16 %v2692_v62 }
 0x321   : > { %v2533_v11 = vpop.f32.mrf.mxu2  ;;  %v2357_v59 = vpop.f32.mrf.mxu0 }
 0x322   : > { %4944 = vmatpush.bf16.msra.mxu3 %v7013_v63  ;;  %v8896_v10 = vpack.c.b16 %v2788_v1, %v2787_v9  ;;  %v8898_v13 = vpack.c.b16 %v3976_v2, %v3975_v0  ;;  %v2358_v60 = vadd.f32 %v2357_v59, %v8855_v50  ;;  %v2446_v32 = vpop.f32.mrf.mxu1  ;;  %v2622_v42 = vpop.f32.mrf.mxu3  ;;  %v2534_v16 = vadd.f32 %v2533_v11, %v8862_v54  ;;  %v7280_v9 = vld [vmem:[%s8397_s6 + $0xd4] sm:$0xf0]  ;;  %v7279_v0 = vld [vmem:[%s8397_s6 + $0xd4] sm:$0xf]  ;;  %v6618_v1 = vld [vmem:[%s8397_s6 + $0xd8] sm:$0xf0] }
 0x323   : > { %v6617_v3 = vor.u32 %v7280_v9, %v6616_v8 }
 0x324   : > { %v2447_v33 = vadd.f32 %v2446_v32, %v2358_v60  ;;  %v2623_v27 = vadd.f32 %v2622_v42, %v2534_v16  ;;  %v6621_v60 = vor.u32 %v7279_v0, %v6618_v1 }
 0x326   : > { %4945 = vmatpush.bf16.msra.mxu3 %v7009_v6  ;;  %v2693_v12 = vpack.c.bf16 %v2623_v27, %v2445_v52 }
 0x328   : > { %v2789_v30 = vunpack.c.l.b16 %v2693_v12  ;;  %v3977_v39 = vunpack.c.h.b16 %v2693_v12 }
 0x329   : > { %v2535_v44 = vpop.f32.mrf.mxu2  ;;  %v2360_v58 = vpop.f32.mrf.mxu0 }
 0x32a   : > { %4946 = vmatpush.bf16.msra.mxu3 %v7005_v19  ;;  %v2536_v17 = vadd.f32 %v2535_v44, %v8862_v54  ;;  %v2361_v34 = vadd.f32 %v2360_v58, %v8855_v50  ;;  %v2449_v36 = vpop.f32.mrf.mxu1  ;;  %v2624_v15 = vpop.f32.mrf.mxu3 }
 0x32c   : > { %v2450_v55 = vadd.f32 %v2449_v36, %v2361_v34  ;;  %v2625_v37 = vadd.f32 %v2624_v15, %v2536_v17  ;;  %2399 = vmatmul.bf16.gmra.mxu0 %v6609_v4  ;;  %v6624_v34 = vld [vmem:[%s8397_s6 + $0xe0] sm:$0xf]  ;;  %v7282_v36 = vld [vmem:[%s8397_s6 + $0xe4] sm:$0xf0]  ;;  %v6626_v15 = vld [vmem:[%s8397_s6 + $0xe8] sm:$0xf0] }
 0x32d   : > { %2488 = vmatmul.bf16.gmra.mxu1 %v6613_v24 }
 0x32e   : > { %4947 = vmatpush.bf16.msra.mxu3 %v7001_v29  ;;  %2577 = vmatmul.bf16.gmra.mxu2 %v6609_v4  ;;  %v2694_v38 = vpack.c.bf16 %v2625_v37, %v2447_v33  ;;  %v6625_v37 = vor.u32 %v7282_v36, %v6624_v34 }
 0x32f   : > { %2666 = vmatmul.bf16.gmra.mxu3 %v6613_v24 }
 0x330   : > { %v2790_v5 = vunpack.c.l.b16 %v2694_v38  ;;  %v3978_v41 = vunpack.c.h.b16 %v2694_v38  ;;  %v6629_v38 = vor.u32 %v7281_v14, %v6626_v15 }
 0x331   : > { %v2538_v43 = vpop.f32.mrf.mxu2  ;;  %v2362_v7 = vpop.f32.mrf.mxu0 }
 0x332   : > { %4948 = vmatpush.bf16.msra.mxu3 %v6997_v45  ;;  %v2363_v22 = vadd.f32 %v2362_v7, %v8855_v50  ;;  %v2451_v25 = vpop.f32.mrf.mxu1  ;;  %v8909_v26 = vpack.c.b16 %v2790_v5, %v2789_v30  ;;  %v8911_v52 = vpack.c.b16 %v3978_v41, %v3977_v39  ;;  %v2627_v53 = vpop.f32.mrf.mxu3  ;;  %v2539_v62 = vadd.f32 %v2538_v43, %v8862_v54 }
 0x334   : > { %v2452_v63 = vadd.f32 %v2451_v25, %v2363_v22  ;;  %v2628_v2 = vadd.f32 %v2627_v53, %v2539_v62 }
 0x336   : > { %4949 = vmatpush.bf16.msra.mxu3 %v6993_v18  ;;  %v2695_v16 = vpack.c.bf16 %v2628_v2, %v2450_v55 }
 0x338   : > { %v2791_v20 = vunpack.c.l.b16 %v2695_v16  ;;  %v3979_v21 = vunpack.c.h.b16 %v2695_v16 }
 0x339   : > { %v2540_v11 = vpop.f32.mrf.mxu2  ;;  %v2365_v6 = vpop.f32.mrf.mxu0 }
 0x33a   : > { %v2541_v59 = vadd.f32 %v2540_v11, %v8862_v54  ;;  %v2366_v32 = vadd.f32 %v2365_v6, %v8855_v50  ;;  %v2454_v35 = vpop.f32.mrf.mxu1  ;;  %v2629_v42 = vpop.f32.mrf.mxu3  ;;  %v7283_v6 = vld [vmem:[%s8397_s6 + $0xf4] sm:$0xf] }
 0x33c   : > { %v2455_v33 = vadd.f32 %v2454_v35, %v2366_v32  ;;  %v2630_v61 = vadd.f32 %v2629_v42, %v2541_v59  ;;  %2404 = vmatmul.bf16.gmra.mxu0 %v6617_v3  ;;  %v7284_v59 = vld [vmem:[%s8397_s6 + $0xf4] sm:$0xf0] }
 0x33d   : > { %2493 = vmatmul.bf16.gmra.mxu1 %v6621_v60 }
 0x33e   : > { %2582 = vmatmul.bf16.gmra.mxu2 %v6617_v3  ;;  %v2696_v19 = vpack.c.bf16 %v2630_v61, %v2452_v63  ;;  %v6632_v3 = vld [vmem:[%s8397_s6 + $0xf0] sm:$0xf] }
 0x33f   : > { %2671 = vmatmul.bf16.gmra.mxu3 %v6621_v60  ;;  %v6634_v60 = vld [vmem:[%s8397_s6 + $0xf8] sm:$0xf0]  ;;  %v6633_v42 = vor.u32 %v7284_v59, %v6632_v3  ;;  %s5955_s6 = sshll.u32 %s5952_s20, 4  ;;  %s5956_s6 = int_to_ptr.hbm [resolvable:$true] %s5955_s6 }
 0x340   : > { %v2792_v40 = vunpack.c.l.b16 %v2696_v19  ;;  %v3980_v23 = vunpack.c.h.b16 %v2696_v19  ;;  %v6637_v61 = vor.u32 %v7283_v6, %v6634_v60  ;;  %s8104_s26 = sshra.s32 %s5956_s6, 4  ;;  %s8105_s26 = int_to_ptr.hbm [resolvable:$true] %s8104_s26 }
 0x341   : > { %v2543_v48 = vpop.f32.mrf.mxu2  ;;  %v2367_v27 = vpop.f32.mrf.mxu0  ;;  %s8106_s16 = scalar_lea.hbm %s8105_s26, 512  ;;  %p8111_p10 = scmp.lt.s32.totalorder %s8105_s26, %s10321_s10 }
 0x342   : > { %v2368_v44 = vadd.f32 %v2367_v27, %v8855_v50  ;;  %v2456_v49 = vpop.f32.mrf.mxu1  ;;  %v8921_v4 = vpack.c.b16 %v2792_v40, %v2791_v20  ;;  %v8923_v17 = vpack.c.b16 %v3980_v23, %v3979_v21  ;;  %v2632_v58 = vpop.f32.mrf.mxu3  ;;  %v2544_v29 = vadd.f32 %v2543_v48, %v8862_v54  ;;  %p8107_p1 = scmp.ne.s32.totalorder %s8105_s26, %s8106_s16  ;;  %p8112_p12 = scmp.lt.s32.totalorder %s8110_s21, %s8106_s16 }
 0x344   : > { %v2457_v24 = vadd.f32 %v2456_v49, %v2368_v44  ;;  %v2633_v12 = vadd.f32 %v2632_v58, %v2544_v29  ;;  %p8108_p4 = pnand %p8107_p1, %p8362_p7  ;;  %p8113_p13 = por %p8112_p12, %p8111_p10 }
 0x346   : > { %v2697_v5 = vpack.c.bf16 %v2633_v12, %v2455_v33  ;;  %p8109_p8 = pneg %p8108_p4 }
 0x348   : > { %v2793_v7 = vunpack.c.l.b16 %v2697_v5  ;;  %v3981_v18 = vunpack.c.h.b16 %v2697_v5  ;;  %p8114_p0 = pnand %p8113_p13, %p8109_p8 }
 0x349   : > { %v2545_v55 = vpop.f32.mrf.mxu2  ;;  %v2370_v45 = vpop.f32.mrf.mxu0 }
 0x34a   : > { %v2546_v31 = vadd.f32 %v2545_v55, %v8862_v54  ;;  %v2371_v51 = vadd.f32 %v2370_v45, %v8855_v50  ;;  %v2459_v30 = vpop.f32.mrf.mxu1  ;;  %v2634_v39 = vpop.f32.mrf.mxu3 }
 0x34c   : > { %v2460_v41 = vadd.f32 %v2459_v30, %v2371_v51  ;;  %v2635_v43 = vadd.f32 %v2634_v39, %v2546_v31  ;;  %2409 = vmatmul.bf16.gmra.mxu0 %v6625_v37 }
 0x34d   : > { %2498 = vmatmul.bf16.gmra.mxu1 %v6629_v38 }
 0x34e   : > { %2587 = vmatmul.bf16.gmra.mxu2 %v6625_v37  ;;  %v2698_v57 = vpack.c.bf16 %v2635_v43, %v2457_v24 }
 0x34f   : > { %2676 = vmatmul.bf16.gmra.mxu3 %v6629_v38 }
 0x350   : > { %v2794_v22 = vunpack.c.l.b16 %v2698_v57  ;;  %v3982_v25 = vunpack.c.h.b16 %v2698_v57 }
 0x351   : > { %v2548_v53 = vpop.f32.mrf.mxu2  ;;  %v2372_v62 = vpop.f32.mrf.mxu0 }
 0x352   : > { %v2373_v63 = vadd.f32 %v2372_v62, %v8855_v50  ;;  %v2461_v8 = vpop.f32.mrf.mxu1  ;;  %v8933_v9 = vpack.c.b16 %v2794_v22, %v2793_v7  ;;  %v8935_v0 = vpack.c.b16 %v3982_v25, %v3981_v18  ;;  %v2637_v1 = vpop.f32.mrf.mxu3  ;;  %v2549_v2 = vadd.f32 %v2548_v53, %v8862_v54 }
 0x354   : > { %v2462_v11 = vadd.f32 %v2461_v8, %v2373_v63  ;;  %v2638_v32 = vadd.f32 %v2637_v1, %v2549_v2 }
 0x356   : > { %v2699_v40 = vpack.c.bf16 %v2638_v32, %v2460_v41 }
 0x358   : > { %v2795_v44 = vunpack.c.l.b16 %v2699_v40  ;;  %v3983_v49 = vunpack.c.h.b16 %v2699_v40 }
 0x359   : > { %v2550_v35 = vpop.f32.mrf.mxu2  ;;  %v2375_v33 = vpop.f32.mrf.mxu0 }
 0x35a   : > { %v2551_v16 = vadd.f32 %v2550_v35, %v8862_v54  ;;  %v2376_v19 = vadd.f32 %v2375_v33, %v8855_v50  ;;  %v2464_v20 = vpop.f32.mrf.mxu1  ;;  %v2639_v21 = vpop.f32.mrf.mxu3 }
 0x35c   : > { %v2465_v23 = vadd.f32 %v2464_v20, %v2376_v19  ;;  %v2640_v48 = vadd.f32 %v2639_v21, %v2551_v16  ;;  %2414 = vmatmul.bf16.gmra.mxu0 %v6633_v42 }
 0x35d   : > { %2503 = vmatmul.bf16.gmra.mxu1 %v6637_v61 }
 0x35e   : > { %2592 = vmatmul.bf16.gmra.mxu2 %v6633_v42  ;;  %v2700_v27 = vpack.c.bf16 %v2640_v48, %v2462_v11 }
 0x35f   : > { %2681 = vmatmul.bf16.gmra.mxu3 %v6637_v61 }
 0x360   : > { %v2796_v58 = vunpack.c.l.b16 %v2700_v27  ;;  %v3984_v29 = vunpack.c.h.b16 %v2700_v27 }
 0x361   : > { %v2553_v24 = vpop.f32.mrf.mxu2  ;;  %v2377_v34 = vpop.f32.mrf.mxu0 }
 0x362   : > { %v2378_v36 = vadd.f32 %v2377_v34, %v8855_v50  ;;  %v2466_v14 = vpop.f32.mrf.mxu1  ;;  %v8945_v15 = vpack.c.b16 %v2796_v58, %v2795_v44  ;;  %v8947_v12 = vpack.c.b16 %v3984_v29, %v3983_v49  ;;  %v2642_v55 = vpop.f32.mrf.mxu3  ;;  %v2554_v37 = vadd.f32 %v2553_v24, %v8862_v54 }
 0x364   : > { %v2467_v31 = vadd.f32 %v2466_v14, %v2378_v36  ;;  %v2643_v45 = vadd.f32 %v2642_v55, %v2554_v37 }
 0x366   : > { %v2701_v43 = vpack.c.bf16 %v2643_v45, %v2465_v23 }
 0x368   : > { %v2797_v22 = vunpack.c.l.b16 %v2701_v43  ;;  %v3985_v25 = vunpack.c.h.b16 %v2701_v43 }
 0x369   : > { %v2555_v38 = vpop.f32.mrf.mxu2  ;;  %v2380_v30 = vpop.f32.mrf.mxu0 }
 0x36a   : > { %v2556_v51 = vadd.f32 %v2555_v38, %v8862_v54  ;;  %v2381_v39 = vadd.f32 %v2380_v30, %v8855_v50  ;;  %v2469_v5 = vpop.f32.mrf.mxu1  ;;  %v2644_v41 = vpop.f32.mrf.mxu3 }
 0x36c   : > { %v2470_v57 = vadd.f32 %v2469_v5, %v2381_v39  ;;  %v2645_v7 = vadd.f32 %v2644_v41, %v2556_v51  ;;  %2951 = vmatmul.bf16.vlgmr.msrb.gmra.mxu0 %v8872_v46 }
 0x36d   : > { %3040 = vmatmul.bf16.vlgmr.msrb.gmra.mxu1 %v8872_v46 }
 0x36e   : > { %v2702_v18 = vpack.c.bf16 %v2645_v7, %v2467_v31 }
 0x370   : > { %v2798_v53 = vunpack.c.l.b16 %v2702_v18  ;;  %v3986_v62 = vunpack.c.h.b16 %v2702_v18 }
 0x371   : > { %v2558_v63 = vpop.f32.mrf.mxu2  ;;  %v2382_v8 = vpop.f32.mrf.mxu0 }
 0x372   : > { %v2383_v1 = vadd.f32 %v2382_v8, %v8855_v50  ;;  %v2471_v2 = vpop.f32.mrf.mxu1  ;;  %v8955_v11 = vpack.c.b16 %v2798_v53, %v2797_v22  ;;  %v8957_v3 = vpack.c.b16 %v3986_v62, %v3985_v25  ;;  %v2647_v59 = vpop.f32.mrf.mxu3  ;;  %v2559_v6 = vadd.f32 %v2558_v63, %v8862_v54 }
 0x374   : > { %v2472_v60 = vadd.f32 %v2471_v2, %v2383_v1  ;;  %v2648_v32 = vadd.f32 %v2647_v59, %v2559_v6 }
 0x376   : > { %v2703_v19 = vpack.c.bf16 %v2648_v32, %v2470_v57 }
 0x378   : > { %v2799_v23 = vunpack.c.l.b16 %v2703_v19  ;;  %v3987_v48 = vunpack.c.h.b16 %v2703_v19 }
 0x379   : > { %v2560_v46 = vpop.f32.mrf.mxu2  ;;  %v2385_v42 = vpop.f32.mrf.mxu0 }
 0x37a   : > { %v2561_v35 = vadd.f32 %v2560_v46, %v8862_v54  ;;  %v2386_v16 = vadd.f32 %v2385_v42, %v8855_v50  ;;  %v2474_v33 = vpop.f32.mrf.mxu1  ;;  %v2649_v61 = vpop.f32.mrf.mxu3 }
 0x37c   : > { %v2475_v20 = vadd.f32 %v2474_v33, %v2386_v16  ;;  %v2650_v21 = vadd.f32 %v2649_v61, %v2561_v35  ;;  %2956 = vmatmul.bf16.gmra.mxu0 %v8884_v28 }
 0x37d   : > { %3045 = vmatmul.bf16.gmra.mxu1 %v8884_v28 }
 0x37e   : > { %v2704_v40 = vpack.c.bf16 %v2650_v21, %v2472_v60 }
 0x380   : > { %v2800_v27 = vunpack.c.l.b16 %v2704_v40  ;;  %v3988_v44 = vunpack.c.h.b16 %v2704_v40 }
 0x381   : > { %v2563_v49 = vpop.f32.mrf.mxu2  ;;  %v2387_v58 = vpop.f32.mrf.mxu0 }
 0x382   : > { %v2388_v29 = vadd.f32 %v2387_v58, %v8855_v50  ;;  %v2476_v24 = vpop.f32.mrf.mxu1  ;;  %v8965_v34 = vpack.c.b16 %v2800_v27, %v2799_v23  ;;  %v8967_v36 = vpack.c.b16 %v3988_v44, %v3987_v48  ;;  %v2652_v14 = vpop.f32.mrf.mxu3  ;;  %v2564_v55 = vadd.f32 %v2563_v49, %v8862_v54 }
 0x384   : > { %v2477_v37 = vadd.f32 %v2476_v24, %v2388_v29  ;;  %v2653_v31 = vadd.f32 %v2652_v14, %v2564_v55 }
 0x386   : > { %v2705_v5 = vpack.c.bf16 %v2653_v31, %v2475_v20 }
 0x388   : > { %v2801_v7 = vunpack.c.l.b16 %v2705_v5  ;;  %v3989_v18 = vunpack.c.h.b16 %v2705_v5 }
 0x389   : > { %v2565_v28 = vpop.f32.mrf.mxu2  ;;  %v2390_v38 = vpop.f32.mrf.mxu0 }
 0x38a   : > { %v2566_v45 = vadd.f32 %v2565_v28, %v8862_v54  ;;  %v2391_v51 = vadd.f32 %v2390_v38, %v8855_v50  ;;  %v2479_v30 = vpop.f32.mrf.mxu1  ;;  %v2654_v39 = vpop.f32.mrf.mxu3 }
 0x38c   : > { %v2480_v41 = vadd.f32 %v2479_v30, %v2391_v51  ;;  %v2655_v43 = vadd.f32 %v2654_v39, %v2566_v45  ;;  %2961 = vmatmul.bf16.gmra.mxu0 %v8896_v10 }
 0x38d   : > { %3050 = vmatmul.bf16.gmra.mxu1 %v8896_v10 }
 0x38e   : > { %v2706_v57 = vpack.c.bf16 %v2655_v43, %v2477_v37 }
 0x390   : > { %v2802_v22 = vunpack.c.l.b16 %v2706_v57  ;;  %v3990_v25 = vunpack.c.h.b16 %v2706_v57 }
 0x391   : > { %v2568_v53 = vpop.f32.mrf.mxu2  ;;  %v2392_v62 = vpop.f32.mrf.mxu0 }
 0x392   : > { %v2393_v63 = vadd.f32 %v2392_v62, %v8855_v50  ;;  %v2481_v8 = vpop.f32.mrf.mxu1  ;;  %v8975_v1 = vpack.c.b16 %v2802_v22, %v2801_v7  ;;  %v8977_v2 = vpack.c.b16 %v3990_v25, %v3989_v18  ;;  %v2657_v59 = vpop.f32.mrf.mxu3  ;;  %v2569_v6 = vadd.f32 %v2568_v53, %v8862_v54 }
 0x394   : > { %v2482_v60 = vadd.f32 %v2481_v8, %v2393_v63  ;;  %v2658_v32 = vadd.f32 %v2657_v59, %v2569_v6 }
 0x396   : > { %v2707_v61 = vpack.c.bf16 %v2658_v32, %v2480_v41 }
 0x398   : > { %v2803_v40 = vunpack.c.l.b16 %v2707_v61  ;;  %v3991_v23 = vunpack.c.h.b16 %v2707_v61 }
 0x399   : > { %v2570_v10 = vpop.f32.mrf.mxu2  ;;  %v2395_v35 = vpop.f32.mrf.mxu0 }
 0x39a   : > { %v2571_v46 = vadd.f32 %v2570_v10, %v8862_v54  ;;  %v2396_v42 = vadd.f32 %v2395_v35, %v8855_v50  ;;  %v2484_v16 = vpop.f32.mrf.mxu1  ;;  %v2659_v33 = vpop.f32.mrf.mxu3 }
 0x39c   : > { %v2485_v19 = vadd.f32 %v2484_v16, %v2396_v42  ;;  %v2660_v20 = vadd.f32 %v2659_v33, %v2571_v46  ;;  %2966 = vmatmul.bf16.gmra.mxu0 %v8909_v26 }
 0x39d   : > { %3055 = vmatmul.bf16.gmra.mxu1 %v8909_v26 }
 0x39e   : > { %v2708_v21 = vpack.c.bf16 %v2660_v20, %v2482_v60 }
 0x3a0   : > { %v2804_v48 = vunpack.c.l.b16 %v2708_v21  ;;  %v3992_v27 = vunpack.c.h.b16 %v2708_v21 }
 0x3a1   : > { %v2573_v44 = vpop.f32.mrf.mxu2  ;;  %v2397_v49 = vpop.f32.mrf.mxu0 }
 0x3a2   : > { %v2398_v58 = vadd.f32 %v2397_v49, %v8855_v50  ;;  %v2486_v29 = vpop.f32.mrf.mxu1  ;;  %v8985_v24 = vpack.c.b16 %v2804_v48, %v2803_v40  ;;  %v8987_v14 = vpack.c.b16 %v3992_v27, %v3991_v23  ;;  %v2662_v55 = vpop.f32.mrf.mxu3  ;;  %v2574_v37 = vadd.f32 %v2573_v44, %v8862_v54 }
 0x3a4   : > { %v2487_v31 = vadd.f32 %v2486_v29, %v2398_v58  ;;  %v2663_v28 = vadd.f32 %v2662_v55, %v2574_v37 }
 0x3a6   : > { %v2709_v5 = vpack.c.bf16 %v2663_v28, %v2485_v19 }
 0x3a8   : > { %v2805_v7 = vunpack.c.l.b16 %v2709_v5  ;;  %v3993_v18 = vunpack.c.h.b16 %v2709_v5 }
 0x3a9   : > { %v2575_v26 = vpop.f32.mrf.mxu2  ;;  %v2400_v38 = vpop.f32.mrf.mxu0 }
 0x3aa   : > { %v2576_v45 = vadd.f32 %v2575_v26, %v8862_v54  ;;  %v2401_v51 = vadd.f32 %v2400_v38, %v8855_v50  ;;  %v2489_v30 = vpop.f32.mrf.mxu1  ;;  %v2664_v39 = vpop.f32.mrf.mxu3 }
 0x3ac   : > { %v2490_v41 = vadd.f32 %v2489_v30, %v2401_v51  ;;  %v2665_v43 = vadd.f32 %v2664_v39, %v2576_v45  ;;  %2971 = vmatmul.bf16.gmra.mxu0 %v8921_v4 }
 0x3ad   : > { %3060 = vmatmul.bf16.gmra.mxu1 %v8921_v4 }
 0x3ae   : > { %v2710_v57 = vpack.c.bf16 %v2665_v43, %v2487_v31 }
 0x3b0   : > { %v2806_v22 = vunpack.c.l.b16 %v2710_v57  ;;  %v3994_v25 = vunpack.c.h.b16 %v2710_v57 }
 0x3b1   : > { %v2578_v53 = vpop.f32.mrf.mxu2  ;;  %v2402_v62 = vpop.f32.mrf.mxu0 }
 0x3b2   : > { %v2403_v63 = vadd.f32 %v2402_v62, %v8855_v50  ;;  %v2491_v8 = vpop.f32.mrf.mxu1  ;;  %v8995_v59 = vpack.c.b16 %v2806_v22, %v2805_v7  ;;  %v8997_v6 = vpack.c.b16 %v3994_v25, %v3993_v18  ;;  %v2667_v60 = vpop.f32.mrf.mxu3  ;;  %v2579_v32 = vadd.f32 %v2578_v53, %v8862_v54 }
 0x3b4   : > { %v2492_v10 = vadd.f32 %v2491_v8, %v2403_v63  ;;  %v2668_v46 = vadd.f32 %v2667_v60, %v2579_v32 }
 0x3b6   : > { %v2711_v19 = vpack.c.bf16 %v2668_v46, %v2490_v41 }
 0x3b8   : > { %v2807_v23 = vunpack.c.l.b16 %v2711_v19  ;;  %v3995_v48 = vunpack.c.h.b16 %v2711_v19 }
 0x3b9   : > { %v2580_v4 = vpop.f32.mrf.mxu2  ;;  %v2405_v42 = vpop.f32.mrf.mxu0 }
 0x3ba   : > { %v2581_v35 = vadd.f32 %v2580_v4, %v8862_v54  ;;  %v2406_v16 = vadd.f32 %v2405_v42, %v8855_v50  ;;  %v2494_v33 = vpop.f32.mrf.mxu1  ;;  %v2669_v61 = vpop.f32.mrf.mxu3 }
 0x3bc   : > { %v2495_v20 = vadd.f32 %v2494_v33, %v2406_v16  ;;  %v2670_v21 = vadd.f32 %v2669_v61, %v2581_v35  ;;  %2976 = vmatmul.bf16.gmra.mxu0 %v8933_v9 }
 0x3bd   : > { %3065 = vmatmul.bf16.gmra.mxu1 %v8933_v9 }
 0x3be   : > { %v2712_v40 = vpack.c.bf16 %v2670_v21, %v2492_v10 }
 0x3c0   : > { %v2808_v27 = vunpack.c.l.b16 %v2712_v40  ;;  %v3996_v44 = vunpack.c.h.b16 %v2712_v40 }
 0x3c1   : > { %v2583_v49 = vpop.f32.mrf.mxu2  ;;  %v2407_v58 = vpop.f32.mrf.mxu0 }
 0x3c2   : > { %v2408_v29 = vadd.f32 %v2407_v58, %v8855_v50  ;;  %v2496_v55 = vpop.f32.mrf.mxu1  ;;  %v9005_v37 = vpack.c.b16 %v2808_v27, %v2807_v23  ;;  %v9007_v31 = vpack.c.b16 %v3996_v44, %v3995_v48  ;;  %v2672_v28 = vpop.f32.mrf.mxu3  ;;  %v2584_v26 = vadd.f32 %v2583_v49, %v8862_v54 }
 0x3c4   : > { %v2497_v45 = vadd.f32 %v2496_v55, %v2408_v29  ;;  %v2673_v38 = vadd.f32 %v2672_v28, %v2584_v26 }
 0x3c6   : > { %v2713_v43 = vpack.c.bf16 %v2673_v38, %v2495_v20 }
 0x3c8   : > { %v2809_v22 = vunpack.c.l.b16 %v2713_v43  ;;  %v3997_v25 = vunpack.c.h.b16 %v2713_v43 }
 0x3c9   : > { %v2585_v9 = vpop.f32.mrf.mxu2  ;;  %v2410_v30 = vpop.f32.mrf.mxu0 }
 0x3ca   : > { %v2586_v51 = vadd.f32 %v2585_v9, %v8862_v54  ;;  %v2411_v39 = vadd.f32 %v2410_v30, %v8855_v50  ;;  %v2499_v5 = vpop.f32.mrf.mxu1  ;;  %v2674_v41 = vpop.f32.mrf.mxu3 }
 0x3cc   : > { %v2500_v57 = vadd.f32 %v2499_v5, %v2411_v39  ;;  %v2675_v7 = vadd.f32 %v2674_v41, %v2586_v51  ;;  %2981 = vmatmul.bf16.gmra.mxu0 %v8945_v15 }
 0x3cd   : > { %3070 = vmatmul.bf16.gmra.mxu1 %v8945_v15 }
 0x3ce   : > { %v2714_v18 = vpack.c.bf16 %v2675_v7, %v2497_v45 }
 0x3d0   : > { %v2810_v53 = vunpack.c.l.b16 %v2714_v18  ;;  %v3998_v62 = vunpack.c.h.b16 %v2714_v18 }
 0x3d1   : > { %v2588_v63 = vpop.f32.mrf.mxu2  ;;  %v2412_v8 = vpop.f32.mrf.mxu0 }
 0x3d2   : > { %v2413_v60 = vadd.f32 %v2412_v8, %v8855_v50  ;;  %v2501_v32 = vpop.f32.mrf.mxu1  ;;  %v9015_v10 = vpack.c.b16 %v2810_v53, %v2809_v22  ;;  %v9017_v46 = vpack.c.b16 %v3998_v62, %v3997_v25  ;;  %v2677_v4 = vpop.f32.mrf.mxu3  ;;  %v2589_v35 = vadd.f32 %v2588_v63, %v8862_v54 }
 0x3d4   : > { %v2502_v42 = vadd.f32 %v2501_v32, %v2413_v60  ;;  %v2678_v16 = vadd.f32 %v2677_v4, %v2589_v35 }
 0x3d6   : > { %v2715_v40 = vpack.c.bf16 %v2678_v16, %v2500_v57 }
 0x3d8   : > { %v2811_v44 = vunpack.c.l.b16 %v2715_v40  ;;  %v3999_v49 = vunpack.c.h.b16 %v2715_v40 }
 0x3d9   : > { %v2590_v15 = vpop.f32.mrf.mxu2  ;;  %v2415_v61 = vpop.f32.mrf.mxu0 }
 0x3da   : > { %v2591_v33 = vadd.f32 %v2590_v15, %v8862_v54  ;;  %v2416_v19 = vadd.f32 %v2415_v61, %v8855_v50  ;;  %v2504_v20 = vpop.f32.mrf.mxu1  ;;  %v2679_v21 = vpop.f32.mrf.mxu3 }
 0x3dc   : > { %v2505_v23 = vadd.f32 %v2504_v20, %v2416_v19  ;;  %v2680_v48 = vadd.f32 %v2679_v21, %v2591_v33  ;;  %2986 = vmatmul.bf16.gmra.mxu0 %v8955_v11 }
 0x3dd   : > { %3075 = vmatmul.bf16.gmra.mxu1 %v8955_v11 }
 0x3de   : > { %v2716_v27 = vpack.c.bf16 %v2680_v48, %v2502_v42 }
 0x3e0   : > { %v2812_v58 = vunpack.c.l.b16 %v2716_v27  ;;  %v4000_v29 = vunpack.c.h.b16 %v2716_v27 }
 0x3e1   : > { %v2593_v55 = vpop.f32.mrf.mxu2  ;;  %v2417_v28 = vpop.f32.mrf.mxu0 }
 0x3e2   : > { %v2418_v26 = vadd.f32 %v2417_v28, %v8855_v50  ;;  %v2506_v45 = vpop.f32.mrf.mxu1  ;;  %v9025_v38 = vpack.c.b16 %v2812_v58, %v2811_v44  ;;  %v9027_v9 = vpack.c.b16 %v4000_v29, %v3999_v49  ;;  %v2682_v51 = vpop.f32.mrf.mxu3  ;;  %v2594_v30 = vadd.f32 %v2593_v55, %v8862_v54 }
 0x3e4   : > { %v2507_v39 = vadd.f32 %v2506_v45, %v2418_v26  ;;  %v2683_v5 = vadd.f32 %v2682_v51, %v2594_v30 }
 0x3e6   : > { %v2717_v18 = vpack.c.bf16 %v2683_v5, %v2505_v23 }
 0x3e8   : > { %v2813_v53 = vunpack.c.l.b16 %v2717_v18  ;;  %v4001_v62 = vunpack.c.h.b16 %v2717_v18 }
 0x3e9   : > { %v2595_v11 = vpop.f32.mrf.mxu2  ;;  %v9031_v43 = vpop.f32.mrf.mxu0 }
 0x3ea   : > { %v2596_v41 = vadd.f32 %v2595_v11, %v8862_v54  ;;  %v9033_v57 = vpop.f32.mrf.mxu1  ;;  %v2684_v7 = vpop.f32.mrf.mxu3 }
 0x3eb   : > { %v3121_v50 = vmax.f32 %v9031_v43, %v9033_v57 }
 0x3ec   : > { %v2685_v22 = vadd.f32 %v2684_v7, %v2596_v41  ;;  %2991 = vmatmul.bf16.gmra.mxu0 %v8965_v34 }
 0x3ed   : > { %3080 = vmatmul.bf16.gmra.mxu1 %v8965_v34  ;;  %3122 = vmax.xlane.f32.xlu0 %v3121_v50 }
 0x3ee   : > { %v2718_v25 = vpack.c.bf16 %v2685_v22, %v2507_v39 }
 0x3f0   : > { %v2814_v63 = vunpack.c.l.b16 %v2718_v25  ;;  %v4002_v54 = vunpack.c.h.b16 %v2718_v25 }
 0x3f1   : > { %v9039_v8 = vpop.f32.mrf.mxu0 }
 0x3f2   : > { %v9041_v60 = vpop.f32.mrf.mxu1  ;;  %v9043_v32 = vpack.c.b16 %v2814_v63, %v2813_v53  ;;  %v9045_v4 = vpack.c.b16 %v4002_v54, %v4001_v62 }
 0x3f3   : > { %v3124_v35 = vmax.f32 %v9039_v8, %v9041_v60 }
 0x3f5   : > { %3125 = vmax.xlane.f32.xlu0 %v3124_v35 }
 0x3f9   : > { %v9049_v42 = vpop.f32.mrf.mxu0 }
 0x3fa   : > { %v9051_v34 = vpop.f32.mrf.mxu1 }
 0x3fb   : > { %v3127_v16 = vmax.f32 %v9049_v42, %v9051_v34 }
 0x3fc   : > { %2996 = vmatmul.bf16.gmra.mxu0 %v8975_v1 }
 0x3fd   : > { %3085 = vmatmul.bf16.gmra.mxu1 %v8975_v1  ;;  %3128 = vmax.xlane.f32.xlu1 %v3127_v16 }
 0x401   : > { %v9057_v15 = vpop.f32.mrf.mxu0 }
 0x402   : > { %v9059_v33 = vpop.f32.mrf.mxu1 }
 0x403   : > { %v3130_v61 = vmax.f32 %v9057_v15, %v9059_v33 }
 0x405   : > { %3131 = vmax.xlane.f32.xlu1 %v3130_v61 }
 0x409   : > { %v9063_v19 = vpop.f32.mrf.mxu0 }
 0x40a   : > { %v9065_v20 = vpop.f32.mrf.mxu1 }
 0x40b   : > { %v3133_v21 = vmax.f32 %v9063_v19, %v9065_v20 }
 0x40c   : > { %3001 = vmatmul.bf16.gmra.mxu0 %v8985_v24 }
 0x40d   : > { %3090 = vmatmul.bf16.gmra.mxu1 %v8985_v24  ;;  %3134 = vmax.xlane.f32.xlu2 %v3133_v21 }
 0x411   : > { %v9071_v1 = vpop.f32.mrf.mxu0 }
 0x412   : > { %v9073_v40 = vpop.f32.mrf.mxu1 }
 0x413   : > { %v3136_v23 = vmax.f32 %v9071_v1, %v9073_v40 }
 0x415   : > { %3137 = vmax.xlane.f32.xlu2 %v3136_v23 }
 0x419   : > { %v9077_v48 = vpop.f32.mrf.mxu0 }
 0x41a   : > { %v9079_v27 = vpop.f32.mrf.mxu1 }
 0x41b   : > { %v3139_v44 = vmax.f32 %v9077_v48, %v9079_v27 }
 0x41c   : > { %3006 = vmatmul.bf16.gmra.mxu0 %v8995_v59 }
 0x41d   : > { %3095 = vmatmul.bf16.gmra.mxu1 %v8995_v59  ;;  %3140 = vmax.xlane.f32.xlu0 %v3139_v44 }
 0x421   : > { %v9085_v24 = vpop.f32.mrf.mxu0 }
 0x422   : > { %v9087_v49 = vpop.f32.mrf.mxu1 }
 0x423   : > { %v3142_v58 = vmax.f32 %v9085_v24, %v9087_v49 }
 0x425   : > { %3143 = vmax.xlane.f32.xlu1 %v3142_v58 }
 0x429   : > { %v9091_v29 = vpop.f32.mrf.mxu0 }
 0x42a   : > { %v9093_v55 = vpop.f32.mrf.mxu1 }
 0x42b   : > { %v3145_v28 = vmax.f32 %v9091_v29, %v9093_v55 }
 0x42c   : > { %3011 = vmatmul.bf16.gmra.mxu0 %v9005_v37 }
 0x42d   : > { %3100 = vmatmul.bf16.gmra.mxu1 %v9005_v37  ;;  %3146 = vmax.xlane.f32.xlu2 %v3145_v28 }
 0x431   : > { %v9099_v59 = vpop.f32.mrf.mxu0 }
 0x432   : > { %v9101_v26 = vpop.f32.mrf.mxu1 }
 0x433   : > { %v3148_v45 = vmax.f32 %v9099_v59, %v9101_v26 }
 0x435   : > { %3149 = vmax.xlane.f32.xlu0 %v3148_v45 }
 0x439   : > { %v9105_v51 = vpop.f32.mrf.mxu0 }
 0x43a   : > { %v9107_v30 = vpop.f32.mrf.mxu1 }
 0x43b   : > { %v3151_v39 = vmax.f32 %v9105_v51, %v9107_v30 }
 0x43c   : > { %3016 = vmatmul.bf16.gmra.mxu0 %v9015_v10 }
 0x43d   : > { %3105 = vmatmul.bf16.gmra.mxu1 %v9015_v10  ;;  %3152 = vmax.xlane.f32.xlu1 %v3151_v39 }
 0x441   : > { %v9113_v37 = vpop.f32.mrf.mxu0 }
 0x442   : > { %v9115_v5 = vpop.f32.mrf.mxu1 }
 0x443   : > { %v3154_v11 = vmax.f32 %v9113_v37, %v9115_v5 }
 0x445   : > { %3155 = vmax.xlane.f32.xlu2 %v3154_v11 }
 0x449   : > { %v9119_v41 = vpop.f32.mrf.mxu0 }
 0x44a   : > { %v9121_v7 = vpop.f32.mrf.mxu1 }
 0x44b   : > { %v3157_v50 = vmax.f32 %v9119_v41, %v9121_v7 }
 0x44c   : > { %3021 = vmatmul.bf16.gmra.mxu0 %v9025_v38 }
 0x44d   : > { %3110 = vmatmul.bf16.gmra.mxu1 %v9025_v38  ;;  %3158 = vmax.xlane.f32.xlu0 %v3157_v50 }
 0x451   : > { %v9127_v10 = vpop.f32.mrf.mxu0 }
 0x452   : > { %v9129_v18 = vpop.f32.mrf.mxu1 }
 0x453   : > { %v3160_v22 = vmax.f32 %v9127_v10, %v9129_v18 }
 0x455   : > { %3161 = vmax.xlane.f32.xlu1 %v3160_v22 }
 0x459   : > { %v9133_v25 = vpop.f32.mrf.mxu0 }
 0x45a   : > { %v9135_v53 = vpop.f32.mrf.mxu1 }
 0x45b   : > { %v3163_v62 = vmax.f32 %v9133_v25, %v9135_v53 }
 0x45c   : > { %3026 = vmatmul.bf16.gmra.mxu0 %v9043_v32 }
 0x45d   : > { %3115 = vmatmul.bf16.gmra.mxu1 %v9043_v32  ;;  %3164 = vmax.xlane.f32.xlu2 %v3163_v62 }
 0x460   : > { %v3123_v38 = vpop.xlane.xlu0 %3122 }
 0x461   : > { %v3217_v63 = vsub.f32 %v9031_v43, %v3123_v38  ;;  %v3218_v54 = vsub.f32 %v9033_v57, %v3123_v38  ;;  %v9143_v35 = vpop.f32.mrf.mxu0 }
 0x462   : > { %v9145_v16 = vpop.f32.mrf.mxu1 }
 0x463   : > { %v3281_v61 = vmul.f32 1.442695, %v3217_v63  ;;  %v3283_v21 = vmul.f32 1.442695, %v3218_v54  ;;  %v3166_v23 = vmax.f32 %v9143_v35, %v9145_v16 }
 0x465   : > { %7526 = vpow2.f32 %v3281_v61  ;;  %3167 = vmax.xlane.f32.xlu0 %v3166_v23 }
 0x466   : > { %7528 = vpow2.f32 %v3283_v21 }
 0x468   : > { %v3126_v44 = vpop.xlane.xlu0 %3125 }
 0x469   : > { %v3219_v32 = vsub.f32 %v9039_v8, %v3126_v44  ;;  %v3220_v58 = vsub.f32 %v9041_v60, %v3126_v44  ;;  %v9151_v43 = vpop.f32.mrf.mxu0 }
 0x46a   : > { %v9153_v57 = vpop.f32.mrf.mxu1 }
 0x46b   : > { %v7527_v28 = vpop.eup %7526  ;;  %v3285_v45 = vmul.f32 1.442695, %v3219_v32  ;;  %v3287_v39 = vmul.f32 1.442695, %v3220_v58  ;;  %v3169_v11 = vmax.f32 %v9151_v43, %v9153_v57 }
 0x46c   : > { %v7529_v50 = vpop.eup %7528  ;;  %4139 = vmatmul.bf16.vlgmr.msra.gmra.mxu0 %v8874_v47 }
 0x46d   : > { %7530 = vpow2.f32 %v3285_v45  ;;  %4228 = vmatmul.bf16.vlgmr.msra.gmra.mxu1 %v8874_v47  ;;  %3170 = vmax.xlane.f32.xlu1 %v3169_v11  ;;  %v9159_v8 = vadd.f32 %v7529_v50, %v7527_v28 }
 0x46e   : > { %7532 = vpow2.f32 %v3287_v39 }
 0x470   : > { %v3129_v60 = vpop.xlane.xlu1 %3128 }
 0x471   : > { %v3221_v22 = vsub.f32 %v9049_v42, %v3129_v60  ;;  %v3222_v62 = vsub.f32 %v9051_v34, %v3129_v60  ;;  %v9163_v38 = vpop.f32.mrf.mxu0 }
 0x472   : > { %v9165_v63 = vpop.f32.mrf.mxu1 }
 0x473   : > { %v7531_v54 = vpop.eup %7530  ;;  %v3289_v61 = vmul.f32 1.442695, %v3221_v22  ;;  %v3291_v21 = vmul.f32 1.442695, %v3222_v62  ;;  %v3172_v23 = vmax.f32 %v9163_v38, %v9165_v63 }
 0x474   : > { %v7533_v47 = vpop.eup %7532  ;;  %v3505_v44 = vpack.c.bf16 %v7531_v54, %v7527_v28 }
 0x475   : > { %v3506_v32 = vpack.c.bf16 %v7533_v47, %v7529_v50  ;;  %7534 = vpow2.f32 %v3289_v61  ;;  %3173 = vmax.xlane.f32.xlu2 %v3172_v23  ;;  %v9169_v58 = vadd.f32 %v7533_v47, %v7531_v54 }
 0x476   : > { %7536 = vpow2.f32 %v3291_v21  ;;  %3673 = vmatmul.bf16.vlgmr.msrb.gmra.mxu2 %v3505_v44 }
 0x477   : > { %3762 = vmatmul.bf16.vlgmr.msrb.gmra.mxu3 %v3506_v32 }
 0x478   : > { %v3132_v42 = vpop.xlane.xlu1 %3131 }
 0x479   : > { %v3223_v34 = vsub.f32 %v9057_v15, %v3132_v42  ;;  %v3224_v45 = vsub.f32 %v9059_v33, %v3132_v42  ;;  %v9173_v39 = vpop.f32.mrf.mxu0 }
 0x47a   : > { %v9175_v11 = vpop.f32.mrf.mxu1 }
 0x47b   : > { %v7535_v60 = vpop.eup %7534  ;;  %v3293_v22 = vmul.f32 1.442695, %v3223_v34  ;;  %v3295_v28 = vmul.f32 1.442695, %v3224_v45  ;;  %v3175_v50 = vmax.f32 %v9173_v39, %v9175_v11 }
 0x47c   : > { %v7537_v62 = vpop.eup %7536  ;;  %4144 = vmatmul.bf16.gmra.mxu0 %v8886_v56 }
 0x47d   : > { %7538 = vpow2.f32 %v3293_v22  ;;  %4233 = vmatmul.bf16.gmra.mxu1 %v8886_v56  ;;  %3176 = vmax.xlane.f32.xlu0 %v3175_v50  ;;  %v9181_v15 = vadd.f32 %v7537_v62, %v7535_v60 }
 0x47e   : > { %7540 = vpow2.f32 %v3295_v28 }
 0x480   : > { %v3135_v33 = vpop.xlane.xlu2 %3134 }
 0x481   : > { %v3225_v54 = vsub.f32 %v9063_v19, %v3135_v33  ;;  %v3226_v61 = vsub.f32 %v9065_v20, %v3135_v33  ;;  %v9185_v21 = vpop.f32.mrf.mxu0 }
 0x482   : > { %v9187_v23 = vpop.f32.mrf.mxu1 }
 0x483   : > { %v7539_v47 = vpop.eup %7538  ;;  %v3297_v44 = vmul.f32 1.442695, %v3225_v54  ;;  %v3299_v32 = vmul.f32 1.442695, %v3226_v61  ;;  %v3178_v42 = vmax.f32 %v9185_v21, %v9187_v23 }
 0x484   : > { %v7541_v56 = vpop.eup %7540  ;;  %v3507_v34 = vpack.c.bf16 %v7539_v47, %v7535_v60 }
 0x485   : > { %7542 = vpow2.f32 %v3297_v44  ;;  %3179 = vmax.xlane.f32.xlu1 %v3178_v42  ;;  %v3508_v45 = vpack.c.bf16 %v7541_v56, %v7537_v62  ;;  %v9191_v22 = vadd.f32 %v7541_v56, %v7539_v47 }
 0x486   : > { %7544 = vpow2.f32 %v3299_v32  ;;  %3678 = vmatmul.bf16.gmra.mxu2 %v3507_v34 }
 0x487   : > { %3767 = vmatmul.bf16.gmra.mxu3 %v3508_v45 }
 0x488   : > { %v3138_v19 = vpop.xlane.xlu2 %3137 }
 0x489   : > { %v3227_v20 = vsub.f32 %v9071_v1, %v3138_v19  ;;  %v3228_v28 = vsub.f32 %v9073_v40, %v3138_v19  ;;  %v9195_v50 = vpop.f32.mrf.mxu0 }
 0x48a   : > { %v9197_v33 = vpop.f32.mrf.mxu1 }
 0x48b   : > { %v7543_v54 = vpop.eup %7542  ;;  %v3301_v61 = vmul.f32 1.442695, %v3227_v20  ;;  %v3303_v60 = vmul.f32 1.442695, %v3228_v28  ;;  %v3181_v62 = vmax.f32 %v9195_v50, %v9197_v33 }
 0x48c   : > { %v7545_v47 = vpop.eup %7544  ;;  %4149 = vmatmul.bf16.gmra.mxu0 %v8898_v13 }
 0x48d   : > { %7546 = vpow2.f32 %v3301_v61  ;;  %4238 = vmatmul.bf16.gmra.mxu1 %v8898_v13  ;;  %3182 = vmax.xlane.f32.xlu2 %v3181_v62  ;;  %v9203_v1 = vadd.f32 %v7545_v47, %v7543_v54 }
 0x48e   : > { %7548 = vpow2.f32 %v3303_v60 }
 0x48f   : > { %10363 = vst [vmem:[#allocation29_spill] sm:$0xff] %v9203_v1 }
 0x490   : > { %v3141_v40 = vpop.xlane.xlu0 %3140 }
 0x491   : > { %v3229_v44 = vsub.f32 %v9077_v48, %v3141_v40  ;;  %v3230_v32 = vsub.f32 %v9079_v27, %v3141_v40  ;;  %v9207_v42 = vpop.f32.mrf.mxu0 }
 0x492   : > { %v9209_v56 = vpop.f32.mrf.mxu1 }
 0x493   : > { %v7547_v34 = vpop.eup %7546  ;;  %v3305_v45 = vmul.f32 1.442695, %v3229_v44  ;;  %v3307_v19 = vmul.f32 1.442695, %v3230_v32  ;;  %v3184_v20 = vmax.f32 %v9207_v42, %v9209_v56 }
 0x494   : > { %v7549_v13 = vpop.eup %7548  ;;  %v3509_v28 = vpack.c.bf16 %v7547_v34, %v7543_v54 }
 0x495   : > { %7550 = vpow2.f32 %v3305_v45  ;;  %3185 = vmax.xlane.f32.xlu0 %v3184_v20  ;;  %v3510_v61 = vpack.c.bf16 %v7549_v13, %v7545_v47  ;;  %v9213_v60 = vadd.f32 %v7549_v13, %v7547_v34 }
 0x496   : > { %7552 = vpow2.f32 %v3307_v19  ;;  %3683 = vmatmul.bf16.gmra.mxu2 %v3509_v28 }
 0x497   : > { %3772 = vmatmul.bf16.gmra.mxu3 %v3510_v61 }
 0x498   : > { %v3144_v48 = vpop.xlane.xlu1 %3143 }
 0x499   : > { %v3231_v27 = vsub.f32 %v9085_v24, %v3144_v48  ;;  %v3232_v62 = vsub.f32 %v9087_v49, %v3144_v48  ;;  %v9217_v40 = vpop.f32.mrf.mxu0 }
 0x49a   : > { %v9219_v44 = vpop.f32.mrf.mxu1 }
 0x49b   : > { %v7551_v32 = vpop.eup %7550  ;;  %v3309_v1 = vmul.f32 1.442695, %v3231_v27  ;;  %v3311_v54 = vmul.f32 1.442695, %v3232_v62  ;;  %v3187_v47 = vmax.f32 %v9217_v40, %v9219_v44 }
 0x49c   : > { %v7553_v34 = vpop.eup %7552  ;;  %4154 = vmatmul.bf16.gmra.mxu0 %v8911_v52 }
 0x49d   : > { %7554 = vpow2.f32 %v3309_v1  ;;  %4243 = vmatmul.bf16.gmra.mxu1 %v8911_v52  ;;  %3188 = vmax.xlane.f32.xlu1 %v3187_v47  ;;  %v9225_v24 = vadd.f32 %v7553_v34, %v7551_v32 }
 0x49e   : > { %7556 = vpow2.f32 %v3311_v54 }
 0x49f   : > { %10364 = vst [vmem:[#allocation30_spill] sm:$0xff] %v9225_v24 }
 0x4a0   : > { %v3147_v49 = vpop.xlane.xlu2 %3146 }
 0x4a1   : > { %v3233_v45 = vsub.f32 %v9091_v29, %v3147_v49  ;;  %v3234_v19 = vsub.f32 %v9093_v55, %v3147_v49  ;;  %v9229_v20 = vpop.f32.mrf.mxu0 }
 0x4a2   : > { %v9231_v13 = vpop.f32.mrf.mxu1 }
 0x4a3   : > { %v7555_v28 = vpop.eup %7554  ;;  %v3313_v61 = vmul.f32 1.442695, %v3233_v45  ;;  %v3315_v48 = vmul.f32 1.442695, %v3234_v19  ;;  %v3190_v1 = vmax.f32 %v9229_v20, %v9231_v13 }
 0x4a4   : > { %v7557_v52 = vpop.eup %7556  ;;  %v3511_v27 = vpack.c.bf16 %v7555_v28, %v7551_v32 }
 0x4a5   : > { %7558 = vpow2.f32 %v3313_v61  ;;  %3191 = vmax.xlane.f32.xlu2 %v3190_v1  ;;  %v3512_v62 = vpack.c.bf16 %v7557_v52, %v7553_v34  ;;  %v9235_v54 = vadd.f32 %v7557_v52, %v7555_v28 }
 0x4a6   : > { %7560 = vpow2.f32 %v3315_v48  ;;  %3688 = vmatmul.bf16.gmra.mxu2 %v3511_v27 }
 0x4a7   : > { %3777 = vmatmul.bf16.gmra.mxu3 %v3512_v62 }
 0x4a8   : > { %v3150_v29 = vpop.xlane.xlu0 %3149 }
 0x4a9   : > { %v3235_v55 = vsub.f32 %v9099_v59, %v3150_v29  ;;  %v3236_v47 = vsub.f32 %v9101_v26, %v3150_v29  ;;  %v9239_v49 = vpop.f32.mrf.mxu0 }
 0x4aa   : > { %v9241_v45 = vpop.f32.mrf.mxu1 }
 0x4ab   : > { %v7559_v19 = vpop.eup %7558  ;;  %v3317_v24 = vmul.f32 1.442695, %v3235_v55  ;;  %v3319_v32 = vmul.f32 1.442695, %v3236_v47  ;;  %v3193_v34 = vmax.f32 %v9239_v49, %v9241_v45 }
 0x4ac   : > { %v7561_v28 = vpop.eup %7560  ;;  %4159 = vmatmul.bf16.gmra.mxu0 %v8923_v17 }
 0x4ad   : > { %7562 = vpow2.f32 %v3317_v24  ;;  %4248 = vmatmul.bf16.gmra.mxu1 %v8923_v17  ;;  %3194 = vmax.xlane.f32.xlu0 %v3193_v34  ;;  %v9247_v59 = vadd.f32 %v7561_v28, %v7559_v19 }
 0x4ae   : > { %7564 = vpow2.f32 %v3319_v32 }
 0x4af   : > { %10365 = vst [vmem:[#allocation31_spill] sm:$0xff] %v9247_v59 }
 0x4b0   : > { %v3153_v26 = vpop.xlane.xlu1 %3152 }
 0x4b1   : > { %v3237_v61 = vsub.f32 %v9105_v51, %v3153_v26  ;;  %v3238_v48 = vsub.f32 %v9107_v30, %v3153_v26  ;;  %v9251_v1 = vpop.f32.mrf.mxu0 }
 0x4b2   : > { %v9253_v52 = vpop.f32.mrf.mxu1 }
 0x4b3   : > { %v7563_v27 = vpop.eup %7562  ;;  %v3321_v62 = vmul.f32 1.442695, %v3237_v61  ;;  %v3323_v29 = vmul.f32 1.442695, %v3238_v48  ;;  %v3196_v24 = vmax.f32 %v9251_v1, %v9253_v52 }
 0x4b4   : > { %v7565_v17 = vpop.eup %7564  ;;  %v3513_v55 = vpack.c.bf16 %v7563_v27, %v7559_v19 }
 0x4b5   : > { %7566 = vpow2.f32 %v3321_v62  ;;  %3197 = vmax.xlane.f32.xlu1 %v3196_v24  ;;  %v3514_v47 = vpack.c.bf16 %v7565_v17, %v7561_v28  ;;  %v9257_v32 = vadd.f32 %v7565_v17, %v7563_v27 }
 0x4b6   : > { %7568 = vpow2.f32 %v3323_v29  ;;  %3693 = vmatmul.bf16.gmra.mxu2 %v3513_v55 }
 0x4b7   : > { %3782 = vmatmul.bf16.gmra.mxu3 %v3514_v47 }
 0x4b8   : > { %v3156_v51 = vpop.xlane.xlu2 %3155 }
 0x4b9   : > { %v3239_v30 = vsub.f32 %v9113_v37, %v3156_v51  ;;  %v3240_v34 = vsub.f32 %v9115_v5, %v3156_v51  ;;  %v9261_v26 = vpop.f32.mrf.mxu0 }
 0x4ba   : > { %v9263_v61 = vpop.f32.mrf.mxu1 }
 0x4bb   : > { %v7567_v48 = vpop.eup %7566  ;;  %v3325_v59 = vmul.f32 1.442695, %v3239_v30  ;;  %v3327_v19 = vmul.f32 1.442695, %v3240_v34  ;;  %v3199_v28 = vmax.f32 %v9261_v26, %v9263_v61 }
 0x4bc   : > { %v7569_v27 = vpop.eup %7568  ;;  %4164 = vmatmul.bf16.gmra.mxu0 %v8935_v0 }
 0x4bd   : > { %7570 = vpow2.f32 %v3325_v59  ;;  %4253 = vmatmul.bf16.gmra.mxu1 %v8935_v0  ;;  %3200 = vmax.xlane.f32.xlu2 %v3199_v28  ;;  %v9269_v37 = vadd.f32 %v7569_v27, %v7567_v48 }
 0x4be   : > { %7572 = vpow2.f32 %v3327_v19 }
 0x4bf   : > { %10366 = vst [vmem:[#allocation32_spill] sm:$0xff] %v9269_v37 }
 0x4c0   : > { %v3159_v5 = vpop.xlane.xlu0 %3158 }
 0x4c1   : > { %v3241_v62 = vsub.f32 %v9119_v41, %v3159_v5  ;;  %v3242_v29 = vsub.f32 %v9121_v7, %v3159_v5  ;;  %v9273_v24 = vpop.f32.mrf.mxu0 }
 0x4c2   : > { %v9275_v17 = vpop.f32.mrf.mxu1 }
 0x4c3   : > { %v7571_v55 = vpop.eup %7570  ;;  %v3329_v47 = vmul.f32 1.442695, %v3241_v62  ;;  %v3331_v51 = vmul.f32 1.442695, %v3242_v29  ;;  %v3202_v59 = vmax.f32 %v9273_v24, %v9275_v17 }
 0x4c4   : > { %v7573_v0 = vpop.eup %7572  ;;  %v3515_v30 = vpack.c.bf16 %v7571_v55, %v7567_v48 }
 0x4c5   : > { %7574 = vpow2.f32 %v3329_v47  ;;  %3203 = vmax.xlane.f32.xlu0 %v3202_v59  ;;  %v3516_v34 = vpack.c.bf16 %v7573_v0, %v7569_v27  ;;  %v9279_v19 = vadd.f32 %v7573_v0, %v7571_v55 }
 0x4c6   : > { %7576 = vpow2.f32 %v3331_v51  ;;  %3698 = vmatmul.bf16.gmra.mxu2 %v3515_v30 }
 0x4c7   : > { %3787 = vmatmul.bf16.gmra.mxu3 %v3516_v34 }
 0x4c8   : > { %v3162_v41 = vpop.xlane.xlu1 %3161 }
 0x4c9   : > { %v3243_v7 = vsub.f32 %v9127_v10, %v3162_v41  ;;  %v3244_v28 = vsub.f32 %v9129_v18, %v3162_v41  ;;  %v9283_v5 = vpop.f32.mrf.mxu0 }
 0x4ca   : > { %v9285_v62 = vpop.f32.mrf.mxu1 }
 0x4cb   : > { %v7575_v29 = vpop.eup %7574  ;;  %v3333_v37 = vmul.f32 1.442695, %v3243_v7  ;;  %v3335_v48 = vmul.f32 1.442695, %v3244_v28  ;;  %v3205_v27 = vmax.f32 %v9283_v5, %v9285_v62 }
 0x4cc   : > { %v7577_v55 = vpop.eup %7576  ;;  %4169 = vmatmul.bf16.gmra.mxu0 %v8947_v12 }
 0x4cd   : > { %7578 = vpow2.f32 %v3333_v37  ;;  %4258 = vmatmul.bf16.gmra.mxu1 %v8947_v12  ;;  %3206 = vmax.xlane.f32.xlu1 %v3205_v27  ;;  %v9291_v10 = vadd.f32 %v7577_v55, %v7575_v29 }
 0x4ce   : > { %7580 = vpow2.f32 %v3335_v48 }
 0x4cf   : > { %10367 = vst [vmem:[#allocation33_spill] sm:$0xff] %v9291_v10 }
 0x4d0   : > { %v3165_v18 = vpop.xlane.xlu2 %3164 }
 0x4d1   : > { %v3245_v47 = vsub.f32 %v9133_v25, %v3165_v18  ;;  %v3246_v51 = vsub.f32 %v9135_v53, %v3165_v18  ;;  %v9295_v59 = vpop.f32.mrf.mxu0 }
 0x4d2   : > { %v9297_v0 = vpop.f32.mrf.mxu1 }
 0x4d3   : > { %v7579_v30 = vpop.eup %7578  ;;  %v3337_v34 = vmul.f32 1.442695, %v3245_v47  ;;  %v3339_v41 = vmul.f32 1.442695, %v3246_v51  ;;  %v3208_v37 = vmax.f32 %v9295_v59, %v9297_v0 }
 0x4d4   : > { %v7581_v12 = vpop.eup %7580  ;;  %v3517_v7 = vpack.c.bf16 %v7579_v30, %v7575_v29 }
 0x4d5   : > { %7582 = vpow2.f32 %v3337_v34  ;;  %3209 = vmax.xlane.f32.xlu2 %v3208_v37  ;;  %v3518_v28 = vpack.c.bf16 %v7581_v12, %v7577_v55  ;;  %v9301_v48 = vadd.f32 %v7581_v12, %v7579_v30 }
 0x4d6   : > { %7584 = vpow2.f32 %v3339_v41  ;;  %3703 = vmatmul.bf16.gmra.mxu2 %v3517_v7 }
 0x4d7   : > { %10368 = vst [vmem:[#allocation34_spill] sm:$0xff] %v9301_v48  ;;  %3792 = vmatmul.bf16.gmra.mxu3 %v3518_v28 }
 0x4d8   : > { %v3168_v25 = vpop.xlane.xlu0 %3167 }
 0x4d9   : > { %v3247_v53 = vsub.f32 %v9143_v35, %v3168_v25  ;;  %v3248_v27 = vsub.f32 %v9145_v16, %v3168_v25  ;;  %v9305_v18 = vpop.f32.mrf.mxu0 }
 0x4da   : > { %v9307_v47 = vpop.f32.mrf.mxu1 }
 0x4db   : > { %v7583_v51 = vpop.eup %7582  ;;  %v3341_v10 = vmul.f32 1.442695, %v3247_v53  ;;  %v3343_v29 = vmul.f32 1.442695, %v3248_v27  ;;  %v3211_v55 = vmax.f32 %v9305_v18, %v9307_v47 }
 0x4dc   : > { %v7585_v30 = vpop.eup %7584  ;;  %4174 = vmatmul.bf16.gmra.mxu0 %v8957_v3 }
 0x4dd   : > { %7586 = vpow2.f32 %v3341_v10  ;;  %4263 = vmatmul.bf16.gmra.mxu1 %v8957_v3  ;;  %3212 = vmax.xlane.f32.xlu0 %v3211_v55  ;;  %v9313_v35 = vadd.f32 %v7585_v30, %v7583_v51 }
 0x4de   : > { %7588 = vpow2.f32 %v3343_v29 }
 0x4df   : > { %10369 = vst [vmem:[#allocation35_spill] sm:$0xff] %v9313_v35 }
 0x4e0   : > { %v3171_v16 = vpop.xlane.xlu1 %3170 }
 0x4e1   : > { %v3249_v34 = vsub.f32 %v9151_v43, %v3171_v16  ;;  %v3250_v41 = vsub.f32 %v9153_v57, %v3171_v16  ;;  %v9317_v37 = vpop.f32.mrf.mxu0 }
 0x4e2   : > { %v9319_v12 = vpop.f32.mrf.mxu1 }
 0x4e3   : > { %v7587_v7 = vpop.eup %7586  ;;  %v3345_v28 = vmul.f32 1.442695, %v3249_v34  ;;  %v3347_v25 = vmul.f32 1.442695, %v3250_v41  ;;  %v3214_v10 = vmax.f32 %v9317_v37, %v9319_v12 }
 0x4e4   : > { %v7589_v3 = vpop.eup %7588  ;;  %v3519_v53 = vpack.c.bf16 %v7587_v7, %v7583_v51 }
 0x4e5   : > { %7590 = vpow2.f32 %v3345_v28  ;;  %3215 = vmax.xlane.f32.xlu1 %v3214_v10  ;;  %v3520_v27 = vpack.c.bf16 %v7589_v3, %v7585_v30  ;;  %v9323_v29 = vadd.f32 %v7589_v3, %v7587_v7 }
 0x4e6   : > { %7592 = vpow2.f32 %v3347_v25  ;;  %3708 = vmatmul.bf16.gmra.mxu2 %v3519_v53 }
 0x4e7   : > { %10370 = vst [vmem:[#allocation36_spill] sm:$0xff] %v9323_v29  ;;  %3797 = vmatmul.bf16.gmra.mxu3 %v3520_v27 }
 0x4e8   : > { %v3174_v43 = vpop.xlane.xlu2 %3173 }
 0x4e9   : > { %v3251_v57 = vsub.f32 %v9163_v38, %v3174_v43  ;;  %v3252_v55 = vsub.f32 %v9165_v63, %v3174_v43  ;;  %v9327_v16 = vpop.f32.mrf.mxu0 }
 0x4ea   : > { %v9329_v34 = vpop.f32.mrf.mxu1 }
 0x4eb   : > { %v7591_v41 = vpop.eup %7590  ;;  %v3349_v35 = vmul.f32 1.442695, %v3251_v57  ;;  %v3351_v51 = vmul.f32 1.442695, %v3252_v55  ;;  %v4309_v30 = vmax.f32 %v9327_v16, %v9329_v34 }
 0x4ec   : > { %v7593_v7 = vpop.eup %7592  ;;  %4179 = vmatmul.bf16.gmra.mxu0 %v8967_v36 }
 0x4ed   : > { %7594 = vpow2.f32 %v3349_v35  ;;  %4268 = vmatmul.bf16.gmra.mxu1 %v8967_v36  ;;  %4310 = vmax.xlane.f32.xlu2 %v4309_v30  ;;  %v9335_v38 = vadd.f32 %v7593_v7, %v7591_v41 }
 0x4ee   : > { %7596 = vpow2.f32 %v3351_v51 }
 0x4ef   : > { %10371 = vst [vmem:[#allocation37_spill] sm:$0xff] %v9335_v38 }
 0x4f0   : > { %v3177_v63 = vpop.xlane.xlu0 %3176 }
 0x4f1   : > { %v3253_v28 = vsub.f32 %v9173_v39, %v3177_v63  ;;  %v3254_v25 = vsub.f32 %v9175_v11, %v3177_v63  ;;  %v9339_v10 = vpop.f32.mrf.mxu0 }
 0x4f2   : > { %v9341_v3 = vpop.f32.mrf.mxu1 }
 0x4f3   : > { %v7595_v53 = vpop.eup %7594  ;;  %v3353_v27 = vmul.f32 1.442695, %v3253_v28  ;;  %v3355_v43 = vmul.f32 1.442695, %v3254_v25  ;;  %v4312_v35 = vmax.f32 %v9339_v10, %v9341_v3 }
 0x4f4   : > { %v7597_v36 = vpop.eup %7596  ;;  %v3521_v57 = vpack.c.bf16 %v7595_v53, %v7591_v41 }
 0x4f5   : > { %7598 = vpow2.f32 %v3353_v27  ;;  %4313 = vmax.xlane.f32.xlu0 %v4312_v35  ;;  %v3522_v55 = vpack.c.bf16 %v7597_v36, %v7593_v7  ;;  %v9345_v51 = vadd.f32 %v7597_v36, %v7595_v53 }
 0x4f6   : > { %7600 = vpow2.f32 %v3355_v43  ;;  %3713 = vmatmul.bf16.gmra.mxu2 %v3521_v57 }
 0x4f7   : > { %10372 = vst [vmem:[#allocation38_spill] sm:$0xff] %v9345_v51  ;;  %3802 = vmatmul.bf16.gmra.mxu3 %v3522_v55 }
 0x4f8   : > { %v3180_v39 = vpop.xlane.xlu1 %3179 }
 0x4f9   : > { %v3255_v11 = vsub.f32 %v9185_v21, %v3180_v39  ;;  %v3256_v30 = vsub.f32 %v9187_v23, %v3180_v39  ;;  %v3674_v63 = vpop.f32.mrf.mxu2  ;;  %v9349_v28 = vpop.f32.mrf.mxu0 }
 0x4fa   : > { %v3763_v25 = vpop.f32.mrf.mxu3  ;;  %v9351_v38 = vpop.f32.mrf.mxu1 }
 0x4fb   : > { %v7599_v41 = vpop.eup %7598  ;;  %v3357_v27 = vmul.f32 1.442695, %v3255_v11  ;;  %v3359_v35 = vmul.f32 1.442695, %v3256_v30  ;;  %v9353_v7 = vadd.f32 %v3763_v25, %v3674_v63  ;;  %v4315_v53 = vmax.f32 %v9349_v28, %v9351_v38 }
 0x4fc   : > { %v7601_v43 = vpop.eup %7600  ;;  %4184 = vmatmul.bf16.gmra.mxu0 %v8977_v2 }
 0x4fd   : > { %10373 = vst [vmem:[#allocation39_spill] sm:$0xff] %v9353_v7  ;;  %7602 = vpow2.f32 %v3357_v27  ;;  %4273 = vmatmul.bf16.gmra.mxu1 %v8977_v2  ;;  %4316 = vmax.xlane.f32.xlu1 %v4315_v53  ;;  %v9359_v21 = vadd.f32 %v7601_v43, %v7599_v41 }
 0x4fe   : > { %7604 = vpow2.f32 %v3359_v35 }
 0x4ff   : > { %10374 = vst [vmem:[#allocation40_spill] sm:$0xff] %v9359_v21 }
 0x500   : > { %v3183_v23 = vpop.xlane.xlu2 %3182 }
 0x501   : > { %v3257_v36 = vsub.f32 %v9195_v50, %v3183_v23  ;;  %v3258_v57 = vsub.f32 %v9197_v33, %v3183_v23  ;;  %v3676_v55 = vpop.f32.mrf.mxu2  ;;  %v9363_v39 = vpop.f32.mrf.mxu0 }
 0x502   : > { %v3765_v11 = vpop.f32.mrf.mxu3  ;;  %v9365_v30 = vpop.f32.mrf.mxu1 }
 0x503   : > { %v7603_v63 = vpop.eup %7602  ;;  %v3361_v25 = vmul.f32 1.442695, %v3257_v36  ;;  %v3363_v27 = vmul.f32 1.442695, %v3258_v57  ;;  %v9367_v7 = vadd.f32 %v3765_v11, %v3676_v55  ;;  %v4318_v2 = vmax.f32 %v9363_v39, %v9365_v30 }
 0x504   : > { %v7605_v35 = vpop.eup %7604  ;;  %v3523_v53 = vpack.c.bf16 %v7603_v63, %v7599_v41 }
 0x505   : > { %10375 = vst [vmem:[#allocation41_spill] sm:$0xff] %v9367_v7  ;;  %7606 = vpow2.f32 %v3361_v25  ;;  %4319 = vmax.xlane.f32.xlu2 %v4318_v2  ;;  %v3524_v50 = vpack.c.bf16 %v7605_v35, %v7601_v43  ;;  %v9371_v33 = vadd.f32 %v7605_v35, %v7603_v63 }
 0x506   : > { %7608 = vpow2.f32 %v3363_v27  ;;  %3718 = vmatmul.bf16.gmra.mxu2 %v3523_v53 }
 0x507   : > { %10376 = vst [vmem:[#allocation42_spill] sm:$0xff] %v9371_v33  ;;  %3807 = vmatmul.bf16.gmra.mxu3 %v3524_v50  ;;  %v7407_v33 = vld [vmem:[#allocation13 + $0xd4] sm:$0xf] }
 0x508   : > { %v3186_v23 = vpop.xlane.xlu0 %3185 }
 0x509   : > { %v3259_v21 = vsub.f32 %v9207_v42, %v3186_v23  ;;  %v3260_v36 = vsub.f32 %v9209_v56, %v3186_v23  ;;  %v3679_v57 = vpop.f32.mrf.mxu2  ;;  %v9375_v55 = vpop.f32.mrf.mxu0 }
 0x50a   : > { %v3768_v11 = vpop.f32.mrf.mxu3  ;;  %v9377_v7 = vpop.f32.mrf.mxu1 }
 0x50b   : > { %v7607_v41 = vpop.eup %7606  ;;  %v3365_v25 = vmul.f32 1.442695, %v3259_v21  ;;  %v3367_v2 = vmul.f32 1.442695, %v3260_v36  ;;  %v9379_v43 = vadd.f32 %v3768_v11, %v3679_v57  ;;  %v4321_v63 = vmax.f32 %v9375_v55, %v9377_v7 }
 0x50c   : > { %v7609_v27 = vpop.eup %7608  ;;  %4189 = vmatmul.bf16.gmra.mxu0 %v8987_v14 }
 0x50d   : > { %10377 = vst [vmem:[#allocation43_spill] sm:$0xff] %v9379_v43  ;;  %7610 = vpow2.f32 %v3365_v25  ;;  %4278 = vmatmul.bf16.gmra.mxu1 %v8987_v14  ;;  %4322 = vmax.xlane.f32.xlu0 %v4321_v63  ;;  %v9385_v42 = vadd.f32 %v7609_v27, %v7607_v41 }
 0x50e   : > { %7612 = vpow2.f32 %v3367_v2 }
 0x50f   : > { %10378 = vst [vmem:[#allocation44_spill] sm:$0xff] %v9385_v42 }
 0x510   : > { %v3189_v56 = vpop.xlane.xlu1 %3188 }
 0x511   : > { %v3261_v35 = vsub.f32 %v9217_v40, %v3189_v56  ;;  %v3262_v21 = vsub.f32 %v9219_v44, %v3189_v56  ;;  %v3681_v53 = vpop.f32.mrf.mxu2  ;;  %v9389_v50 = vpop.f32.mrf.mxu0 }
 0x512   : > { %v3770_v23 = vpop.f32.mrf.mxu3  ;;  %v9391_v36 = vpop.f32.mrf.mxu1 }
 0x513   : > { %v7611_v57 = vpop.eup %7610  ;;  %v3369_v11 = vmul.f32 1.442695, %v3261_v35  ;;  %v3371_v25 = vmul.f32 1.442695, %v3262_v21  ;;  %v9393_v43 = vadd.f32 %v3770_v23, %v3681_v53  ;;  %v4324_v14 = vmax.f32 %v9389_v50, %v9391_v36 }
 0x514   : > { %v7613_v2 = vpop.eup %7612  ;;  %v3525_v63 = vpack.c.bf16 %v7611_v57, %v7607_v41 }
 0x515   : > { %10379 = vst [vmem:[#allocation45_spill] sm:$0xff] %v9393_v43  ;;  %7614 = vpow2.f32 %v3369_v11  ;;  %4325 = vmax.xlane.f32.xlu1 %v4324_v14  ;;  %v3526_v40 = vpack.c.bf16 %v7613_v2, %v7609_v27  ;;  %v9397_v44 = vadd.f32 %v7613_v2, %v7611_v57 }
 0x516   : > { %7616 = vpow2.f32 %v3371_v25  ;;  %3723 = vmatmul.bf16.gmra.mxu2 %v3525_v63 }
 0x517   : > { %10380 = vst [vmem:[#allocation46_spill] sm:$0xff] %v9397_v44  ;;  %3812 = vmatmul.bf16.gmra.mxu3 %v3526_v40 }
 0x518   : > { %v3192_v56 = vpop.xlane.xlu2 %3191 }
 0x519   : > { %v3263_v42 = vsub.f32 %v9229_v20, %v3192_v56  ;;  %v3264_v35 = vsub.f32 %v9231_v13, %v3192_v56  ;;  %v3684_v21 = vpop.f32.mrf.mxu2  ;;  %v9401_v53 = vpop.f32.mrf.mxu0 }
 0x51a   : > { %v3773_v23 = vpop.f32.mrf.mxu3  ;;  %v9403_v43 = vpop.f32.mrf.mxu1 }
 0x51b   : > { %v7615_v41 = vpop.eup %7614  ;;  %v3373_v11 = vmul.f32 1.442695, %v3263_v42  ;;  %v3375_v14 = vmul.f32 1.442695, %v3264_v35  ;;  %v9405_v27 = vadd.f32 %v3773_v23, %v3684_v21  ;;  %v4327_v57 = vmax.f32 %v9401_v53, %v9403_v43 }
 0x51c   : > { %v7617_v25 = vpop.eup %7616  ;;  %4194 = vmatmul.bf16.gmra.mxu0 %v8997_v6 }
 0x51d   : > { %10381 = vst [vmem:[#allocation47_spill] sm:$0xff] %v9405_v27  ;;  %7618 = vpow2.f32 %v3373_v11  ;;  %4283 = vmatmul.bf16.gmra.mxu1 %v8997_v6  ;;  %4328 = vmax.xlane.f32.xlu2 %v4327_v57  ;;  %v9411_v20 = vadd.f32 %v7617_v25, %v7615_v41 }
 0x51e   : > { %7620 = vpow2.f32 %v3375_v14 }
 0x51f   : > { %10382 = vst [vmem:[#allocation48_spill] sm:$0xff] %v9411_v20 }
 0x520   : > { %v3195_v13 = vpop.xlane.xlu0 %3194 }
 0x521   : > { %v3265_v2 = vsub.f32 %v9239_v49, %v3195_v13  ;;  %v3266_v42 = vsub.f32 %v9241_v45, %v3195_v13  ;;  %v3686_v63 = vpop.f32.mrf.mxu2  ;;  %v9415_v40 = vpop.f32.mrf.mxu0 }
 0x522   : > { %v3775_v56 = vpop.f32.mrf.mxu3  ;;  %v9417_v35 = vpop.f32.mrf.mxu1 }
 0x523   : > { %v7619_v21 = vpop.eup %7618  ;;  %v3377_v23 = vmul.f32 1.442695, %v3265_v2  ;;  %v3379_v11 = vmul.f32 1.442695, %v3266_v42  ;;  %v9419_v27 = vadd.f32 %v3775_v56, %v3686_v63  ;;  %v4330_v6 = vmax.f32 %v9415_v40, %v9417_v35 }
 0x524   : > { %v7621_v14 = vpop.eup %7620  ;;  %v3527_v57 = vpack.c.bf16 %v7619_v21, %v7615_v41 }
 0x525   : > { %10383 = vst [vmem:[#allocation49_spill] sm:$0xff] %v9419_v27  ;;  %7622 = vpow2.f32 %v3377_v23  ;;  %4331 = vmax.xlane.f32.xlu0 %v4330_v6  ;;  %v3528_v49 = vpack.c.bf16 %v7621_v14, %v7617_v25  ;;  %v9423_v45 = vadd.f32 %v7621_v14, %v7619_v21 }
 0x526   : > { %7624 = vpow2.f32 %v3379_v11  ;;  %3728 = vmatmul.bf16.gmra.mxu2 %v3527_v57 }
 0x527   : > { %10384 = vst [vmem:[#allocation50_spill] sm:$0xff] %v9423_v45  ;;  %3817 = vmatmul.bf16.gmra.mxu3 %v3528_v49 }
 0x528   : > { %v3198_v13 = vpop.xlane.xlu1 %3197 }
 0x529   : > { %v3267_v20 = vsub.f32 %v9251_v1, %v3198_v13  ;;  %v3268_v2 = vsub.f32 %v9253_v52, %v3198_v13  ;;  %v3689_v42 = vpop.f32.mrf.mxu2  ;;  %v9427_v63 = vpop.f32.mrf.mxu0 }
 0x52a   : > { %v3778_v56 = vpop.f32.mrf.mxu3  ;;  %v9429_v27 = vpop.f32.mrf.mxu1 }
 0x52b   : > { %v7623_v41 = vpop.eup %7622  ;;  %v3381_v23 = vmul.f32 1.442695, %v3267_v20  ;;  %v3383_v6 = vmul.f32 1.442695, %v3268_v2  ;;  %v9431_v25 = vadd.f32 %v3778_v56, %v3689_v42  ;;  %v4333_v21 = vmax.f32 %v9427_v63, %v9429_v27 }
 0x52c   : > { %v7625_v11 = vpop.eup %7624  ;;  %4199 = vmatmul.bf16.gmra.mxu0 %v9007_v31 }
 0x52d   : > { %10385 = vst [vmem:[#allocation51_spill] sm:$0xff] %v9431_v25  ;;  %7626 = vpow2.f32 %v3381_v23  ;;  %4288 = vmatmul.bf16.gmra.mxu1 %v9007_v31  ;;  %4334 = vmax.xlane.f32.xlu1 %v4333_v21  ;;  %v9437_v1 = vadd.f32 %v7625_v11, %v7623_v41 }
 0x52e   : > { %7628 = vpow2.f32 %v3383_v6 }
 0x52f   : > { %10386 = vst [vmem:[#allocation52_spill] sm:$0xff] %v9437_v1 }
 0x530   : > { %v3201_v52 = vpop.xlane.xlu2 %3200 }
 0x531   : > { %v3269_v14 = vsub.f32 %v9261_v26, %v3201_v52  ;;  %v3270_v20 = vsub.f32 %v9263_v61, %v3201_v52  ;;  %v3691_v57 = vpop.f32.mrf.mxu2  ;;  %v9441_v49 = vpop.f32.mrf.mxu0 }
 0x532   : > { %v3780_v13 = vpop.f32.mrf.mxu3  ;;  %v9443_v2 = vpop.f32.mrf.mxu1 }
 0x533   : > { %v7627_v42 = vpop.eup %7626  ;;  %v3385_v56 = vmul.f32 1.442695, %v3269_v14  ;;  %v3387_v23 = vmul.f32 1.442695, %v3270_v20  ;;  %v9445_v25 = vadd.f32 %v3780_v13, %v3691_v57  ;;  %v4336_v31 = vmax.f32 %v9441_v49, %v9443_v2 }
 0x534   : > { %v7629_v6 = vpop.eup %7628  ;;  %v3529_v21 = vpack.c.bf16 %v7627_v42, %v7623_v41 }
 0x535   : > { %10387 = vst [vmem:[#allocation53_spill] sm:$0xff] %v9445_v25  ;;  %7630 = vpow2.f32 %v3385_v56  ;;  %4337 = vmax.xlane.f32.xlu2 %v4336_v31  ;;  %v3530_v26 = vpack.c.bf16 %v7629_v6, %v7625_v11  ;;  %v9449_v61 = vadd.f32 %v7629_v6, %v7627_v42 }
 0x536   : > { %7632 = vpow2.f32 %v3387_v23  ;;  %3733 = vmatmul.bf16.gmra.mxu2 %v3529_v21 }
 0x537   : > { %10388 = vst [vmem:[#allocation54_spill] sm:$0xff] %v9449_v61  ;;  %3822 = vmatmul.bf16.gmra.mxu3 %v3530_v26 }
 0x538   : > { %v3204_v52 = vpop.xlane.xlu0 %3203 }
 0x539   : > { %v3271_v1 = vsub.f32 %v9273_v24, %v3204_v52  ;;  %v3272_v14 = vsub.f32 %v9275_v17, %v3204_v52  ;;  %v3694_v20 = vpop.f32.mrf.mxu2  ;;  %v9453_v57 = vpop.f32.mrf.mxu0 }
 0x53a   : > { %v3783_v13 = vpop.f32.mrf.mxu3  ;;  %v9455_v25 = vpop.f32.mrf.mxu1 }
 0x53b   : > { %v7631_v41 = vpop.eup %7630  ;;  %v3389_v56 = vmul.f32 1.442695, %v3271_v1  ;;  %v3391_v31 = vmul.f32 1.442695, %v3272_v14  ;;  %v9457_v11 = vadd.f32 %v3783_v13, %v3694_v20  ;;  %v4339_v42 = vmax.f32 %v9453_v57, %v9455_v25 }
 0x53c   : > { %v7633_v23 = vpop.eup %7632  ;;  %4204 = vmatmul.bf16.gmra.mxu0 %v9017_v46 }
 0x53d   : > { %10389 = vst [vmem:[#allocation55_spill] sm:$0xff] %v9457_v11  ;;  %7634 = vpow2.f32 %v3389_v56  ;;  %4293 = vmatmul.bf16.gmra.mxu1 %v9017_v46  ;;  %4340 = vmax.xlane.f32.xlu0 %v4339_v42  ;;  %v9463_v24 = vadd.f32 %v7633_v23, %v7631_v41 }
 0x53e   : > { %7636 = vpow2.f32 %v3391_v31 }
 0x53f   : > { %10390 = vst [vmem:[#allocation56_spill] sm:$0xff] %v9463_v24 }
 0x540   : > { %v3207_v17 = vpop.xlane.xlu1 %3206 }
 0x541   : > { %v3273_v6 = vsub.f32 %v9283_v5, %v3207_v17  ;;  %v3274_v1 = vsub.f32 %v9285_v62, %v3207_v17  ;;  %v3696_v21 = vpop.f32.mrf.mxu2  ;;  %v9467_v26 = vpop.f32.mrf.mxu0 }
 0x542   : > { %v3785_v52 = vpop.f32.mrf.mxu3  ;;  %v9469_v14 = vpop.f32.mrf.mxu1 }
 0x543   : > { %v7635_v20 = vpop.eup %7634  ;;  %v3393_v13 = vmul.f32 1.442695, %v3273_v6  ;;  %v3395_v56 = vmul.f32 1.442695, %v3274_v1  ;;  %v9471_v11 = vadd.f32 %v3785_v52, %v3696_v21  ;;  %v4342_v46 = vmax.f32 %v9467_v26, %v9469_v14 }
 0x544   : > { %v7637_v31 = vpop.eup %7636  ;;  %v3531_v42 = vpack.c.bf16 %v7635_v20, %v7631_v41 }
 0x545   : > { %10391 = vst [vmem:[#allocation57_spill] sm:$0xff] %v9471_v11  ;;  %7638 = vpow2.f32 %v3393_v13  ;;  %4343 = vmax.xlane.f32.xlu1 %v4342_v46  ;;  %v3532_v5 = vpack.c.bf16 %v7637_v31, %v7633_v23  ;;  %v9475_v62 = vadd.f32 %v7637_v31, %v7635_v20 }
 0x546   : > { %7640 = vpow2.f32 %v3395_v56  ;;  %3738 = vmatmul.bf16.gmra.mxu2 %v3531_v42 }
 0x547   : > { %10392 = vst [vmem:[#allocation58_spill] sm:$0xff] %v9475_v62  ;;  %3827 = vmatmul.bf16.gmra.mxu3 %v3532_v5  ;;  %v7411_v62 = vld [vmem:[#allocation13 + $0xf4] sm:$0xf] }
 0x548   : > { %v3210_v17 = vpop.xlane.xlu2 %3209 }
 0x549   : > { %v3275_v24 = vsub.f32 %v9295_v59, %v3210_v17  ;;  %v3276_v6 = vsub.f32 %v9297_v0, %v3210_v17  ;;  %v3699_v1 = vpop.f32.mrf.mxu2  ;;  %v9479_v21 = vpop.f32.mrf.mxu0 }
 0x54a   : > { %v3788_v52 = vpop.f32.mrf.mxu3  ;;  %v9481_v11 = vpop.f32.mrf.mxu1 }
 0x54b   : > { %v7639_v41 = vpop.eup %7638  ;;  %v3397_v13 = vmul.f32 1.442695, %v3275_v24  ;;  %v3399_v46 = vmul.f32 1.442695, %v3276_v6  ;;  %v9483_v23 = vadd.f32 %v3788_v52, %v3699_v1  ;;  %v4345_v20 = vmax.f32 %v9479_v21, %v9481_v11 }
 0x54c   : > { %v7641_v56 = vpop.eup %7640  ;;  %4209 = vmatmul.bf16.gmra.mxu0 %v9027_v9 }
 0x54d   : > { %10393 = vst [vmem:[#allocation59_spill] sm:$0xff] %v9483_v23  ;;  %7642 = vpow2.f32 %v3397_v13  ;;  %4298 = vmatmul.bf16.gmra.mxu1 %v9027_v9  ;;  %4346 = vmax.xlane.f32.xlu2 %v4345_v20  ;;  %v9489_v59 = vadd.f32 %v7641_v56, %v7639_v41 }
 0x54e   : > { %7644 = vpow2.f32 %v3399_v46 }
 0x54f   : > { %10394 = vst [vmem:[#allocation60_spill] sm:$0xff] %v9489_v59  ;;  %v7082_v59 = vld [vmem:[#allocation13 + $0x78] sm:$0xf0] }
 0x550   : > { %v3213_v0 = vpop.xlane.xlu0 %3212 }
 0x551   : > { %v3277_v31 = vsub.f32 %v9305_v18, %v3213_v0  ;;  %v3278_v24 = vsub.f32 %v9307_v47, %v3213_v0  ;;  %v3701_v42 = vpop.f32.mrf.mxu2  ;;  %v9493_v5 = vpop.f32.mrf.mxu0  ;;  %v7395_v0 = vld [vmem:[#allocation13 + $0x74] sm:$0xf] }
 0x552   : > { %v3790_v17 = vpop.f32.mrf.mxu3  ;;  %v9495_v6 = vpop.f32.mrf.mxu1 }
 0x553   : > { %v7643_v1 = vpop.eup %7642  ;;  %v3401_v52 = vmul.f32 1.442695, %v3277_v31  ;;  %v3403_v13 = vmul.f32 1.442695, %v3278_v24  ;;  %v9497_v23 = vadd.f32 %v3790_v17, %v3701_v42  ;;  %v4348_v9 = vmax.f32 %v9493_v5, %v9495_v6  ;;  %v7146_v42 = vld [vmem:[#allocation13 + $0xf8] sm:$0xf0] }
 0x554   : > { %v7645_v46 = vpop.eup %7644  ;;  %v3533_v20 = vpack.c.bf16 %v7643_v1, %v7639_v41  ;;  %v7085_v24 = vor.u32 %v7395_v0, %v7082_v59  ;;  %v7144_v0 = vld [vmem:[#allocation13 + $0xf0] sm:$0xf] }
 0x555   : > { %10395 = vst [vmem:[#allocation61_spill] sm:$0xff] %v9497_v23  ;;  %7646 = vpow2.f32 %v3401_v52  ;;  %4349 = vmax.xlane.f32.xlu0 %v4348_v9  ;;  %v3534_v18 = vpack.c.bf16 %v7645_v46, %v7641_v56  ;;  %v9501_v47 = vadd.f32 %v7645_v46, %v7643_v1  ;;  %v7149_v52 = vor.u32 %v7411_v62, %v7146_v42  ;;  %v7080_v62 = vld [vmem:[#allocation13 + $0x70] sm:$0xf] }
 0x556   : > { %7648 = vpow2.f32 %v3403_v13  ;;  %3743 = vmatmul.bf16.gmra.mxu2 %v3533_v20 }
 0x557   : > { %10396 = vst [vmem:[#allocation62_spill] sm:$0xff] %v9501_v47  ;;  %3832 = vmatmul.bf16.gmra.mxu3 %v3534_v18  ;;  %5695 = vmatpush.bf16.msrb.mxu2 %v7085_v24  ;;  %v7396_v18 = vld [vmem:[#allocation13 + $0x74] sm:$0xf0] }
 0x558   : > { %v3216_v31 = vpop.xlane.xlu1 %3215  ;;  %5784 = vmatpush.bf16.msrb.mxu3 %v7149_v52 }
 0x559   : > { %v3279_v17 = vsub.f32 %v9317_v37, %v3216_v31  ;;  %v3280_v23 = vsub.f32 %v9319_v12, %v3216_v31  ;;  %v3704_v61 = vpop.f32.mrf.mxu2  ;;  %v9505_v41 = vpop.f32.mrf.mxu0 }
 0x55a   : > { %v3793_v56 = vpop.f32.mrf.mxu3  ;;  %v9507_v1 = vpop.f32.mrf.mxu1 }
 0x55b   : > { %v7647_v13 = vpop.eup %7646  ;;  %v3405_v9 = vmul.f32 1.442695, %v3279_v17  ;;  %v3407_v46 = vmul.f32 1.442695, %v3280_v23  ;;  %v9509_v20 = vadd.f32 %v3793_v56, %v3704_v61  ;;  %v4351_v59 = vmax.f32 %v9505_v41, %v9507_v1  ;;  %v7412_v61 = vld [vmem:[#allocation13 + $0xf4] sm:$0xf0] }
 0x55c   : > { %v7649_v37 = vpop.eup %7648  ;;  %4214 = vmatmul.bf16.gmra.mxu0 %v9045_v4  ;;  %v7081_v23 = vor.u32 %v7396_v18, %v7080_v62  ;;  %v7145_v24 = vor.u32 %v7412_v61, %v7144_v0 }
 0x55d   : > { %10397 = vst [vmem:[#allocation63_spill] sm:$0xff] %v9509_v20  ;;  %7650 = vpow2.f32 %v3405_v9  ;;  %4303 = vmatmul.bf16.gmra.mxu1 %v9045_v4  ;;  %4352 = vmax.xlane.f32.xlu1 %v4351_v59  ;;  %v9515_v12 = vadd.f32 %v7649_v37, %v7647_v13 }
 0x55e   : > { %7652 = vpow2.f32 %v3407_v46  ;;  %5517 = vmatpush.bf16.msrb.mxu0 %v7081_v23  ;;  %5606 = vmatpush.bf16.msrb.mxu1 %v7145_v24 }
 0x55f   : > { %10398 = vst [vmem:[#allocation64_spill] sm:$0xff] %v9515_v12 }
 0x560   : > { %v4311_v31 = vpop.xlane.xlu2 %4310 }
 0x561   : > { %v4405_v42 = vsub.f32 %v9327_v16, %v4311_v31  ;;  %v4406_v17 = vsub.f32 %v9329_v34, %v4311_v31  ;;  %v3706_v52 = vpop.f32.mrf.mxu2  ;;  %v9519_v56 = vpop.f32.mrf.mxu0 }
 0x562   : > { %v3795_v4 = vpop.f32.mrf.mxu3  ;;  %v9521_v9 = vpop.f32.mrf.mxu1 }
 0x563   : > { %v7651_v46 = vpop.eup %7650  ;;  %v4469_v59 = vmul.f32 1.442695, %v4405_v42  ;;  %v4471_v20 = vmul.f32 1.442695, %v4406_v17  ;;  %v9523_v12 = vadd.f32 %v3795_v4, %v3706_v52  ;;  %v4354_v62 = vmax.f32 %v9519_v56, %v9521_v9 }
 0x564   : > { %v7653_v18 = vpop.eup %7652  ;;  %v3535_v16 = vpack.c.bf16 %v7651_v46, %v7647_v13 }
 0x565   : > { %10399 = vst [vmem:[#allocation65_spill] sm:$0xff] %v9523_v12  ;;  %7654 = vpow2.f32 %v4469_v59  ;;  %4355 = vmax.xlane.f32.xlu2 %v4354_v62  ;;  %v3536_v34 = vpack.c.bf16 %v7653_v18, %v7649_v37  ;;  %v9527_v0 = vadd.f32 %v7653_v18, %v7651_v46 }
 0x566   : > { %7656 = vpow2.f32 %v4471_v20  ;;  %3748 = vmatmul.bf16.gmra.mxu2 %v3535_v16 }
 0x567   : > { %10400 = vst [vmem:[#allocation66_spill] sm:$0xff] %v9527_v0  ;;  %3837 = vmatmul.bf16.gmra.mxu3 %v3536_v34  ;;  %v7409_v0 = vld [vmem:[#allocation13 + $0xe4] sm:$0xf] }
 0x568   : > { %v4314_v23 = vpop.xlane.xlu0 %4313 }
 0x569   : > { %v4407_v61 = vsub.f32 %v9339_v10, %v4314_v23  ;;  %v4408_v31 = vsub.f32 %v9341_v3, %v4314_v23  ;;  %v3709_v24 = vpop.f32.mrf.mxu2  ;;  %v9531_v42 = vpop.f32.mrf.mxu0 }
 0x56a   : > { %v3798_v17 = vpop.f32.mrf.mxu3  ;;  %v9533_v52 = vpop.f32.mrf.mxu1 }
 0x56b   : > { %v7655_v13 = vpop.eup %7654  ;;  %v4473_v4 = vmul.f32 1.442695, %v4407_v61  ;;  %v4475_v59 = vmul.f32 1.442695, %v4408_v31  ;;  %v9535_v37 = vadd.f32 %v3798_v17, %v3709_v24  ;;  %v4357_v20 = vmax.f32 %v9531_v42, %v9533_v52 }
 0x56c   : > { %v7657_v46 = vpop.eup %7656 }
 0x56d   : > { %10401 = vst [vmem:[#allocation67_spill] sm:$0xff] %v9535_v37  ;;  %7658 = vpow2.f32 %v4473_v4  ;;  %4358 = vmax.xlane.f32.xlu0 %v4357_v20  ;;  %v9539_v10 = vadd.f32 %v7657_v46, %v7655_v13 }
 0x56e   : > { %7660 = vpow2.f32 %v4475_v59 }
 0x570   : > { %v4317_v3 = vpop.xlane.xlu1 %4316 }
 0x571   : > { %v4409_v62 = vsub.f32 %v9349_v28, %v4317_v3  ;;  %v4410_v18 = vsub.f32 %v9351_v38, %v4317_v3  ;;  %v3711_v16 = vpop.f32.mrf.mxu2  ;;  %v9543_v34 = vpop.f32.mrf.mxu0  ;;  %v7393_v28 = vld [vmem:[#allocation13 + $0x64] sm:$0xf]  ;;  %v7074_v3 = vld [vmem:[#allocation13 + $0x68] sm:$0xf0] }
 0x572   : > { %v3800_v23 = vpop.f32.mrf.mxu3  ;;  %v9545_v61 = vpop.f32.mrf.mxu1 }
 0x573   : > { %v7659_v31 = vpop.eup %7658  ;;  %v4477_v24 = vmul.f32 1.442695, %v4409_v62  ;;  %v4479_v17 = vmul.f32 1.442695, %v4410_v18  ;;  %v9547_v37 = vadd.f32 %v3800_v23, %v3711_v16  ;;  %v4360_v4 = vmax.f32 %v9543_v34, %v9545_v61  ;;  %v7138_v16 = vld [vmem:[#allocation13 + $0xe8] sm:$0xf0] }
 0x574   : > { %v7661_v59 = vpop.eup %7660  ;;  %v4693_v20 = vpack.c.bf16 %v7659_v31, %v7655_v13  ;;  %v7077_v18 = vor.u32 %v7393_v28, %v7074_v3  ;;  %v7394_v28 = vld [vmem:[#allocation13 + $0x64] sm:$0xf0]  ;;  %v7136_v3 = vld [vmem:[#allocation13 + $0xe0] sm:$0xf] }
 0x575   : > { %10402 = vst [vmem:[#allocation68_spill] sm:$0xff] %v9547_v37  ;;  %v4694_v12 = vpack.c.bf16 %v7661_v59, %v7657_v46  ;;  %7662 = vpow2.f32 %v4477_v24  ;;  %4361 = vmax.xlane.f32.xlu1 %v4360_v4  ;;  %v9551_v38 = vadd.f32 %v7661_v59, %v7659_v31  ;;  %v7141_v46 = vor.u32 %v7409_v0, %v7138_v16  ;;  %v7072_v0 = vld [vmem:[#allocation13 + $0x60] sm:$0xf] }
 0x576   : > { %7664 = vpow2.f32 %v4479_v17  ;;  %4861 = vmatmul.bf16.vlgmr.msra.gmra.mxu2 %v4693_v20 }
 0x577   : > { %4950 = vmatmul.bf16.vlgmr.msra.gmra.mxu3 %v4694_v12  ;;  %5696 = vmatpush.bf16.msrb.mxu2 %v7077_v18  ;;  %v7410_v18 = vld [vmem:[#allocation13 + $0xe4] sm:$0xf0] }
 0x578   : > { %v4320_v62 = vpop.xlane.xlu2 %4319  ;;  %5785 = vmatpush.bf16.msrb.mxu3 %v7141_v46 }
 0x579   : > { %v4411_v23 = vsub.f32 %v9363_v39, %v4320_v62  ;;  %v4412_v37 = vsub.f32 %v9365_v30, %v4320_v62  ;;  %v3714_v47 = vpop.f32.mrf.mxu2  ;;  %v9555_v13 = vpop.f32.mrf.mxu0  ;;  %v7073_v62 = vor.u32 %v7394_v28, %v7072_v0 }
 0x57a   : > { %v3803_v24 = vpop.f32.mrf.mxu3  ;;  %v9557_v31 = vpop.f32.mrf.mxu1 }
 0x57b   : > { %v7663_v17 = vpop.eup %7662  ;;  %v4481_v12 = vmul.f32 1.442695, %v4411_v23  ;;  %v4483_v4 = vmul.f32 1.442695, %v4412_v37  ;;  %v9559_v59 = vadd.f32 %v3803_v24, %v3714_v47  ;;  %v4363_v20 = vmax.f32 %v9555_v13, %v9557_v31  ;;  %5518 = vmatpush.bf16.msrb.mxu0 %v7073_v62 }
 0x57c   : > { %v7665_v39 = vpop.eup %7664  ;;  %v7137_v23 = vor.u32 %v7410_v18, %v7136_v3 }
 0x57d   : > { %10403 = vst [vmem:[#allocation69_spill] sm:$0xff] %v9559_v59  ;;  %7666 = vpow2.f32 %v4481_v12  ;;  %4364 = vmax.xlane.f32.xlu2 %v4363_v20  ;;  %v9563_v30 = vadd.f32 %v7665_v39, %v7663_v17 }
 0x57e   : > { %7668 = vpow2.f32 %v4483_v4  ;;  %5607 = vmatpush.bf16.msrb.mxu1 %v7137_v23 }
 0x580   : > { %v4323_v16 = vpop.xlane.xlu0 %4322 }
 0x581   : > { %v4413_v47 = vsub.f32 %v9375_v55, %v4323_v16  ;;  %v4414_v37 = vsub.f32 %v9377_v7, %v4323_v16  ;;  %v3716_v24 = vpop.f32.mrf.mxu2  ;;  %v9567_v59 = vpop.f32.mrf.mxu0 }
 0x582   : > { %v3805_v46 = vpop.f32.mrf.mxu3  ;;  %v9569_v12 = vpop.f32.mrf.mxu1 }
 0x583   : > { %v7667_v4 = vpop.eup %7666  ;;  %v4485_v20 = vmul.f32 1.442695, %v4413_v47  ;;  %v4487_v45 = vmul.f32 1.442695, %v4414_v37  ;;  %v9571_v44 = vadd.f32 %v3805_v46, %v3716_v24  ;;  %v4366_v0 = vmax.f32 %v9567_v59, %v9569_v12 }
 0x584   : > { %v7669_v28 = vpop.eup %7668  ;;  %v4695_v55 = vpack.c.bf16 %v7667_v4, %v7663_v17 }
 0x585   : > { %10404 = vst [vmem:[#allocation70_spill] sm:$0xff] %v9571_v44  ;;  %7670 = vpow2.f32 %v4485_v20  ;;  %4367 = vmax.xlane.f32.xlu0 %v4366_v0  ;;  %v4696_v7 = vpack.c.bf16 %v7669_v28, %v7665_v39  ;;  %v9575_v3 = vadd.f32 %v7669_v28, %v7667_v4  ;;  %v7066_v44 = vld [vmem:[#allocation13 + $0x58] sm:$0xf0] }
 0x586   : > { %7672 = vpow2.f32 %v4487_v45  ;;  %4866 = vmatmul.bf16.gmra.mxu2 %v4695_v55 }
 0x587   : > { %4955 = vmatmul.bf16.gmra.mxu3 %v4696_v7 }
 0x588   : > { %v4326_v62 = vpop.xlane.xlu1 %4325 }
 0x589   : > { %v4415_v18 = vsub.f32 %v9389_v50, %v4326_v62  ;;  %v4416_v16 = vsub.f32 %v9391_v36, %v4326_v62  ;;  %v3719_v23 = vpop.f32.mrf.mxu2  ;;  %v9579_v47 = vpop.f32.mrf.mxu0 }
 0x58a   : > { %v3808_v37 = vpop.f32.mrf.mxu3  ;;  %v9581_v24 = vpop.f32.mrf.mxu1 }
 0x58b   : > { %v7671_v17 = vpop.eup %7670  ;;  %v4489_v46 = vmul.f32 1.442695, %v4415_v18  ;;  %v4491_v20 = vmul.f32 1.442695, %v4416_v16  ;;  %v9583_v39 = vadd.f32 %v3808_v37, %v3719_v23  ;;  %v4369_v45 = vmax.f32 %v9579_v47, %v9581_v24 }
 0x58c   : > { %v7673_v4 = vpop.eup %7672 }
 0x58d   : > { %10405 = vst [vmem:[#allocation71_spill] sm:$0xff] %v9583_v39  ;;  %7674 = vpow2.f32 %v4489_v46  ;;  %4370 = vmax.xlane.f32.xlu1 %v4369_v45  ;;  %v9587_v50 = vadd.f32 %v7673_v4, %v7671_v17 }
 0x58e   : > { %7676 = vpow2.f32 %v4491_v20 }
 0x590   : > { %v4329_v36 = vpop.xlane.xlu2 %4328 }
 0x591   : > { %v4417_v0 = vsub.f32 %v9401_v53, %v4329_v36  ;;  %v4418_v28 = vsub.f32 %v9403_v43, %v4329_v36  ;;  %v3721_v55 = vpop.f32.mrf.mxu2  ;;  %v9591_v7 = vpop.f32.mrf.mxu0  ;;  %v7391_v36 = vld [vmem:[#allocation13 + $0x54] sm:$0xf] }
 0x592   : > { %v3810_v62 = vpop.f32.mrf.mxu3  ;;  %v9593_v18 = vpop.f32.mrf.mxu1 }
 0x593   : > { %v7675_v16 = vpop.eup %7674  ;;  %v4493_v23 = vmul.f32 1.442695, %v4417_v0  ;;  %v4495_v37 = vmul.f32 1.442695, %v4418_v28  ;;  %v9595_v39 = vadd.f32 %v3810_v62, %v3721_v55  ;;  %v4372_v46 = vmax.f32 %v9591_v7, %v9593_v18  ;;  %v7130_v55 = vld [vmem:[#allocation13 + $0xd8] sm:$0xf0] }
 0x594   : > { %v7677_v20 = vpop.eup %7676  ;;  %v4697_v45 = vpack.c.bf16 %v7675_v16, %v7671_v17  ;;  %v7069_v28 = vor.u32 %v7391_v36, %v7066_v44  ;;  %v7128_v36 = vld [vmem:[#allocation13 + $0xd0] sm:$0xf] }
 0x595   : > { %10406 = vst [vmem:[#allocation72_spill] sm:$0xff] %v9595_v39  ;;  %7678 = vpow2.f32 %v4493_v23  ;;  %4373 = vmax.xlane.f32.xlu2 %v4372_v46  ;;  %v4698_v53 = vpack.c.bf16 %v7677_v20, %v7673_v4  ;;  %v9599_v43 = vadd.f32 %v7677_v20, %v7675_v16  ;;  %v7133_v23 = vor.u32 %v7407_v33, %v7130_v55  ;;  %v7064_v33 = vld [vmem:[#allocation13 + $0x50] sm:$0xf] }
 0x596   : > { %7680 = vpow2.f32 %v4495_v37  ;;  %4871 = vmatmul.bf16.gmra.mxu2 %v4697_v45 }
 0x597   : > { %4960 = vmatmul.bf16.gmra.mxu3 %v4698_v53  ;;  %5697 = vmatpush.bf16.msrb.mxu2 %v7069_v28  ;;  %v7392_v53 = vld [vmem:[#allocation13 + $0x54] sm:$0xf0] }
 0x598   : > { %v4332_v0 = vpop.xlane.xlu0 %4331  ;;  %5786 = vmatpush.bf16.msrb.mxu3 %v7133_v23  ;;  %v7408_v28 = vld [vmem:[#allocation13 + $0xd4] sm:$0xf0] }
 0x599   : > { %v4419_v62 = vsub.f32 %v9415_v40, %v4332_v0  ;;  %v4420_v39 = vsub.f32 %v9417_v35, %v4332_v0  ;;  %v3724_v51 = vpop.f32.mrf.mxu2  ;;  %v9603_v17 = vpop.f32.mrf.mxu0  ;;  %v7065_v0 = vor.u32 %v7392_v53, %v7064_v33 }
 0x59a   : > { %v3813_v4 = vpop.f32.mrf.mxu3  ;;  %v9605_v16 = vpop.f32.mrf.mxu1 }
 0x59b   : > { %v7679_v37 = vpop.eup %7678  ;;  %v4497_v46 = vmul.f32 1.442695, %v4419_v62  ;;  %v4499_v20 = vmul.f32 1.442695, %v4420_v39  ;;  %v9607_v45 = vadd.f32 %v3813_v4, %v3724_v51  ;;  %v4375_v44 = vmax.f32 %v9603_v17, %v9605_v16  ;;  %5519 = vmatpush.bf16.msrb.mxu0 %v7065_v0 }
 0x59c   : > { %v7681_v40 = vpop.eup %7680  ;;  %v7129_v62 = vor.u32 %v7408_v28, %v7128_v36 }
 0x59d   : > { %10407 = vst [vmem:[#allocation73_spill] sm:$0xff] %v9607_v45  ;;  %7682 = vpow2.f32 %v4497_v46  ;;  %4376 = vmax.xlane.f32.xlu0 %v4375_v44  ;;  %v9611_v35 = vadd.f32 %v7681_v40, %v7679_v37 }
 0x59e   : > { %7684 = vpow2.f32 %v4499_v20  ;;  %5608 = vmatpush.bf16.msrb.mxu1 %v7129_v62 }
 0x5a0   : > { %v4335_v55 = vpop.xlane.xlu1 %4334 }
 0x5a1   : > { %v4421_v51 = vsub.f32 %v9427_v63, %v4335_v55  ;;  %v4422_v39 = vsub.f32 %v9429_v27, %v4335_v55  ;;  %v3726_v4 = vpop.f32.mrf.mxu2  ;;  %v9615_v45 = vpop.f32.mrf.mxu0 }
 0x5a2   : > { %v3815_v23 = vpop.f32.mrf.mxu3  ;;  %v9617_v46 = vpop.f32.mrf.mxu1 }
 0x5a3   : > { %v7683_v20 = vpop.eup %7682  ;;  %v4501_v44 = vmul.f32 1.442695, %v4421_v51  ;;  %v4503_v29 = vmul.f32 1.442695, %v4422_v39  ;;  %v9619_v48 = vadd.f32 %v3815_v23, %v3726_v4  ;;  %v4378_v33 = vmax.f32 %v9615_v45, %v9617_v46 }
 0x5a4   : > { %v7685_v53 = vpop.eup %7684  ;;  %v4699_v63 = vpack.c.bf16 %v7683_v20, %v7679_v37 }
 0x5a5   : > { %10408 = vst [vmem:[#allocation74_spill] sm:$0xff] %v9619_v48  ;;  %7686 = vpow2.f32 %v4501_v44  ;;  %4379 = vmax.xlane.f32.xlu1 %v4378_v33  ;;  %v4700_v27 = vpack.c.bf16 %v7685_v53, %v7681_v40  ;;  %v9623_v36 = vadd.f32 %v7685_v53, %v7683_v20  ;;  %v7058_v48 = vld [vmem:[#allocation13 + $0x48] sm:$0xf0] }
 0x5a6   : > { %7688 = vpow2.f32 %v4503_v29  ;;  %4876 = vmatmul.bf16.gmra.mxu2 %v4699_v63 }
 0x5a7   : > { %4965 = vmatmul.bf16.gmra.mxu3 %v4700_v27 }
 0x5a8   : > { %v4338_v0 = vpop.xlane.xlu2 %4337 }
 0x5a9   : > { %v4423_v28 = vsub.f32 %v9441_v49, %v4338_v0  ;;  %v4424_v55 = vsub.f32 %v9443_v2, %v4338_v0  ;;  %v3729_v62 = vpop.f32.mrf.mxu2  ;;  %v9627_v51 = vpop.f32.mrf.mxu0 }
 0x5aa   : > { %v3818_v39 = vpop.f32.mrf.mxu3  ;;  %v9629_v4 = vpop.f32.mrf.mxu1 }
 0x5ab   : > { %10409 = vst [vmem:[#allocation75_spill] sm:$0xff] %v9629_v4  ;;  %v7687_v37 = vpop.eup %7686  ;;  %v4505_v23 = vmul.f32 1.442695, %v4423_v28  ;;  %v4507_v44 = vmul.f32 1.442695, %v4424_v55  ;;  %v9631_v40 = vadd.f32 %v3818_v39, %v3729_v62  ;;  %v4381_v29 = vmax.f32 %v9627_v51, %v9629_v4 }
 0x5ac   : > { %v7689_v20 = vpop.eup %7688  ;;  %v7405_v4 = vld [vmem:[#allocation13 + $0xc4] sm:$0xf] }
 0x5ad   : > { %10410 = vst [vmem:[#allocation76_spill] sm:$0xff] %v9631_v40  ;;  %7690 = vpow2.f32 %v4505_v23  ;;  %4382 = vmax.xlane.f32.xlu2 %v4381_v29  ;;  %v9635_v49 = vadd.f32 %v7689_v20, %v7687_v37 }
 0x5ae   : > { %7692 = vpow2.f32 %v4507_v44 }
 0x5b0   : > { %v4341_v2 = vpop.xlane.xlu0 %4340 }
 0x5b1   : > { %v4425_v33 = vsub.f32 %v9453_v57, %v4341_v2  ;;  %v4426_v53 = vsub.f32 %v9455_v25, %v4341_v2  ;;  %v3731_v63 = vpop.f32.mrf.mxu2  ;;  %v9639_v27 = vpop.f32.mrf.mxu0  ;;  %v7389_v2 = vld [vmem:[#allocation13 + $0x44] sm:$0xf] }
 0x5b2   : > { %v3820_v0 = vpop.f32.mrf.mxu3  ;;  %v9641_v28 = vpop.f32.mrf.mxu1 }
 0x5b3   : > { %10411 = vst [vmem:[#allocation77_spill] sm:$0xff] %v9641_v28  ;;  %v7691_v55 = vpop.eup %7690  ;;  %v4509_v62 = vmul.f32 1.442695, %v4425_v33  ;;  %v4511_v39 = vmul.f32 1.442695, %v4426_v53  ;;  %v9643_v40 = vadd.f32 %v3820_v0, %v3731_v63  ;;  %v4384_v23 = vmax.f32 %v9639_v27, %v9641_v28 }
 0x5b4   : > { %v7693_v44 = vpop.eup %7692  ;;  %v4701_v29 = vpack.c.bf16 %v7691_v55, %v7687_v37  ;;  %v7061_v53 = vor.u32 %v7389_v2, %v7058_v48  ;;  %v7122_v63 = vld [vmem:[#allocation13 + $0xc8] sm:$0xf0]  ;;  %v7120_v2 = vld [vmem:[#allocation13 + $0xc0] sm:$0xf] }
 0x5b5   : > { %10412 = vst [vmem:[#allocation78_spill] sm:$0xff] %v9643_v40  ;;  %7694 = vpow2.f32 %v4509_v62  ;;  %4385 = vmax.xlane.f32.xlu0 %v4384_v23  ;;  %v4702_v57 = vpack.c.bf16 %v7693_v44, %v7689_v20  ;;  %v9647_v25 = vadd.f32 %v7693_v44, %v7691_v55  ;;  %v7125_v62 = vor.u32 %v7405_v4, %v7122_v63  ;;  %v7056_v4 = vld [vmem:[#allocation13 + $0x40] sm:$0xf] }
 0x5b6   : > { %7696 = vpow2.f32 %v4511_v39  ;;  %4881 = vmatmul.bf16.gmra.mxu2 %v4701_v29 }
 0x5b7   : > { %4970 = vmatmul.bf16.gmra.mxu3 %v4702_v57  ;;  %5698 = vmatpush.bf16.msrb.mxu2 %v7061_v53  ;;  %v7390_v57 = vld [vmem:[#allocation13 + $0x44] sm:$0xf0] }
 0x5b8   : > { %v4344_v33 = vpop.xlane.xlu1 %4343  ;;  %5787 = vmatpush.bf16.msrb.mxu3 %v7125_v62  ;;  %v7406_v53 = vld [vmem:[#allocation13 + $0xc4] sm:$0xf0] }
 0x5b9   : > { %v4427_v0 = vsub.f32 %v9467_v26, %v4344_v33  ;;  %v4428_v40 = vsub.f32 %v9469_v14, %v4344_v33  ;;  %v3734_v28 = vpop.f32.mrf.mxu2  ;;  %v9651_v37 = vpop.f32.mrf.mxu0  ;;  %v7057_v33 = vor.u32 %v7390_v57, %v7056_v4 }
 0x5ba   : > { %10413 = vst [vmem:[#allocation79_spill] sm:$0xff] %v9651_v37  ;;  %v3823_v20 = vpop.f32.mrf.mxu3  ;;  %v9653_v55 = vpop.f32.mrf.mxu1 }
 0x5bb   : > { %10414 = vst [vmem:[#allocation80_spill] sm:$0xff] %v9653_v55  ;;  %v7695_v39 = vpop.eup %7694  ;;  %v4513_v23 = vmul.f32 1.442695, %v4427_v0  ;;  %v4515_v44 = vmul.f32 1.442695, %v4428_v40  ;;  %v9655_v29 = vadd.f32 %v3823_v20, %v3734_v28  ;;  %v4387_v48 = vmax.f32 %v9651_v37, %v9653_v55  ;;  %5520 = vmatpush.bf16.msrb.mxu0 %v7057_v33 }
 0x5bc   : > { %v7697_v26 = vpop.eup %7696  ;;  %v7121_v0 = vor.u32 %v7406_v53, %v7120_v2 }
 0x5bd   : > { %10415 = vst [vmem:[#allocation81_spill] sm:$0xff] %v9655_v29  ;;  %7698 = vpow2.f32 %v4513_v23  ;;  %4388 = vmax.xlane.f32.xlu1 %v4387_v48  ;;  %v9659_v14 = vadd.f32 %v7697_v26, %v7695_v39 }
 0x5be   : > { %7700 = vpow2.f32 %v4515_v44  ;;  %5609 = vmatpush.bf16.msrb.mxu1 %v7121_v0 }
 0x5c0   : > { %v4347_v63 = vpop.xlane.xlu2 %4346 }
 0x5c1   : > { %v4429_v40 = vsub.f32 %v9479_v21, %v4347_v63  ;;  %v4430_v28 = vsub.f32 %v9481_v11, %v4347_v63  ;;  %v3736_v20 = vpop.f32.mrf.mxu2  ;;  %v9663_v29 = vpop.f32.mrf.mxu0 }
 0x5c2   : > { %v3825_v62 = vpop.f32.mrf.mxu3  ;;  %v9665_v23 = vpop.f32.mrf.mxu1 }
 0x5c3   : > { %v7699_v44 = vpop.eup %7698  ;;  %v4517_v48 = vmul.f32 1.442695, %v4429_v40  ;;  %v4519_v55 = vmul.f32 1.442695, %v4430_v28  ;;  %v9667_v37 = vadd.f32 %v3825_v62, %v3736_v20  ;;  %v4390_v4 = vmax.f32 %v9663_v29, %v9665_v23 }
 0x5c4   : > { %v7701_v57 = vpop.eup %7700  ;;  %v4703_v21 = vpack.c.bf16 %v7699_v44, %v7695_v39 }
 0x5c5   : > { %10416 = vst [vmem:[#allocation82_spill] sm:$0xff] %v9667_v37  ;;  %7702 = vpow2.f32 %v4517_v48  ;;  %4391 = vmax.xlane.f32.xlu2 %v4390_v4  ;;  %v4704_v11 = vpack.c.bf16 %v7701_v57, %v7697_v26  ;;  %v9671_v2 = vadd.f32 %v7701_v57, %v7699_v44  ;;  %v7050_v37 = vld [vmem:[#allocation13 + $0x38] sm:$0xf0] }
 0x5c6   : > { %7704 = vpow2.f32 %v4519_v55  ;;  %4886 = vmatmul.bf16.gmra.mxu2 %v4703_v21 }
 0x5c7   : > { %4975 = vmatmul.bf16.gmra.mxu3 %v4704_v11 }
 0x5c8   : > { %v4350_v33 = vpop.xlane.xlu0 %4349 }
 0x5c9   : > { %v4431_v53 = vsub.f32 %v9493_v5, %v4350_v33  ;;  %v4432_v63 = vsub.f32 %v9495_v6, %v4350_v33  ;;  %v3739_v0 = vpop.f32.mrf.mxu2  ;;  %v9675_v40 = vpop.f32.mrf.mxu0 }
 0x5ca   : > { %v3828_v28 = vpop.f32.mrf.mxu3  ;;  %v9677_v20 = vpop.f32.mrf.mxu1 }
 0x5cb   : > { %10417 = vst [vmem:[#allocation83_spill] sm:$0xff] %v9677_v20  ;;  %v7703_v39 = vpop.eup %7702  ;;  %v4521_v62 = vmul.f32 1.442695, %v4431_v53  ;;  %v4523_v48 = vmul.f32 1.442695, %v4432_v63  ;;  %v9679_v26 = vadd.f32 %v3828_v28, %v3739_v0  ;;  %v4393_v55 = vmax.f32 %v9675_v40, %v9677_v20 }
 0x5cc   : > { %v7705_v44 = vpop.eup %7704  ;;  %v7403_v20 = vld [vmem:[#allocation13 + $0xb4] sm:$0xf] }
 0x5cd   : > { %10418 = vst [vmem:[#allocation84_spill] sm:$0xff] %v9679_v26  ;;  %7706 = vpow2.f32 %v4521_v62  ;;  %4394 = vmax.xlane.f32.xlu0 %v4393_v55  ;;  %v9683_v5 = vadd.f32 %v7705_v44, %v7703_v39 }
 0x5ce   : > { %7708 = vpow2.f32 %v4523_v48 }
 0x5d0   : > { %v4353_v6 = vpop.xlane.xlu1 %4352 }
 0x5d1   : > { %v4433_v4 = vsub.f32 %v9505_v41, %v4353_v6  ;;  %v4434_v57 = vsub.f32 %v9507_v1, %v4353_v6  ;;  %v3741_v21 = vpop.f32.mrf.mxu2  ;;  %v9687_v11 = vpop.f32.mrf.mxu0  ;;  %v7387_v6 = vld [vmem:[#allocation13 + $0x34] sm:$0xf] }
 0x5d2   : > { %v3830_v33 = vpop.f32.mrf.mxu3  ;;  %v9689_v53 = vpop.f32.mrf.mxu1 }
 0x5d3   : > { %10419 = vst [vmem:[#allocation85_spill] sm:$0xff] %v9689_v53  ;;  %v7707_v63 = vpop.eup %7706  ;;  %v4525_v0 = vmul.f32 1.442695, %v4433_v4  ;;  %v4527_v28 = vmul.f32 1.442695, %v4434_v57  ;;  %v9691_v26 = vadd.f32 %v3830_v33, %v3741_v21  ;;  %v4396_v62 = vmax.f32 %v9687_v11, %v9689_v53 }
 0x5d4   : > { %v7709_v48 = vpop.eup %7708  ;;  %v4705_v55 = vpack.c.bf16 %v7707_v63, %v7703_v39  ;;  %v7053_v57 = vor.u32 %v7387_v6, %v7050_v37  ;;  %v7114_v21 = vld [vmem:[#allocation13 + $0xb8] sm:$0xf0]  ;;  %v7112_v6 = vld [vmem:[#allocation13 + $0xb0] sm:$0xf] }
 0x5d5   : > { %10420 = vst [vmem:[#allocation86_spill] sm:$0xff] %v9691_v26  ;;  %7710 = vpow2.f32 %v4525_v0  ;;  %4397 = vmax.xlane.f32.xlu1 %v4396_v62  ;;  %v4706_v41 = vpack.c.bf16 %v7709_v48, %v7705_v44  ;;  %v9695_v1 = vadd.f32 %v7709_v48, %v7707_v63  ;;  %v7117_v0 = vor.u32 %v7403_v20, %v7114_v21  ;;  %v7048_v20 = vld [vmem:[#allocation13 + $0x30] sm:$0xf] }
 0x5d6   : > { %7712 = vpow2.f32 %v4527_v28  ;;  %4891 = vmatmul.bf16.gmra.mxu2 %v4705_v55 }
 0x5d7   : > { %4980 = vmatmul.bf16.gmra.mxu3 %v4706_v41  ;;  %5699 = vmatpush.bf16.msrb.mxu2 %v7053_v57  ;;  %v7388_v41 = vld [vmem:[#allocation13 + $0x34] sm:$0xf0] }
 0x5d8   : > { %v4356_v4 = vpop.xlane.xlu2 %4355  ;;  %5788 = vmatpush.bf16.msrb.mxu3 %v7117_v0  ;;  %v7404_v57 = vld [vmem:[#allocation13 + $0xb4] sm:$0xf0] }
 0x5d9   : > { %v4435_v33 = vsub.f32 %v9519_v56, %v4356_v4  ;;  %v4436_v26 = vsub.f32 %v9521_v9, %v4356_v4  ;;  %v3744_v53 = vpop.f32.mrf.mxu2  ;;  %v9699_v39 = vpop.f32.mrf.mxu0  ;;  %v7049_v4 = vor.u32 %v7388_v41, %v7048_v20 }
 0x5da   : > { %v3833_v44 = vpop.f32.mrf.mxu3  ;;  %v9701_v63 = vpop.f32.mrf.mxu1 }
 0x5db   : > { %10421 = vst [vmem:[#allocation87_spill] sm:$0xff] %v9701_v63  ;;  %v7711_v28 = vpop.eup %7710  ;;  %v4529_v62 = vmul.f32 1.442695, %v4435_v33  ;;  %v4531_v48 = vmul.f32 1.442695, %v4436_v26  ;;  %v9703_v55 = vadd.f32 %v3833_v44, %v3744_v53  ;;  %v4399_v37 = vmax.f32 %v9699_v39, %v9701_v63  ;;  %5521 = vmatpush.bf16.msrb.mxu0 %v7049_v4 }
 0x5dc   : > { %v7713_v56 = vpop.eup %7712  ;;  %v7113_v53 = vor.u32 %v7404_v57, %v7112_v6 }
 0x5dd   : > { %10422 = vst [vmem:[#allocation88_spill] sm:$0xff] %v9703_v55  ;;  %7714 = vpow2.f32 %v4529_v62  ;;  %4400 = vmax.xlane.f32.xlu2 %v4399_v37  ;;  %3410 = vadd.xlane.f32.xlu1 %v9159_v8  ;;  %v9708_v9 = vadd.f32 %v7713_v56, %v7711_v28 }
 0x5de   : > { %7716 = vpow2.f32 %v4531_v48  ;;  %5610 = vmatpush.bf16.msrb.mxu1 %v7113_v53 }
 0x5e0   : > { %v4359_v26 = vpop.xlane.xlu0 %4358 }
 0x5e1   : > { %v4437_v21 = vsub.f32 %v9531_v42, %v4359_v26  ;;  %v4438_v33 = vsub.f32 %v9533_v52, %v4359_v26  ;;  %v3746_v0 = vpop.f32.mrf.mxu2  ;;  %v9712_v44 = vpop.f32.mrf.mxu0 }
 0x5e2   : > { %v3835_v62 = vpop.f32.mrf.mxu3  ;;  %v9714_v8 = vpop.f32.mrf.mxu1 }
 0x5e3   : > { %v7715_v48 = vpop.eup %7714  ;;  %v4533_v37 = vmul.f32 1.442695, %v4437_v21  ;;  %v4535_v55 = vmul.f32 1.442695, %v4438_v33  ;;  %v9716_v63 = vadd.f32 %v3835_v62, %v3746_v0  ;;  %v4402_v20 = vmax.f32 %v9712_v44, %v9714_v8 }
 0x5e4   : > { %v7717_v41 = vpop.eup %7716  ;;  %v4707_v42 = vpack.c.bf16 %v7715_v48, %v7711_v28 }
 0x5e5   : > { %7718 = vpow2.f32 %v4533_v37  ;;  %3413 = vadd.xlane.f32.xlu2 %v9169_v58  ;;  %4403 = vmax.xlane.f32.xlu0 %v4402_v20  ;;  %v4708_v52 = vpack.c.bf16 %v7717_v41, %v7713_v56  ;;  %v9721_v6 = vadd.f32 %v7717_v41, %v7715_v48 }
 0x5e6   : > { %7720 = vpow2.f32 %v4535_v55  ;;  %4601 = vadd.xlane.f32.xlu1 %v9551_v38  ;;  %4896 = vmatmul.bf16.gmra.mxu2 %v4707_v42 }
 0x5e7   : > { %4985 = vmatmul.bf16.gmra.mxu3 %v4708_v52 }
 0x5e8   : > { %v4362_v4 = vpop.xlane.xlu1 %4361 }
 0x5e9   : > { %v4439_v57 = vsub.f32 %v9543_v34, %v4362_v4  ;;  %v4440_v26 = vsub.f32 %v9545_v61, %v4362_v4  ;;  %v3749_v53 = vpop.f32.mrf.mxu2  ;;  %v7401_v4 = vld [vmem:[#allocation13 + $0xa4] sm:$0xf] }
 0x5ea   : > { %v3838_v21 = vpop.f32.mrf.mxu3 }
 0x5eb   : > { %v7719_v28 = vpop.eup %7718  ;;  %v4537_v33 = vmul.f32 1.442695, %v4439_v57  ;;  %v4539_v0 = vmul.f32 1.442695, %v4440_v26  ;;  %v9726_v58 = vadd.f32 %v3838_v21, %v3749_v53  ;;  %v7106_v53 = vld [vmem:[#allocation13 + $0xa8] sm:$0xf0] }
 0x5ec   : > { %v7721_v56 = vpop.eup %7720 }
 0x5ed   : > { %7722 = vpow2.f32 %v4537_v33  ;;  %3416 = vadd.xlane.f32.xlu2 %v9181_v15  ;;  %4598 = vadd.xlane.f32.xlu0 %v9539_v10  ;;  %v9730_v38 = vadd.f32 %v7721_v56, %v7719_v28 }
 0x5ee   : > { %7724 = vpow2.f32 %v4539_v0  ;;  %4604 = vadd.xlane.f32.xlu1 %v9563_v30 }
 0x5f0   : > { %v4365_v34 = vpop.xlane.xlu2 %4364 }
 0x5f1   : > { %v4441_v61 = vsub.f32 %v9555_v13, %v4365_v34  ;;  %v4442_v55 = vsub.f32 %v9557_v31, %v4365_v34  ;;  %v3751_v62 = vpop.f32.mrf.mxu2  ;;  %v7385_v13 = vld [vmem:[#allocation13 + $0x24] sm:$0xf]  ;;  %v7042_v31 = vld [vmem:[#allocation13 + $0x28] sm:$0xf0] }
 0x5f2   : > { %v3840_v48 = vpop.f32.mrf.mxu3  ;;  %v7045_v26 = vor.u32 %v7385_v13, %v7042_v31 }
 0x5f3   : > { %v7723_v37 = vpop.eup %7722  ;;  %v4541_v20 = vmul.f32 1.442695, %v4441_v61  ;;  %v4543_v41 = vmul.f32 1.442695, %v4442_v55  ;;  %v9735_v42 = vadd.f32 %v3840_v48, %v3751_v62  ;;  %v10423_v55 = vld [vmem:[#allocation29_spill] sm:$0xff] }
 0x5f4   : > { %v7725_v15 = vpop.eup %7724  ;;  %v4709_v52 = vpack.c.bf16 %v7723_v37, %v7719_v28  ;;  %5700 = vmatpush.bf16.msrb.mxu2 %v7045_v26  ;;  %v7386_v48 = vld [vmem:[#allocation13 + $0x24] sm:$0xf0] }
 0x5f5   : > { %7726 = vpow2.f32 %v4541_v20  ;;  %4607 = vadd.xlane.f32.xlu2 %v9575_v3  ;;  %3419 = vadd.xlane.f32.xlu0 %v9191_v22  ;;  %v4710_v10 = vpack.c.bf16 %v7725_v15, %v7721_v56  ;;  %v9739_v30 = vadd.f32 %v7725_v15, %v7723_v37  ;;  %v7109_v22 = vor.u32 %v7401_v4, %v7106_v53  ;;  %v7104_v37 = vld [vmem:[#allocation13 + $0xa0] sm:$0xf] }
 0x5f6   : > { %7728 = vpow2.f32 %v4543_v41  ;;  %3425 = vadd.xlane.f32.xlu1 %v9213_v60  ;;  %4901 = vmatmul.bf16.gmra.mxu2 %v4709_v52  ;;  %v7402_v41 = vld [vmem:[#allocation13 + $0xa4] sm:$0xf0] }
 0x5f7   : > { %4990 = vmatmul.bf16.gmra.mxu3 %v4710_v10  ;;  %v7105_v52 = vor.u32 %v7402_v41, %v7104_v37 }
 0x5f8   : > { %v4368_v57 = vpop.xlane.xlu0 %4367  ;;  %5789 = vmatpush.bf16.msrb.mxu3 %v7109_v22 }
 0x5f9   : > { %v4443_v21 = vsub.f32 %v9567_v59, %v4368_v57  ;;  %v4444_v3 = vsub.f32 %v9569_v12, %v4368_v57  ;;  %v4862_v28 = vpop.f32.mrf.mxu2  ;;  %v10424_v59 = vld [vmem:[#allocation30_spill] sm:$0xff]  ;;  %v7040_v12 = vld [vmem:[#allocation13 + $0x20] sm:$0xf]  ;;  %5611 = vmatpush.bf16.msrb.mxu1 %v7105_v52 }
 0x5fa   : > { %v4951_v33 = vpop.f32.mrf.mxu3  ;;  %v7041_v20 = vor.u32 %v7386_v48, %v7040_v12 }
 0x5fb   : > { %v7727_v0 = vpop.eup %7726  ;;  %v4545_v56 = vmul.f32 1.442695, %v4443_v21  ;;  %v4547_v34 = vmul.f32 1.442695, %v4444_v3  ;;  %v9744_v60 = vadd.f32 %v4951_v33, %v4862_v28 }
 0x5fc   : > { %v7729_v61 = vpop.eup %7728  ;;  %5522 = vmatpush.bf16.msrb.mxu0 %v7041_v20 }
 0x5fd   : > { %7730 = vpow2.f32 %v4545_v56  ;;  %4610 = vadd.xlane.f32.xlu2 %v9587_v50  ;;  %3422 = vadd.xlane.f32.xlu0 %v10423_v55  ;;  %v9748_v62 = vadd.f32 %v7729_v61, %v7727_v0 }
 0x5fe   : > { %7732 = vpow2.f32 %v4547_v34  ;;  %3428 = vadd.xlane.f32.xlu1 %v10424_v59 }
 0x600   : > { %v4371_v15 = vpop.xlane.xlu1 %4370 }
 0x601   : > { %v4864_v10 = vpop.f32.mrf.mxu2  ;;  %v4445_v50 = vsub.f32 %v9579_v47, %v4371_v15  ;;  %v4446_v26 = vsub.f32 %v9581_v24, %v4371_v15 }
 0x602   : > { %v4953_v13 = vpop.f32.mrf.mxu3 }
 0x603   : > { %v7731_v31 = vpop.eup %7730  ;;  %v9752_v4 = vadd.f32 %v4953_v13, %v4864_v10  ;;  %v4549_v28 = vmul.f32 1.442695, %v4445_v50  ;;  %v4551_v22 = vmul.f32 1.442695, %v4446_v26  ;;  %v7034_v10 = vld [vmem:[#allocation13 + $0x18] sm:$0xf0] }
 0x604   : > { %v7733_v57 = vpop.eup %7732  ;;  %v4711_v53 = vpack.c.bf16 %v7731_v31, %v7727_v0  ;;  %v7399_v13 = vld [vmem:[#allocation13 + $0x94] sm:$0xf] }
 0x605   : > { %3431 = vadd.xlane.f32.xlu2 %v9235_v54  ;;  %4613 = vadd.xlane.f32.xlu0 %v9599_v43  ;;  %v4712_v21 = vpack.c.bf16 %v7733_v57, %v7729_v61  ;;  %v9757_v3 = vadd.f32 %v7733_v57, %v7731_v31  ;;  %7734 = vpow2.f32 %v4549_v28  ;;  %v10425_v61 = vld [vmem:[#allocation31_spill] sm:$0xff]  ;;  %v7098_v57 = vld [vmem:[#allocation13 + $0x98] sm:$0xf0] }
 0x606   : > { %4619 = vadd.xlane.f32.xlu1 %v9623_v36  ;;  %4906 = vmatmul.bf16.gmra.mxu2 %v4711_v53  ;;  %7736 = vpow2.f32 %v4551_v22  ;;  %v7101_v53 = vor.u32 %v7399_v13, %v7098_v57 }
 0x607   : > { %4995 = vmatmul.bf16.gmra.mxu3 %v4712_v21 }
 0x608   : > { %v4374_v47 = vpop.xlane.xlu2 %4373  ;;  %5790 = vmatpush.bf16.msrb.mxu3 %v7101_v53 }
 0x609   : > { %v4447_v33 = vsub.f32 %v9591_v7, %v4374_v47  ;;  %v4448_v56 = vsub.f32 %v9593_v18, %v4374_v47  ;;  %v4867_v24 = vpop.f32.mrf.mxu2  ;;  %v10426_v47 = vld [vmem:[#allocation32_spill] sm:$0xff] }
 0x60a   : > { %v4956_v0 = vpop.f32.mrf.mxu3 }
 0x60b   : > { %v4553_v54 = vmul.f32 1.442695, %v4447_v33  ;;  %v4555_v34 = vmul.f32 1.442695, %v4448_v56  ;;  %v9762_v43 = vadd.f32 %v4956_v0, %v4867_v24  ;;  %v9767_v7 = vpop.eup %7734  ;;  %v7384_v33 = vld [vmem:[#allocation13 + $0x14] sm:$0xf0] }
 0x60c   : > { %v9769_v55 = vpop.eup %7736  ;;  %v7096_v56 = vld [vmem:[#allocation13 + $0x90] sm:$0xf]  ;;  %v7400_v0 = vld [vmem:[#allocation13 + $0x94] sm:$0xf0] }
 0x60d   : > { %7738 = vpow2.f32 %v4553_v54  ;;  %3434 = vadd.xlane.f32.xlu2 %v10425_v61  ;;  %4616 = vadd.xlane.f32.xlu0 %v9611_v35 }
 0x60e   : > { %7740 = vpow2.f32 %v4555_v34  ;;  %4622 = vadd.xlane.f32.xlu1 %v9635_v49  ;;  %v7097_v34 = vor.u32 %v7400_v0, %v7096_v56  ;;  %v10433_v0 = vld [vmem:[#allocation80_spill] sm:$0xff] }
 0x610   : > { %v4377_v36 = vpop.xlane.xlu0 %4376  ;;  %5612 = vmatpush.bf16.msrb.mxu1 %v7097_v34 }
 0x611   : > { %v4869_v18 = vpop.f32.mrf.mxu2  ;;  %v4449_v59 = vsub.f32 %v9603_v17, %v4377_v36  ;;  %v4450_v41 = vsub.f32 %v9605_v16, %v4377_v36  ;;  %v7383_v17 = vld [vmem:[#allocation13 + $0x14] sm:$0xf] }
 0x612   : > { %v4958_v12 = vpop.f32.mrf.mxu3  ;;  %v7037_v50 = vor.u32 %v7383_v17, %v7034_v10 }
 0x613   : > { %v7739_v48 = vpop.eup %7738  ;;  %v9772_v37 = vadd.f32 %v4958_v12, %v4869_v18  ;;  %v4557_v52 = vmul.f32 1.442695, %v4449_v59  ;;  %v4559_v31 = vmul.f32 1.442695, %v4450_v41  ;;  %v10428_v41 = vld [vmem:[#allocation75_spill] sm:$0xff] }
 0x614   : > { %v7741_v20 = vpop.eup %7740  ;;  %v4713_v35 = vpack.c.bf16 %v7739_v48, %v9767_v7  ;;  %5701 = vmatpush.bf16.msrb.mxu2 %v7037_v50  ;;  %v10430_v50 = vld [vmem:[#allocation77_spill] sm:$0xff] }
 0x615   : > { %4625 = vadd.xlane.f32.xlu2 %v9647_v25  ;;  %3437 = vadd.xlane.f32.xlu0 %v9257_v32  ;;  %v4714_v49 = vpack.c.bf16 %v7741_v20, %v9769_v55  ;;  %v9779_v15 = vadd.f32 %v7741_v20, %v7739_v48  ;;  %7742 = vpow2.f32 %v4557_v52  ;;  %v10429_v52 = vld [vmem:[#allocation34_spill] sm:$0xff] }
 0x616   : > { %3443 = vadd.xlane.f32.xlu1 %v9279_v19  ;;  %4911 = vmatmul.bf16.gmra.mxu2 %v4713_v35  ;;  %7744 = vpow2.f32 %v4559_v31 }
 0x617   : > { %5000 = vmatmul.bf16.gmra.mxu3 %v4714_v49 }
 0x618   : > { %v4380_v16 = vpop.xlane.xlu1 %4379 }
 0x619   : > { %v4451_v25 = vsub.f32 %v9615_v45, %v4380_v16  ;;  %v4452_v32 = vsub.f32 %v9617_v46, %v4380_v16  ;;  %v4872_v26 = vpop.f32.mrf.mxu2  ;;  %v10427_v45 = vld [vmem:[#allocation33_spill] sm:$0xff]  ;;  %v7032_v46 = vld [vmem:[#allocation13 + $0x10] sm:$0xf] }
 0x61a   : > { %v4961_v21 = vpop.f32.mrf.mxu3  ;;  %v7033_v24 = vor.u32 %v7384_v33, %v7032_v46  ;;  %v10432_v46 = vld [vmem:[#allocation79_spill] sm:$0xff] }
 0x61b   : > { %v4561_v28 = vmul.f32 1.442695, %v4451_v25  ;;  %v4563_v19 = vmul.f32 1.442695, %v4452_v32  ;;  %v9784_v22 = vadd.f32 %v4961_v21, %v4872_v26  ;;  %v9789_v61 = vpop.eup %7742  ;;  %v10431_v21 = vld [vmem:[#allocation35_spill] sm:$0xff] }
 0x61c   : > { %5523 = vmatpush.bf16.msrb.mxu0 %v7033_v24  ;;  %v9791_v18 = vpop.eup %7744 }
 0x61d   : > { %7746 = vpow2.f32 %v4561_v28  ;;  %4628 = vadd.xlane.f32.xlu2 %v9659_v14  ;;  %3440 = vadd.xlane.f32.xlu0 %v10426_v47 }
 0x61e   : > { %7748 = vpow2.f32 %v4563_v19  ;;  %3446 = vadd.xlane.f32.xlu1 %v10427_v45 }
 0x620   : > { %v4383_v54 = vpop.xlane.xlu2 %4382 }
 0x621   : > { %v4874_v36 = vpop.f32.mrf.mxu2  ;;  %v4453_v12 = vsub.f32 %v9627_v51, %v4383_v54  ;;  %v4454_v35 = vsub.f32 %v10428_v41, %v4383_v54  ;;  %v10434_v54 = vld [vmem:[#allocation36_spill] sm:$0xff] }
 0x622   : > { %v4963_v59 = vpop.f32.mrf.mxu3 }
 0x623   : > { %v7747_v14 = vpop.eup %7746  ;;  %v9794_v48 = vadd.f32 %v4963_v59, %v4874_v36  ;;  %v4565_v13 = vmul.f32 1.442695, %v4453_v12  ;;  %v4567_v51 = vmul.f32 1.442695, %v4454_v35  ;;  %v10435_v36 = vld [vmem:[#allocation38_spill] sm:$0xff] }
 0x624   : > { %v7749_v20 = vpop.eup %7748  ;;  %v4715_v49 = vpack.c.bf16 %v7747_v14, %v9789_v61 }
 0x625   : > { %3449 = vadd.xlane.f32.xlu2 %v10429_v52  ;;  %4631 = vadd.xlane.f32.xlu0 %v9671_v2  ;;  %v4716_v17 = vpack.c.bf16 %v7749_v20, %v9791_v18  ;;  %v9801_v10 = vadd.f32 %v7749_v20, %v7747_v14  ;;  %7750 = vpow2.f32 %v4565_v13  ;;  %v7381_v13 = vld [vmem:[#allocation13 + $0x4] sm:$0xf] }
 0x626   : > { %4637 = vadd.xlane.f32.xlu1 %v9695_v1  ;;  %4916 = vmatmul.bf16.gmra.mxu2 %v4715_v49  ;;  %7752 = vpow2.f32 %v4567_v51  ;;  %v7026_v51 = vld [vmem:[#allocation13 + $0x8] sm:$0xf0] }
 0x627   : > { %5005 = vmatmul.bf16.gmra.mxu3 %v4716_v17 }
 0x628   : > { %v4386_v31 = vpop.xlane.xlu0 %4385 }
 0x629   : > { %v4455_v16 = vsub.f32 %v9639_v27, %v4386_v31  ;;  %v4456_v57 = vsub.f32 %v10430_v50, %v4386_v31  ;;  %v4877_v25 = vpop.f32.mrf.mxu2  ;;  %v7397_v31 = vld [vmem:[#allocation13 + $0x84] sm:$0xf]  ;;  %v7029_v50 = vor.u32 %v7381_v13, %v7026_v51 }
 0x62a   : > { %v4966_v32 = vpop.f32.mrf.mxu3 }
 0x62b   : > { %v4569_v26 = vmul.f32 1.442695, %v4455_v16  ;;  %v4571_v2 = vmul.f32 1.442695, %v4456_v57  ;;  %v9806_v53 = vadd.f32 %v4966_v32, %v4877_v25  ;;  %v9811_v27 = vpop.eup %7750  ;;  %v10436_v16 = vld [vmem:[#allocation37_spill] sm:$0xff]  ;;  %5702 = vmatpush.bf16.msrb.mxu2 %v7029_v50 }
 0x62c   : > { %v9813_v19 = vpop.eup %7752 }
 0x62d   : > { %7754 = vpow2.f32 %v4569_v26  ;;  %3452 = vadd.xlane.f32.xlu2 %v10431_v21  ;;  %4634 = vadd.xlane.f32.xlu0 %v9683_v5 }
 0x62e   : > { %7756 = vpow2.f32 %v4571_v2  ;;  %4640 = vadd.xlane.f32.xlu1 %v9708_v9 }
 0x630   : > { %v4389_v1 = vpop.xlane.xlu1 %4388 }
 0x631   : > { %v4879_v28 = vpop.f32.mrf.mxu2  ;;  %v4457_v33 = vsub.f32 %v10432_v46, %v4389_v1  ;;  %v4458_v5 = vsub.f32 %v10433_v0, %v4389_v1  ;;  %v10438_v46 = vld [vmem:[#allocation83_spill] sm:$0xff] }
 0x632   : > { %v4968_v47 = vpop.f32.mrf.mxu3 }
 0x633   : > { %v9815_v45 = vpop.eup %7754  ;;  %v9818_v56 = vadd.f32 %v4968_v47, %v4879_v28  ;;  %v4573_v59 = vmul.f32 1.442695, %v4457_v33  ;;  %v4575_v14 = vmul.f32 1.442695, %v4458_v5  ;;  %v7024_v5 = vld [vmem:[#allocation13] sm:$0xf] }
 0x634   : > { %v9820_v24 = vpop.eup %7756  ;;  %v4717_v9 = vpack.c.bf16 %v9815_v45, %v9811_v27 }
 0x635   : > { %4643 = vadd.xlane.f32.xlu2 %v9721_v6  ;;  %3455 = vadd.xlane.f32.xlu0 %v10434_v54  ;;  %v4718_v34 = vpack.c.bf16 %v9820_v24, %v9813_v19  ;;  %7758 = vpow2.f32 %v4573_v59  ;;  %v10439_v54 = vld [vmem:[#allocation42_spill] sm:$0xff] }
 0x636   : > { %3461 = vadd.xlane.f32.xlu1 %v10435_v36  ;;  %4921 = vmatmul.bf16.gmra.mxu2 %v4717_v9  ;;  %7760 = vpow2.f32 %v4575_v14  ;;  %v7382_v9 = vld [vmem:[#allocation13 + $0x4] sm:$0xf0] }
 0x637   : > { %5010 = vmatmul.bf16.gmra.mxu3 %v4718_v34  ;;  %v7025_v36 = vor.u32 %v7382_v9, %v7024_v5  ;;  %v7398_v59 = vld [vmem:[#allocation13 + $0x84] sm:$0xf0] }
 0x638   : > { %v4392_v12 = vpop.xlane.xlu2 %4391  ;;  %v10444_v5 = vld [vmem:[#allocation50_spill] sm:$0xff] }
 0x639   : > { %v4459_v20 = vsub.f32 %v9663_v29, %v4392_v12  ;;  %v4460_v41 = vsub.f32 %v9665_v23, %v4392_v12  ;;  %v4882_v35 = vpop.f32.mrf.mxu2  ;;  %v7090_v29 = vld [vmem:[#allocation13 + $0x88] sm:$0xf0]  ;;  %v10437_v23 = vld [vmem:[#allocation40_spill] sm:$0xff]  ;;  %5524 = vmatpush.bf16.msrb.mxu0 %v7025_v36 }
 0x63a   : > { %v4971_v49 = vpop.f32.mrf.mxu3  ;;  %v7093_v57 = vor.u32 %v7397_v31, %v7090_v29  ;;  %v4657_v31 = vadd.f32 %v9769_v55, %v9767_v7  ;;  %v10442_v7 = vld [vmem:[#allocation87_spill] sm:$0xff] }
 0x63b   : > { %v4577_v6 = vmul.f32 1.442695, %v4459_v20  ;;  %v4579_v52 = vmul.f32 1.442695, %v4460_v41  ;;  %v9832_v17 = vadd.f32 %v4971_v49, %v4882_v35  ;;  %v9837_v32 = vpop.eup %7758  ;;  %v10440_v49 = vld [vmem:[#allocation85_spill] sm:$0xff] }
 0x63c   : > { %5791 = vmatpush.bf16.msrb.mxu3 %v7093_v57  ;;  %v9839_v2 = vpop.eup %7760 }
 0x63d   : > { %7762 = vpow2.f32 %v4577_v6  ;;  %4646 = vadd.xlane.f32.xlu2 %v9730_v38  ;;  %3458 = vadd.xlane.f32.xlu0 %v10436_v16  ;;  %v10441_v16 = vld [vmem:[#allocation44_spill] sm:$0xff] }
 0x63e   : > { %7764 = vpow2.f32 %v4579_v52  ;;  %3464 = vadd.xlane.f32.xlu1 %v10437_v23 }
 0x640   : > { %v4395_v25 = vpop.xlane.xlu0 %4394 }
 0x641   : > { %v4884_v26 = vpop.f32.mrf.mxu2  ;;  %v4461_v38 = vsub.f32 %v9675_v40, %v4395_v25  ;;  %v4462_v33 = vsub.f32 %v10438_v46, %v4395_v25  ;;  %v7088_v40 = vld [vmem:[#allocation13 + $0x80] sm:$0xf] }
 0x642   : > { %v4973_v21 = vpop.f32.mrf.mxu3  ;;  %v7089_v12 = vor.u32 %v7398_v59, %v7088_v40 }
 0x643   : > { %v9841_v1 = vpop.eup %7762  ;;  %v9844_v28 = vadd.f32 %v4973_v21, %v4884_v26  ;;  %v4581_v14 = vmul.f32 1.442695, %v4461_v38  ;;  %v4583_v20 = vmul.f32 1.442695, %v4462_v33  ;;  %v10443_v33 = vld [vmem:[#allocation46_spill] sm:$0xff] }
 0x644   : > { %v9846_v47 = vpop.eup %7764  ;;  %v4719_v0 = vpack.c.bf16 %v9841_v1, %v9837_v32  ;;  %5613 = vmatpush.bf16.msrb.mxu1 %v7089_v12 }
 0x645   : > { %3467 = vadd.xlane.f32.xlu2 %v10439_v54  ;;  %4649 = vadd.xlane.f32.xlu0 %v9739_v30  ;;  %v4720_v34 = vpack.c.bf16 %v9846_v47, %v9839_v2  ;;  %7766 = vpow2.f32 %v4581_v14 }
 0x646   : > { %4655 = vadd.xlane.f32.xlu1 %v9757_v3  ;;  %4926 = vmatmul.bf16.gmra.mxu2 %v4719_v0  ;;  %7768 = vpow2.f32 %v4583_v20  ;;  %v4663_v20 = vadd.f32 %v9791_v18, %v9789_v61  ;;  %v10448_v61 = vld [vmem:[#allocation41_spill] sm:$0xff] }
 0x647   : > { %5015 = vmatmul.bf16.gmra.mxu3 %v4720_v34 }
 0x648   : > { %v4398_v41 = vpop.xlane.xlu1 %4397 }
 0x649   : > { %v4463_v35 = vsub.f32 %v9687_v11, %v4398_v41  ;;  %v4464_v6 = vsub.f32 %v10440_v49, %v4398_v41  ;;  %v4887_v30 = vpop.f32.mrf.mxu2 }
 0x64a   : > { %v4976_v52 = vpop.f32.mrf.mxu3 }
 0x64b   : > { %v4585_v13 = vmul.f32 1.442695, %v4463_v35  ;;  %v4587_v51 = vmul.f32 1.442695, %v4464_v6  ;;  %v9858_v3 = vadd.f32 %v4976_v52, %v4887_v30  ;;  %v9864_v29 = vpop.eup %7766  ;;  %v10445_v6 = vld [vmem:[#allocation39_spill] sm:$0xff] }
 0x64c   : > { %v9866_v57 = vpop.eup %7768 }
 0x64d   : > { %7770 = vpow2.f32 %v4585_v13  ;;  %3470 = vadd.xlane.f32.xlu2 %v10441_v16  ;;  %4652 = vadd.xlane.f32.xlu0 %v9748_v62 }
 0x64e   : > { %7772 = vpow2.f32 %v4587_v51  ;;  %4658 = vadd.xlane.f32.xlu1 %v4657_v31 }
 0x650   : > { %v4401_v11 = vpop.xlane.xlu2 %4400  ;;  %v3411_v50 = vpop.xlane.xlu1 %3410 }
 0x651   : > { %v4889_v23 = vpop.f32.mrf.mxu2  ;;  %v4465_v25 = vsub.f32 %v9699_v39, %v4401_v11  ;;  %v4466_v55 = vsub.f32 %v10442_v7, %v4401_v11  ;;  %7774 = vrcp.f32 %v3411_v50 }
 0x652   : > { %v4978_v26 = vpop.f32.mrf.mxu3 }
 0x653   : > { %v9869_v21 = vpop.eup %7770  ;;  %v9872_v38 = vadd.f32 %v4978_v26, %v4889_v23  ;;  %v4589_v0 = vmul.f32 1.442695, %v4465_v25  ;;  %v4591_v9 = vmul.f32 1.442695, %v4466_v55 }
 0x654   : > { %v9874_v62 = vpop.eup %7772  ;;  %v4721_v46 = vpack.c.bf16 %v9869_v21, %v9864_v29 }
 0x655   : > { %4661 = vadd.xlane.f32.xlu2 %v9779_v15  ;;  %3473 = vadd.xlane.f32.xlu0 %v10443_v33  ;;  %v4722_v39 = vpack.c.bf16 %v9874_v62, %v9866_v57  ;;  %v4672_v33 = vadd.f32 %v9820_v24, %v9815_v45 }
 0x656   : > { %3479 = vadd.xlane.f32.xlu1 %v10444_v5  ;;  %4931 = vmatmul.bf16.gmra.mxu2 %v4721_v46 }
 0x657   : > { %5020 = vmatmul.bf16.gmra.mxu3 %v4722_v39  ;;  %v7775_v36 = vpop.eup %7774 }
 0x658   : > { %v3414_v54 = vpop.xlane.xlu2 %3413  ;;  %v4404_v34 = vpop.xlane.xlu0 %4403  ;;  %v3875_v30 = vmul.f32 %v7775_v36, %v10445_v6 }
 0x659   : > { %7776 = vrcp.f32 %v3414_v54  ;;  %v4467_v40 = vsub.f32 %v9712_v44, %v4404_v34  ;;  %v4468_v59 = vsub.f32 %v9714_v8, %v4404_v34  ;;  %v4602_v15 = vpop.xlane.xlu1 %4601  ;;  %v4892_v14 = vpop.f32.mrf.mxu2  ;;  %v10446_v44 = vld [vmem:[#allocation48_spill] sm:$0xff]  ;;  %v10449_v34 = vld [vmem:[#allocation54_spill] sm:$0xff] }
 0x65a   : > { %7778 = vpow2.f32 %v4589_v0  ;;  %v4981_v12 = vpop.f32.mrf.mxu3  ;;  %v10447_v8 = vld [vmem:[#allocation52_spill] sm:$0xff]  ;;  %v3907_v51 = vpack.c.bf16 %v3875_v30, %v3875_v30  ;;  %v4669_v30 = vadd.f32 %v9813_v19, %v9811_v27 }
 0x65b   : > { %7780 = vpow2.f32 %v4591_v9  ;;  %v4593_v41 = vmul.f32 1.442695, %v4467_v40  ;;  %v4595_v35 = vmul.f32 1.442695, %v4468_v59  ;;  %v9887_v49 = vadd.f32 %v4981_v12, %v4892_v14 }
 0x65c   : > { %7782 = vrcp.f32 %v4602_v15  ;;  %v5159_v0 = vunpack.c.l.b16 %v3907_v51  ;;  %v10450_v51 = vld [vmem:[#allocation56_spill] sm:$0xff] }
 0x65d   : > { %7784 = vpow2.f32 %v4593_v41  ;;  %4664 = vadd.xlane.f32.xlu2 %v4663_v20  ;;  %3476 = vadd.xlane.f32.xlu0 %v10446_v44  ;;  %v4675_v44 = vadd.f32 %v9839_v2, %v9837_v32 }
 0x65e   : > { %7786 = vpow2.f32 %v4595_v35  ;;  %3482 = vadd.xlane.f32.xlu1 %v10447_v8 }
 0x65f   : > { %v7777_v52 = vpop.eup %7776 }
 0x660   : > { %v9892_v13 = vpop.eup %7778  ;;  %v3876_v18 = vmul.f32 %v7777_v52, %v10448_v61  ;;  %v3417_v31 = vpop.xlane.xlu2 %3416  ;;  %v10451_v61 = vld [vmem:[#allocation43_spill] sm:$0xff] }
 0x661   : > { %v4599_v16 = vpop.xlane.xlu0 %4598  ;;  %v9895_v11 = vpop.eup %7780 }
 0x662   : > { %v4605_v50 = vpop.xlane.xlu1 %4604  ;;  %v4894_v23 = vpop.f32.mrf.mxu2  ;;  %v3908_v26 = vpack.c.bf16 %v3876_v18, %v3876_v18  ;;  %7788 = vrcp.f32 %v4599_v16 }
 0x663   : > { %v7783_v25 = vpop.eup %7782  ;;  %v4983_v7 = vpop.f32.mrf.mxu3  ;;  %7790 = vrcp.f32 %v4605_v50 }
 0x664   : > { %v9897_v55 = vpop.eup %7784  ;;  %v9899_v46 = vadd.f32 %v4983_v7, %v4894_v23  ;;  %v5160_v5 = vunpack.c.l.b16 %v3908_v26  ;;  %7792 = vrcp.f32 %v3417_v31  ;;  %v5064_v54 = vmul.f32 %v7783_v25, %v9752_v4 }
 0x665   : > { %v9903_v39 = vpop.eup %7786  ;;  %v4723_v9 = vpack.c.bf16 %v9897_v55, %v9892_v13  ;;  %3485 = vadd.xlane.f32.xlu2 %v10449_v34  ;;  %4667 = vadd.xlane.f32.xlu0 %v9801_v10 }
 0x666   : > { %v4724_v36 = vpack.c.bf16 %v9903_v39, %v9895_v11  ;;  %v5191_v40 = vpack.c.b16 %v5160_v5, %v5159_v0  ;;  %4673 = vadd.xlane.f32.xlu1 %v4672_v33  ;;  %v5096_v14 = vpack.c.bf16 %v5064_v54, %v5064_v54  ;;  %v4678_v54 = vadd.f32 %v9846_v47, %v9841_v1 }
 0x667   : > { %4936 = vmatmul.bf16.gmra.mxu2 %v4723_v9 }
 0x668   : > { %5025 = vmatmul.bf16.gmra.mxu3 %v4724_v36  ;;  %v7789_v45 = vpop.eup %7788  ;;  %v4608_v24 = vpop.xlane.xlu2 %4607  ;;  %5525 = vmatmul.bf16.vlgmr.msrb.gmra.mxu0 %v5191_v40  ;;  %v5256_v52 = vunpack.c.l.b16 %v5096_v14 }
 0x669   : > { %v3420_v59 = vpop.xlane.xlu0 %3419  ;;  %v7791_v15 = vpop.eup %7790  ;;  %v5063_v12 = vmul.f32 %v7789_v45, %v9744_v60  ;;  %7794 = vrcp.f32 %v4608_v24  ;;  %v10453_v45 = vld [vmem:[#allocation58_spill] sm:$0xff] }
 0x66a   : > { %v3426_v4 = vpop.xlane.xlu1 %3425  ;;  %v4897_v20 = vpop.f32.mrf.mxu2  ;;  %7796 = vrcp.f32 %v3420_v59  ;;  %v5065_v8 = vmul.f32 %v7791_v15, %v9762_v43  ;;  %v10452_v43 = vld [vmem:[#allocation45_spill] sm:$0xff] }
 0x66b   : > { %v7793_v41 = vpop.eup %7792  ;;  %v4986_v10 = vpop.f32.mrf.mxu3  ;;  %v5095_v35 = vpack.c.bf16 %v5063_v12, %v5063_v12  ;;  %7798 = vrcp.f32 %v3426_v4  ;;  %v10454_v15 = vld [vmem:[#allocation49_spill] sm:$0xff]  ;;  %v10455_v12 = vld [vmem:[#allocation62_spill] sm:$0xff] }
 0x66c   : > { %v9913_v6 = vadd.f32 %v4986_v10, %v4897_v20  ;;  %v3877_v18 = vmul.f32 %v7793_v41, %v10451_v61  ;;  %v5097_v19 = vpack.c.bf16 %v5065_v8, %v5065_v8 }
 0x66d   : > { %v5255_v60 = vunpack.c.l.b16 %v5095_v35  ;;  %3488 = vadd.xlane.f32.xlu2 %v10450_v51  ;;  %4670 = vadd.xlane.f32.xlu0 %v4669_v30 }
 0x66e   : > { %4676 = vadd.xlane.f32.xlu1 %v4675_v44  ;;  %v3909_v7 = vpack.c.bf16 %v3877_v18, %v3877_v18  ;;  %v10456_v44 = vld [vmem:[#allocation47_spill] sm:$0xff] }
 0x66f   : > { %v7795_v31 = vpop.eup %7794  ;;  %v5287_v16 = vpack.c.b16 %v5256_v52, %v5255_v60 }
 0x670   : > { %v7797_v50 = vpop.eup %7796  ;;  %v4611_v23 = vpop.xlane.xlu2 %4610  ;;  %v5066_v27 = vmul.f32 %v7795_v31, %v9772_v37  ;;  %v5257_v37 = vunpack.c.l.b16 %v5097_v19  ;;  %v5161_v24 = vunpack.c.l.b16 %v3909_v7  ;;  %v10457_v31 = vld [vmem:[#allocation51_spill] sm:$0xff]  ;;  %v10459_v19 = vld [vmem:[#allocation64_spill] sm:$0xff] }
 0x671   : > { %v3423_v25 = vpop.xlane.xlu0 %3422  ;;  %5614 = vmatmul.bf16.vlgmr.msrb.gmra.mxu1 %v5287_v16  ;;  %v3878_v26 = vmul.f32 %v7797_v50, %v10452_v43  ;;  %v7799_v33 = vpop.eup %7798  ;;  %v10458_v50 = vld [vmem:[#allocation60_spill] sm:$0xff] }
 0x672   : > { %v3429_v32 = vpop.xlane.xlu1 %3428  ;;  %v4899_v2 = vpop.f32.mrf.mxu2  ;;  %7800 = vrcp.f32 %v3423_v25  ;;  %v5098_v5 = vpack.c.bf16 %v5066_v27, %v5066_v27  ;;  %v3880_v14 = vmul.f32 %v7799_v33, %v10454_v15  ;;  %v4690_v15 = vadd.f32 %v9903_v39, %v9897_v55 }
 0x673   : > { %v4988_v0 = vpop.f32.mrf.mxu3  ;;  %7802 = vrcp.f32 %v3429_v32  ;;  %v3910_v34 = vpack.c.bf16 %v3878_v26, %v3878_v26 }
 0x674   : > { %v9924_v9 = vadd.f32 %v4988_v0, %v4899_v2  ;;  %7804 = vrcp.f32 %v4611_v23  ;;  %v5258_v36 = vunpack.c.l.b16 %v5098_v5  ;;  %v3912_v52 = vpack.c.bf16 %v3880_v14, %v3880_v14 }
 0x675   : > { %4679 = vadd.xlane.f32.xlu2 %v4678_v54  ;;  %3491 = vadd.xlane.f32.xlu0 %v10453_v45  ;;  %v5162_v59 = vunpack.c.l.b16 %v3910_v34 }
 0x676   : > { %3497 = vadd.xlane.f32.xlu1 %v10455_v12  ;;  %v5288_v4 = vpack.c.b16 %v5258_v36, %v5257_v37  ;;  %v5164_v25 = vunpack.c.l.b16 %v3912_v52 }
 0x677   : > { %5703 = vmatmul.bf16.vlgmr.msrb.gmra.mxu2 %v5191_v40  ;;  %v5192_v20 = vpack.c.b16 %v5162_v59, %v5161_v24  ;;  %v4681_v40 = vadd.f32 %v9866_v57, %v9864_v29  ;;  %v10460_v29 = vld [vmem:[#allocation53_spill] sm:$0xff]  ;;  %v4684_v24 = vadd.f32 %v9874_v62, %v9869_v21 }
 0x678   : > { %5792 = vmatmul.bf16.vlgmr.msrb.gmra.mxu3 %v5287_v16  ;;  %v7801_v41 = vpop.eup %7800  ;;  %v3432_v10 = vpop.xlane.xlu2 %3431 }
 0x679   : > { %v4614_v1 = vpop.xlane.xlu0 %4613  ;;  %v7803_v47 = vpop.eup %7802  ;;  %7806 = vrcp.f32 %v3432_v10  ;;  %5530 = vmatmul.bf16.gmra.mxu0 %v5192_v20  ;;  %v3879_v8 = vmul.f32 %v7801_v41, %v10456_v44  ;;  %v10461_v41 = vld [vmem:[#allocation66_spill] sm:$0xff] }
 0x67a   : > { %v4620_v35 = vpop.xlane.xlu1 %4619  ;;  %v4902_v30 = vpop.f32.mrf.mxu2  ;;  %7808 = vrcp.f32 %v4614_v1  ;;  %v3881_v16 = vmul.f32 %v7803_v47, %v10457_v31 }
 0x67b   : > { %v7805_v60 = vpop.eup %7804  ;;  %v4991_v51 = vpop.f32.mrf.mxu3  ;;  %v3911_v18 = vpack.c.bf16 %v3879_v8, %v3879_v8  ;;  %7810 = vrcp.f32 %v4620_v35 }
 0x67c   : > { %v9932_v61 = vadd.f32 %v4991_v51, %v4902_v30  ;;  %v5067_v27 = vmul.f32 %v7805_v60, %v9784_v22  ;;  %v3913_v33 = vpack.c.bf16 %v3881_v16, %v3881_v16  ;;  %v10462_v16 = vld [vmem:[#allocation55_spill] sm:$0xff] }
 0x67d   : > { %4682 = vadd.xlane.f32.xlu2 %v4681_v40  ;;  %3494 = vadd.xlane.f32.xlu0 %v10458_v50  ;;  %v5163_v23 = vunpack.c.l.b16 %v3911_v18 }
 0x67e   : > { %3500 = vadd.xlane.f32.xlu1 %v10459_v19  ;;  %v5099_v34 = vpack.c.bf16 %v5067_v27, %v5067_v27  ;;  %v5165_v14 = vunpack.c.l.b16 %v3913_v33 }
 0x67f   : > { %v7807_v32 = vpop.eup %7806  ;;  %v9940_v2 = vpack.c.b16 %v5164_v25, %v5163_v23 }
 0x680   : > { %v7809_v43 = vpop.eup %7808  ;;  %v3435_v26 = vpop.xlane.xlu2 %3434  ;;  %v3882_v57 = vmul.f32 %v7807_v32, %v10460_v29 }
 0x681   : > { %v4617_v7 = vpop.xlane.xlu0 %4616  ;;  %5619 = vmatmul.bf16.gmra.mxu1 %v5288_v4  ;;  %v5068_v54 = vmul.f32 %v7809_v43, %v9794_v48  ;;  %v7811_v37 = vpop.eup %7810  ;;  %v5259_v48 = vunpack.c.l.b16 %v5099_v34 }
 0x682   : > { %v4623_v0 = vpop.xlane.xlu1 %4622  ;;  %v4904_v5 = vpop.f32.mrf.mxu2  ;;  %7812 = vrcp.f32 %v4617_v7  ;;  %v3914_v36 = vpack.c.bf16 %v3882_v57, %v3882_v57  ;;  %v5070_v1 = vmul.f32 %v7811_v37, %v9818_v56 }
 0x683   : > { %v4993_v22 = vpop.f32.mrf.mxu3  ;;  %7814 = vrcp.f32 %v4623_v0  ;;  %v5100_v59 = vpack.c.bf16 %v5068_v54, %v5068_v54 }
 0x684   : > { %v9944_v45 = vadd.f32 %v4993_v22, %v4904_v5  ;;  %7816 = vrcp.f32 %v3435_v26  ;;  %v5166_v12 = vunpack.c.l.b16 %v3914_v36  ;;  %v5102_v52 = vpack.c.bf16 %v5070_v1, %v5070_v1  ;;  %v10463_v26 = vld [vmem:[#allocation57_spill] sm:$0xff]  ;;  %v10465_v1 = vld [vmem:[#allocation59_spill] sm:$0xff] }
 0x685   : > { %3503 = vadd.xlane.f32.xlu2 %v10461_v41  ;;  %4685 = vadd.xlane.f32.xlu0 %v4684_v24  ;;  %v5260_v10 = vunpack.c.l.b16 %v5100_v59  ;;  %v10464_v22 = vld [vmem:[#allocation61_spill] sm:$0xff] }
 0x686   : > { %4691 = vadd.xlane.f32.xlu1 %v4690_v15  ;;  %v9952_v47 = vpack.c.b16 %v5166_v12, %v5165_v14  ;;  %v5262_v31 = vunpack.c.l.b16 %v5102_v52 }
 0x687   : > { %5708 = vmatmul.bf16.gmra.mxu2 %v5192_v20  ;;  %v5289_v21 = vpack.c.b16 %v5260_v10, %v5259_v48 }
 0x688   : > { %5797 = vmatmul.bf16.gmra.mxu3 %v5288_v4  ;;  %v7813_v62 = vpop.eup %7812  ;;  %v4626_v35 = vpop.xlane.xlu2 %4625  ;;  %v4687_v4 = vadd.f32 %v9895_v11, %v9892_v13 }
 0x689   : > { %v3438_v30 = vpop.xlane.xlu0 %3437  ;;  %v7815_v44 = vpop.eup %7814  ;;  %7818 = vrcp.f32 %v4626_v35  ;;  %5535 = vmatmul.bf16.gmra.mxu0 %v9940_v2  ;;  %v5069_v8 = vmul.f32 %v7813_v62, %v9806_v53 }
 0x68a   : > { %v3444_v55 = vpop.xlane.xlu1 %3443  ;;  %v4907_v39 = vpop.f32.mrf.mxu2  ;;  %7820 = vrcp.f32 %v3438_v30  ;;  %v5071_v40 = vmul.f32 %v7815_v44, %v9832_v17 }
 0x68b   : > { %v7817_v60 = vpop.eup %7816  ;;  %v4996_v56 = vpop.f32.mrf.mxu3  ;;  %v5101_v51 = vpack.c.bf16 %v5069_v8, %v5069_v8  ;;  %7822 = vrcp.f32 %v3444_v55  ;;  %v10466_v55 = vld [vmem:[#allocation63_spill] sm:$0xff] }
 0x68c   : > { %v9956_v20 = vadd.f32 %v4996_v56, %v4907_v39  ;;  %v3883_v50 = vmul.f32 %v7817_v60, %v10462_v16  ;;  %v5103_v43 = vpack.c.bf16 %v5071_v40, %v5071_v40 }
 0x68d   : > { %4688 = vadd.xlane.f32.xlu0 %v4687_v4  ;;  %v5261_v18 = vunpack.c.l.b16 %v5101_v51 }
 0x68e   : > { %v3915_v17 = vpack.c.bf16 %v3883_v50, %v3883_v50  ;;  %v5263_v54 = vunpack.c.l.b16 %v5103_v43 }
 0x68f   : > { %v7819_v23 = vpop.eup %7818  ;;  %v9962_v53 = vpack.c.b16 %v5262_v31, %v5261_v18  ;;  %v10467_v31 = vld [vmem:[#allocation65_spill] sm:$0xff] }
 0x690   : > { %v7821_v25 = vpop.eup %7820  ;;  %v4629_v27 = vpop.xlane.xlu2 %4628  ;;  %v5072_v32 = vmul.f32 %v7819_v23, %v9844_v28  ;;  %v5167_v37 = vunpack.c.l.b16 %v3915_v17 }
 0x691   : > { %v3441_v19 = vpop.xlane.xlu0 %3440  ;;  %5624 = vmatmul.bf16.gmra.mxu1 %v5289_v21  ;;  %v3884_v7 = vmul.f32 %v7821_v25, %v10463_v26  ;;  %v7823_v29 = vpop.eup %7822 }
 0x692   : > { %v3447_v13 = vpop.xlane.xlu1 %3446  ;;  %v4909_v11 = vpop.f32.mrf.mxu2  ;;  %7824 = vrcp.f32 %v3441_v19  ;;  %v5104_v33 = vpack.c.bf16 %v5072_v32, %v5072_v32  ;;  %v3886_v36 = vmul.f32 %v7823_v29, %v10464_v22 }
 0x693   : > { %v4998_v57 = vpop.f32.mrf.mxu3  ;;  %7826 = vrcp.f32 %v3447_v13  ;;  %v3916_v5 = vpack.c.bf16 %v3884_v7, %v3884_v7 }
 0x694   : > { %v9966_v0 = vadd.f32 %v4998_v57, %v4909_v11  ;;  %7828 = vrcp.f32 %v4629_v27  ;;  %v5264_v34 = vunpack.c.l.b16 %v5104_v33  ;;  %v3918_v35 = vpack.c.bf16 %v3886_v36, %v3886_v36 }
 0x695   : > { %v5168_v28 = vunpack.c.l.b16 %v3916_v5 }
 0x696   : > { %v9970_v24 = vpack.c.b16 %v5264_v34, %v5263_v54  ;;  %v5170_v52 = vunpack.c.l.b16 %v3918_v35 }
 0x697   : > { %5713 = vmatmul.bf16.gmra.mxu2 %v9940_v2  ;;  %v9972_v59 = vpack.c.b16 %v5168_v28, %v5167_v37 }
 0x698   : > { %5802 = vmatmul.bf16.gmra.mxu3 %v5289_v21  ;;  %v7825_v15 = vpop.eup %7824  ;;  %v3450_v14 = vpop.xlane.xlu2 %3449 }
 0x699   : > { %v4632_v12 = vpop.xlane.xlu0 %4631  ;;  %v7827_v41 = vpop.eup %7826  ;;  %7830 = vrcp.f32 %v3450_v14  ;;  %5540 = vmatmul.bf16.gmra.mxu0 %v9952_v47  ;;  %v3885_v62 = vmul.f32 %v7825_v15, %v10465_v1 }
 0x69a   : > { %v4638_v48 = vpop.xlane.xlu1 %4637  ;;  %v4912_v10 = vpop.f32.mrf.mxu2  ;;  %7832 = vrcp.f32 %v4632_v12  ;;  %v3887_v39 = vmul.f32 %v7827_v41, %v10466_v55 }
 0x69b   : > { %v7829_v30 = vpop.eup %7828  ;;  %v5001_v2 = vpop.f32.mrf.mxu3  ;;  %v3917_v21 = vpack.c.bf16 %v3885_v62, %v3885_v62  ;;  %7834 = vrcp.f32 %v4638_v48 }
 0x69c   : > { %v9976_v44 = vadd.f32 %v5001_v2, %v4912_v10  ;;  %v5073_v60 = vmul.f32 %v7829_v30, %v9858_v3  ;;  %v3919_v50 = vpack.c.bf16 %v3887_v39, %v3887_v39  ;;  %v10468_v10 = vld [vmem:[#allocation67_spill] sm:$0xff] }
 0x69d   : > { %v5169_v8 = vunpack.c.l.b16 %v3917_v21 }
 0x69e   : > { %v5105_v19 = vpack.c.bf16 %v5073_v60, %v5073_v60  ;;  %v5171_v26 = vunpack.c.l.b16 %v3919_v50 }
 0x69f   : > { %v7831_v56 = vpop.eup %7830  ;;  %v9980_v4 = vpack.c.b16 %v5170_v52, %v5169_v8  ;;  %v10469_v52 = vld [vmem:[#allocation68_spill] sm:$0xff] }
 0x6a0   : > { %v7833_v51 = vpop.eup %7832  ;;  %v3453_v40 = vpop.xlane.xlu2 %3452  ;;  %v3888_v16 = vmul.f32 %v7831_v56, %v10467_v31  ;;  %v5265_v17 = vunpack.c.l.b16 %v5105_v19 }
 0x6a1   : > { %v4635_v18 = vpop.xlane.xlu0 %4634  ;;  %5629 = vmatmul.bf16.gmra.mxu1 %v9962_v53  ;;  %v5074_v27 = vmul.f32 %v7833_v51, %v9872_v38  ;;  %v7835_v32 = vpop.eup %7834 }
 0x6a2   : > { %v4641_v23 = vpop.xlane.xlu1 %4640  ;;  %v4914_v25 = vpop.f32.mrf.mxu2  ;;  %7836 = vrcp.f32 %v4635_v18  ;;  %v3920_v3 = vpack.c.bf16 %v3888_v16, %v3888_v16  ;;  %v5076_v57 = vmul.f32 %v7835_v32, %v9899_v46 }
 0x6a3   : > { %v5003_v43 = vpop.f32.mrf.mxu3  ;;  %7838 = vrcp.f32 %v4641_v23  ;;  %v5106_v11 = vpack.c.bf16 %v5074_v27, %v5074_v27 }
 0x6a4   : > { %v9985_v13 = vadd.f32 %v5003_v43, %v4914_v25  ;;  %7840 = vrcp.f32 %v3453_v40  ;;  %v5172_v7 = vunpack.c.l.b16 %v3920_v3  ;;  %v5108_v46 = vpack.c.bf16 %v5076_v57, %v5076_v57  ;;  %v10470_v25 = vld [vmem:[#allocation70_spill] sm:$0xff] }
 0x6a5   : > { %v5266_v29 = vunpack.c.l.b16 %v5106_v11 }
 0x6a6   : > { %v9989_v33 = vpack.c.b16 %v5172_v7, %v5171_v26  ;;  %v5268_v48 = vunpack.c.l.b16 %v5108_v46 }
 0x6a7   : > { %5718 = vmatmul.bf16.gmra.mxu2 %v9952_v47  ;;  %v9992_v38 = vpack.c.b16 %v5266_v29, %v5265_v17  ;;  %v10471_v29 = vld [vmem:[#allocation69_spill] sm:$0xff] }
 0x6a8   : > { %5807 = vmatmul.bf16.gmra.mxu3 %v9962_v53  ;;  %v7837_v5 = vpop.eup %7836  ;;  %v4644_v54 = vpop.xlane.xlu2 %4643 }
 0x6a9   : > { %v3456_v34 = vpop.xlane.xlu0 %3455  ;;  %v7839_v37 = vpop.eup %7838  ;;  %7842 = vrcp.f32 %v4644_v54  ;;  %5545 = vmatmul.bf16.gmra.mxu0 %v9972_v59  ;;  %v5075_v36 = vmul.f32 %v7837_v5, %v9887_v49 }
 0x6aa   : > { %v3462_v28 = vpop.xlane.xlu1 %3461  ;;  %v4917_v22 = vpop.f32.mrf.mxu2  ;;  %7844 = vrcp.f32 %v3456_v34  ;;  %v5077_v12 = vmul.f32 %v7839_v37, %v9913_v6  ;;  %v10472_v37 = vld [vmem:[#allocation71_spill] sm:$0xff] }
 0x6ab   : > { %v7841_v15 = vpop.eup %7840  ;;  %v5006_v47 = vpop.f32.mrf.mxu3  ;;  %v5107_v53 = vpack.c.bf16 %v5075_v36, %v5075_v36  ;;  %7846 = vrcp.f32 %v3462_v28 }
 0x6ac   : > { %v9996_v14 = vadd.f32 %v5006_v47, %v4917_v22  ;;  %v3889_v1 = vmul.f32 %v7841_v15, %v10468_v10  ;;  %v5109_v55 = vpack.c.bf16 %v5077_v12, %v5077_v12 }
 0x6ad   : > { %v5267_v41 = vunpack.c.l.b16 %v5107_v53 }
 0x6ae   : > { %v3921_v6 = vpack.c.bf16 %v3889_v1, %v3889_v1  ;;  %v5269_v16 = vunpack.c.l.b16 %v5109_v55 }
 0x6af   : > { %v7843_v62 = vpop.eup %7842  ;;  %v10000_v35 = vpack.c.b16 %v5268_v48, %v5267_v41  ;;  %v10473_v48 = vld [vmem:[#allocation72_spill] sm:$0xff] }
 0x6b0   : > { %v7845_v30 = vpop.eup %7844  ;;  %v4647_v2 = vpop.xlane.xlu2 %4646  ;;  %v5078_v21 = vmul.f32 %v7843_v62, %v9924_v9  ;;  %v5173_v9 = vunpack.c.l.b16 %v3921_v6 }
 0x6b1   : > { %v3459_v49 = vpop.xlane.xlu0 %3458  ;;  %5634 = vmatmul.bf16.gmra.mxu1 %v9970_v24  ;;  %v3890_v60 = vmul.f32 %v7845_v30, %v10469_v52  ;;  %v7847_v56 = vpop.eup %7846 }
 0x6b2   : > { %v3465_v39 = vpop.xlane.xlu1 %3464  ;;  %v4919_v8 = vpop.f32.mrf.mxu2  ;;  %7848 = vrcp.f32 %v3459_v49  ;;  %v5110_v40 = vpack.c.bf16 %v5078_v21, %v5078_v21  ;;  %v3892_v27 = vmul.f32 %v7847_v56, %v10470_v25 }
 0x6b3   : > { %v5008_v51 = vpop.f32.mrf.mxu3  ;;  %7850 = vrcp.f32 %v3465_v39  ;;  %v3922_v31 = vpack.c.bf16 %v3890_v60, %v3890_v60 }
 0x6b4   : > { %v10005_v18 = vadd.f32 %v5008_v51, %v4919_v8  ;;  %7852 = vrcp.f32 %v4647_v2  ;;  %v5270_v50 = vunpack.c.l.b16 %v5110_v40  ;;  %v3924_v5 = vpack.c.bf16 %v3892_v27, %v3892_v27 }
 0x6b5   : > { %v5174_v23 = vunpack.c.l.b16 %v3922_v31 }
 0x6b6   : > { %v10009_v19 = vpack.c.b16 %v5270_v50, %v5269_v16  ;;  %v5176_v36 = vunpack.c.l.b16 %v3924_v5 }
 0x6b7   : > { %5723 = vmatmul.bf16.gmra.mxu2 %v9972_v59  ;;  %v10012_v32 = vpack.c.b16 %v5174_v23, %v5173_v9 }
 0x6b8   : > { %5812 = vmatmul.bf16.gmra.mxu3 %v9970_v24  ;;  %v7849_v43 = vpop.eup %7848  ;;  %v3468_v3 = vpop.xlane.xlu2 %3467 }
 0x6b9   : > { %v4650_v11 = vpop.xlane.xlu0 %4649  ;;  %v7851_v26 = vpop.eup %7850  ;;  %7854 = vrcp.f32 %v3468_v3  ;;  %5550 = vmatmul.bf16.gmra.mxu0 %v9980_v4  ;;  %v3891_v57 = vmul.f32 %v7849_v43, %v10471_v29 }
 0x6ba   : > { %v4656_v7 = vpop.xlane.xlu1 %4655  ;;  %v4922_v17 = vpop.f32.mrf.mxu2  ;;  %7856 = vrcp.f32 %v4650_v11  ;;  %v3893_v28 = vmul.f32 %v7851_v26, %v10472_v37 }
 0x6bb   : > { %v7853_v54 = vpop.eup %7852  ;;  %v5011_v59 = vpop.f32.mrf.mxu3  ;;  %v3923_v24 = vpack.c.bf16 %v3891_v57, %v3891_v57  ;;  %7858 = vrcp.f32 %v4656_v7 }
 0x6bc   : > { %v10016_v34 = vadd.f32 %v5011_v59, %v4922_v17  ;;  %v5079_v46 = vmul.f32 %v7853_v54, %v9932_v61  ;;  %v3925_v1 = vpack.c.bf16 %v3893_v28, %v3893_v28  ;;  %v10474_v17 = vld [vmem:[#allocation73_spill] sm:$0xff] }
 0x6bd   : > { %v5175_v22 = vunpack.c.l.b16 %v3923_v24 }
 0x6be   : > { %v5111_v49 = vpack.c.bf16 %v5079_v46, %v5079_v46  ;;  %v5177_v52 = vunpack.c.l.b16 %v3925_v1 }
 0x6bf   : > { %v7855_v15 = vpop.eup %7854  ;;  %v10020_v47 = vpack.c.b16 %v5176_v36, %v5175_v22  ;;  %v10475_v36 = vld [vmem:[#allocation74_spill] sm:$0xff] }
 0x6c0   : > { %v7857_v53 = vpop.eup %7856  ;;  %v3471_v12 = vpop.xlane.xlu2 %3470  ;;  %v3894_v10 = vmul.f32 %v7855_v15, %v10473_v48  ;;  %v5271_v6 = vunpack.c.l.b16 %v5111_v49 }
 0x6c1   : > { %v4653_v41 = vpop.xlane.xlu0 %4652  ;;  %5639 = vmatmul.bf16.gmra.mxu1 %v9992_v38  ;;  %v5080_v2 = vmul.f32 %v7857_v53, %v9944_v45  ;;  %v7859_v21 = vpop.eup %7858 }
 0x6c2   : > { %v4659_v62 = vpop.xlane.xlu1 %4658  ;;  %v4924_v30 = vpop.f32.mrf.mxu2  ;;  %7860 = vrcp.f32 %v4653_v41  ;;  %v3926_v61 = vpack.c.bf16 %v3894_v10, %v3894_v10  ;;  %v5082_v51 = vmul.f32 %v7859_v21, %v9966_v0 }
 0x6c3   : > { %v5013_v55 = vpop.f32.mrf.mxu3  ;;  %7862 = vrcp.f32 %v4659_v62  ;;  %v5112_v8 = vpack.c.bf16 %v5080_v2, %v5080_v2 }
 0x6c4   : > { %v10025_v39 = vadd.f32 %v5013_v55, %v4924_v30  ;;  %7864 = vrcp.f32 %v3471_v12  ;;  %v5178_v60 = vunpack.c.l.b16 %v3926_v61  ;;  %v5114_v0 = vpack.c.bf16 %v5082_v51, %v5082_v51  ;;  %v10476_v30 = vld [vmem:[#allocation78_spill] sm:$0xff] }
 0x6c5   : > { %v5272_v56 = vunpack.c.l.b16 %v5112_v8 }
 0x6c6   : > { %v10029_v40 = vpack.c.b16 %v5178_v60, %v5177_v52  ;;  %v5274_v7 = vunpack.c.l.b16 %v5114_v0 }
 0x6c7   : > { %5728 = vmatmul.bf16.gmra.mxu2 %v9980_v4  ;;  %v10032_v45 = vpack.c.b16 %v5272_v56, %v5271_v6  ;;  %v10477_v56 = vld [vmem:[#allocation76_spill] sm:$0xff] }
 0x6c8   : > { %5817 = vmatmul.bf16.gmra.mxu3 %v9992_v38  ;;  %v7861_v31 = vpop.eup %7860  ;;  %v4662_v16 = vpop.xlane.xlu2 %4661 }
 0x6c9   : > { %v3474_v50 = vpop.xlane.xlu0 %3473  ;;  %v7863_v9 = vpop.eup %7862  ;;  %7866 = vrcp.f32 %v4662_v16  ;;  %5555 = vmatmul.bf16.gmra.mxu0 %v9989_v33  ;;  %v5081_v27 = vmul.f32 %v7861_v31, %v9956_v20 }
 0x6ca   : > { %v3480_v23 = vpop.xlane.xlu1 %3479  ;;  %v4927_v25 = vpop.f32.mrf.mxu2  ;;  %7868 = vrcp.f32 %v3474_v50  ;;  %v5083_v11 = vmul.f32 %v7863_v9, %v9976_v44  ;;  %v10478_v9 = vld [vmem:[#allocation81_spill] sm:$0xff] }
 0x6cb   : > { %v7865_v43 = vpop.eup %7864  ;;  %v5016_v4 = vpop.f32.mrf.mxu3  ;;  %v5113_v38 = vpack.c.bf16 %v5081_v27, %v5081_v27  ;;  %7870 = vrcp.f32 %v3480_v23 }
 0x6cc   : > { %v10036_v3 = vadd.f32 %v5016_v4, %v4927_v25  ;;  %v3895_v29 = vmul.f32 %v7865_v43, %v10474_v17  ;;  %v5115_v37 = vpack.c.bf16 %v5083_v11, %v5083_v11 }
 0x6cd   : > { %v5273_v26 = vunpack.c.l.b16 %v5113_v38 }
 0x6ce   : > { %v3927_v44 = vpack.c.bf16 %v3895_v29, %v3895_v29  ;;  %v5275_v10 = vunpack.c.l.b16 %v5115_v37 }
 0x6cf   : > { %v7867_v57 = vpop.eup %7866  ;;  %v10040_v5 = vpack.c.b16 %v5274_v7, %v5273_v26  ;;  %v10479_v7 = vld [vmem:[#allocation82_spill] sm:$0xff] }
 0x6d0   : > { %v7869_v54 = vpop.eup %7868  ;;  %v4665_v59 = vpop.xlane.xlu2 %4664  ;;  %v5084_v24 = vmul.f32 %v7867_v57, %v9985_v13  ;;  %v5179_v13 = vunpack.c.l.b16 %v3927_v44 }
 0x6d1   : > { %v3477_v20 = vpop.xlane.xlu0 %3476  ;;  %5644 = vmatmul.bf16.gmra.mxu1 %v10000_v35  ;;  %v3896_v46 = vmul.f32 %v7869_v54, %v10475_v36  ;;  %v7871_v15 = vpop.eup %7870 }
 0x6d2   : > { %v3483_v28 = vpop.xlane.xlu1 %3482  ;;  %v4929_v22 = vpop.f32.mrf.mxu2  ;;  %7872 = vrcp.f32 %v3477_v20  ;;  %v5116_v12 = vpack.c.bf16 %v5084_v24, %v5084_v24  ;;  %v3898_v2 = vmul.f32 %v7871_v15, %v10476_v30 }
 0x6d3   : > { %v5018_v53 = vpop.f32.mrf.mxu3  ;;  %7874 = vrcp.f32 %v3483_v28  ;;  %v3928_v48 = vpack.c.bf16 %v3896_v46, %v3896_v46 }
 0x6d4   : > { %v10045_v41 = vadd.f32 %v5018_v53, %v4929_v22  ;;  %7876 = vrcp.f32 %v4665_v59  ;;  %v5276_v1 = vunpack.c.l.b16 %v5116_v12  ;;  %v3930_v31 = vpack.c.bf16 %v3898_v2, %v3898_v2 }
 0x6d5   : > { %v5180_v62 = vunpack.c.l.b16 %v3928_v48 }
 0x6d6   : > { %v10049_v49 = vpack.c.b16 %v5276_v1, %v5275_v10  ;;  %v5182_v27 = vunpack.c.l.b16 %v3930_v31 }
 0x6d7   : > { %5733 = vmatmul.bf16.gmra.mxu2 %v9989_v33  ;;  %v10052_v21 = vpack.c.b16 %v5180_v62, %v5179_v13 }
 0x6d8   : > { %5822 = vmatmul.bf16.gmra.mxu3 %v10000_v35  ;;  %v7873_v55 = vpop.eup %7872  ;;  %v3486_v61 = vpop.xlane.xlu2 %3485 }
 0x6d9   : > { %v4668_v8 = vpop.xlane.xlu0 %4667  ;;  %v7875_v52 = vpop.eup %7874  ;;  %7878 = vrcp.f32 %v3486_v61  ;;  %5560 = vmatmul.bf16.gmra.mxu0 %v10012_v32  ;;  %v3897_v51 = vmul.f32 %v7873_v55, %v10477_v56 }
 0x6da   : > { %v4674_v60 = vpop.xlane.xlu1 %4673  ;;  %v4932_v6 = vpop.f32.mrf.mxu2  ;;  %7880 = vrcp.f32 %v4668_v8  ;;  %v3899_v23 = vmul.f32 %v7875_v52, %v10478_v9 }
 0x6db   : > { %v7877_v16 = vpop.eup %7876  ;;  %v5021_v33 = vpop.f32.mrf.mxu3  ;;  %v3929_v35 = vpack.c.bf16 %v3897_v51, %v3897_v51  ;;  %7882 = vrcp.f32 %v4674_v60 }
 0x6dc   : > { %v10056_v50 = vadd.f32 %v5021_v33, %v4932_v6  ;;  %v5085_v0 = vmul.f32 %v7877_v16, %v9996_v14  ;;  %v3931_v29 = vpack.c.bf16 %v3899_v23, %v3899_v23  ;;  %v10480_v33 = vld [vmem:[#allocation84_spill] sm:$0xff] }
 0x6dd   : > { %v5181_v25 = vunpack.c.l.b16 %v3929_v35 }
 0x6de   : > { %v5117_v20 = vpack.c.bf16 %v5085_v0, %v5085_v0  ;;  %v5183_v36 = vunpack.c.l.b16 %v3931_v29 }
 0x6df   : > { %v7879_v43 = vpop.eup %7878  ;;  %v10060_v4 = vpack.c.b16 %v5182_v27, %v5181_v25 }
 0x6e0   : > { %v7881_v38 = vpop.eup %7880  ;;  %v3489_v11 = vpop.xlane.xlu2 %3488  ;;  %v3900_v17 = vmul.f32 %v7879_v43, %v10479_v7  ;;  %v5277_v15 = vunpack.c.l.b16 %v5117_v20  ;;  %v10481_v7 = vld [vmem:[#allocation86_spill] sm:$0xff] }
 0x6e1   : > { %v4671_v26 = vpop.xlane.xlu0 %4670  ;;  %5649 = vmatmul.bf16.gmra.mxu1 %v10009_v19  ;;  %v5086_v59 = vmul.f32 %v7881_v38, %v10005_v18  ;;  %v7883_v24 = vpop.eup %7882  ;;  %v5351_v18 = vld [vmem:[%s10320_s9] sm:$0x3] }
 0x6e2   : > { %v4677_v57 = vpop.xlane.xlu1 %4676  ;;  %v4934_v54 = vpop.f32.mrf.mxu2  ;;  %7884 = vrcp.f32 %v4671_v26  ;;  %v3932_v14 = vpack.c.bf16 %v3900_v17, %v3900_v17  ;;  %v5088_v12 = vmul.f32 %v7883_v24, %v10025_v39  ;;  %v10077_v2 = vperm.slane %v5351_v18, 0 }
 0x6e3   : > { %v5023_v37 = vpop.f32.mrf.mxu3  ;;  %7886 = vrcp.f32 %v4677_v57  ;;  %v5118_v22 = vpack.c.bf16 %v5086_v59, %v5086_v59 }
 0x6e4   : > { %v10065_v28 = vadd.f32 %v5023_v37, %v4934_v54  ;;  %7888 = vrcp.f32 %v3489_v11  ;;  %v5184_v46 = vunpack.c.l.b16 %v3932_v14  ;;  %v5120_v61 = vpack.c.bf16 %v5088_v12, %v5088_v12 }
 0x6e5   : > { %v5526_v44 = vpop.f32.mrf.mxu0  ;;  %v5278_v53 = vunpack.c.l.b16 %v5118_v22 }
 0x6e6   : > { %v10072_v48 = vpack.c.b16 %v5184_v46, %v5183_v36  ;;  %v5527_v56 = vadd.f32 %v5526_v44, %v10077_v2  ;;  %v5280_v16 = vunpack.c.l.b16 %v5120_v61 }
 0x6e7   : > { %5738 = vmatmul.bf16.gmra.mxu2 %v10012_v32  ;;  %v10075_v10 = vpack.c.b16 %v5278_v53, %v5277_v15  ;;  %v10098_v53 = vperm.slane %v5351_v18, 1  ;;  %v10482_v18 = vld [vmem:[#allocation88_spill] sm:$0xff] }
 0x6e8   : > { %5827 = vmatmul.bf16.gmra.mxu3 %v10009_v19  ;;  %v7885_v1 = vpop.eup %7884  ;;  %v4680_v13 = vpop.xlane.xlu2 %4679 }
 0x6e9   : > { %v3492_v62 = vpop.xlane.xlu0 %3491  ;;  %v7887_v30 = vpop.eup %7886  ;;  %7890 = vrcp.f32 %v4680_v13  ;;  %5565 = vmatmul.bf16.gmra.mxu0 %v10020_v47  ;;  %v5087_v32 = vmul.f32 %v7885_v1, %v10016_v34 }
 0x6ea   : > { %v3498_v39 = vpop.xlane.xlu1 %3497  ;;  %v4937_v55 = vpop.f32.mrf.mxu2  ;;  %7892 = vrcp.f32 %v3492_v62  ;;  %v5089_v6 = vmul.f32 %v7887_v30, %v10036_v3 }
 0x6eb   : > { %v7889_v8 = vpop.eup %7888  ;;  %v5026_v19 = vpop.f32.mrf.mxu3  ;;  %v5119_v60 = vpack.c.bf16 %v5087_v32, %v5087_v32  ;;  %7894 = vrcp.f32 %v3498_v39 }
 0x6ec   : > { %v10081_v52 = vadd.f32 %v5026_v19, %v4937_v55  ;;  %v3901_v35 = vmul.f32 %v7889_v8, %v10480_v33  ;;  %v5121_v11 = vpack.c.bf16 %v5089_v6, %v5089_v6 }
 0x6ed   : > { %v5528_v51 = vpop.f32.mrf.mxu0  ;;  %v5279_v31 = vunpack.c.l.b16 %v5119_v60 }
 0x6ee   : > { %v5615_v9 = vpop.f32.mrf.mxu1  ;;  %v3933_v29 = vpack.c.bf16 %v3901_v35, %v3901_v35  ;;  %v5529_v14 = vadd.f32 %v5528_v51, %v10077_v2 }
 0x6ef   : > { %v7891_v34 = vpop.eup %7890  ;;  %v5616_v23 = vadd.f32 %v5615_v9, %v5527_v56  ;;  %v10087_v25 = vpack.c.b16 %v5280_v16, %v5279_v31 }
 0x6f0   : > { %v7893_v27 = vpop.eup %7892  ;;  %v4683_v0 = vpop.xlane.xlu2 %4682  ;;  %v5090_v38 = vmul.f32 %v7891_v34, %v10045_v41  ;;  %v5281_v41 = vunpack.c.l.b16 %v5121_v11  ;;  %v5185_v22 = vunpack.c.l.b16 %v3933_v29 }
 0x6f1   : > { %v3495_v43 = vpop.xlane.xlu0 %3494  ;;  %5873 = vst [vmem:[%s10090_s25] sm:$0xff] %v5616_v23  ;;  %5654 = vmatmul.bf16.gmra.mxu1 %v10032_v45  ;;  %v3902_v17 = vmul.f32 %v7893_v27, %v10481_v7  ;;  %v7895_v57 = vpop.eup %7894 }
 0x6f2   : > { %v3501_v3 = vpop.xlane.xlu1 %3500  ;;  %v4939_v26 = vpop.f32.mrf.mxu2  ;;  %7896 = vrcp.f32 %v3495_v43  ;;  %v5122_v59 = vpack.c.bf16 %v5090_v38, %v5090_v38  ;;  %v3904_v46 = vmul.f32 %v7895_v57, %v9716_v63 }
 0x6f3   : > { %v5028_v54 = vpop.f32.mrf.mxu3  ;;  %7898 = vrcp.f32 %v3501_v3  ;;  %v3934_v24 = vpack.c.bf16 %v3902_v17, %v3902_v17 }
 0x6f4   : > { %v5029_v20 = vadd.f32 %v5028_v54, %v4939_v26  ;;  %7900 = vrcp.f32 %v4683_v0  ;;  %v5282_v37 = vunpack.c.l.b16 %v5122_v59  ;;  %v3936_v61 = vpack.c.bf16 %v3904_v46, %v3904_v46 }
 0x6f5   : > { %v5186_v36 = vunpack.c.l.b16 %v3934_v24 }
 0x6f6   : > { %v5531_v44 = vpop.f32.mrf.mxu0  ;;  %v5617_v15 = vpop.f32.mrf.mxu1  ;;  %v10100_v12 = vpack.c.b16 %v5282_v37, %v5281_v41  ;;  %v5188_v16 = vunpack.c.l.b16 %v3936_v61 }
 0x6f7   : > { %5743 = vmatmul.bf16.gmra.mxu2 %v10020_v47  ;;  %v5618_v1 = vadd.f32 %v5617_v15, %v5529_v14  ;;  %v10103_v13 = vpack.c.b16 %v5186_v36, %v5185_v22  ;;  %v5532_v51 = vadd.f32 %v5531_v44, %v10077_v2 }
 0x6f8   : > { %5832 = vmatmul.bf16.gmra.mxu3 %v10032_v45  ;;  %v7897_v62 = vpop.eup %7896  ;;  %v3504_v30 = vpop.xlane.xlu2 %3503 }
 0x6f9   : > { %v4686_v39 = vpop.xlane.xlu0 %4685  ;;  %v7899_v55 = vpop.eup %7898  ;;  %5875 = vst [vmem:[%s10090_s25 + $0x10] sm:$0xff] %v5618_v1  ;;  %7902 = vrcp.f32 %v3504_v30  ;;  %5570 = vmatmul.bf16.gmra.mxu0 %v10029_v40  ;;  %v3903_v32 = vmul.f32 %v7897_v62, %v10482_v18 }
 0x6fa   : > { %v4692_v63 = vpop.xlane.xlu1 %4691  ;;  %v5704_v47 = vpop.f32.mrf.mxu2  ;;  %7904 = vrcp.f32 %v4686_v39  ;;  %v3905_v56 = vmul.f32 %v7899_v55, %v9726_v58 }
 0x6fb   : > { %v7901_v8 = vpop.eup %7900  ;;  %v5705_v45 = vadd.f32 %v5704_v47, %v10098_v53  ;;  %v5793_v19 = vpop.f32.mrf.mxu3  ;;  %7906 = vrcp.f32 %v4692_v63  ;;  %v3935_v60 = vpack.c.bf16 %v3903_v32, %v3903_v32 }
 0x6fc   : > { %v5091_v33 = vmul.f32 %v7901_v8, %v10056_v50  ;;  %v3937_v11 = vpack.c.bf16 %v3905_v56, %v3905_v56 }
 0x6fd   : > { %v5794_v6 = vadd.f32 %v5793_v19, %v5705_v45  ;;  %v5187_v31 = vunpack.c.l.b16 %v3935_v60 }
 0x6fe   : > { %v5533_v35 = vpop.f32.mrf.mxu0  ;;  %v5620_v9 = vpop.f32.mrf.mxu1  ;;  %v5123_v26 = vpack.c.bf16 %v5091_v33, %v5091_v33 }
 0x6ff   : > { %5874 = vst [vmem:[%s10090_s25 + $0x8] sm:$0xff] %v5794_v6  ;;  %v7903_v34 = vpop.eup %7902  ;;  %v5621_v23 = vadd.f32 %v5620_v9, %v5532_v51  ;;  %v10113_v27 = vpack.c.b16 %v5188_v16, %v5187_v31  ;;  %v5534_v41 = vadd.f32 %v5533_v35, %v10077_v2 }
 0x700   : > { %v7905_v0 = vpop.eup %7904  ;;  %v3906_v43 = vmul.f32 %v7903_v34, %v9735_v42  ;;  %v5189_v42 = vunpack.c.l.b16 %v3937_v11  ;;  %v5283_v37 = vunpack.c.l.b16 %v5123_v26 }
 0x701   : > { %v4689_v38 = vpop.xlane.xlu0 %4688  ;;  %v7907_v58 = vpop.eup %7906  ;;  %5877 = vst [vmem:[%s10090_s25 + $0x20] sm:$0xff] %v5621_v23  ;;  %5659 = vmatmul.bf16.gmra.mxu1 %v10040_v5  ;;  %v5092_v50 = vmul.f32 %v7905_v0, %v10065_v28 }
 0x702   : > { %7908 = vrcp.f32 %v4689_v38  ;;  %v5706_v3 = vpop.f32.mrf.mxu2  ;;  %v3938_v29 = vpack.c.bf16 %v3906_v43, %v3906_v43  ;;  %v5094_v54 = vmul.f32 %v7907_v58, %v5029_v20 }
 0x703   : > { %v5707_v7 = vadd.f32 %v5706_v3, %v10098_v53  ;;  %v5795_v17 = vpop.f32.mrf.mxu3  ;;  %v5124_v57 = vpack.c.bf16 %v5092_v50, %v5092_v50 }
 0x704   : > { %v5190_v24 = vunpack.c.l.b16 %v3938_v29  ;;  %v5126_v1 = vpack.c.bf16 %v5094_v54, %v5094_v54 }
 0x705   : > { %v5796_v59 = vadd.f32 %v5795_v17, %v5707_v7  ;;  %v5284_v14 = vunpack.c.l.b16 %v5124_v57 }
 0x706   : > { %v5536_v22 = vpop.f32.mrf.mxu0  ;;  %v5622_v36 = vpop.f32.mrf.mxu1  ;;  %v10123_v28 = vpack.c.b16 %v5190_v24, %v5189_v42  ;;  %v5286_v47 = vunpack.c.l.b16 %v5126_v1 }
 0x707   : > { %5876 = vst [vmem:[%s10090_s25 + $0x18] sm:$0xff] %v5796_v59  ;;  %5748 = vmatmul.bf16.gmra.mxu2 %v10029_v40  ;;  %v5623_v44 = vadd.f32 %v5622_v36, %v5534_v41  ;;  %v10126_v20 = vpack.c.b16 %v5284_v14, %v5283_v37 }
 0x708   : > { %v7909_v46 = vpop.eup %7908  ;;  %5837 = vmatmul.bf16.gmra.mxu3 %v10040_v5  ;;  %v5537_v5 = vadd.f32 %v5536_v22, %v10077_v2 }
 0x709   : > { %v5093_v15 = vmul.f32 %v7909_v46, %v10081_v52  ;;  %5879 = vst [vmem:[%s10090_s25 + $0x30] sm:$0xff] %v5623_v44  ;;  %5575 = vmatmul.bf16.gmra.mxu0 %v10052_v21 }
 0x70a   : > { %v5709_v62 = vpop.f32.mrf.mxu2 }
 0x70b   : > { %v5710_v30 = vadd.f32 %v5709_v62, %v10098_v53  ;;  %v5798_v40 = vpop.f32.mrf.mxu3  ;;  %v5125_v39 = vpack.c.bf16 %v5093_v15, %v5093_v15 }
 0x70d   : > { %v5799_v55 = vadd.f32 %v5798_v40, %v5710_v30  ;;  %v5285_v63 = vunpack.c.l.b16 %v5125_v39 }
 0x70e   : > { %v5538_v18 = vpop.f32.mrf.mxu0  ;;  %v5625_v32 = vpop.f32.mrf.mxu1 }
 0x70f   : > { %5878 = vst [vmem:[%s10090_s25 + $0x28] sm:$0xff] %v5799_v55  ;;  %v10134_v52 = vpack.c.b16 %v5286_v47, %v5285_v63  ;;  %v5626_v61 = vadd.f32 %v5625_v32, %v5537_v5  ;;  %v5539_v6 = vadd.f32 %v5538_v18, %v10077_v2 }
 0x711   : > { %5881 = vst [vmem:[%s10090_s25 + $0x40] sm:$0xff] %v5626_v61  ;;  %5664 = vmatmul.bf16.gmra.mxu1 %v10049_v49 }
 0x712   : > { %v5711_v8 = vpop.f32.mrf.mxu2 }
 0x713   : > { %v5712_v45 = vadd.f32 %v5711_v8, %v10098_v53  ;;  %v5800_v19 = vpop.f32.mrf.mxu3 }
 0x715   : > { %v5801_v60 = vadd.f32 %v5800_v19, %v5712_v45 }
 0x716   : > { %v5541_v56 = vpop.f32.mrf.mxu0  ;;  %v5627_v51 = vpop.f32.mrf.mxu1 }
 0x717   : > { %5880 = vst [vmem:[%s10090_s25 + $0x38] sm:$0xff] %v5801_v60  ;;  %5753 = vmatmul.bf16.gmra.mxu2 %v10052_v21  ;;  %v5628_v31 = vadd.f32 %v5627_v51, %v5539_v6  ;;  %v5542_v34 = vadd.f32 %v5541_v56, %v10077_v2 }
 0x718   : > { %5842 = vmatmul.bf16.gmra.mxu3 %v10049_v49 }
 0x719   : > { %5883 = vst [vmem:[%s10090_s25 + $0x50] sm:$0xff] %v5628_v31  ;;  %5580 = vmatmul.bf16.gmra.mxu0 %v10060_v4 }
 0x71a   : > { %v5714_v16 = vpop.f32.mrf.mxu2 }
 0x71b   : > { %v5715_v33 = vadd.f32 %v5714_v16, %v10098_v53  ;;  %v5803_v35 = vpop.f32.mrf.mxu3 }
 0x71d   : > { %v5804_v9 = vadd.f32 %v5803_v35, %v5715_v33 }
 0x71e   : > { %v5543_v23 = vpop.f32.mrf.mxu0  ;;  %v5630_v0 = vpop.f32.mrf.mxu1 }
 0x71f   : > { %5882 = vst [vmem:[%s10090_s25 + $0x48] sm:$0xff] %v5804_v9  ;;  %v5631_v43 = vadd.f32 %v5630_v0, %v5542_v34  ;;  %v5544_v58 = vadd.f32 %v5543_v23, %v10077_v2 }
 0x721   : > { %5885 = vst [vmem:[%s10090_s25 + $0x60] sm:$0xff] %v5631_v43  ;;  %5669 = vmatmul.bf16.gmra.mxu1 %v10075_v10 }
 0x722   : > { %v5716_v49 = vpop.f32.mrf.mxu2 }
 0x723   : > { %v5717_v21 = vadd.f32 %v5716_v49, %v10098_v53  ;;  %v5805_v38 = vpop.f32.mrf.mxu3 }
 0x725   : > { %v5806_v11 = vadd.f32 %v5805_v38, %v5717_v21 }
 0x726   : > { %v5546_v3 = vpop.f32.mrf.mxu0  ;;  %v5632_v50 = vpop.f32.mrf.mxu1 }
 0x727   : > { %5884 = vst [vmem:[%s10090_s25 + $0x58] sm:$0xff] %v5806_v11  ;;  %5758 = vmatmul.bf16.gmra.mxu2 %v10060_v4  ;;  %v5633_v26 = vadd.f32 %v5632_v50, %v5544_v58  ;;  %v5547_v54 = vadd.f32 %v5546_v3, %v10077_v2 }
 0x728   : > { %5847 = vmatmul.bf16.gmra.mxu3 %v10075_v10 }
 0x729   : > { %5887 = vst [vmem:[%s10090_s25 + $0x70] sm:$0xff] %v5633_v26  ;;  %5585 = vmatmul.bf16.gmra.mxu0 %v10072_v48 }
 0x72a   : > { %v5719_v7 = vpop.f32.mrf.mxu2 }
 0x72b   : > { %v5720_v17 = vadd.f32 %v5719_v7, %v10098_v53  ;;  %v5808_v29 = vpop.f32.mrf.mxu3 }
 0x72d   : > { %v5809_v57 = vadd.f32 %v5808_v29, %v5720_v17 }
 0x72e   : > { %v5548_v59 = vpop.f32.mrf.mxu0  ;;  %v5635_v42 = vpop.f32.mrf.mxu1 }
 0x72f   : > { %5886 = vst [vmem:[%s10090_s25 + $0x68] sm:$0xff] %v5809_v57  ;;  %v5636_v24 = vadd.f32 %v5635_v42, %v5547_v54  ;;  %v5549_v14 = vadd.f32 %v5548_v59, %v10077_v2 }
 0x731   : > { %5889 = vst [vmem:[%s10090_s25 + $0x80] sm:$0xff] %v5636_v24  ;;  %5674 = vmatmul.bf16.gmra.mxu1 %v10087_v25 }
 0x732   : > { %v5721_v4 = vpop.f32.mrf.mxu2 }
 0x733   : > { %v5722_v10 = vadd.f32 %v5721_v4, %v10098_v53  ;;  %v5810_v41 = vpop.f32.mrf.mxu3 }
 0x735   : > { %v5811_v37 = vadd.f32 %v5810_v41, %v5722_v10 }
 0x736   : > { %v5551_v22 = vpop.f32.mrf.mxu0  ;;  %v5637_v36 = vpop.f32.mrf.mxu1 }
 0x737   : > { %5888 = vst [vmem:[%s10090_s25 + $0x78] sm:$0xff] %v5811_v37  ;;  %5763 = vmatmul.bf16.gmra.mxu2 %v10072_v48  ;;  %v5638_v46 = vadd.f32 %v5637_v36, %v5549_v14  ;;  %v5552_v30 = vadd.f32 %v5551_v22, %v10077_v2 }
 0x738   : > { %5852 = vmatmul.bf16.gmra.mxu3 %v10087_v25 }
 0x739   : > { %5891 = vst [vmem:[%s10090_s25 + $0x90] sm:$0xff] %v5638_v46  ;;  %5590 = vmatmul.bf16.gmra.mxu0 %v10103_v13 }
 0x73a   : > { %v5724_v44 = vpop.f32.mrf.mxu2 }
 0x73b   : > { %v5725_v15 = vadd.f32 %v5724_v44, %v10098_v53  ;;  %v5813_v1 = vpop.f32.mrf.mxu3 }
 0x73d   : > { %v5814_v62 = vadd.f32 %v5813_v1, %v5725_v15 }
 0x73e   : > { %v5553_v40 = vpop.f32.mrf.mxu0  ;;  %v5640_v39 = vpop.f32.mrf.mxu1 }
 0x73f   : > { %5890 = vst [vmem:[%s10090_s25 + $0x88] sm:$0xff] %v5814_v62  ;;  %v5641_v55 = vadd.f32 %v5640_v39, %v5552_v30  ;;  %v5554_v5 = vadd.f32 %v5553_v40, %v10077_v2 }
 0x741   : > { %5893 = vst [vmem:[%s10090_s25 + $0xa0] sm:$0xff] %v5641_v55  ;;  %5679 = vmatmul.bf16.gmra.mxu1 %v10100_v12 }
 0x742   : > { %v5726_v48 = vpop.f32.mrf.mxu2 }
 0x743   : > { %v5727_v25 = vadd.f32 %v5726_v48, %v10098_v53  ;;  %v5815_v63 = vpop.f32.mrf.mxu3 }
 0x745   : > { %v5816_v47 = vadd.f32 %v5815_v63, %v5727_v25 }
 0x746   : > { %v5556_v18 = vpop.f32.mrf.mxu0  ;;  %v5642_v32 = vpop.f32.mrf.mxu1 }
 0x747   : > { %5892 = vst [vmem:[%s10090_s25 + $0x98] sm:$0xff] %v5816_v47  ;;  %5768 = vmatmul.bf16.gmra.mxu2 %v10103_v13  ;;  %v5643_v61 = vadd.f32 %v5642_v32, %v5554_v5  ;;  %v5557_v6 = vadd.f32 %v5556_v18, %v10077_v2 }
 0x748   : > { %5857 = vmatmul.bf16.gmra.mxu3 %v10100_v12 }
 0x749   : > { %5895 = vst [vmem:[%s10090_s25 + $0xb0] sm:$0xff] %v5643_v61  ;;  %5595 = vmatmul.bf16.gmra.mxu0 %v10113_v27 }
 0x74a   : > { %v5729_v8 = vpop.f32.mrf.mxu2 }
 0x74b   : > { %v5730_v45 = vadd.f32 %v5729_v8, %v10098_v53  ;;  %v5818_v19 = vpop.f32.mrf.mxu3 }
 0x74d   : > { %v5819_v60 = vadd.f32 %v5818_v19, %v5730_v45 }
 0x74e   : > { %v5558_v56 = vpop.f32.mrf.mxu0  ;;  %v5645_v51 = vpop.f32.mrf.mxu1 }
 0x74f   : > { %5894 = vst [vmem:[%s10090_s25 + $0xa8] sm:$0xff] %v5819_v60  ;;  %v5646_v31 = vadd.f32 %v5645_v51, %v5557_v6  ;;  %v5559_v35 = vadd.f32 %v5558_v56, %v10077_v2 }
 0x751   : > { %5897 = vst [vmem:[%s10090_s25 + $0xc0] sm:$0xff] %v5646_v31  ;;  %5684 = vmatmul.bf16.gmra.mxu1 %v10126_v20 }
 0x752   : > { %v5731_v12 = vpop.f32.mrf.mxu2 }
 0x753   : > { %v5732_v13 = vadd.f32 %v5731_v12, %v10098_v53  ;;  %v5820_v16 = vpop.f32.mrf.mxu3 }
 0x755   : > { %v5821_v33 = vadd.f32 %v5820_v16, %v5732_v13 }
 0x756   : > { %v5561_v9 = vpop.f32.mrf.mxu0  ;;  %v5647_v34 = vpop.f32.mrf.mxu1 }
 0x757   : > { %5896 = vst [vmem:[%s10090_s25 + $0xb8] sm:$0xff] %v5821_v33  ;;  %5773 = vmatmul.bf16.gmra.mxu2 %v10113_v27  ;;  %v5648_v23 = vadd.f32 %v5647_v34, %v5559_v35  ;;  %v5562_v38 = vadd.f32 %v5561_v9, %v10077_v2 }
 0x758   : > { %5862 = vmatmul.bf16.gmra.mxu3 %v10126_v20 }
 0x759   : > { %5899 = vst [vmem:[%s10090_s25 + $0xd0] sm:$0xff] %v5648_v23  ;;  %5600 = vmatmul.bf16.gmra.mxu0 %v10123_v28 }
 0x75a   : > { %v5734_v0 = vpop.f32.mrf.mxu2 }
 0x75b   : > { %v5735_v43 = vadd.f32 %v5734_v0, %v10098_v53  ;;  %v5823_v49 = vpop.f32.mrf.mxu3 }
 0x75d   : > { %v5824_v21 = vadd.f32 %v5823_v49, %v5735_v43 }
 0x75e   : > { %v5563_v11 = vpop.f32.mrf.mxu0  ;;  %v5650_v58 = vpop.f32.mrf.mxu1 }
 0x75f   : > { %5898 = vst [vmem:[%s10090_s25 + $0xc8] sm:$0xff] %v5824_v21  ;;  %v5651_v3 = vadd.f32 %v5650_v58, %v5562_v38  ;;  %v5564_v7 = vadd.f32 %v5563_v11, %v10077_v2 }
 0x761   : > { %5901 = vst [vmem:[%s10090_s25 + $0xe0] sm:$0xff] %v5651_v3  ;;  %5689 = vmatmul.bf16.gmra.mxu1 %v10134_v52 }
 0x762   : > { %v5736_v27 = vpop.f32.mrf.mxu2 }
 0x763   : > { %v5737_v20 = vadd.f32 %v5736_v27, %v10098_v53  ;;  %v5825_v50 = vpop.f32.mrf.mxu3 }
 0x765   : > { %v5826_v26 = vadd.f32 %v5825_v50, %v5737_v20 }
 0x766   : > { %v5566_v17 = vpop.f32.mrf.mxu0  ;;  %v5652_v29 = vpop.f32.mrf.mxu1 }
 0x767   : > { %5900 = vst [vmem:[%s10090_s25 + $0xd8] sm:$0xff] %v5826_v26  ;;  %5778 = vmatmul.bf16.gmra.mxu2 %v10123_v28  ;;  %v5653_v57 = vadd.f32 %v5652_v29, %v5564_v7  ;;  %v5567_v4 = vadd.f32 %v5566_v17, %v10077_v2 }
 0x768   : > { %5867 = vmatmul.bf16.gmra.mxu3 %v10134_v52 }
 0x769   : > { %5903 = vst [vmem:[%s10090_s25 + $0xf0] sm:$0xff] %v5653_v57 }
 0x76a   : > { %v5739_v54 = vpop.f32.mrf.mxu2 }
 0x76b   : > { %v5740_v59 = vadd.f32 %v5739_v54, %v10098_v53  ;;  %v5828_v42 = vpop.f32.mrf.mxu3 }
 0x76d   : > { %v5829_v24 = vadd.f32 %v5828_v42, %v5740_v59 }
 0x76e   : > { %v5568_v10 = vpop.f32.mrf.mxu0  ;;  %v5655_v41 = vpop.f32.mrf.mxu1 }
 0x76f   : > { %5902 = vst [vmem:[%s10090_s25 + $0xe8] sm:$0xff] %v5829_v24  ;;  %v5656_v37 = vadd.f32 %v5655_v41, %v5567_v4  ;;  %v5569_v36 = vadd.f32 %v5568_v10, %v10077_v2 }
 0x771   : > { %5905 = vst [vmem:[%s10090_s25 + $0x100] sm:$0xff] %v5656_v37 }
 0x772   : > { %v5741_v28 = vpop.f32.mrf.mxu2 }
 0x773   : > { %v5742_v14 = vadd.f32 %v5741_v28, %v10098_v53  ;;  %v5830_v52 = vpop.f32.mrf.mxu3 }
 0x775   : > { %v5831_v22 = vadd.f32 %v5830_v52, %v5742_v14 }
 0x776   : > { %v5571_v46 = vpop.f32.mrf.mxu0  ;;  %v5657_v44 = vpop.f32.mrf.mxu1 }
 0x777   : > { %5904 = vst [vmem:[%s10090_s25 + $0xf8] sm:$0xff] %v5831_v22  ;;  %v5658_v15 = vadd.f32 %v5657_v44, %v5569_v36  ;;  %v5572_v39 = vadd.f32 %v5571_v46, %v10077_v2 }
 0x779   : > { %5907 = vst [vmem:[%s10090_s25 + $0x110] sm:$0xff] %v5658_v15 }
 0x77a   : > { %v5744_v1 = vpop.f32.mrf.mxu2 }
 0x77b   : > { %v5745_v62 = vadd.f32 %v5744_v1, %v10098_v53  ;;  %v5833_v30 = vpop.f32.mrf.mxu3 }
 0x77d   : > { %v5834_v40 = vadd.f32 %v5833_v30, %v5745_v62 }
 0x77e   : > { %v5573_v55 = vpop.f32.mrf.mxu0  ;;  %v5660_v48 = vpop.f32.mrf.mxu1 }
 0x77f   : > { %5906 = vst [vmem:[%s10090_s25 + $0x108] sm:$0xff] %v5834_v40  ;;  %v5661_v25 = vadd.f32 %v5660_v48, %v5572_v39  ;;  %v5574_v32 = vadd.f32 %v5573_v55, %v10077_v2 }
 0x781   : > { %5909 = vst [vmem:[%s10090_s25 + $0x120] sm:$0xff] %v5661_v25 }
 0x782   : > { %v5746_v63 = vpop.f32.mrf.mxu2 }
 0x783   : > { %v5747_v47 = vadd.f32 %v5746_v63, %v10098_v53  ;;  %v5835_v5 = vpop.f32.mrf.mxu3 }
 0x785   : > { %v5836_v18 = vadd.f32 %v5835_v5, %v5747_v47 }
 0x786   : > { %v5576_v61 = vpop.f32.mrf.mxu0  ;;  %v5662_v8 = vpop.f32.mrf.mxu1 }
 0x787   : > { %5908 = vst [vmem:[%s10090_s25 + $0x118] sm:$0xff] %v5836_v18  ;;  %v5663_v45 = vadd.f32 %v5662_v8, %v5574_v32  ;;  %v5577_v51 = vadd.f32 %v5576_v61, %v10077_v2 }
 0x789   : > { %5911 = vst [vmem:[%s10090_s25 + $0x130] sm:$0xff] %v5663_v45 }
 0x78a   : > { %v5749_v19 = vpop.f32.mrf.mxu2 }
 0x78b   : > { %v5750_v60 = vadd.f32 %v5749_v19, %v10098_v53  ;;  %v5838_v6 = vpop.f32.mrf.mxu3 }
 0x78d   : > { %v5839_v56 = vadd.f32 %v5838_v6, %v5750_v60 }
 0x78e   : > { %v5578_v31 = vpop.f32.mrf.mxu0  ;;  %v5665_v12 = vpop.f32.mrf.mxu1 }
 0x78f   : > { %5910 = vst [vmem:[%s10090_s25 + $0x128] sm:$0xff] %v5839_v56  ;;  %v5666_v13 = vadd.f32 %v5665_v12, %v5577_v51  ;;  %v5579_v34 = vadd.f32 %v5578_v31, %v10077_v2 }
 0x791   : > { %5913 = vst [vmem:[%s10090_s25 + $0x140] sm:$0xff] %v5666_v13 }
 0x792   : > { %v5751_v16 = vpop.f32.mrf.mxu2 }
 0x793   : > { %v5752_v33 = vadd.f32 %v5751_v16, %v10098_v53  ;;  %v5840_v35 = vpop.f32.mrf.mxu3 }
 0x795   : > { %v5841_v9 = vadd.f32 %v5840_v35, %v5752_v33 }
 0x796   : > { %v5581_v23 = vpop.f32.mrf.mxu0  ;;  %v5667_v0 = vpop.f32.mrf.mxu1 }
 0x797   : > { %5912 = vst [vmem:[%s10090_s25 + $0x138] sm:$0xff] %v5841_v9  ;;  %v5668_v43 = vadd.f32 %v5667_v0, %v5579_v34  ;;  %v5582_v58 = vadd.f32 %v5581_v23, %v10077_v2 }
 0x799   : > { %5915 = vst [vmem:[%s10090_s25 + $0x150] sm:$0xff] %v5668_v43 }
 0x79a   : > { %v5754_v49 = vpop.f32.mrf.mxu2 }
 0x79b   : > { %v5755_v21 = vadd.f32 %v5754_v49, %v10098_v53  ;;  %v5843_v38 = vpop.f32.mrf.mxu3 }
 0x79d   : > { %v5844_v11 = vadd.f32 %v5843_v38, %v5755_v21 }
 0x79e   : > { %v5583_v3 = vpop.f32.mrf.mxu0  ;;  %v5670_v27 = vpop.f32.mrf.mxu1 }
 0x79f   : > { %5914 = vst [vmem:[%s10090_s25 + $0x148] sm:$0xff] %v5844_v11  ;;  %v5671_v20 = vadd.f32 %v5670_v27, %v5582_v58  ;;  %v5584_v29 = vadd.f32 %v5583_v3, %v10077_v2 }
 0x7a1   : > { %5917 = vst [vmem:[%s10090_s25 + $0x160] sm:$0xff] %v5671_v20 }
 0x7a2   : > { %v5756_v50 = vpop.f32.mrf.mxu2 }
 0x7a3   : > { %v5757_v26 = vadd.f32 %v5756_v50, %v10098_v53  ;;  %v5845_v7 = vpop.f32.mrf.mxu3 }
 0x7a5   : > { %v5846_v17 = vadd.f32 %v5845_v7, %v5757_v26 }
 0x7a6   : > { %v5586_v57 = vpop.f32.mrf.mxu0  ;;  %v5672_v54 = vpop.f32.mrf.mxu1 }
 0x7a7   : > { %5916 = vst [vmem:[%s10090_s25 + $0x158] sm:$0xff] %v5846_v17  ;;  %v5673_v59 = vadd.f32 %v5672_v54, %v5584_v29  ;;  %v5587_v41 = vadd.f32 %v5586_v57, %v10077_v2 }
 0x7a9   : > { %5919 = vst [vmem:[%s10090_s25 + $0x170] sm:$0xff] %v5673_v59 }
 0x7aa   : > { %v5759_v42 = vpop.f32.mrf.mxu2 }
 0x7ab   : > { %v5760_v24 = vadd.f32 %v5759_v42, %v10098_v53  ;;  %v5848_v4 = vpop.f32.mrf.mxu3 }
 0x7ad   : > { %v5849_v10 = vadd.f32 %v5848_v4, %v5760_v24 }
 0x7ae   : > { %v5588_v37 = vpop.f32.mrf.mxu0  ;;  %v5675_v28 = vpop.f32.mrf.mxu1 }
 0x7af   : > { %5918 = vst [vmem:[%s10090_s25 + $0x168] sm:$0xff] %v5849_v10  ;;  %v5676_v14 = vadd.f32 %v5675_v28, %v5587_v41  ;;  %v5589_v44 = vadd.f32 %v5588_v37, %v10077_v2 }
 0x7b1   : > { %5921 = vst [vmem:[%s10090_s25 + $0x180] sm:$0xff] %v5676_v14 }
 0x7b2   : > { %v5761_v52 = vpop.f32.mrf.mxu2 }
 0x7b3   : > { %v5762_v22 = vadd.f32 %v5761_v52, %v10098_v53  ;;  %v5850_v36 = vpop.f32.mrf.mxu3 }
 0x7b5   : > { %v5851_v46 = vadd.f32 %v5850_v36, %v5762_v22 }
 0x7b6   : > { %v5591_v15 = vpop.f32.mrf.mxu0  ;;  %v5677_v1 = vpop.f32.mrf.mxu1 }
 0x7b7   : > { %5920 = vst [vmem:[%s10090_s25 + $0x178] sm:$0xff] %v5851_v46  ;;  %v5678_v62 = vadd.f32 %v5677_v1, %v5589_v44  ;;  %v5592_v48 = vadd.f32 %v5591_v15, %v10077_v2 }
 0x7b9   : > { %5923 = vst [vmem:[%s10090_s25 + $0x190] sm:$0xff] %v5678_v62 }
 0x7ba   : > { %v5764_v30 = vpop.f32.mrf.mxu2 }
 0x7bb   : > { %v5765_v40 = vadd.f32 %v5764_v30, %v10098_v53  ;;  %v5853_v39 = vpop.f32.mrf.mxu3 }
 0x7bd   : > { %v5854_v55 = vadd.f32 %v5853_v39, %v5765_v40 }
 0x7be   : > { %v5593_v25 = vpop.f32.mrf.mxu0  ;;  %v5680_v63 = vpop.f32.mrf.mxu1 }
 0x7bf   : > { %5922 = vst [vmem:[%s10090_s25 + $0x188] sm:$0xff] %v5854_v55  ;;  %v5681_v47 = vadd.f32 %v5680_v63, %v5592_v48  ;;  %v5594_v8 = vadd.f32 %v5593_v25, %v10077_v2 }
 0x7c1   : > { %5925 = vst [vmem:[%s10090_s25 + $0x1a0] sm:$0xff] %v5681_v47 }
 0x7c2   : > { %v5766_v5 = vpop.f32.mrf.mxu2 }
 0x7c3   : > { %v5767_v18 = vadd.f32 %v5766_v5, %v10098_v53  ;;  %v5855_v32 = vpop.f32.mrf.mxu3 }
 0x7c5   : > { %v5856_v61 = vadd.f32 %v5855_v32, %v5767_v18 }
 0x7c6   : > { %v5596_v45 = vpop.f32.mrf.mxu0  ;;  %v5682_v19 = vpop.f32.mrf.mxu1 }
 0x7c7   : > { %5924 = vst [vmem:[%s10090_s25 + $0x198] sm:$0xff] %v5856_v61  ;;  %v5683_v60 = vadd.f32 %v5682_v19, %v5594_v8  ;;  %v5597_v12 = vadd.f32 %v5596_v45, %v10077_v2 }
 0x7c9   : > { %5927 = vst [vmem:[%s10090_s25 + $0x1b0] sm:$0xff] %v5683_v60 }
 0x7ca   : > { %v5769_v6 = vpop.f32.mrf.mxu2 }
 0x7cb   : > { %v5770_v56 = vadd.f32 %v5769_v6, %v10098_v53  ;;  %v5858_v51 = vpop.f32.mrf.mxu3 }
 0x7cd   : > { %v5859_v31 = vadd.f32 %v5858_v51, %v5770_v56 }
 0x7ce   : > { %v5598_v13 = vpop.f32.mrf.mxu0  ;;  %v5685_v16 = vpop.f32.mrf.mxu1 }
 0x7cf   : > { %5926 = vst [vmem:[%s10090_s25 + $0x1a8] sm:$0xff] %v5859_v31  ;;  %v5686_v33 = vadd.f32 %v5685_v16, %v5597_v12  ;;  %v5599_v0 = vadd.f32 %v5598_v13, %v10077_v2 }
 0x7d1   : > { %5929 = vst [vmem:[%s10090_s25 + $0x1c0] sm:$0xff] %v5686_v33 }
 0x7d2   : > { %v5771_v35 = vpop.f32.mrf.mxu2 }
 0x7d3   : > { %v5772_v9 = vadd.f32 %v5771_v35, %v10098_v53  ;;  %v5860_v34 = vpop.f32.mrf.mxu3 }
 0x7d5   : > { %v5861_v23 = vadd.f32 %v5860_v34, %v5772_v9 }
 0x7d6   : > { %v5687_v43 = vpop.f32.mrf.mxu1  ;;  %v5601_v21 = vpop.f32.mrf.mxu0 }
 0x7d7   : > { %5928 = vst [vmem:[%s10090_s25 + $0x1b8] sm:$0xff] %v5861_v23  ;;  %v5688_v49 = vadd.f32 %v5687_v43, %v5599_v0  ;;  %v5602_v27 = vadd.f32 %v5601_v21, %v10077_v2 }
 0x7d9   : > { %5931 = vst [vmem:[%s10090_s25 + $0x1d0] sm:$0xff] %v5688_v49 }
 0x7da   : > { %v5774_v38 = vpop.f32.mrf.mxu2 }
 0x7db   : > { %v5775_v11 = vadd.f32 %v5774_v38, %v10098_v53  ;;  %v5863_v58 = vpop.f32.mrf.mxu3 }
 0x7dd   : > { %v5864_v3 = vadd.f32 %v5863_v58, %v5775_v11 }
 0x7de   : > { %v5690_v20 = vpop.f32.mrf.mxu1  ;;  %v5603_v7 = vpop.f32.mrf.mxu0 }
 0x7df   : > { %5930 = vst [vmem:[%s10090_s25 + $0x1c8] sm:$0xff] %v5864_v3  ;;  %v5691_v50 = vadd.f32 %v5690_v20, %v5602_v27  ;;  %v5604_v54 = vadd.f32 %v5603_v7, %v10077_v2 }
 0x7e1   : > { %5933 = vst [vmem:[%s10090_s25 + $0x1e0] sm:$0xff] %v5691_v50 }
 0x7e2   : > { %v5776_v26 = vpop.f32.mrf.mxu2 }
 0x7e3   : > { %v5777_v17 = vadd.f32 %v5776_v26, %v10098_v53  ;;  %v5865_v29 = vpop.f32.mrf.mxu3 }
 0x7e5   : > { %v5866_v57 = vadd.f32 %v5865_v29, %v5777_v17 }
 0x7e6   : > { %v5692_v59 = vpop.f32.mrf.mxu1 }
 0x7e7   : > { %5932 = vst [vmem:[%s10090_s25 + $0x1d8] sm:$0xff] %v5866_v57  ;;  %v5693_v42 = vadd.f32 %v5692_v59, %v5604_v54 }
 0x7e9   : > { %5935 = vst [vmem:[%s10090_s25 + $0x1f0] sm:$0xff] %v5693_v42 }
 0x7ea   : > { %v5779_v24 = vpop.f32.mrf.mxu2 }
 0x7eb   : > { %v5780_v4 = vadd.f32 %v5779_v24, %v10098_v53  ;;  %v5868_v10 = vpop.f32.mrf.mxu3 }
 0x7ed   : > { %v5869_v41 = vadd.f32 %v5868_v10, %v5780_v4 }
 0x7ef   : > { %5934 = vst [vmem:[%s10090_s25 + $0x1e8] sm:$0xff] %v5869_v41 }
 0x7f2   : > { %v5781_v2 = vpop.f32.mrf.mxu2 }
 0x7f3   : > { %v5782_v37 = vadd.f32 %v5781_v2, %v10098_v53  ;;  %v5870_v28 = vpop.f32.mrf.mxu3 }
 0x7f5   : > { %v5871_v14 = vadd.f32 %v5870_v28, %v5782_v37 }
 0x7f7   : > { %5936 = vst [vmem:[%s10090_s25 + $0x1f8] sm:$0xff] %v5871_v14 }
 0x7f8   : > { %8117 = shalt.err (!%p8114_p0)
}
 0x7f9   : > { %s8196_s8 = smov 256   ;;  %s8197_s28 = smov 16  }
 0x7fa   : > { %7434 = dma.vmem_to_hbm [thread:$0]  (%p8362_p7), %s5954_s12, 8192, %s5956_s6, %s5938_s15, %s8196_s8, %s8196_s8, %s8197_s28  }
 0x7fb PF: > { %s10484_s30 = sld [smem:[#allocation22_spill]]  ;;  %p7457_p3 = pnand %p6111_p11, %p8298_p6 }
 0x7fd   : > { %p7458_p5 = pneg %p7457_p3 }
 0x801   : > { %s5970_s24 = sand.u32 1, %s10484_s30  }
 0x802   : > { %s5971_s22 = scalar_lea.sflag [#allocation6], %s5970_s24 }
 0x803   : > { %8163 = dma.done.wait (%p7458_p5), %s5971_s22, 8192  }
 0x804   : > { %8165 = vsyncadd (%p7458_p5), %s5971_s22, 4294959104  ;;  %s31_s18 = sadd.s32 1, %s8188_s18   ;;  %s10486_s25 = sld [smem:[#allocation23_spill]] }
 0x805   : > { %p28_p9 = scmp.ge.s32.totalorder %s31_s18, 4   ;;  %s10487_s15 = sld [smem:[#allocation28_spill]] }
 0x806   : > { %s10488_s16 = sld [smem:[#allocation24_spill]]  ;;  %s10490_s13 = smov %s8172_s14 }
 0x807   : > { %s10489_s17 = sld [smem:[#allocation26_spill]]  ;;  %30 = sbr.rel (!%p28_p9) target bundleno = 15 (0xf), region = 138 }
 0x80a   : > { %s10491_s14 = smov %s10486_s25 }
 0x80c   :  { %5977 = vsyncpa [#allocation5], 1 }
 0x80d   :  { %5979 = vsyncpa [#allocation5 + $0x1], 1 }
 0x80e   :  { %5980 = vsyncpa [#allocation8], 1 }
 0x80f   :  { %5982 = vsyncpa [#allocation8 + $0x1], 1 }
 0x810   :  { %5983 = vsyncpa [#allocation11], 1 }
 0x811   :  { %5984 = vsyncpa [#allocation14], 1 }
 0x812   :  { %5985 = vsyncpa [#allocation6], 1 }
 0x813   :  { %5987 = vsyncpa [#allocation6 + $0x1], 1 }

</bundles_post_ra>
